<compile_context>
chip_gen: v7x
topology: tpu7x:2x2x1
jax: 0.10.0
libtpu: 0.0.40
codegen_flags: <defaults>
</compile_context>

<pallas_src>
import functools
import numpy as np
import jax
import jax.numpy as jnp
from jax.experimental import pallas as pl
from jax.experimental.pallas import tpu as pltpu

# ----------------------------- configuration --------------------------------
B = 2            # batch
IMG = 32         # image H = W
PATCH = 8        # patch size
SQRT_PATCHES = IMG // PATCH          # 4
NUM_PATCHES = SQRT_PATCHES ** 2      # 16
SEQ = NUM_PATCHES + 1                # 17 (class token + patches)
C_IN = 3
PATCH_DIM = C_IN * PATCH * PATCH     # 192
D = 32           # vision hidden size
HEADS = 4
HEAD_DIM = D // HEADS                # 8
MLP = 64         # encoder MLP intermediate size
LAYERS = 2       # encoder layers
QDIM = 24        # text / query embedding dim (class head out_dim)
NQ = 5           # number of query embeddings per image
NQ_LVIS = 7      # number of LVIS query embeddings per image (demo)
LN_EPS = 1e-5
ATTN_SCALE = float(HEAD_DIM) ** -0.5

# packed, lane-dense output slab layout (last dim = 128 -> unmasked stores)
OUT_W = 128
_BOX_OFF = 0                 # [0:4]            box corners (x0, y0, x1, y1)
_SIM_OFF = 4                 # [4:4+nq]         class similarities
                             # [4+nq:4+nq+nql]  LVIS similarities (if requested)

# ---- parameter slab (VEC_ROWS, 128) f32: 8-aligned row sections -------------
_ROW_CLSPOS = 0                          # rows [0, SEQ): class+pos table (SEQ, D)
_ROW_MISC = 24                           # 9 rows: pre_g, pre_b, post_g, post_b,
                                         #   ppln_g, ppln_b, box_b0, box_b1, cls_b0
_ROW_LAYER = 40                          # 8 rows/layer: ln1_g, ln1_b, attn_out_b,
                                         #   ln2_g, ln2_b, fc2_b, b_qkv(3D), b_fc1(MLP)
_ROW_BOXBIAS = _ROW_LAYER + 8 * LAYERS   # NUM_PATCHES rows, 4 lanes (box_bias + b2)
VEC_ROWS = _ROW_BOXBIAS + NUM_PATCHES    # 72

# ---- (L+2, D, D) square-weight stack: [w_o per layer, box_w1, box_w2(pad)] --
_DD_BOXW1 = LAYERS
_DD_BOXW2 = LAYERS + 1


# --------------------------- in-kernel helpers -------------------------------
def _mm(a, w):
    """MXU matmul: activation cast to bf16, weight pre-packed bf16, f32 accum."""
    return jnp.dot(a.astype(jnp.bfloat16), w, preferred_element_type=jnp.float32)


def _ln(x, g, b):
    """LayerNorm with single-pass variance (E[x^2] - mu^2)."""
    mu = jnp.mean(x, axis=-1, keepdims=True)
    ms = jnp.mean(x * x, axis=-1, keepdims=True)
    var = ms - mu * mu
    return (x - mu) * jax.lax.rsqrt(var + LN_EPS) * g + b


def _quick_gelu(x):                       # OwlViT encoder hidden_act
    return x * jax.nn.sigmoid(1.702 * x)


# ----------------------------- fused kernel ---------------------------------
def _owlvit_fused_kernel(*refs, bb, nql):
    if nql > 0:
        (patches_ref, queries_ref, lvis_ref, patch_w_ref, w_qkv_ref, w_dd_ref,
         w_fc1_ref, w_fc2_ref, w_head_ref, vecs_ref, out_ref) = refs
    else:
        (patches_ref, queries_ref, patch_w_ref, w_qkv_ref, w_dd_ref,
         w_fc1_ref, w_fc2_ref, w_head_ref, vecs_ref, out_ref) = refs
        lvis_ref = None

    # ---- per-head lane masks (hoisted: image/layer independent) -------------
    lane = jax.lax.broadcasted_iota(jnp.int32, (1, D), 1)
    head_masks = [((lane >= h * HEAD_DIM) & (lane < (h + 1) * HEAD_DIM))
                  .astype(jnp.float32) for h in range(HEADS)]

    # ---- image-independent parameter rows (loaded once) ---------------------
    clspos = vecs_ref[_ROW_CLSPOS:_ROW_CLSPOS + SEQ, 0:D]          # (SEQ, D)
    pre_g = vecs_ref[_ROW_MISC + 0:_ROW_MISC + 1, 0:D]
    pre_b = vecs_ref[_ROW_MISC + 1:_ROW_MISC + 2, 0:D]
    post_g = vecs_ref[_ROW_MISC + 2:_ROW_MISC + 3, 0:D]
    post_b = vecs_ref[_ROW_MISC + 3:_ROW_MISC + 4, 0:D]
    ppln_g = vecs_ref[_ROW_MISC + 4:_ROW_MISC + 5, 0:D]
    ppln_b = vecs_ref[_ROW_MISC + 5:_ROW_MISC + 6, 0:D]
    box_b0 = vecs_ref[_ROW_MISC + 6:_ROW_MISC + 7, 0:D]
    box_b1 = vecs_ref[_ROW_MISC + 7:_ROW_MISC + 8, 0:D]
    cls_b0 = vecs_ref[_ROW_MISC + 8:_ROW_MISC + 9, 0:QDIM]
    box_bias = vecs_ref[_ROW_BOXBIAS:_ROW_BOXBIAS + NUM_PATCHES, 0:4]

    for img in range(bb):
        # ---- patch embedding (+ zero cls row) + class/pos table + pre-LN ----
        x = _mm(patches_ref[img], patch_w_ref[...]) + clspos               # (SEQ, D)
        x = _ln(x, pre_g, pre_b)

        # ---- transformer encoder (unrolled; LAYERS is small & static) -------
        for l in range(LAYERS):
            r = _ROW_LAYER + 8 * l
            resid = x
            h = _ln(x, vecs_ref[r + 0:r + 1, 0:D], vecs_ref[r + 1:r + 2, 0:D])
            qkv = _mm(h, w_qkv_ref[l]) + vecs_ref[r + 6:r + 7, 0:3 * D]    # (SEQ, 3D)
            q = qkv[:, 0:D] * ATTN_SCALE
            k_bf = qkv[:, D:2 * D].astype(jnp.bfloat16)
            v = qkv[:, 2 * D:3 * D]

            # mask-based multi-head attention: no per-head lane slices, no concat
            ctx = jnp.zeros((SEQ, D), jnp.float32)
            for hm in head_masks:
                qh = (q * hm).astype(jnp.bfloat16)                         # zeros off-head
                logits = jax.lax.dot_general(                              # q_h @ k_h^T
                    qh, k_bf, (((1,), (1,)), ((), ())),
                    preferred_element_type=jnp.float32)                    # (SEQ, SEQ)
                logits = logits - jnp.max(logits, axis=-1, keepdims=True)
                p = jnp.exp(logits)
                attn = p * pl.reciprocal(jnp.sum(p, axis=-1, keepdims=True),
                                         approx=True)
                vh = (v * hm).astype(jnp.bfloat16)
                ctx = ctx + jnp.dot(attn.astype(jnp.bfloat16), vh,
                                    preferred_element_type=jnp.float32)
            x = resid + _mm(ctx, w_dd_ref[l]) + vecs_ref[r + 2:r + 3, 0:D]

            resid = x
            h = _ln(x, vecs_ref[r + 3:r + 4, 0:D], vecs_ref[r + 4:r + 5, 0:D])
            h = _quick_gelu(_mm(h, w_fc1_ref[l]) + vecs_ref[r + 7:r + 8, 0:MLP])
            x = resid + _mm(h, w_fc2_ref[l]) + vecs_ref[r + 5:r + 6, 0:D]

        # ---- image_embedder post-process -------------------------------------
        x = _ln(x, post_g, post_b)                                         # post_layernorm
        feats = x[1:, :] * x[0:1, :]                                       # patches * cls tok
        feats = _ln(feats, ppln_g, ppln_b)                                 # post_post_layernorm

        # ---- fused box-head layer0 + class projection (one MXU launch) -------
        z = _mm(feats, w_head_ref[...])                                    # (NP, D+QDIM)
        # TODO(synk): tanh-approx GELU (EUP-friendly) instead of nn.GELU()'s exact erf.
        h1 = jax.nn.gelu(z[:, 0:D] + box_b0, approximate=True)
        ic = z[:, D:D + QDIM] + cls_b0                                     # (NP, QDIM)

        # ---- rest of box head: GELU + (bias+box_bias) + sigmoid + corners ----
        h2 = jax.nn.gelu(_mm(h1, w_dd_ref[_DD_BOXW1]) + box_b1, approximate=True)
        pred = jax.nn.sigmoid(_mm(h2, w_dd_ref[_DD_BOXW2])[:, 0:4] + box_bias)
        centers = pred[:, 0:2]
        half = 0.5 * pred[:, 2:4]
        corners = jnp.concatenate([centers - half, centers + half], axis=-1)

        # ---- class head -------------------------------------------------------
        inv_n = pl.reciprocal(
            jnp.sqrt(jnp.sum(ic * ic, axis=-1, keepdims=True)) + 1e-6, approx=True)
        ic = ic * inv_n
        qry = queries_ref[img]                                             # (NQ, QDIM)
        # NOTE: reproduces the reference's "+1e-6 OUTSIDE the division" quirk.
        qn = qry * jax.lax.rsqrt(jnp.sum(qry * qry, axis=-1, keepdims=True)) + 1e-6
        sims = jax.lax.dot_general(ic, qn, (((1,), (1,)), ((), ())),
                                   preferred_element_type=jnp.float32)     # (NP, NQ)

        pieces = [corners, sims]
        if nql > 0:
            # original_class_predictor is a deepcopy -> identical weights, so the
            # LVIS similarities are computed ONCE here and reused for pred & target.
            lq = lvis_ref[img]                                             # (NQL, QDIM)
            lqn = lq * jax.lax.rsqrt(jnp.sum(lq * lq, axis=-1, keepdims=True)) + 1e-6
            pieces.append(jax.lax.dot_general(ic, lqn, (((1,), (1,)), ((), ())),
                                              preferred_element_type=jnp.float32))

        used = sum(pc.shape[1] for pc in pieces)
        if OUT_W - used > 0:
            pieces.append(jnp.zeros((NUM_PATCHES, OUT_W - used), jnp.float32))
        # single lane-dense (NP, 128) store per image (unmasked vst)
        out_ref[img] = jnp.concatenate(pieces, axis=-1)


# --------------------------- pallas_call wrapper ------------------------------
def _const_spec(arr):
    """Full-array block, same block every grid step (weights DMA'd once)."""
    n = arr.ndim
    return pl.BlockSpec(arr.shape, lambda g, _n=n: (0,) * _n)


def _num_grid_steps(batch):
    """v7x has 2 TensorCores/chip -> split the batch across them via the grid;
    v5e/v6e have one TensorCore -> fold the whole batch into a single step."""
    try:
        kind = jax.devices()[0].device_kind.lower()
    except Exception:
        kind = ""
    if "7" in kind and batch % 2 == 0:
        return 2
    return 1


def owlvit_fused_forward(patches_pad, queries, kp, lvis_queries=None):
    Bb, seq, pdim = patches_pad.shape
    _, nq, qdim = queries.shape
    nql = 0 if lvis_queries is None else lvis_queries.shape[1]
    assert 4 + nq + nql <= OUT_W, "output slab too narrow for requested queries"

    G = _num_grid_steps(Bb)
    BB = Bb // G

    batch_inputs = [patches_pad, queries]
    batch_specs = [pl.BlockSpec((BB, seq, pdim), lambda g: (g, 0, 0)),
                   pl.BlockSpec((BB, nq, qdim), lambda g: (g, 0, 0))]
    if nql > 0:
        batch_inputs.append(lvis_queries)
        batch_specs.append(pl.BlockSpec((BB, nql, qdim), lambda g: (g, 0, 0)))

    weights = [kp["patch_w"], kp["w_qkv"], kp["w_dd"], kp["w_fc1"],
               kp["w_fc2"], kp["w_head"], kp["vecs"]]

    kernel = functools.partial(_owlvit_fused_kernel, bb=BB, nql=nql)
    return pl.pallas_call(
        kernel,
        out_shape=jax.ShapeDtypeStruct((Bb, NUM_PATCHES, OUT_W), jnp.float32),
        grid=(G,),
        in_specs=batch_specs + [_const_spec(w) for w in weights],
        out_specs=pl.BlockSpec((BB, NUM_PATCHES, OUT_W), lambda g: (g, 0, 0)),
        compiler_params=pltpu.CompilerParams(dimension_semantics=("parallel",)),
    )(*batch_inputs, *weights)


# --------------------------- plain-JAX glue ----------------------------------
def patchify_padded(pixel_values):
    """NCHW pixels -> (B, SEQ, C*P*P) with row 0 = zeros (cls-token placeholder)."""
    Bb, C, H, W = pixel_values.shape
    gh, gw = H // PATCH, W // PATCH
    p = pixel_values.reshape(Bb, C, gh, PATCH, gw, PATCH)
    p = p.transpose(0, 2, 4, 1, 3, 5).reshape(Bb, gh * gw, C * PATCH * PATCH)
    zeros = jnp.zeros((Bb, 1, C * PATCH * PATCH), p.dtype)
    return jnp.concatenate([zeros, p], axis=1)


def compute_box_bias(num_patches):
    coords = np.stack(np.meshgrid(np.arange(1, num_patches + 1),
                                  np.arange(1, num_patches + 1)), axis=-1).astype(np.float32)
    coords /= np.array([num_patches, num_patches], dtype=np.float32)
    coords = coords.reshape(num_patches * num_patches, 2)
    coords = np.clip(coords, 0.0, 1.0)
    coord_bias = np.log(coords + 1e-4) - np.log1p(-coords + 1e-4)
    box_size = np.full_like(coord_bias, 1.0 / num_patches)
    size_bias = np.log(box_size + 1e-4) - np.log1p(-box_size + 1e-4)
    return np.concatenate([coord_bias, size_bias], axis=-1)


# ------------------------------ the model ------------------------------------
class OwlViTPallas:
    def __init__(self, params, sqrt_num_patches):
        self.params = params
        self.kp = self._pack(params, compute_box_bias(sqrt_num_patches))

    @staticmethod
    def _pack(p, box_bias):
        bf = lambda a: jnp.asarray(a, jnp.bfloat16)
        lyrs = p["layers"]

        w_qkv = jnp.stack([jnp.concatenate([l["wq"], l["wk"], l["wv"]], axis=1)
                           for l in lyrs])                                  # (L, D, 3D)
        w_dd = jnp.stack([l["wo"] for l in lyrs]
                         + [p["box_w1"],
                            jnp.pad(p["box_w2"], ((0, 0), (0, D - 4)))])    # (L+2, D, D)
        w_fc1 = jnp.stack([l["fc1_w"] for l in lyrs])                       # (L, D, MLP)
        w_fc2 = jnp.stack([l["fc2_w"] for l in lyrs])                       # (L, MLP, D)
        w_head = jnp.concatenate([p["box_w0"], p["cls_w0"]], axis=1)        # (D, D+QDIM)

        vecs = np.zeros((VEC_ROWS, 128), np.float32)

        def put_row(r, v):
            v = np.asarray(v, np.float32).reshape(-1)
            vecs[r, :v.shape[0]] = v

        def put_block(r, m):
            m = np.asarray(m, np.float32)
            vecs[r:r + m.shape[0], :m.shape[1]] = m

        clspos = np.asarray(p["pos_embedding"], np.float32).copy()
        clspos[0] += np.asarray(p["class_embedding"], np.float32)
        put_block(_ROW_CLSPOS, clspos)

        put_row(_ROW_MISC + 0, p["pre_ln_g"]);  put_row(_ROW_MISC + 1, p["pre_ln_b"])
        put_row(_ROW_MISC + 2, p["post_ln_g"]); put_row(_ROW_MISC + 3, p["post_ln_b"])
        put_row(_ROW_MISC + 4, p["ppln_g"]);    put_row(_ROW_MISC + 5, p["ppln_b"])
        put_row(_ROW_MISC + 6, p["box_b0"]);    put_row(_ROW_MISC + 7, p["box_b1"])
        put_row(_ROW_MISC + 8, p["cls_b0"])

        for li, l in enumerate(lyrs):
            r = _ROW_LAYER + 8 * li
            put_row(r + 0, l["ln1_g"]); put_row(r + 1, l["ln1_b"]); put_row(r + 2, l["bo"])
            put_row(r + 3, l["ln2_g"]); put_row(r + 4, l["ln2_b"]); put_row(r + 5, l["fc2_b"])
            put_row(r + 6, np.concatenate([np.asarray(l["bq"], np.float32),
                                           np.asarray(l["bk"], np.float32),
                                           np.asarray(l["bv"], np.float32)]))
            put_row(r + 7, l["fc1_b"])

        # fold dense2 bias into the box bias (added pre-sigmoid in the reference)
        put_block(_ROW_BOXBIAS,
                  np.asarray(box_bias, np.float32) + np.asarray(p["box_b2"], np.float32)[None, :])

        return dict(patch_w=bf(p["patch_w"]), w_qkv=bf(w_qkv), w_dd=bf(w_dd),
                    w_fc1=bf(w_fc1), w_fc2=bf(w_fc2), w_head=bf(w_head),
                    vecs=jnp.asarray(vecs))

    def __call__(self, image, texts=None, queries=None, lvis_query_embeds=None):
        assert texts is not None or queries is not None, \
            "At least a vocabulary or a set of embeddings should be provided!"
        if texts is not None:
            # TODO(synk): CLIP text_model + text_projection not implemented; the
            # forward is exercised with precomputed `queries`.
            raise NotImplementedError("text branch not implemented")

        patches = patchify_padded(image.astype(jnp.float32))
        queries = queries.astype(jnp.float32)
        lvis = None if lvis_query_embeds is None else lvis_query_embeds.astype(jnp.float32)

        slab = owlvit_fused_forward(patches, queries, self.kp, lvis)
        nq = queries.shape[1]
        pred_boxes = slab[..., _BOX_OFF:_BOX_OFF + 4]
        pred_class_sims = slab[..., _SIM_OFF:_SIM_OFF + nq]

        if lvis is not None:
            nql = lvis.shape[1]
            lvis_off = _SIM_OFF + nq
            lvis_sims = slab[..., lvis_off:lvis_off + nql]
            # original_class_predictor is a deepcopy -> identical weights; the
            # similarities are computed once in-kernel and returned for both.
            return (pred_boxes, None, pred_class_sims, None, lvis_sims, lvis_sims)
        return (pred_boxes, None, pred_class_sims, None)


# --------------------------- parameter init ----------------------------------
def init_params(key):
    keys = iter(jax.random.split(key, 64))

    def nrm(shape, scale=0.02):
        return scale * jax.random.normal(next(keys), shape, dtype=jnp.float32)

    params = dict(
        patch_w=nrm((PATCH_DIM, D)),
        class_embedding=nrm((D,)),
        pos_embedding=nrm((SEQ, D)),
        pre_ln_g=jnp.ones((D,), jnp.float32), pre_ln_b=jnp.zeros((D,), jnp.float32),
        post_ln_g=jnp.ones((D,), jnp.float32) + nrm((D,)), post_ln_b=nrm((D,)),
        ppln_g=jnp.ones((D,), jnp.float32) + nrm((D,)), ppln_b=nrm((D,)),
        box_w0=nrm((D, D)), box_b0=nrm((D,)),
        box_w1=nrm((D, D)), box_b1=nrm((D,)),
        box_w2=nrm((D, 4)), box_b2=nrm((4,)),
        cls_w0=nrm((D, QDIM)), cls_b0=nrm((QDIM,)),
        layers=[],
    )
    for _ in range(LAYERS):
        params["layers"].append(dict(
            ln1_g=jnp.ones((D,), jnp.float32), ln1_b=jnp.zeros((D,), jnp.float32),
            wq=nrm((D, D)), bq=nrm((D,)),
            wk=nrm((D, D)), bk=nrm((D,)),
            wv=nrm((D, D)), bv=nrm((D,)),
            wo=nrm((D, D)), bo=nrm((D,)),
            ln2_g=jnp.ones((D,), jnp.float32), ln2_b=jnp.zeros((D,), jnp.float32),
            fc1_w=nrm((D, MLP)), fc1_b=nrm((MLP,)),
            fc2_w=nrm((MLP, D)), fc2_b=nrm((D,)),
        ))
    return params


# ------------------------------- main -----------------------------------------
if __name__ == "__main__":
    key = jax.random.PRNGKey(0)
    k_img, k_q, k_lvis, k_par = jax.random.split(key, 4)
    image = jax.random.normal(k_img, (B, 3, IMG, IMG), dtype=jnp.float32)   # NCHW
    queries = jax.random.normal(k_q, (B, NQ, QDIM), dtype=jnp.float32)
    lvis_q = jax.random.normal(k_lvis, (B, NQ_LVIS, QDIM), dtype=jnp.float32)
    params = init_params(k_par)

    model = OwlViTPallas(params, SQRT_PATCHES)

    # basic path
    pred_boxes, pred_class_logits, pred_class_sims, _ = model(image, queries=queries)
    jax.block_until_ready((pred_boxes, pred_class_sims))
    assert pred_boxes.shape == (B, NUM_PATCHES, 4)
    assert pred_class_sims.shape == (B, NUM_PATCHES, NQ)
    assert pred_class_logits is None
    assert bool(jnp.all(jnp.isfinite(pred_boxes)))
    assert bool(jnp.all(jnp.isfinite(pred_class_sims)))

    # LVIS path (fused into the same kernel)
    out6 = model(image, queries=queries, lvis_query_embeds=lvis_q)
    jax.block_until_ready(out6[0])
    assert len(out6) == 6
    assert out6[0].shape == (B, NUM_PATCHES, 4)
    assert out6[2].shape == (B, NUM_PATCHES, NQ)
    assert out6[4].shape == (B, NUM_PATCHES, NQ_LVIS)
    assert out6[5].shape == (B, NUM_PATCHES, NQ_LVIS)
    assert bool(jnp.all(jnp.isfinite(out6[4])))

    print("KERNEL_OK")
</pallas_src>

<mosaic_0001>
module attributes {stable_mosaic.version = 11 : i64} {
  func.func @_owlvit_fused_kernel(%arg0: i32, %arg1: memref<2x17x192xf32, #tpu.memory_space<vmem>>, %arg2: memref<2x5x24xf32, #tpu.memory_space<vmem>>, %arg3: memref<192x32xbf16, #tpu.memory_space<vmem>>, %arg4: memref<2x32x96xbf16, #tpu.memory_space<vmem>>, %arg5: memref<4x32x32xbf16, #tpu.memory_space<vmem>>, %arg6: memref<2x32x64xbf16, #tpu.memory_space<vmem>>, %arg7: memref<2x64x32xbf16, #tpu.memory_space<vmem>>, %arg8: memref<32x56xbf16, #tpu.memory_space<vmem>>, %arg9: memref<72x128xf32, #tpu.memory_space<vmem>>, %arg10: memref<2x16x128xf32, #tpu.memory_space<vmem>>) attributes {dimension_semantics = [#tpu.dimension_semantics<parallel>], iteration_bounds = array<i64: 1>, scalar_prefetch = 0 : i64, scratch_operands = 0 : i64, tpu.core_type = #tpu.core_type<tc>, window_params = [{transform_indices = @transform_0, window_bounds = array<i64: 2, 17, 192>}, {transform_indices = @transform_1, window_bounds = array<i64: 2, 5, 24>}, {pipeline_mode = #tpu.pipeline_mode<synchronous>, transform_indices = @transform_2, window_bounds = array<i64: 192, 32>}, {pipeline_mode = #tpu.pipeline_mode<synchronous>, transform_indices = @transform_3, window_bounds = array<i64: 2, 32, 96>}, {pipeline_mode = #tpu.pipeline_mode<synchronous>, transform_indices = @transform_4, window_bounds = array<i64: 4, 32, 32>}, {pipeline_mode = #tpu.pipeline_mode<synchronous>, transform_indices = @transform_5, window_bounds = array<i64: 2, 32, 64>}, {pipeline_mode = #tpu.pipeline_mode<synchronous>, transform_indices = @transform_6, window_bounds = array<i64: 2, 64, 32>}, {pipeline_mode = #tpu.pipeline_mode<synchronous>, transform_indices = @transform_7, window_bounds = array<i64: 32, 56>}, {pipeline_mode = #tpu.pipeline_mode<synchronous>, transform_indices = @transform_8, window_bounds = array<i64: 72, 128>}, {transform_indices = @transform_9, window_bounds = array<i64: 2, 16, 128>}]} {
    %0 = tpu.iota {dimensions = array<i32: 1>} : vector<1x32xi32>
    %c0_i32 = arith.constant 0 : i32
    %1 = vector.broadcast %c0_i32 : i32 to vector<1x32xi32>
    %2 = arith.cmpi sge, %0, %1 : vector<1x32xi32>
    %c8_i32 = arith.constant 8 : i32
    %3 = vector.broadcast %c8_i32 : i32 to vector<1x32xi32>
    %4 = arith.cmpi slt, %0, %3 : vector<1x32xi32>
    %5 = arith.andi %2, %4 : vector<1x32xi1>
    %6 = arith.extui %5 : vector<1x32xi1> to vector<1x32xi32>
    %7 = arith.sitofp %6 : vector<1x32xi32> to vector<1x32xf32>
    %c8_i32_0 = arith.constant 8 : i32
    %8 = vector.broadcast %c8_i32_0 : i32 to vector<1x32xi32>
    %9 = arith.cmpi sge, %0, %8 : vector<1x32xi32>
    %c16_i32 = arith.constant 16 : i32
    %10 = vector.broadcast %c16_i32 : i32 to vector<1x32xi32>
    %11 = arith.cmpi slt, %0, %10 : vector<1x32xi32>
    %12 = arith.andi %9, %11 : vector<1x32xi1>
    %13 = arith.extui %12 : vector<1x32xi1> to vector<1x32xi32>
    %14 = arith.sitofp %13 : vector<1x32xi32> to vector<1x32xf32>
    %c16_i32_1 = arith.constant 16 : i32
    %15 = vector.broadcast %c16_i32_1 : i32 to vector<1x32xi32>
    %16 = arith.cmpi sge, %0, %15 : vector<1x32xi32>
    %c24_i32 = arith.constant 24 : i32
    %17 = vector.broadcast %c24_i32 : i32 to vector<1x32xi32>
    %18 = arith.cmpi slt, %0, %17 : vector<1x32xi32>
    %19 = arith.andi %16, %18 : vector<1x32xi1>
    %20 = arith.extui %19 : vector<1x32xi1> to vector<1x32xi32>
    %21 = arith.sitofp %20 : vector<1x32xi32> to vector<1x32xf32>
    %c24_i32_2 = arith.constant 24 : i32
    %22 = vector.broadcast %c24_i32_2 : i32 to vector<1x32xi32>
    %23 = arith.cmpi sge, %0, %22 : vector<1x32xi32>
    %c32_i32 = arith.constant 32 : i32
    %24 = vector.broadcast %c32_i32 : i32 to vector<1x32xi32>
    %25 = arith.cmpi slt, %0, %24 : vector<1x32xi32>
    %26 = arith.andi %23, %25 : vector<1x32xi1>
    %27 = arith.extui %26 : vector<1x32xi1> to vector<1x32xi32>
    %28 = arith.sitofp %27 : vector<1x32xi32> to vector<1x32xf32>
    %c0 = arith.constant 0 : index
    %c0_3 = arith.constant 0 : index
    %29 = vector.load %arg9[%c0, %c0_3] : memref<72x128xf32, #tpu.memory_space<vmem>>, vector<17x32xf32>
    %c24 = arith.constant 24 : index
    %c0_4 = arith.constant 0 : index
    %30 = vector.load %arg9[%c24, %c0_4] : memref<72x128xf32, #tpu.memory_space<vmem>>, vector<1x32xf32>
    %c25 = arith.constant 25 : index
    %c0_5 = arith.constant 0 : index
    %31 = vector.load %arg9[%c25, %c0_5] : memref<72x128xf32, #tpu.memory_space<vmem>>, vector<1x32xf32>
    %c26 = arith.constant 26 : index
    %c0_6 = arith.constant 0 : index
    %32 = vector.load %arg9[%c26, %c0_6] : memref<72x128xf32, #tpu.memory_space<vmem>>, vector<1x32xf32>
    %c27 = arith.constant 27 : index
    %c0_7 = arith.constant 0 : index
    %33 = vector.load %arg9[%c27, %c0_7] : memref<72x128xf32, #tpu.memory_space<vmem>>, vector<1x32xf32>
    %c28 = arith.constant 28 : index
    %c0_8 = arith.constant 0 : index
    %34 = vector.load %arg9[%c28, %c0_8] : memref<72x128xf32, #tpu.memory_space<vmem>>, vector<1x32xf32>
    %c29 = arith.constant 29 : index
    %c0_9 = arith.constant 0 : index
    %35 = vector.load %arg9[%c29, %c0_9] : memref<72x128xf32, #tpu.memory_space<vmem>>, vector<1x32xf32>
    %c30 = arith.constant 30 : index
    %c0_10 = arith.constant 0 : index
    %36 = vector.load %arg9[%c30, %c0_10] : memref<72x128xf32, #tpu.memory_space<vmem>>, vector<1x32xf32>
    %c31 = arith.constant 31 : index
    %c0_11 = arith.constant 0 : index
    %37 = vector.load %arg9[%c31, %c0_11] : memref<72x128xf32, #tpu.memory_space<vmem>>, vector<1x32xf32>
    %c32 = arith.constant 32 : index
    %c0_12 = arith.constant 0 : index
    %38 = vector.load %arg9[%c32, %c0_12] : memref<72x128xf32, #tpu.memory_space<vmem>>, vector<1x24xf32>
    %c56 = arith.constant 56 : index
    %c0_13 = arith.constant 0 : index
    %39 = vector.load %arg9[%c56, %c0_13] : memref<72x128xf32, #tpu.memory_space<vmem>>, vector<16x4xf32>
    %c0_14 = arith.constant 0 : index
    %c0_15 = arith.constant 0 : index
    %c0_16 = arith.constant 0 : index
    %40 = vector.load %arg1[%c0_14, %c0_15, %c0_16] : memref<2x17x192xf32, #tpu.memory_space<vmem>>, vector<1x17x192xf32>
    %41 = vector.shape_cast %40 : vector<1x17x192xf32> to vector<17x192xf32>
    %c0_17 = arith.constant 0 : index
    %c0_18 = arith.constant 0 : index
    %42 = vector.load %arg3[%c0_17, %c0_18] : memref<192x32xbf16, #tpu.memory_space<vmem>>, vector<192x32xbf16>
    %43 = arith.truncf %41 : vector<17x192xf32> to vector<17x192xbf16>
    %cst = arith.constant dense<0.000000e+00> : vector<17x32xf32>
    %44 = tpu.matmul %43, %42, %cst {dimension_numbers = #tpu.dot_dimension_numbers<[1], [0], [0], [1], [0, 0, 1, 1], [], []>} : vector<17x192xbf16>, vector<192x32xbf16>, vector<17x32xf32> -> vector<17x32xf32>
    %45 = arith.addf %44, %29 : vector<17x32xf32>
    %cst_19 = arith.constant dense<0.000000e+00> : vector<17xf32>
    %46 = vector.multi_reduction <add>, %45, %cst_19 [1] : vector<17x32xf32> to vector<17xf32>
    %47 = vector.shape_cast %46 : vector<17xf32> to vector<17x1xf32>
    %cst_20 = arith.constant 3.200000e+01 : f32
    %48 = vector.broadcast %cst_20 : f32 to vector<17x1xf32>
    %49 = arith.divf %47, %48 : vector<17x1xf32>
    %50 = arith.mulf %45, %45 : vector<17x32xf32>
    %cst_21 = arith.constant dense<0.000000e+00> : vector<17xf32>
    %51 = vector.multi_reduction <add>, %50, %cst_21 [1] : vector<17x32xf32> to vector<17xf32>
    %52 = vector.shape_cast %51 : vector<17xf32> to vector<17x1xf32>
    %cst_22 = arith.constant 3.200000e+01 : f32
    %53 = vector.broadcast %cst_22 : f32 to vector<17x1xf32>
    %54 = arith.divf %52, %53 : vector<17x1xf32>
    %55 = arith.mulf %49, %49 : vector<17x1xf32>
    %56 = arith.subf %54, %55 : vector<17x1xf32>
    %57 = vector.broadcast %49 : vector<17x1xf32> to vector<17x32xf32>
    %58 = arith.subf %45, %57 : vector<17x32xf32>
    %cst_23 = arith.constant 9.99999974E-6 : f32
    %59 = vector.broadcast %cst_23 : f32 to vector<17x1xf32>
    %60 = arith.addf %56, %59 : vector<17x1xf32>
    %61 = math.rsqrt %60 : vector<17x1xf32>
    %62 = vector.broadcast %61 : vector<17x1xf32> to vector<17x32xf32>
    %63 = arith.mulf %58, %62 : vector<17x32xf32>
    %64 = vector.broadcast %30 : vector<1x32xf32> to vector<17x32xf32>
    %65 = arith.mulf %63, %64 : vector<17x32xf32>
    %66 = vector.broadcast %31 : vector<1x32xf32> to vector<17x32xf32>
    %67 = arith.addf %65, %66 : vector<17x32xf32>
    %c40 = arith.constant 40 : index
    %c0_24 = arith.constant 0 : index
    %68 = vector.load %arg9[%c40, %c0_24] : memref<72x128xf32, #tpu.memory_space<vmem>>, vector<1x32xf32>
    %c41 = arith.constant 41 : index
    %c0_25 = arith.constant 0 : index
    %69 = vector.load %arg9[%c41, %c0_25] : memref<72x128xf32, #tpu.memory_space<vmem>>, vector<1x32xf32>
    %cst_26 = arith.constant dense<0.000000e+00> : vector<17xf32>
    %70 = vector.multi_reduction <add>, %67, %cst_26 [1] : vector<17x32xf32> to vector<17xf32>
    %71 = vector.shape_cast %70 : vector<17xf32> to vector<17x1xf32>
    %cst_27 = arith.constant 3.200000e+01 : f32
    %72 = vector.broadcast %cst_27 : f32 to vector<17x1xf32>
    %73 = arith.divf %71, %72 : vector<17x1xf32>
    %74 = arith.mulf %67, %67 : vector<17x32xf32>
    %cst_28 = arith.constant dense<0.000000e+00> : vector<17xf32>
    %75 = vector.multi_reduction <add>, %74, %cst_28 [1] : vector<17x32xf32> to vector<17xf32>
    %76 = vector.shape_cast %75 : vector<17xf32> to vector<17x1xf32>
    %cst_29 = arith.constant 3.200000e+01 : f32
    %77 = vector.broadcast %cst_29 : f32 to vector<17x1xf32>
    %78 = arith.divf %76, %77 : vector<17x1xf32>
    %79 = arith.mulf %73, %73 : vector<17x1xf32>
    %80 = arith.subf %78, %79 : vector<17x1xf32>
    %81 = vector.broadcast %73 : vector<17x1xf32> to vector<17x32xf32>
    %82 = arith.subf %67, %81 : vector<17x32xf32>
    %cst_30 = arith.constant 9.99999974E-6 : f32
    %83 = vector.broadcast %cst_30 : f32 to vector<17x1xf32>
    %84 = arith.addf %80, %83 : vector<17x1xf32>
    %85 = math.rsqrt %84 : vector<17x1xf32>
    %86 = vector.broadcast %85 : vector<17x1xf32> to vector<17x32xf32>
    %87 = arith.mulf %82, %86 : vector<17x32xf32>
    %88 = vector.broadcast %68 : vector<1x32xf32> to vector<17x32xf32>
    %89 = arith.mulf %87, %88 : vector<17x32xf32>
    %90 = vector.broadcast %69 : vector<1x32xf32> to vector<17x32xf32>
    %91 = arith.addf %89, %90 : vector<17x32xf32>
    %c0_31 = arith.constant 0 : index
    %c0_32 = arith.constant 0 : index
    %c0_33 = arith.constant 0 : index
    %92 = vector.load %arg4[%c0_31, %c0_32, %c0_33] : memref<2x32x96xbf16, #tpu.memory_space<vmem>>, vector<1x32x96xbf16>
    %93 = vector.shape_cast %92 : vector<1x32x96xbf16> to vector<32x96xbf16>
    %94 = arith.truncf %91 : vector<17x32xf32> to vector<17x32xbf16>
    %cst_34 = arith.constant dense<0.000000e+00> : vector<17x96xf32>
    %95 = tpu.matmul %94, %93, %cst_34 {dimension_numbers = #tpu.dot_dimension_numbers<[1], [0], [0], [1], [0, 0, 1, 1], [], []>} : vector<17x32xbf16>, vector<32x96xbf16>, vector<17x96xf32> -> vector<17x96xf32>
    %c46 = arith.constant 46 : index
    %c0_35 = arith.constant 0 : index
    %96 = vector.load %arg9[%c46, %c0_35] : memref<72x128xf32, #tpu.memory_space<vmem>>, vector<1x96xf32>
    %97 = vector.broadcast %96 : vector<1x96xf32> to vector<17x96xf32>
    %98 = arith.addf %95, %97 : vector<17x96xf32>
    %99 = vector.extract_strided_slice %98 {offsets = [0, 0], sizes = [17, 32], strides = [1, 1]} : vector<17x96xf32> to vector<17x32xf32>
    %cst_36 = arith.constant 0.353553385 : f32
    %100 = vector.broadcast %cst_36 : f32 to vector<17x32xf32>
    %101 = arith.mulf %99, %100 : vector<17x32xf32>
    %102 = vector.extract_strided_slice %98 {offsets = [0, 32], sizes = [17, 32], strides = [1, 1]} : vector<17x96xf32> to vector<17x32xf32>
    %103 = arith.truncf %102 : vector<17x32xf32> to vector<17x32xbf16>
    %104 = vector.extract_strided_slice %98 {offsets = [0, 64], sizes = [17, 32], strides = [1, 1]} : vector<17x96xf32> to vector<17x32xf32>
    %cst_37 = arith.constant 0.000000e+00 : f32
    %105 = vector.broadcast %cst_37 : f32 to vector<17x32xf32>
    %106 = vector.broadcast %7 : vector<1x32xf32> to vector<17x32xf32>
    %107 = arith.mulf %101, %106 : vector<17x32xf32>
    %108 = arith.truncf %107 : vector<17x32xf32> to vector<17x32xbf16>
    %cst_38 = arith.constant dense<0.000000e+00> : vector<17x17xf32>
    %109 = tpu.matmul %108, %103, %cst_38 {dimension_numbers = #tpu.dot_dimension_numbers<[1], [1], [0], [0], [0, 0, 1, 0], [], []>} : vector<17x32xbf16>, vector<17x32xbf16>, vector<17x17xf32> -> vector<17x17xf32>
    %cst_39 = arith.constant dense<0xFF800000> : vector<17xf32>
    %110 = vector.multi_reduction <maximumf>, %109, %cst_39 [1] : vector<17x17xf32> to vector<17xf32>
    %111 = vector.shape_cast %110 : vector<17xf32> to vector<17x1xf32>
    %112 = vector.broadcast %111 : vector<17x1xf32> to vector<17x17xf32>
    %113 = arith.subf %109, %112 : vector<17x17xf32>
    %114 = math.exp %113 : vector<17x17xf32>
    %cst_40 = arith.constant dense<0.000000e+00> : vector<17xf32>
    %115 = vector.multi_reduction <add>, %114, %cst_40 [1] : vector<17x17xf32> to vector<17xf32>
    %116 = vector.shape_cast %115 : vector<17xf32> to vector<17x1xf32>
    %117 = tpu.reciprocal %116 {approx = true} : vector<17x1xf32> -> vector<17x1xf32>
    %118 = vector.broadcast %117 : vector<17x1xf32> to vector<17x17xf32>
    %119 = arith.mulf %114, %118 : vector<17x17xf32>
    %120 = vector.broadcast %7 : vector<1x32xf32> to vector<17x32xf32>
    %121 = arith.mulf %104, %120 : vector<17x32xf32>
    %122 = arith.truncf %121 : vector<17x32xf32> to vector<17x32xbf16>
    %123 = arith.truncf %119 : vector<17x17xf32> to vector<17x17xbf16>
    %cst_41 = arith.constant dense<0.000000e+00> : vector<17x32xf32>
    %124 = tpu.matmul %123, %122, %cst_41 {dimension_numbers = #tpu.dot_dimension_numbers<[1], [0], [0], [1], [0, 0, 1, 1], [], []>} : vector<17x17xbf16>, vector<17x32xbf16>, vector<17x32xf32> -> vector<17x32xf32>
    %125 = arith.addf %105, %124 : vector<17x32xf32>
    %126 = vector.broadcast %14 : vector<1x32xf32> to vector<17x32xf32>
    %127 = arith.mulf %101, %126 : vector<17x32xf32>
    %128 = arith.truncf %127 : vector<17x32xf32> to vector<17x32xbf16>
    %cst_42 = arith.constant dense<0.000000e+00> : vector<17x17xf32>
    %129 = tpu.matmul %128, %103, %cst_42 {dimension_numbers = #tpu.dot_dimension_numbers<[1], [1], [0], [0], [0, 0, 1, 0], [], []>} : vector<17x32xbf16>, vector<17x32xbf16>, vector<17x17xf32> -> vector<17x17xf32>
    %cst_43 = arith.constant dense<0xFF800000> : vector<17xf32>
    %130 = vector.multi_reduction <maximumf>, %129, %cst_43 [1] : vector<17x17xf32> to vector<17xf32>
    %131 = vector.shape_cast %130 : vector<17xf32> to vector<17x1xf32>
    %132 = vector.broadcast %131 : vector<17x1xf32> to vector<17x17xf32>
    %133 = arith.subf %129, %132 : vector<17x17xf32>
    %134 = math.exp %133 : vector<17x17xf32>
    %cst_44 = arith.constant dense<0.000000e+00> : vector<17xf32>
    %135 = vector.multi_reduction <add>, %134, %cst_44 [1] : vector<17x17xf32> to vector<17xf32>
    %136 = vector.shape_cast %135 : vector<17xf32> to vector<17x1xf32>
    %137 = tpu.reciprocal %136 {approx = true} : vector<17x1xf32> -> vector<17x1xf32>
    %138 = vector.broadcast %137 : vector<17x1xf32> to vector<17x17xf32>
    %139 = arith.mulf %134, %138 : vector<17x17xf32>
    %140 = vector.broadcast %14 : vector<1x32xf32> to vector<17x32xf32>
    %141 = arith.mulf %104, %140 : vector<17x32xf32>
    %142 = arith.truncf %141 : vector<17x32xf32> to vector<17x32xbf16>
    %143 = arith.truncf %139 : vector<17x17xf32> to vector<17x17xbf16>
    %cst_45 = arith.constant dense<0.000000e+00> : vector<17x32xf32>
    %144 = tpu.matmul %143, %142, %cst_45 {dimension_numbers = #tpu.dot_dimension_numbers<[1], [0], [0], [1], [0, 0, 1, 1], [], []>} : vector<17x17xbf16>, vector<17x32xbf16>, vector<17x32xf32> -> vector<17x32xf32>
    %145 = arith.addf %125, %144 : vector<17x32xf32>
    %146 = vector.broadcast %21 : vector<1x32xf32> to vector<17x32xf32>
    %147 = arith.mulf %101, %146 : vector<17x32xf32>
    %148 = arith.truncf %147 : vector<17x32xf32> to vector<17x32xbf16>
    %cst_46 = arith.constant dense<0.000000e+00> : vector<17x17xf32>
    %149 = tpu.matmul %148, %103, %cst_46 {dimension_numbers = #tpu.dot_dimension_numbers<[1], [1], [0], [0], [0, 0, 1, 0], [], []>} : vector<17x32xbf16>, vector<17x32xbf16>, vector<17x17xf32> -> vector<17x17xf32>
    %cst_47 = arith.constant dense<0xFF800000> : vector<17xf32>
    %150 = vector.multi_reduction <maximumf>, %149, %cst_47 [1] : vector<17x17xf32> to vector<17xf32>
    %151 = vector.shape_cast %150 : vector<17xf32> to vector<17x1xf32>
    %152 = vector.broadcast %151 : vector<17x1xf32> to vector<17x17xf32>
    %153 = arith.subf %149, %152 : vector<17x17xf32>
    %154 = math.exp %153 : vector<17x17xf32>
    %cst_48 = arith.constant dense<0.000000e+00> : vector<17xf32>
    %155 = vector.multi_reduction <add>, %154, %cst_48 [1] : vector<17x17xf32> to vector<17xf32>
    %156 = vector.shape_cast %155 : vector<17xf32> to vector<17x1xf32>
    %157 = tpu.reciprocal %156 {approx = true} : vector<17x1xf32> -> vector<17x1xf32>
    %158 = vector.broadcast %157 : vector<17x1xf32> to vector<17x17xf32>
    %159 = arith.mulf %154, %158 : vector<17x17xf32>
    %160 = vector.broadcast %21 : vector<1x32xf32> to vector<17x32xf32>
    %161 = arith.mulf %104, %160 : vector<17x32xf32>
    %162 = arith.truncf %161 : vector<17x32xf32> to vector<17x32xbf16>
    %163 = arith.truncf %159 : vector<17x17xf32> to vector<17x17xbf16>
    %cst_49 = arith.constant dense<0.000000e+00> : vector<17x32xf32>
    %164 = tpu.matmul %163, %162, %cst_49 {dimension_numbers = #tpu.dot_dimension_numbers<[1], [0], [0], [1], [0, 0, 1, 1], [], []>} : vector<17x17xbf16>, vector<17x32xbf16>, vector<17x32xf32> -> vector<17x32xf32>
    %165 = arith.addf %145, %164 : vector<17x32xf32>
    %166 = vector.broadcast %28 : vector<1x32xf32> to vector<17x32xf32>
    %167 = arith.mulf %101, %166 : vector<17x32xf32>
    %168 = arith.truncf %167 : vector<17x32xf32> to vector<17x32xbf16>
    %cst_50 = arith.constant dense<0.000000e+00> : vector<17x17xf32>
    %169 = tpu.matmul %168, %103, %cst_50 {dimension_numbers = #tpu.dot_dimension_numbers<[1], [1], [0], [0], [0, 0, 1, 0], [], []>} : vector<17x32xbf16>, vector<17x32xbf16>, vector<17x17xf32> -> vector<17x17xf32>
    %cst_51 = arith.constant dense<0xFF800000> : vector<17xf32>
    %170 = vector.multi_reduction <maximumf>, %169, %cst_51 [1] : vector<17x17xf32> to vector<17xf32>
    %171 = vector.shape_cast %170 : vector<17xf32> to vector<17x1xf32>
    %172 = vector.broadcast %171 : vector<17x1xf32> to vector<17x17xf32>
    %173 = arith.subf %169, %172 : vector<17x17xf32>
    %174 = math.exp %173 : vector<17x17xf32>
    %cst_52 = arith.constant dense<0.000000e+00> : vector<17xf32>
    %175 = vector.multi_reduction <add>, %174, %cst_52 [1] : vector<17x17xf32> to vector<17xf32>
    %176 = vector.shape_cast %175 : vector<17xf32> to vector<17x1xf32>
    %177 = tpu.reciprocal %176 {approx = true} : vector<17x1xf32> -> vector<17x1xf32>
    %178 = vector.broadcast %177 : vector<17x1xf32> to vector<17x17xf32>
    %179 = arith.mulf %174, %178 : vector<17x17xf32>
    %180 = vector.broadcast %28 : vector<1x32xf32> to vector<17x32xf32>
    %181 = arith.mulf %104, %180 : vector<17x32xf32>
    %182 = arith.truncf %181 : vector<17x32xf32> to vector<17x32xbf16>
    %183 = arith.truncf %179 : vector<17x17xf32> to vector<17x17xbf16>
    %cst_53 = arith.constant dense<0.000000e+00> : vector<17x32xf32>
    %184 = tpu.matmul %183, %182, %cst_53 {dimension_numbers = #tpu.dot_dimension_numbers<[1], [0], [0], [1], [0, 0, 1, 1], [], []>} : vector<17x17xbf16>, vector<17x32xbf16>, vector<17x32xf32> -> vector<17x32xf32>
    %185 = arith.addf %165, %184 : vector<17x32xf32>
    %c0_54 = arith.constant 0 : index
    %c0_55 = arith.constant 0 : index
    %c0_56 = arith.constant 0 : index
    %186 = vector.load %arg5[%c0_54, %c0_55, %c0_56] : memref<4x32x32xbf16, #tpu.memory_space<vmem>>, vector<1x32x32xbf16>
    %187 = vector.shape_cast %186 : vector<1x32x32xbf16> to vector<32x32xbf16>
    %188 = arith.truncf %185 : vector<17x32xf32> to vector<17x32xbf16>
    %cst_57 = arith.constant dense<0.000000e+00> : vector<17x32xf32>
    %189 = tpu.matmul %188, %187, %cst_57 {dimension_numbers = #tpu.dot_dimension_numbers<[1], [0], [0], [1], [0, 0, 1, 1], [], []>} : vector<17x32xbf16>, vector<32x32xbf16>, vector<17x32xf32> -> vector<17x32xf32>
    %190 = arith.addf %67, %189 : vector<17x32xf32>
    %c42 = arith.constant 42 : index
    %c0_58 = arith.constant 0 : index
    %191 = vector.load %arg9[%c42, %c0_58] : memref<72x128xf32, #tpu.memory_space<vmem>>, vector<1x32xf32>
    %192 = vector.broadcast %191 : vector<1x32xf32> to vector<17x32xf32>
    %193 = arith.addf %190, %192 : vector<17x32xf32>
    %c43 = arith.constant 43 : index
    %c0_59 = arith.constant 0 : index
    %194 = vector.load %arg9[%c43, %c0_59] : memref<72x128xf32, #tpu.memory_space<vmem>>, vector<1x32xf32>
    %c44 = arith.constant 44 : index
    %c0_60 = arith.constant 0 : index
    %195 = vector.load %arg9[%c44, %c0_60] : memref<72x128xf32, #tpu.memory_space<vmem>>, vector<1x32xf32>
    %cst_61 = arith.constant dense<0.000000e+00> : vector<17xf32>
    %196 = vector.multi_reduction <add>, %193, %cst_61 [1] : vector<17x32xf32> to vector<17xf32>
    %197 = vector.shape_cast %196 : vector<17xf32> to vector<17x1xf32>
    %cst_62 = arith.constant 3.200000e+01 : f32
    %198 = vector.broadcast %cst_62 : f32 to vector<17x1xf32>
    %199 = arith.divf %197, %198 : vector<17x1xf32>
    %200 = arith.mulf %193, %193 : vector<17x32xf32>
    %cst_63 = arith.constant dense<0.000000e+00> : vector<17xf32>
    %201 = vector.multi_reduction <add>, %200, %cst_63 [1] : vector<17x32xf32> to vector<17xf32>
    %202 = vector.shape_cast %201 : vector<17xf32> to vector<17x1xf32>
    %cst_64 = arith.constant 3.200000e+01 : f32
    %203 = vector.broadcast %cst_64 : f32 to vector<17x1xf32>
    %204 = arith.divf %202, %203 : vector<17x1xf32>
    %205 = arith.mulf %199, %199 : vector<17x1xf32>
    %206 = arith.subf %204, %205 : vector<17x1xf32>
    %207 = vector.broadcast %199 : vector<17x1xf32> to vector<17x32xf32>
    %208 = arith.subf %193, %207 : vector<17x32xf32>
    %cst_65 = arith.constant 9.99999974E-6 : f32
    %209 = vector.broadcast %cst_65 : f32 to vector<17x1xf32>
    %210 = arith.addf %206, %209 : vector<17x1xf32>
    %211 = math.rsqrt %210 : vector<17x1xf32>
    %212 = vector.broadcast %211 : vector<17x1xf32> to vector<17x32xf32>
    %213 = arith.mulf %208, %212 : vector<17x32xf32>
    %214 = vector.broadcast %194 : vector<1x32xf32> to vector<17x32xf32>
    %215 = arith.mulf %213, %214 : vector<17x32xf32>
    %216 = vector.broadcast %195 : vector<1x32xf32> to vector<17x32xf32>
    %217 = arith.addf %215, %216 : vector<17x32xf32>
    %c0_66 = arith.constant 0 : index
    %c0_67 = arith.constant 0 : index
    %c0_68 = arith.constant 0 : index
    %218 = vector.load %arg6[%c0_66, %c0_67, %c0_68] : memref<2x32x64xbf16, #tpu.memory_space<vmem>>, vector<1x32x64xbf16>
    %219 = vector.shape_cast %218 : vector<1x32x64xbf16> to vector<32x64xbf16>
    %220 = arith.truncf %217 : vector<17x32xf32> to vector<17x32xbf16>
    %cst_69 = arith.constant dense<0.000000e+00> : vector<17x64xf32>
    %221 = tpu.matmul %220, %219, %cst_69 {dimension_numbers = #tpu.dot_dimension_numbers<[1], [0], [0], [1], [0, 0, 1, 1], [], []>} : vector<17x32xbf16>, vector<32x64xbf16>, vector<17x64xf32> -> vector<17x64xf32>
    %c47 = arith.constant 47 : index
    %c0_70 = arith.constant 0 : index
    %222 = vector.load %arg9[%c47, %c0_70] : memref<72x128xf32, #tpu.memory_space<vmem>>, vector<1x64xf32>
    %223 = vector.broadcast %222 : vector<1x64xf32> to vector<17x64xf32>
    %224 = arith.addf %221, %223 : vector<17x64xf32>
    %cst_71 = arith.constant 1.702000e+00 : f32
    %225 = vector.broadcast %cst_71 : f32 to vector<17x64xf32>
    %226 = arith.mulf %225, %224 : vector<17x64xf32>
    %227 = arith.negf %226 : vector<17x64xf32>
    %228 = math.exp %227 : vector<17x64xf32>
    %cst_72 = arith.constant 1.000000e+00 : f32
    %229 = vector.broadcast %cst_72 : f32 to vector<17x64xf32>
    %230 = arith.addf %229, %228 : vector<17x64xf32>
    %231 = arith.divf %229, %230 : vector<17x64xf32>
    %232 = arith.mulf %224, %231 : vector<17x64xf32>
    %c0_73 = arith.constant 0 : index
    %c0_74 = arith.constant 0 : index
    %c0_75 = arith.constant 0 : index
    %233 = vector.load %arg7[%c0_73, %c0_74, %c0_75] : memref<2x64x32xbf16, #tpu.memory_space<vmem>>, vector<1x64x32xbf16>
    %234 = vector.shape_cast %233 : vector<1x64x32xbf16> to vector<64x32xbf16>
    %235 = arith.truncf %232 : vector<17x64xf32> to vector<17x64xbf16>
    %cst_76 = arith.constant dense<0.000000e+00> : vector<17x32xf32>
    %236 = tpu.matmul %235, %234, %cst_76 {dimension_numbers = #tpu.dot_dimension_numbers<[1], [0], [0], [1], [0, 0, 1, 1], [], []>} : vector<17x64xbf16>, vector<64x32xbf16>, vector<17x32xf32> -> vector<17x32xf32>
    %237 = arith.addf %193, %236 : vector<17x32xf32>
    %c45 = arith.constant 45 : index
    %c0_77 = arith.constant 0 : index
    %238 = vector.load %arg9[%c45, %c0_77] : memref<72x128xf32, #tpu.memory_space<vmem>>, vector<1x32xf32>
    %239 = vector.broadcast %238 : vector<1x32xf32> to vector<17x32xf32>
    %240 = arith.addf %237, %239 : vector<17x32xf32>
    %c48 = arith.constant 48 : index
    %c0_78 = arith.constant 0 : index
    %241 = vector.load %arg9[%c48, %c0_78] : memref<72x128xf32, #tpu.memory_space<vmem>>, vector<1x32xf32>
    %c49 = arith.constant 49 : index
    %c0_79 = arith.constant 0 : index
    %242 = vector.load %arg9[%c49, %c0_79] : memref<72x128xf32, #tpu.memory_space<vmem>>, vector<1x32xf32>
    %cst_80 = arith.constant dense<0.000000e+00> : vector<17xf32>
    %243 = vector.multi_reduction <add>, %240, %cst_80 [1] : vector<17x32xf32> to vector<17xf32>
    %244 = vector.shape_cast %243 : vector<17xf32> to vector<17x1xf32>
    %cst_81 = arith.constant 3.200000e+01 : f32
    %245 = vector.broadcast %cst_81 : f32 to vector<17x1xf32>
    %246 = arith.divf %244, %245 : vector<17x1xf32>
    %247 = arith.mulf %240, %240 : vector<17x32xf32>
    %cst_82 = arith.constant dense<0.000000e+00> : vector<17xf32>
    %248 = vector.multi_reduction <add>, %247, %cst_82 [1] : vector<17x32xf32> to vector<17xf32>
    %249 = vector.shape_cast %248 : vector<17xf32> to vector<17x1xf32>
    %cst_83 = arith.constant 3.200000e+01 : f32
    %250 = vector.broadcast %cst_83 : f32 to vector<17x1xf32>
    %251 = arith.divf %249, %250 : vector<17x1xf32>
    %252 = arith.mulf %246, %246 : vector<17x1xf32>
    %253 = arith.subf %251, %252 : vector<17x1xf32>
    %254 = vector.broadcast %246 : vector<17x1xf32> to vector<17x32xf32>
    %255 = arith.subf %240, %254 : vector<17x32xf32>
    %cst_84 = arith.constant 9.99999974E-6 : f32
    %256 = vector.broadcast %cst_84 : f32 to vector<17x1xf32>
    %257 = arith.addf %253, %256 : vector<17x1xf32>
    %258 = math.rsqrt %257 : vector<17x1xf32>
    %259 = vector.broadcast %258 : vector<17x1xf32> to vector<17x32xf32>
    %260 = arith.mulf %255, %259 : vector<17x32xf32>
    %261 = vector.broadcast %241 : vector<1x32xf32> to vector<17x32xf32>
    %262 = arith.mulf %260, %261 : vector<17x32xf32>
    %263 = vector.broadcast %242 : vector<1x32xf32> to vector<17x32xf32>
    %264 = arith.addf %262, %263 : vector<17x32xf32>
    %c1 = arith.constant 1 : index
    %c0_85 = arith.constant 0 : index
    %c0_86 = arith.constant 0 : index
    %265 = vector.load %arg4[%c1, %c0_85, %c0_86] : memref<2x32x96xbf16, #tpu.memory_space<vmem>>, vector<1x32x96xbf16>
    %266 = vector.shape_cast %265 : vector<1x32x96xbf16> to vector<32x96xbf16>
    %267 = arith.truncf %264 : vector<17x32xf32> to vector<17x32xbf16>
    %cst_87 = arith.constant dense<0.000000e+00> : vector<17x96xf32>
    %268 = tpu.matmul %267, %266, %cst_87 {dimension_numbers = #tpu.dot_dimension_numbers<[1], [0], [0], [1], [0, 0, 1, 1], [], []>} : vector<17x32xbf16>, vector<32x96xbf16>, vector<17x96xf32> -> vector<17x96xf32>
    %c54 = arith.constant 54 : index
    %c0_88 = arith.constant 0 : index
    %269 = vector.load %arg9[%c54, %c0_88] : memref<72x128xf32, #tpu.memory_space<vmem>>, vector<1x96xf32>
    %270 = vector.broadcast %269 : vector<1x96xf32> to vector<17x96xf32>
    %271 = arith.addf %268, %270 : vector<17x96xf32>
    %272 = vector.extract_strided_slice %271 {offsets = [0, 0], sizes = [17, 32], strides = [1, 1]} : vector<17x96xf32> to vector<17x32xf32>
    %cst_89 = arith.constant 0.353553385 : f32
    %273 = vector.broadcast %cst_89 : f32 to vector<17x32xf32>
    %274 = arith.mulf %272, %273 : vector<17x32xf32>
    %275 = vector.extract_strided_slice %271 {offsets = [0, 32], sizes = [17, 32], strides = [1, 1]} : vector<17x96xf32> to vector<17x32xf32>
    %276 = arith.truncf %275 : vector<17x32xf32> to vector<17x32xbf16>
    %277 = vector.extract_strided_slice %271 {offsets = [0, 64], sizes = [17, 32], strides = [1, 1]} : vector<17x96xf32> to vector<17x32xf32>
    %cst_90 = arith.constant 0.000000e+00 : f32
    %278 = vector.broadcast %cst_90 : f32 to vector<17x32xf32>
    %279 = vector.broadcast %7 : vector<1x32xf32> to vector<17x32xf32>
    %280 = arith.mulf %274, %279 : vector<17x32xf32>
    %281 = arith.truncf %280 : vector<17x32xf32> to vector<17x32xbf16>
    %cst_91 = arith.constant dense<0.000000e+00> : vector<17x17xf32>
    %282 = tpu.matmul %281, %276, %cst_91 {dimension_numbers = #tpu.dot_dimension_numbers<[1], [1], [0], [0], [0, 0, 1, 0], [], []>} : vector<17x32xbf16>, vector<17x32xbf16>, vector<17x17xf32> -> vector<17x17xf32>
    %cst_92 = arith.constant dense<0xFF800000> : vector<17xf32>
    %283 = vector.multi_reduction <maximumf>, %282, %cst_92 [1] : vector<17x17xf32> to vector<17xf32>
    %284 = vector.shape_cast %283 : vector<17xf32> to vector<17x1xf32>
    %285 = vector.broadcast %284 : vector<17x1xf32> to vector<17x17xf32>
    %286 = arith.subf %282, %285 : vector<17x17xf32>
    %287 = math.exp %286 : vector<17x17xf32>
    %cst_93 = arith.constant dense<0.000000e+00> : vector<17xf32>
    %288 = vector.multi_reduction <add>, %287, %cst_93 [1] : vector<17x17xf32> to vector<17xf32>
    %289 = vector.shape_cast %288 : vector<17xf32> to vector<17x1xf32>
    %290 = tpu.reciprocal %289 {approx = true} : vector<17x1xf32> -> vector<17x1xf32>
    %291 = vector.broadcast %290 : vector<17x1xf32> to vector<17x17xf32>
    %292 = arith.mulf %287, %291 : vector<17x17xf32>
    %293 = vector.broadcast %7 : vector<1x32xf32> to vector<17x32xf32>
    %294 = arith.mulf %277, %293 : vector<17x32xf32>
    %295 = arith.truncf %294 : vector<17x32xf32> to vector<17x32xbf16>
    %296 = arith.truncf %292 : vector<17x17xf32> to vector<17x17xbf16>
    %cst_94 = arith.constant dense<0.000000e+00> : vector<17x32xf32>
    %297 = tpu.matmul %296, %295, %cst_94 {dimension_numbers = #tpu.dot_dimension_numbers<[1], [0], [0], [1], [0, 0, 1, 1], [], []>} : vector<17x17xbf16>, vector<17x32xbf16>, vector<17x32xf32> -> vector<17x32xf32>
    %298 = arith.addf %278, %297 : vector<17x32xf32>
    %299 = vector.broadcast %14 : vector<1x32xf32> to vector<17x32xf32>
    %300 = arith.mulf %274, %299 : vector<17x32xf32>
    %301 = arith.truncf %300 : vector<17x32xf32> to vector<17x32xbf16>
    %cst_95 = arith.constant dense<0.000000e+00> : vector<17x17xf32>
    %302 = tpu.matmul %301, %276, %cst_95 {dimension_numbers = #tpu.dot_dimension_numbers<[1], [1], [0], [0], [0, 0, 1, 0], [], []>} : vector<17x32xbf16>, vector<17x32xbf16>, vector<17x17xf32> -> vector<17x17xf32>
    %cst_96 = arith.constant dense<0xFF800000> : vector<17xf32>
    %303 = vector.multi_reduction <maximumf>, %302, %cst_96 [1] : vector<17x17xf32> to vector<17xf32>
    %304 = vector.shape_cast %303 : vector<17xf32> to vector<17x1xf32>
    %305 = vector.broadcast %304 : vector<17x1xf32> to vector<17x17xf32>
    %306 = arith.subf %302, %305 : vector<17x17xf32>
    %307 = math.exp %306 : vector<17x17xf32>
    %cst_97 = arith.constant dense<0.000000e+00> : vector<17xf32>
    %308 = vector.multi_reduction <add>, %307, %cst_97 [1] : vector<17x17xf32> to vector<17xf32>
    %309 = vector.shape_cast %308 : vector<17xf32> to vector<17x1xf32>
    %310 = tpu.reciprocal %309 {approx = true} : vector<17x1xf32> -> vector<17x1xf32>
    %311 = vector.broadcast %310 : vector<17x1xf32> to vector<17x17xf32>
    %312 = arith.mulf %307, %311 : vector<17x17xf32>
    %313 = vector.broadcast %14 : vector<1x32xf32> to vector<17x32xf32>
    %314 = arith.mulf %277, %313 : vector<17x32xf32>
    %315 = arith.truncf %314 : vector<17x32xf32> to vector<17x32xbf16>
    %316 = arith.truncf %312 : vector<17x17xf32> to vector<17x17xbf16>
    %cst_98 = arith.constant dense<0.000000e+00> : vector<17x32xf32>
    %317 = tpu.matmul %316, %315, %cst_98 {dimension_numbers = #tpu.dot_dimension_numbers<[1], [0], [0], [1], [0, 0, 1, 1], [], []>} : vector<17x17xbf16>, vector<17x32xbf16>, vector<17x32xf32> -> vector<17x32xf32>
    %318 = arith.addf %298, %317 : vector<17x32xf32>
    %319 = vector.broadcast %21 : vector<1x32xf32> to vector<17x32xf32>
    %320 = arith.mulf %274, %319 : vector<17x32xf32>
    %321 = arith.truncf %320 : vector<17x32xf32> to vector<17x32xbf16>
    %cst_99 = arith.constant dense<0.000000e+00> : vector<17x17xf32>
    %322 = tpu.matmul %321, %276, %cst_99 {dimension_numbers = #tpu.dot_dimension_numbers<[1], [1], [0], [0], [0, 0, 1, 0], [], []>} : vector<17x32xbf16>, vector<17x32xbf16>, vector<17x17xf32> -> vector<17x17xf32>
    %cst_100 = arith.constant dense<0xFF800000> : vector<17xf32>
    %323 = vector.multi_reduction <maximumf>, %322, %cst_100 [1] : vector<17x17xf32> to vector<17xf32>
    %324 = vector.shape_cast %323 : vector<17xf32> to vector<17x1xf32>
    %325 = vector.broadcast %324 : vector<17x1xf32> to vector<17x17xf32>
    %326 = arith.subf %322, %325 : vector<17x17xf32>
    %327 = math.exp %326 : vector<17x17xf32>
    %cst_101 = arith.constant dense<0.000000e+00> : vector<17xf32>
    %328 = vector.multi_reduction <add>, %327, %cst_101 [1] : vector<17x17xf32> to vector<17xf32>
    %329 = vector.shape_cast %328 : vector<17xf32> to vector<17x1xf32>
    %330 = tpu.reciprocal %329 {approx = true} : vector<17x1xf32> -> vector<17x1xf32>
    %331 = vector.broadcast %330 : vector<17x1xf32> to vector<17x17xf32>
    %332 = arith.mulf %327, %331 : vector<17x17xf32>
    %333 = vector.broadcast %21 : vector<1x32xf32> to vector<17x32xf32>
    %334 = arith.mulf %277, %333 : vector<17x32xf32>
    %335 = arith.truncf %334 : vector<17x32xf32> to vector<17x32xbf16>
    %336 = arith.truncf %332 : vector<17x17xf32> to vector<17x17xbf16>
    %cst_102 = arith.constant dense<0.000000e+00> : vector<17x32xf32>
    %337 = tpu.matmul %336, %335, %cst_102 {dimension_numbers = #tpu.dot_dimension_numbers<[1], [0], [0], [1], [0, 0, 1, 1], [], []>} : vector<17x17xbf16>, vector<17x32xbf16>, vector<17x32xf32> -> vector<17x32xf32>
    %338 = arith.addf %318, %337 : vector<17x32xf32>
    %339 = vector.broadcast %28 : vector<1x32xf32> to vector<17x32xf32>
    %340 = arith.mulf %274, %339 : vector<17x32xf32>
    %341 = arith.truncf %340 : vector<17x32xf32> to vector<17x32xbf16>
    %cst_103 = arith.constant dense<0.000000e+00> : vector<17x17xf32>
    %342 = tpu.matmul %341, %276, %cst_103 {dimension_numbers = #tpu.dot_dimension_numbers<[1], [1], [0], [0], [0, 0, 1, 0], [], []>} : vector<17x32xbf16>, vector<17x32xbf16>, vector<17x17xf32> -> vector<17x17xf32>
    %cst_104 = arith.constant dense<0xFF800000> : vector<17xf32>
    %343 = vector.multi_reduction <maximumf>, %342, %cst_104 [1] : vector<17x17xf32> to vector<17xf32>
    %344 = vector.shape_cast %343 : vector<17xf32> to vector<17x1xf32>
    %345 = vector.broadcast %344 : vector<17x1xf32> to vector<17x17xf32>
    %346 = arith.subf %342, %345 : vector<17x17xf32>
    %347 = math.exp %346 : vector<17x17xf32>
    %cst_105 = arith.constant dense<0.000000e+00> : vector<17xf32>
    %348 = vector.multi_reduction <add>, %347, %cst_105 [1] : vector<17x17xf32> to vector<17xf32>
    %349 = vector.shape_cast %348 : vector<17xf32> to vector<17x1xf32>
    %350 = tpu.reciprocal %349 {approx = true} : vector<17x1xf32> -> vector<17x1xf32>
    %351 = vector.broadcast %350 : vector<17x1xf32> to vector<17x17xf32>
    %352 = arith.mulf %347, %351 : vector<17x17xf32>
    %353 = vector.broadcast %28 : vector<1x32xf32> to vector<17x32xf32>
    %354 = arith.mulf %277, %353 : vector<17x32xf32>
    %355 = arith.truncf %354 : vector<17x32xf32> to vector<17x32xbf16>
    %356 = arith.truncf %352 : vector<17x17xf32> to vector<17x17xbf16>
    %cst_106 = arith.constant dense<0.000000e+00> : vector<17x32xf32>
    %357 = tpu.matmul %356, %355, %cst_106 {dimension_numbers = #tpu.dot_dimension_numbers<[1], [0], [0], [1], [0, 0, 1, 1], [], []>} : vector<17x17xbf16>, vector<17x32xbf16>, vector<17x32xf32> -> vector<17x32xf32>
    %358 = arith.addf %338, %357 : vector<17x32xf32>
    %c1_107 = arith.constant 1 : index
    %c0_108 = arith.constant 0 : index
    %c0_109 = arith.constant 0 : index
    %359 = vector.load %arg5[%c1_107, %c0_108, %c0_109] : memref<4x32x32xbf16, #tpu.memory_space<vmem>>, vector<1x32x32xbf16>
    %360 = vector.shape_cast %359 : vector<1x32x32xbf16> to vector<32x32xbf16>
    %361 = arith.truncf %358 : vector<17x32xf32> to vector<17x32xbf16>
    %cst_110 = arith.constant dense<0.000000e+00> : vector<17x32xf32>
    %362 = tpu.matmul %361, %360, %cst_110 {dimension_numbers = #tpu.dot_dimension_numbers<[1], [0], [0], [1], [0, 0, 1, 1], [], []>} : vector<17x32xbf16>, vector<32x32xbf16>, vector<17x32xf32> -> vector<17x32xf32>
    %363 = arith.addf %240, %362 : vector<17x32xf32>
    %c50 = arith.constant 50 : index
    %c0_111 = arith.constant 0 : index
    %364 = vector.load %arg9[%c50, %c0_111] : memref<72x128xf32, #tpu.memory_space<vmem>>, vector<1x32xf32>
    %365 = vector.broadcast %364 : vector<1x32xf32> to vector<17x32xf32>
    %366 = arith.addf %363, %365 : vector<17x32xf32>
    %c51 = arith.constant 51 : index
    %c0_112 = arith.constant 0 : index
    %367 = vector.load %arg9[%c51, %c0_112] : memref<72x128xf32, #tpu.memory_space<vmem>>, vector<1x32xf32>
    %c52 = arith.constant 52 : index
    %c0_113 = arith.constant 0 : index
    %368 = vector.load %arg9[%c52, %c0_113] : memref<72x128xf32, #tpu.memory_space<vmem>>, vector<1x32xf32>
    %cst_114 = arith.constant dense<0.000000e+00> : vector<17xf32>
    %369 = vector.multi_reduction <add>, %366, %cst_114 [1] : vector<17x32xf32> to vector<17xf32>
    %370 = vector.shape_cast %369 : vector<17xf32> to vector<17x1xf32>
    %cst_115 = arith.constant 3.200000e+01 : f32
    %371 = vector.broadcast %cst_115 : f32 to vector<17x1xf32>
    %372 = arith.divf %370, %371 : vector<17x1xf32>
    %373 = arith.mulf %366, %366 : vector<17x32xf32>
    %cst_116 = arith.constant dense<0.000000e+00> : vector<17xf32>
    %374 = vector.multi_reduction <add>, %373, %cst_116 [1] : vector<17x32xf32> to vector<17xf32>
    %375 = vector.shape_cast %374 : vector<17xf32> to vector<17x1xf32>
    %cst_117 = arith.constant 3.200000e+01 : f32
    %376 = vector.broadcast %cst_117 : f32 to vector<17x1xf32>
    %377 = arith.divf %375, %376 : vector<17x1xf32>
    %378 = arith.mulf %372, %372 : vector<17x1xf32>
    %379 = arith.subf %377, %378 : vector<17x1xf32>
    %380 = vector.broadcast %372 : vector<17x1xf32> to vector<17x32xf32>
    %381 = arith.subf %366, %380 : vector<17x32xf32>
    %cst_118 = arith.constant 9.99999974E-6 : f32
    %382 = vector.broadcast %cst_118 : f32 to vector<17x1xf32>
    %383 = arith.addf %379, %382 : vector<17x1xf32>
    %384 = math.rsqrt %383 : vector<17x1xf32>
    %385 = vector.broadcast %384 : vector<17x1xf32> to vector<17x32xf32>
    %386 = arith.mulf %381, %385 : vector<17x32xf32>
    %387 = vector.broadcast %367 : vector<1x32xf32> to vector<17x32xf32>
    %388 = arith.mulf %386, %387 : vector<17x32xf32>
    %389 = vector.broadcast %368 : vector<1x32xf32> to vector<17x32xf32>
    %390 = arith.addf %388, %389 : vector<17x32xf32>
    %c1_119 = arith.constant 1 : index
    %c0_120 = arith.constant 0 : index
    %c0_121 = arith.constant 0 : index
    %391 = vector.load %arg6[%c1_119, %c0_120, %c0_121] : memref<2x32x64xbf16, #tpu.memory_space<vmem>>, vector<1x32x64xbf16>
    %392 = vector.shape_cast %391 : vector<1x32x64xbf16> to vector<32x64xbf16>
    %393 = arith.truncf %390 : vector<17x32xf32> to vector<17x32xbf16>
    %cst_122 = arith.constant dense<0.000000e+00> : vector<17x64xf32>
    %394 = tpu.matmul %393, %392, %cst_122 {dimension_numbers = #tpu.dot_dimension_numbers<[1], [0], [0], [1], [0, 0, 1, 1], [], []>} : vector<17x32xbf16>, vector<32x64xbf16>, vector<17x64xf32> -> vector<17x64xf32>
    %c55 = arith.constant 55 : index
    %c0_123 = arith.constant 0 : index
    %395 = vector.load %arg9[%c55, %c0_123] : memref<72x128xf32, #tpu.memory_space<vmem>>, vector<1x64xf32>
    %396 = vector.broadcast %395 : vector<1x64xf32> to vector<17x64xf32>
    %397 = arith.addf %394, %396 : vector<17x64xf32>
    %cst_124 = arith.constant 1.702000e+00 : f32
    %398 = vector.broadcast %cst_124 : f32 to vector<17x64xf32>
    %399 = arith.mulf %398, %397 : vector<17x64xf32>
    %400 = arith.negf %399 : vector<17x64xf32>
    %401 = math.exp %400 : vector<17x64xf32>
    %cst_125 = arith.constant 1.000000e+00 : f32
    %402 = vector.broadcast %cst_125 : f32 to vector<17x64xf32>
    %403 = arith.addf %402, %401 : vector<17x64xf32>
    %404 = arith.divf %402, %403 : vector<17x64xf32>
    %405 = arith.mulf %397, %404 : vector<17x64xf32>
    %c1_126 = arith.constant 1 : index
    %c0_127 = arith.constant 0 : index
    %c0_128 = arith.constant 0 : index
    %406 = vector.load %arg7[%c1_126, %c0_127, %c0_128] : memref<2x64x32xbf16, #tpu.memory_space<vmem>>, vector<1x64x32xbf16>
    %407 = vector.shape_cast %406 : vector<1x64x32xbf16> to vector<64x32xbf16>
    %408 = arith.truncf %405 : vector<17x64xf32> to vector<17x64xbf16>
    %cst_129 = arith.constant dense<0.000000e+00> : vector<17x32xf32>
    %409 = tpu.matmul %408, %407, %cst_129 {dimension_numbers = #tpu.dot_dimension_numbers<[1], [0], [0], [1], [0, 0, 1, 1], [], []>} : vector<17x64xbf16>, vector<64x32xbf16>, vector<17x32xf32> -> vector<17x32xf32>
    %410 = arith.addf %366, %409 : vector<17x32xf32>
    %c53 = arith.constant 53 : index
    %c0_130 = arith.constant 0 : index
    %411 = vector.load %arg9[%c53, %c0_130] : memref<72x128xf32, #tpu.memory_space<vmem>>, vector<1x32xf32>
    %412 = vector.broadcast %411 : vector<1x32xf32> to vector<17x32xf32>
    %413 = arith.addf %410, %412 : vector<17x32xf32>
    %cst_131 = arith.constant dense<0.000000e+00> : vector<17xf32>
    %414 = vector.multi_reduction <add>, %413, %cst_131 [1] : vector<17x32xf32> to vector<17xf32>
    %415 = vector.shape_cast %414 : vector<17xf32> to vector<17x1xf32>
    %cst_132 = arith.constant 3.200000e+01 : f32
    %416 = vector.broadcast %cst_132 : f32 to vector<17x1xf32>
    %417 = arith.divf %415, %416 : vector<17x1xf32>
    %418 = arith.mulf %413, %413 : vector<17x32xf32>
    %cst_133 = arith.constant dense<0.000000e+00> : vector<17xf32>
    %419 = vector.multi_reduction <add>, %418, %cst_133 [1] : vector<17x32xf32> to vector<17xf32>
    %420 = vector.shape_cast %419 : vector<17xf32> to vector<17x1xf32>
    %cst_134 = arith.constant 3.200000e+01 : f32
    %421 = vector.broadcast %cst_134 : f32 to vector<17x1xf32>
    %422 = arith.divf %420, %421 : vector<17x1xf32>
    %423 = arith.mulf %417, %417 : vector<17x1xf32>
    %424 = arith.subf %422, %423 : vector<17x1xf32>
    %425 = vector.broadcast %417 : vector<17x1xf32> to vector<17x32xf32>
    %426 = arith.subf %413, %425 : vector<17x32xf32>
    %cst_135 = arith.constant 9.99999974E-6 : f32
    %427 = vector.broadcast %cst_135 : f32 to vector<17x1xf32>
    %428 = arith.addf %424, %427 : vector<17x1xf32>
    %429 = math.rsqrt %428 : vector<17x1xf32>
    %430 = vector.broadcast %429 : vector<17x1xf32> to vector<17x32xf32>
    %431 = arith.mulf %426, %430 : vector<17x32xf32>
    %432 = vector.broadcast %32 : vector<1x32xf32> to vector<17x32xf32>
    %433 = arith.mulf %431, %432 : vector<17x32xf32>
    %434 = vector.broadcast %33 : vector<1x32xf32> to vector<17x32xf32>
    %435 = arith.addf %433, %434 : vector<17x32xf32>
    %436 = vector.extract_strided_slice %435 {offsets = [1, 0], sizes = [16, 32], strides = [1, 1]} : vector<17x32xf32> to vector<16x32xf32>
    %437 = vector.extract_strided_slice %435 {offsets = [0, 0], sizes = [1, 32], strides = [1, 1]} : vector<17x32xf32> to vector<1x32xf32>
    %438 = vector.broadcast %437 : vector<1x32xf32> to vector<16x32xf32>
    %439 = arith.mulf %436, %438 : vector<16x32xf32>
    %cst_136 = arith.constant dense<0.000000e+00> : vector<16xf32>
    %440 = vector.multi_reduction <add>, %439, %cst_136 [1] : vector<16x32xf32> to vector<16xf32>
    %441 = vector.shape_cast %440 : vector<16xf32> to vector<16x1xf32>
    %cst_137 = arith.constant 3.200000e+01 : f32
    %442 = vector.broadcast %cst_137 : f32 to vector<16x1xf32>
    %443 = arith.divf %441, %442 : vector<16x1xf32>
    %444 = arith.mulf %439, %439 : vector<16x32xf32>
    %cst_138 = arith.constant dense<0.000000e+00> : vector<16xf32>
    %445 = vector.multi_reduction <add>, %444, %cst_138 [1] : vector<16x32xf32> to vector<16xf32>
    %446 = vector.shape_cast %445 : vector<16xf32> to vector<16x1xf32>
    %cst_139 = arith.constant 3.200000e+01 : f32
    %447 = vector.broadcast %cst_139 : f32 to vector<16x1xf32>
    %448 = arith.divf %446, %447 : vector<16x1xf32>
    %449 = arith.mulf %443, %443 : vector<16x1xf32>
    %450 = arith.subf %448, %449 : vector<16x1xf32>
    %451 = vector.broadcast %443 : vector<16x1xf32> to vector<16x32xf32>
    %452 = arith.subf %439, %451 : vector<16x32xf32>
    %cst_140 = arith.constant 9.99999974E-6 : f32
    %453 = vector.broadcast %cst_140 : f32 to vector<16x1xf32>
    %454 = arith.addf %450, %453 : vector<16x1xf32>
    %455 = math.rsqrt %454 : vector<16x1xf32>
    %456 = vector.broadcast %455 : vector<16x1xf32> to vector<16x32xf32>
    %457 = arith.mulf %452, %456 : vector<16x32xf32>
    %458 = vector.broadcast %34 : vector<1x32xf32> to vector<16x32xf32>
    %459 = arith.mulf %457, %458 : vector<16x32xf32>
    %460 = vector.broadcast %35 : vector<1x32xf32> to vector<16x32xf32>
    %461 = arith.addf %459, %460 : vector<16x32xf32>
    %c0_141 = arith.constant 0 : index
    %c0_142 = arith.constant 0 : index
    %462 = vector.load %arg8[%c0_141, %c0_142] : memref<32x56xbf16, #tpu.memory_space<vmem>>, vector<32x56xbf16>
    %463 = arith.truncf %461 : vector<16x32xf32> to vector<16x32xbf16>
    %cst_143 = arith.constant dense<0.000000e+00> : vector<16x56xf32>
    %464 = tpu.matmul %463, %462, %cst_143 {dimension_numbers = #tpu.dot_dimension_numbers<[1], [0], [0], [1], [0, 0, 1, 1], [], []>} : vector<16x32xbf16>, vector<32x56xbf16>, vector<16x56xf32> -> vector<16x56xf32>
    %465 = vector.extract_strided_slice %464 {offsets = [0, 0], sizes = [16, 32], strides = [1, 1]} : vector<16x56xf32> to vector<16x32xf32>
    %466 = vector.broadcast %36 : vector<1x32xf32> to vector<16x32xf32>
    %467 = arith.addf %465, %466 : vector<16x32xf32>
    %468 = arith.mulf %467, %467 : vector<16x32xf32>
    %469 = arith.mulf %467, %468 : vector<16x32xf32>
    %cst_144 = arith.constant 4.471500e-02 : f32
    %470 = vector.broadcast %cst_144 : f32 to vector<16x32xf32>
    %471 = arith.mulf %470, %469 : vector<16x32xf32>
    %472 = arith.addf %467, %471 : vector<16x32xf32>
    %cst_145 = arith.constant 0.797884583 : f32
    %473 = vector.broadcast %cst_145 : f32 to vector<16x32xf32>
    %474 = arith.mulf %473, %472 : vector<16x32xf32>
    %475 = math.tanh %474 : vector<16x32xf32>
    %cst_146 = arith.constant 1.000000e+00 : f32
    %476 = vector.broadcast %cst_146 : f32 to vector<16x32xf32>
    %477 = arith.addf %476, %475 : vector<16x32xf32>
    %cst_147 = arith.constant 5.000000e-01 : f32
    %478 = vector.broadcast %cst_147 : f32 to vector<16x32xf32>
    %479 = arith.mulf %478, %477 : vector<16x32xf32>
    %480 = arith.mulf %467, %479 : vector<16x32xf32>
    %481 = vector.extract_strided_slice %464 {offsets = [0, 32], sizes = [16, 24], strides = [1, 1]} : vector<16x56xf32> to vector<16x24xf32>
    %482 = vector.broadcast %38 : vector<1x24xf32> to vector<16x24xf32>
    %483 = arith.addf %481, %482 : vector<16x24xf32>
    %c2 = arith.constant 2 : index
    %c0_148 = arith.constant 0 : index
    %c0_149 = arith.constant 0 : index
    %484 = vector.load %arg5[%c2, %c0_148, %c0_149] : memref<4x32x32xbf16, #tpu.memory_space<vmem>>, vector<1x32x32xbf16>
    %485 = vector.shape_cast %484 : vector<1x32x32xbf16> to vector<32x32xbf16>
    %486 = arith.truncf %480 : vector<16x32xf32> to vector<16x32xbf16>
    %cst_150 = arith.constant dense<0.000000e+00> : vector<16x32xf32>
    %487 = tpu.matmul %486, %485, %cst_150 {dimension_numbers = #tpu.dot_dimension_numbers<[1], [0], [0], [1], [0, 0, 1, 1], [], []>} : vector<16x32xbf16>, vector<32x32xbf16>, vector<16x32xf32> -> vector<16x32xf32>
    %488 = vector.broadcast %37 : vector<1x32xf32> to vector<16x32xf32>
    %489 = arith.addf %487, %488 : vector<16x32xf32>
    %490 = arith.mulf %489, %489 : vector<16x32xf32>
    %491 = arith.mulf %489, %490 : vector<16x32xf32>
    %cst_151 = arith.constant 4.471500e-02 : f32
    %492 = vector.broadcast %cst_151 : f32 to vector<16x32xf32>
    %493 = arith.mulf %492, %491 : vector<16x32xf32>
    %494 = arith.addf %489, %493 : vector<16x32xf32>
    %cst_152 = arith.constant 0.797884583 : f32
    %495 = vector.broadcast %cst_152 : f32 to vector<16x32xf32>
    %496 = arith.mulf %495, %494 : vector<16x32xf32>
    %497 = math.tanh %496 : vector<16x32xf32>
    %cst_153 = arith.constant 1.000000e+00 : f32
    %498 = vector.broadcast %cst_153 : f32 to vector<16x32xf32>
    %499 = arith.addf %498, %497 : vector<16x32xf32>
    %cst_154 = arith.constant 5.000000e-01 : f32
    %500 = vector.broadcast %cst_154 : f32 to vector<16x32xf32>
    %501 = arith.mulf %500, %499 : vector<16x32xf32>
    %502 = arith.mulf %489, %501 : vector<16x32xf32>
    %c3 = arith.constant 3 : index
    %c0_155 = arith.constant 0 : index
    %c0_156 = arith.constant 0 : index
    %503 = vector.load %arg5[%c3, %c0_155, %c0_156] : memref<4x32x32xbf16, #tpu.memory_space<vmem>>, vector<1x32x32xbf16>
    %504 = vector.shape_cast %503 : vector<1x32x32xbf16> to vector<32x32xbf16>
    %505 = arith.truncf %502 : vector<16x32xf32> to vector<16x32xbf16>
    %cst_157 = arith.constant dense<0.000000e+00> : vector<16x32xf32>
    %506 = tpu.matmul %505, %504, %cst_157 {dimension_numbers = #tpu.dot_dimension_numbers<[1], [0], [0], [1], [0, 0, 1, 1], [], []>} : vector<16x32xbf16>, vector<32x32xbf16>, vector<16x32xf32> -> vector<16x32xf32>
    %507 = vector.extract_strided_slice %506 {offsets = [0, 0], sizes = [16, 4], strides = [1, 1]} : vector<16x32xf32> to vector<16x4xf32>
    %508 = arith.addf %507, %39 : vector<16x4xf32>
    %509 = arith.negf %508 : vector<16x4xf32>
    %510 = math.exp %509 : vector<16x4xf32>
    %cst_158 = arith.constant 1.000000e+00 : f32
    %511 = vector.broadcast %cst_158 : f32 to vector<16x4xf32>
    %512 = arith.addf %511, %510 : vector<16x4xf32>
    %513 = arith.divf %511, %512 : vector<16x4xf32>
    %514 = vector.extract_strided_slice %513 {offsets = [0, 0], sizes = [16, 2], strides = [1, 1]} : vector<16x4xf32> to vector<16x2xf32>
    %515 = vector.extract_strided_slice %513 {offsets = [0, 2], sizes = [16, 2], strides = [1, 1]} : vector<16x4xf32> to vector<16x2xf32>
    %cst_159 = arith.constant 5.000000e-01 : f32
    %516 = vector.broadcast %cst_159 : f32 to vector<16x2xf32>
    %517 = arith.mulf %516, %515 : vector<16x2xf32>
    %518 = arith.subf %514, %517 : vector<16x2xf32>
    %519 = arith.addf %514, %517 : vector<16x2xf32>
    %520 = tpu.concatenate %518, %519 in 1 : vector<16x2xf32>, vector<16x2xf32> -> vector<16x4xf32>
    %521 = arith.mulf %483, %483 : vector<16x24xf32>
    %cst_160 = arith.constant dense<0.000000e+00> : vector<16xf32>
    %522 = vector.multi_reduction <add>, %521, %cst_160 [1] : vector<16x24xf32> to vector<16xf32>
    %523 = vector.shape_cast %522 : vector<16xf32> to vector<16x1xf32>
    %524 = math.sqrt %523 : vector<16x1xf32>
    %cst_161 = arith.constant 9.99999997E-7 : f32
    %525 = vector.broadcast %cst_161 : f32 to vector<16x1xf32>
    %526 = arith.addf %524, %525 : vector<16x1xf32>
    %527 = tpu.reciprocal %526 {approx = true} : vector<16x1xf32> -> vector<16x1xf32>
    %528 = vector.broadcast %527 : vector<16x1xf32> to vector<16x24xf32>
    %529 = arith.mulf %483, %528 : vector<16x24xf32>
    %c0_162 = arith.constant 0 : index
    %c0_163 = arith.constant 0 : index
    %c0_164 = arith.constant 0 : index
    %530 = vector.load %arg2[%c0_162, %c0_163, %c0_164] : memref<2x5x24xf32, #tpu.memory_space<vmem>>, vector<1x5x24xf32>
    %531 = vector.shape_cast %530 : vector<1x5x24xf32> to vector<5x24xf32>
    %532 = arith.mulf %531, %531 : vector<5x24xf32>
    %cst_165 = arith.constant dense<0.000000e+00> : vector<5xf32>
    %533 = vector.multi_reduction <add>, %532, %cst_165 [1] : vector<5x24xf32> to vector<5xf32>
    %534 = vector.shape_cast %533 : vector<5xf32> to vector<5x1xf32>
    %535 = math.rsqrt %534 : vector<5x1xf32>
    %536 = vector.broadcast %535 : vector<5x1xf32> to vector<5x24xf32>
    %537 = arith.mulf %531, %536 : vector<5x24xf32>
    %cst_166 = arith.constant 9.99999997E-7 : f32
    %538 = vector.broadcast %cst_166 : f32 to vector<5x24xf32>
    %539 = arith.addf %537, %538 : vector<5x24xf32>
    %cst_167 = arith.constant dense<0.000000e+00> : vector<16x5xf32>
    %540 = tpu.matmul %529, %539, %cst_167 {dimension_numbers = #tpu.dot_dimension_numbers<[1], [1], [0], [0], [0, 0, 1, 0], [], []>} : vector<16x24xf32>, vector<5x24xf32>, vector<16x5xf32> -> vector<16x5xf32>
    %cst_168 = arith.constant 0.000000e+00 : f32
    %541 = vector.broadcast %cst_168 : f32 to vector<16x119xf32>
    %542 = tpu.concatenate %520, %540, %541 in 1 : vector<16x4xf32>, vector<16x5xf32>, vector<16x119xf32> -> vector<16x128xf32>
    %c0_169 = arith.constant 0 : index
    %c0_170 = arith.constant 0 : index
    %c0_171 = arith.constant 0 : index
    %543 = vector.load %arg10[%c0_169, %c0_170, %c0_171] : memref<2x16x128xf32, #tpu.memory_space<vmem>>, vector<1x16x128xf32>
    %544 = vector.shape_cast %543 : vector<1x16x128xf32> to vector<16x128xf32>
    %545 = vector.shape_cast %542 : vector<16x128xf32> to vector<1x16x128xf32>
    tpu.vector_store %arg10[%c0_169, %c0_170, %c0_171], %545 {strides = array<i32>} : memref<2x16x128xf32, #tpu.memory_space<vmem>>, vector<1x16x128xf32>,
    %c1_172 = arith.constant 1 : index
    %c0_173 = arith.constant 0 : index
    %c0_174 = arith.constant 0 : index
    %546 = vector.load %arg1[%c1_172, %c0_173, %c0_174] : memref<2x17x192xf32, #tpu.memory_space<vmem>>, vector<1x17x192xf32>
    %547 = vector.shape_cast %546 : vector<1x17x192xf32> to vector<17x192xf32>
    %c0_175 = arith.constant 0 : index
    %c0_176 = arith.constant 0 : index
    %548 = vector.load %arg3[%c0_175, %c0_176] : memref<192x32xbf16, #tpu.memory_space<vmem>>, vector<192x32xbf16>
    %549 = arith.truncf %547 : vector<17x192xf32> to vector<17x192xbf16>
    %cst_177 = arith.constant dense<0.000000e+00> : vector<17x32xf32>
    %550 = tpu.matmul %549, %548, %cst_177 {dimension_numbers = #tpu.dot_dimension_numbers<[1], [0], [0], [1], [0, 0, 1, 1], [], []>} : vector<17x192xbf16>, vector<192x32xbf16>, vector<17x32xf32> -> vector<17x32xf32>
    %551 = arith.addf %550, %29 : vector<17x32xf32>
    %cst_178 = arith.constant dense<0.000000e+00> : vector<17xf32>
    %552 = vector.multi_reduction <add>, %551, %cst_178 [1] : vector<17x32xf32> to vector<17xf32>
    %553 = vector.shape_cast %552 : vector<17xf32> to vector<17x1xf32>
    %cst_179 = arith.constant 3.200000e+01 : f32
    %554 = vector.broadcast %cst_179 : f32 to vector<17x1xf32>
    %555 = arith.divf %553, %554 : vector<17x1xf32>
    %556 = arith.mulf %551, %551 : vector<17x32xf32>
    %cst_180 = arith.constant dense<0.000000e+00> : vector<17xf32>
    %557 = vector.multi_reduction <add>, %556, %cst_180 [1] : vector<17x32xf32> to vector<17xf32>
    %558 = vector.shape_cast %557 : vector<17xf32> to vector<17x1xf32>
    %cst_181 = arith.constant 3.200000e+01 : f32
    %559 = vector.broadcast %cst_181 : f32 to vector<17x1xf32>
    %560 = arith.divf %558, %559 : vector<17x1xf32>
    %561 = arith.mulf %555, %555 : vector<17x1xf32>
    %562 = arith.subf %560, %561 : vector<17x1xf32>
    %563 = vector.broadcast %555 : vector<17x1xf32> to vector<17x32xf32>
    %564 = arith.subf %551, %563 : vector<17x32xf32>
    %cst_182 = arith.constant 9.99999974E-6 : f32
    %565 = vector.broadcast %cst_182 : f32 to vector<17x1xf32>
    %566 = arith.addf %562, %565 : vector<17x1xf32>
    %567 = math.rsqrt %566 : vector<17x1xf32>
    %568 = vector.broadcast %567 : vector<17x1xf32> to vector<17x32xf32>
    %569 = arith.mulf %564, %568 : vector<17x32xf32>
    %570 = vector.broadcast %30 : vector<1x32xf32> to vector<17x32xf32>
    %571 = arith.mulf %569, %570 : vector<17x32xf32>
    %572 = vector.broadcast %31 : vector<1x32xf32> to vector<17x32xf32>
    %573 = arith.addf %571, %572 : vector<17x32xf32>
    %c40_183 = arith.constant 40 : index
    %c0_184 = arith.constant 0 : index
    %574 = vector.load %arg9[%c40_183, %c0_184] : memref<72x128xf32, #tpu.memory_space<vmem>>, vector<1x32xf32>
    %c41_185 = arith.constant 41 : index
    %c0_186 = arith.constant 0 : index
    %575 = vector.load %arg9[%c41_185, %c0_186] : memref<72x128xf32, #tpu.memory_space<vmem>>, vector<1x32xf32>
    %cst_187 = arith.constant dense<0.000000e+00> : vector<17xf32>
    %576 = vector.multi_reduction <add>, %573, %cst_187 [1] : vector<17x32xf32> to vector<17xf32>
    %577 = vector.shape_cast %576 : vector<17xf32> to vector<17x1xf32>
    %cst_188 = arith.constant 3.200000e+01 : f32
    %578 = vector.broadcast %cst_188 : f32 to vector<17x1xf32>
    %579 = arith.divf %577, %578 : vector<17x1xf32>
    %580 = arith.mulf %573, %573 : vector<17x32xf32>
    %cst_189 = arith.constant dense<0.000000e+00> : vector<17xf32>
    %581 = vector.multi_reduction <add>, %580, %cst_189 [1] : vector<17x32xf32> to vector<17xf32>
    %582 = vector.shape_cast %581 : vector<17xf32> to vector<17x1xf32>
    %cst_190 = arith.constant 3.200000e+01 : f32
    %583 = vector.broadcast %cst_190 : f32 to vector<17x1xf32>
    %584 = arith.divf %582, %583 : vector<17x1xf32>
    %585 = arith.mulf %579, %579 : vector<17x1xf32>
    %586 = arith.subf %584, %585 : vector<17x1xf32>
    %587 = vector.broadcast %579 : vector<17x1xf32> to vector<17x32xf32>
    %588 = arith.subf %573, %587 : vector<17x32xf32>
    %cst_191 = arith.constant 9.99999974E-6 : f32
    %589 = vector.broadcast %cst_191 : f32 to vector<17x1xf32>
    %590 = arith.addf %586, %589 : vector<17x1xf32>
    %591 = math.rsqrt %590 : vector<17x1xf32>
    %592 = vector.broadcast %591 : vector<17x1xf32> to vector<17x32xf32>
    %593 = arith.mulf %588, %592 : vector<17x32xf32>
    %594 = vector.broadcast %574 : vector<1x32xf32> to vector<17x32xf32>
    %595 = arith.mulf %593, %594 : vector<17x32xf32>
    %596 = vector.broadcast %575 : vector<1x32xf32> to vector<17x32xf32>
    %597 = arith.addf %595, %596 : vector<17x32xf32>
    %c0_192 = arith.constant 0 : index
    %c0_193 = arith.constant 0 : index
    %c0_194 = arith.constant 0 : index
    %598 = vector.load %arg4[%c0_192, %c0_193, %c0_194] : memref<2x32x96xbf16, #tpu.memory_space<vmem>>, vector<1x32x96xbf16>
    %599 = vector.shape_cast %598 : vector<1x32x96xbf16> to vector<32x96xbf16>
    %600 = arith.truncf %597 : vector<17x32xf32> to vector<17x32xbf16>
    %cst_195 = arith.constant dense<0.000000e+00> : vector<17x96xf32>
    %601 = tpu.matmul %600, %599, %cst_195 {dimension_numbers = #tpu.dot_dimension_numbers<[1], [0], [0], [1], [0, 0, 1, 1], [], []>} : vector<17x32xbf16>, vector<32x96xbf16>, vector<17x96xf32> -> vector<17x96xf32>
    %c46_196 = arith.constant 46 : index
    %c0_197 = arith.constant 0 : index
    %602 = vector.load %arg9[%c46_196, %c0_197] : memref<72x128xf32, #tpu.memory_space<vmem>>, vector<1x96xf32>
    %603 = vector.broadcast %602 : vector<1x96xf32> to vector<17x96xf32>
    %604 = arith.addf %601, %603 : vector<17x96xf32>
    %605 = vector.extract_strided_slice %604 {offsets = [0, 0], sizes = [17, 32], strides = [1, 1]} : vector<17x96xf32> to vector<17x32xf32>
    %cst_198 = arith.constant 0.353553385 : f32
    %606 = vector.broadcast %cst_198 : f32 to vector<17x32xf32>
    %607 = arith.mulf %605, %606 : vector<17x32xf32>
    %608 = vector.extract_strided_slice %604 {offsets = [0, 32], sizes = [17, 32], strides = [1, 1]} : vector<17x96xf32> to vector<17x32xf32>
    %609 = arith.truncf %608 : vector<17x32xf32> to vector<17x32xbf16>
    %610 = vector.extract_strided_slice %604 {offsets = [0, 64], sizes = [17, 32], strides = [1, 1]} : vector<17x96xf32> to vector<17x32xf32>
    %cst_199 = arith.constant 0.000000e+00 : f32
    %611 = vector.broadcast %cst_199 : f32 to vector<17x32xf32>
    %612 = vector.broadcast %7 : vector<1x32xf32> to vector<17x32xf32>
    %613 = arith.mulf %607, %612 : vector<17x32xf32>
    %614 = arith.truncf %613 : vector<17x32xf32> to vector<17x32xbf16>
    %cst_200 = arith.constant dense<0.000000e+00> : vector<17x17xf32>
    %615 = tpu.matmul %614, %609, %cst_200 {dimension_numbers = #tpu.dot_dimension_numbers<[1], [1], [0], [0], [0, 0, 1, 0], [], []>} : vector<17x32xbf16>, vector<17x32xbf16>, vector<17x17xf32> -> vector<17x17xf32>
    %cst_201 = arith.constant dense<0xFF800000> : vector<17xf32>
    %616 = vector.multi_reduction <maximumf>, %615, %cst_201 [1] : vector<17x17xf32> to vector<17xf32>
    %617 = vector.shape_cast %616 : vector<17xf32> to vector<17x1xf32>
    %618 = vector.broadcast %617 : vector<17x1xf32> to vector<17x17xf32>
    %619 = arith.subf %615, %618 : vector<17x17xf32>
    %620 = math.exp %619 : vector<17x17xf32>
    %cst_202 = arith.constant dense<0.000000e+00> : vector<17xf32>
    %621 = vector.multi_reduction <add>, %620, %cst_202 [1] : vector<17x17xf32> to vector<17xf32>
    %622 = vector.shape_cast %621 : vector<17xf32> to vector<17x1xf32>
    %623 = tpu.reciprocal %622 {approx = true} : vector<17x1xf32> -> vector<17x1xf32>
    %624 = vector.broadcast %623 : vector<17x1xf32> to vector<17x17xf32>
    %625 = arith.mulf %620, %624 : vector<17x17xf32>
    %626 = vector.broadcast %7 : vector<1x32xf32> to vector<17x32xf32>
    %627 = arith.mulf %610, %626 : vector<17x32xf32>
    %628 = arith.truncf %627 : vector<17x32xf32> to vector<17x32xbf16>
    %629 = arith.truncf %625 : vector<17x17xf32> to vector<17x17xbf16>
    %cst_203 = arith.constant dense<0.000000e+00> : vector<17x32xf32>
    %630 = tpu.matmul %629, %628, %cst_203 {dimension_numbers = #tpu.dot_dimension_numbers<[1], [0], [0], [1], [0, 0, 1, 1], [], []>} : vector<17x17xbf16>, vector<17x32xbf16>, vector<17x32xf32> -> vector<17x32xf32>
    %631 = arith.addf %611, %630 : vector<17x32xf32>
    %632 = vector.broadcast %14 : vector<1x32xf32> to vector<17x32xf32>
    %633 = arith.mulf %607, %632 : vector<17x32xf32>
    %634 = arith.truncf %633 : vector<17x32xf32> to vector<17x32xbf16>
    %cst_204 = arith.constant dense<0.000000e+00> : vector<17x17xf32>
    %635 = tpu.matmul %634, %609, %cst_204 {dimension_numbers = #tpu.dot_dimension_numbers<[1], [1], [0], [0], [0, 0, 1, 0], [], []>} : vector<17x32xbf16>, vector<17x32xbf16>, vector<17x17xf32> -> vector<17x17xf32>
    %cst_205 = arith.constant dense<0xFF800000> : vector<17xf32>
    %636 = vector.multi_reduction <maximumf>, %635, %cst_205 [1] : vector<17x17xf32> to vector<17xf32>
    %637 = vector.shape_cast %636 : vector<17xf32> to vector<17x1xf32>
    %638 = vector.broadcast %637 : vector<17x1xf32> to vector<17x17xf32>
    %639 = arith.subf %635, %638 : vector<17x17xf32>
    %640 = math.exp %639 : vector<17x17xf32>
    %cst_206 = arith.constant dense<0.000000e+00> : vector<17xf32>
    %641 = vector.multi_reduction <add>, %640, %cst_206 [1] : vector<17x17xf32> to vector<17xf32>
    %642 = vector.shape_cast %641 : vector<17xf32> to vector<17x1xf32>
    %643 = tpu.reciprocal %642 {approx = true} : vector<17x1xf32> -> vector<17x1xf32>
    %644 = vector.broadcast %643 : vector<17x1xf32> to vector<17x17xf32>
    %645 = arith.mulf %640, %644 : vector<17x17xf32>
    %646 = vector.broadcast %14 : vector<1x32xf32> to vector<17x32xf32>
    %647 = arith.mulf %610, %646 : vector<17x32xf32>
    %648 = arith.truncf %647 : vector<17x32xf32> to vector<17x32xbf16>
    %649 = arith.truncf %645 : vector<17x17xf32> to vector<17x17xbf16>
    %cst_207 = arith.constant dense<0.000000e+00> : vector<17x32xf32>
    %650 = tpu.matmul %649, %648, %cst_207 {dimension_numbers = #tpu.dot_dimension_numbers<[1], [0], [0], [1], [0, 0, 1, 1], [], []>} : vector<17x17xbf16>, vector<17x32xbf16>, vector<17x32xf32> -> vector<17x32xf32>
    %651 = arith.addf %631, %650 : vector<17x32xf32>
    %652 = vector.broadcast %21 : vector<1x32xf32> to vector<17x32xf32>
    %653 = arith.mulf %607, %652 : vector<17x32xf32>
    %654 = arith.truncf %653 : vector<17x32xf32> to vector<17x32xbf16>
    %cst_208 = arith.constant dense<0.000000e+00> : vector<17x17xf32>
    %655 = tpu.matmul %654, %609, %cst_208 {dimension_numbers = #tpu.dot_dimension_numbers<[1], [1], [0], [0], [0, 0, 1, 0], [], []>} : vector<17x32xbf16>, vector<17x32xbf16>, vector<17x17xf32> -> vector<17x17xf32>
    %cst_209 = arith.constant dense<0xFF800000> : vector<17xf32>
    %656 = vector.multi_reduction <maximumf>, %655, %cst_209 [1] : vector<17x17xf32> to vector<17xf32>
    %657 = vector.shape_cast %656 : vector<17xf32> to vector<17x1xf32>
    %658 = vector.broadcast %657 : vector<17x1xf32> to vector<17x17xf32>
    %659 = arith.subf %655, %658 : vector<17x17xf32>
    %660 = math.exp %659 : vector<17x17xf32>
    %cst_210 = arith.constant dense<0.000000e+00> : vector<17xf32>
    %661 = vector.multi_reduction <add>, %660, %cst_210 [1] : vector<17x17xf32> to vector<17xf32>
    %662 = vector.shape_cast %661 : vector<17xf32> to vector<17x1xf32>
    %663 = tpu.reciprocal %662 {approx = true} : vector<17x1xf32> -> vector<17x1xf32>
    %664 = vector.broadcast %663 : vector<17x1xf32> to vector<17x17xf32>
    %665 = arith.mulf %660, %664 : vector<17x17xf32>
    %666 = vector.broadcast %21 : vector<1x32xf32> to vector<17x32xf32>
    %667 = arith.mulf %610, %666 : vector<17x32xf32>
    %668 = arith.truncf %667 : vector<17x32xf32> to vector<17x32xbf16>
    %669 = arith.truncf %665 : vector<17x17xf32> to vector<17x17xbf16>
    %cst_211 = arith.constant dense<0.000000e+00> : vector<17x32xf32>
    %670 = tpu.matmul %669, %668, %cst_211 {dimension_numbers = #tpu.dot_dimension_numbers<[1], [0], [0], [1], [0, 0, 1, 1], [], []>} : vector<17x17xbf16>, vector<17x32xbf16>, vector<17x32xf32> -> vector<17x32xf32>
    %671 = arith.addf %651, %670 : vector<17x32xf32>
    %672 = vector.broadcast %28 : vector<1x32xf32> to vector<17x32xf32>
    %673 = arith.mulf %607, %672 : vector<17x32xf32>
    %674 = arith.truncf %673 : vector<17x32xf32> to vector<17x32xbf16>
    %cst_212 = arith.constant dense<0.000000e+00> : vector<17x17xf32>
    %675 = tpu.matmul %674, %609, %cst_212 {dimension_numbers = #tpu.dot_dimension_numbers<[1], [1], [0], [0], [0, 0, 1, 0], [], []>} : vector<17x32xbf16>, vector<17x32xbf16>, vector<17x17xf32> -> vector<17x17xf32>
    %cst_213 = arith.constant dense<0xFF800000> : vector<17xf32>
    %676 = vector.multi_reduction <maximumf>, %675, %cst_213 [1] : vector<17x17xf32> to vector<17xf32>
    %677 = vector.shape_cast %676 : vector<17xf32> to vector<17x1xf32>
    %678 = vector.broadcast %677 : vector<17x1xf32> to vector<17x17xf32>
    %679 = arith.subf %675, %678 : vector<17x17xf32>
    %680 = math.exp %679 : vector<17x17xf32>
    %cst_214 = arith.constant dense<0.000000e+00> : vector<17xf32>
    %681 = vector.multi_reduction <add>, %680, %cst_214 [1] : vector<17x17xf32> to vector<17xf32>
    %682 = vector.shape_cast %681 : vector<17xf32> to vector<17x1xf32>
    %683 = tpu.reciprocal %682 {approx = true} : vector<17x1xf32> -> vector<17x1xf32>
    %684 = vector.broadcast %683 : vector<17x1xf32> to vector<17x17xf32>
    %685 = arith.mulf %680, %684 : vector<17x17xf32>
    %686 = vector.broadcast %28 : vector<1x32xf32> to vector<17x32xf32>
    %687 = arith.mulf %610, %686 : vector<17x32xf32>
    %688 = arith.truncf %687 : vector<17x32xf32> to vector<17x32xbf16>
    %689 = arith.truncf %685 : vector<17x17xf32> to vector<17x17xbf16>
    %cst_215 = arith.constant dense<0.000000e+00> : vector<17x32xf32>
    %690 = tpu.matmul %689, %688, %cst_215 {dimension_numbers = #tpu.dot_dimension_numbers<[1], [0], [0], [1], [0, 0, 1, 1], [], []>} : vector<17x17xbf16>, vector<17x32xbf16>, vector<17x32xf32> -> vector<17x32xf32>
    %691 = arith.addf %671, %690 : vector<17x32xf32>
    %c0_216 = arith.constant 0 : index
    %c0_217 = arith.constant 0 : index
    %c0_218 = arith.constant 0 : index
    %692 = vector.load %arg5[%c0_216, %c0_217, %c0_218] : memref<4x32x32xbf16, #tpu.memory_space<vmem>>, vector<1x32x32xbf16>
    %693 = vector.shape_cast %692 : vector<1x32x32xbf16> to vector<32x32xbf16>
    %694 = arith.truncf %691 : vector<17x32xf32> to vector<17x32xbf16>
    %cst_219 = arith.constant dense<0.000000e+00> : vector<17x32xf32>
    %695 = tpu.matmul %694, %693, %cst_219 {dimension_numbers = #tpu.dot_dimension_numbers<[1], [0], [0], [1], [0, 0, 1, 1], [], []>} : vector<17x32xbf16>, vector<32x32xbf16>, vector<17x32xf32> -> vector<17x32xf32>
    %696 = arith.addf %573, %695 : vector<17x32xf32>
    %c42_220 = arith.constant 42 : index
    %c0_221 = arith.constant 0 : index
    %697 = vector.load %arg9[%c42_220, %c0_221] : memref<72x128xf32, #tpu.memory_space<vmem>>, vector<1x32xf32>
    %698 = vector.broadcast %697 : vector<1x32xf32> to vector<17x32xf32>
    %699 = arith.addf %696, %698 : vector<17x32xf32>
    %c43_222 = arith.constant 43 : index
    %c0_223 = arith.constant 0 : index
    %700 = vector.load %arg9[%c43_222, %c0_223] : memref<72x128xf32, #tpu.memory_space<vmem>>, vector<1x32xf32>
    %c44_224 = arith.constant 44 : index
    %c0_225 = arith.constant 0 : index
    %701 = vector.load %arg9[%c44_224, %c0_225] : memref<72x128xf32, #tpu.memory_space<vmem>>, vector<1x32xf32>
    %cst_226 = arith.constant dense<0.000000e+00> : vector<17xf32>
    %702 = vector.multi_reduction <add>, %699, %cst_226 [1] : vector<17x32xf32> to vector<17xf32>
    %703 = vector.shape_cast %702 : vector<17xf32> to vector<17x1xf32>
    %cst_227 = arith.constant 3.200000e+01 : f32
    %704 = vector.broadcast %cst_227 : f32 to vector<17x1xf32>
    %705 = arith.divf %703, %704 : vector<17x1xf32>
    %706 = arith.mulf %699, %699 : vector<17x32xf32>
    %cst_228 = arith.constant dense<0.000000e+00> : vector<17xf32>
    %707 = vector.multi_reduction <add>, %706, %cst_228 [1] : vector<17x32xf32> to vector<17xf32>
    %708 = vector.shape_cast %707 : vector<17xf32> to vector<17x1xf32>
    %cst_229 = arith.constant 3.200000e+01 : f32
    %709 = vector.broadcast %cst_229 : f32 to vector<17x1xf32>
    %710 = arith.divf %708, %709 : vector<17x1xf32>
    %711 = arith.mulf %705, %705 : vector<17x1xf32>
    %712 = arith.subf %710, %711 : vector<17x1xf32>
    %713 = vector.broadcast %705 : vector<17x1xf32> to vector<17x32xf32>
    %714 = arith.subf %699, %713 : vector<17x32xf32>
    %cst_230 = arith.constant 9.99999974E-6 : f32
    %715 = vector.broadcast %cst_230 : f32 to vector<17x1xf32>
    %716 = arith.addf %712, %715 : vector<17x1xf32>
    %717 = math.rsqrt %716 : vector<17x1xf32>
    %718 = vector.broadcast %717 : vector<17x1xf32> to vector<17x32xf32>
    %719 = arith.mulf %714, %718 : vector<17x32xf32>
    %720 = vector.broadcast %700 : vector<1x32xf32> to vector<17x32xf32>
    %721 = arith.mulf %719, %720 : vector<17x32xf32>
    %722 = vector.broadcast %701 : vector<1x32xf32> to vector<17x32xf32>
    %723 = arith.addf %721, %722 : vector<17x32xf32>
    %c0_231 = arith.constant 0 : index
    %c0_232 = arith.constant 0 : index
    %c0_233 = arith.constant 0 : index
    %724 = vector.load %arg6[%c0_231, %c0_232, %c0_233] : memref<2x32x64xbf16, #tpu.memory_space<vmem>>, vector<1x32x64xbf16>
    %725 = vector.shape_cast %724 : vector<1x32x64xbf16> to vector<32x64xbf16>
    %726 = arith.truncf %723 : vector<17x32xf32> to vector<17x32xbf16>
    %cst_234 = arith.constant dense<0.000000e+00> : vector<17x64xf32>
    %727 = tpu.matmul %726, %725, %cst_234 {dimension_numbers = #tpu.dot_dimension_numbers<[1], [0], [0], [1], [0, 0, 1, 1], [], []>} : vector<17x32xbf16>, vector<32x64xbf16>, vector<17x64xf32> -> vector<17x64xf32>
    %c47_235 = arith.constant 47 : index
    %c0_236 = arith.constant 0 : index
    %728 = vector.load %arg9[%c47_235, %c0_236] : memref<72x128xf32, #tpu.memory_space<vmem>>, vector<1x64xf32>
    %729 = vector.broadcast %728 : vector<1x64xf32> to vector<17x64xf32>
    %730 = arith.addf %727, %729 : vector<17x64xf32>
    %cst_237 = arith.constant 1.702000e+00 : f32
    %731 = vector.broadcast %cst_237 : f32 to vector<17x64xf32>
    %732 = arith.mulf %731, %730 : vector<17x64xf32>
    %733 = arith.negf %732 : vector<17x64xf32>
    %734 = math.exp %733 : vector<17x64xf32>
    %cst_238 = arith.constant 1.000000e+00 : f32
    %735 = vector.broadcast %cst_238 : f32 to vector<17x64xf32>
    %736 = arith.addf %735, %734 : vector<17x64xf32>
    %737 = arith.divf %735, %736 : vector<17x64xf32>
    %738 = arith.mulf %730, %737 : vector<17x64xf32>
    %c0_239 = arith.constant 0 : index
    %c0_240 = arith.constant 0 : index
    %c0_241 = arith.constant 0 : index
    %739 = vector.load %arg7[%c0_239, %c0_240, %c0_241] : memref<2x64x32xbf16, #tpu.memory_space<vmem>>, vector<1x64x32xbf16>
    %740 = vector.shape_cast %739 : vector<1x64x32xbf16> to vector<64x32xbf16>
    %741 = arith.truncf %738 : vector<17x64xf32> to vector<17x64xbf16>
    %cst_242 = arith.constant dense<0.000000e+00> : vector<17x32xf32>
    %742 = tpu.matmul %741, %740, %cst_242 {dimension_numbers = #tpu.dot_dimension_numbers<[1], [0], [0], [1], [0, 0, 1, 1], [], []>} : vector<17x64xbf16>, vector<64x32xbf16>, vector<17x32xf32> -> vector<17x32xf32>
    %743 = arith.addf %699, %742 : vector<17x32xf32>
    %c45_243 = arith.constant 45 : index
    %c0_244 = arith.constant 0 : index
    %744 = vector.load %arg9[%c45_243, %c0_244] : memref<72x128xf32, #tpu.memory_space<vmem>>, vector<1x32xf32>
    %745 = vector.broadcast %744 : vector<1x32xf32> to vector<17x32xf32>
    %746 = arith.addf %743, %745 : vector<17x32xf32>
    %c48_245 = arith.constant 48 : index
    %c0_246 = arith.constant 0 : index
    %747 = vector.load %arg9[%c48_245, %c0_246] : memref<72x128xf32, #tpu.memory_space<vmem>>, vector<1x32xf32>
    %c49_247 = arith.constant 49 : index
    %c0_248 = arith.constant 0 : index
    %748 = vector.load %arg9[%c49_247, %c0_248] : memref<72x128xf32, #tpu.memory_space<vmem>>, vector<1x32xf32>
    %cst_249 = arith.constant dense<0.000000e+00> : vector<17xf32>
    %749 = vector.multi_reduction <add>, %746, %cst_249 [1] : vector<17x32xf32> to vector<17xf32>
    %750 = vector.shape_cast %749 : vector<17xf32> to vector<17x1xf32>
    %cst_250 = arith.constant 3.200000e+01 : f32
    %751 = vector.broadcast %cst_250 : f32 to vector<17x1xf32>
    %752 = arith.divf %750, %751 : vector<17x1xf32>
    %753 = arith.mulf %746, %746 : vector<17x32xf32>
    %cst_251 = arith.constant dense<0.000000e+00> : vector<17xf32>
    %754 = vector.multi_reduction <add>, %753, %cst_251 [1] : vector<17x32xf32> to vector<17xf32>
    %755 = vector.shape_cast %754 : vector<17xf32> to vector<17x1xf32>
    %cst_252 = arith.constant 3.200000e+01 : f32
    %756 = vector.broadcast %cst_252 : f32 to vector<17x1xf32>
    %757 = arith.divf %755, %756 : vector<17x1xf32>
    %758 = arith.mulf %752, %752 : vector<17x1xf32>
    %759 = arith.subf %757, %758 : vector<17x1xf32>
    %760 = vector.broadcast %752 : vector<17x1xf32> to vector<17x32xf32>
    %761 = arith.subf %746, %760 : vector<17x32xf32>
    %cst_253 = arith.constant 9.99999974E-6 : f32
    %762 = vector.broadcast %cst_253 : f32 to vector<17x1xf32>
    %763 = arith.addf %759, %762 : vector<17x1xf32>
    %764 = math.rsqrt %763 : vector<17x1xf32>
    %765 = vector.broadcast %764 : vector<17x1xf32> to vector<17x32xf32>
    %766 = arith.mulf %761, %765 : vector<17x32xf32>
    %767 = vector.broadcast %747 : vector<1x32xf32> to vector<17x32xf32>
    %768 = arith.mulf %766, %767 : vector<17x32xf32>
    %769 = vector.broadcast %748 : vector<1x32xf32> to vector<17x32xf32>
    %770 = arith.addf %768, %769 : vector<17x32xf32>
    %c1_254 = arith.constant 1 : index
    %c0_255 = arith.constant 0 : index
    %c0_256 = arith.constant 0 : index
    %771 = vector.load %arg4[%c1_254, %c0_255, %c0_256] : memref<2x32x96xbf16, #tpu.memory_space<vmem>>, vector<1x32x96xbf16>
    %772 = vector.shape_cast %771 : vector<1x32x96xbf16> to vector<32x96xbf16>
    %773 = arith.truncf %770 : vector<17x32xf32> to vector<17x32xbf16>
    %cst_257 = arith.constant dense<0.000000e+00> : vector<17x96xf32>
    %774 = tpu.matmul %773, %772, %cst_257 {dimension_numbers = #tpu.dot_dimension_numbers<[1], [0], [0], [1], [0, 0, 1, 1], [], []>} : vector<17x32xbf16>, vector<32x96xbf16>, vector<17x96xf32> -> vector<17x96xf32>
    %c54_258 = arith.constant 54 : index
    %c0_259 = arith.constant 0 : index
    %775 = vector.load %arg9[%c54_258, %c0_259] : memref<72x128xf32, #tpu.memory_space<vmem>>, vector<1x96xf32>
    %776 = vector.broadcast %775 : vector<1x96xf32> to vector<17x96xf32>
    %777 = arith.addf %774, %776 : vector<17x96xf32>
    %778 = vector.extract_strided_slice %777 {offsets = [0, 0], sizes = [17, 32], strides = [1, 1]} : vector<17x96xf32> to vector<17x32xf32>
    %cst_260 = arith.constant 0.353553385 : f32
    %779 = vector.broadcast %cst_260 : f32 to vector<17x32xf32>
    %780 = arith.mulf %778, %779 : vector<17x32xf32>
    %781 = vector.extract_strided_slice %777 {offsets = [0, 32], sizes = [17, 32], strides = [1, 1]} : vector<17x96xf32> to vector<17x32xf32>
    %782 = arith.truncf %781 : vector<17x32xf32> to vector<17x32xbf16>
    %783 = vector.extract_strided_slice %777 {offsets = [0, 64], sizes = [17, 32], strides = [1, 1]} : vector<17x96xf32> to vector<17x32xf32>
    %cst_261 = arith.constant 0.000000e+00 : f32
    %784 = vector.broadcast %cst_261 : f32 to vector<17x32xf32>
    %785 = vector.broadcast %7 : vector<1x32xf32> to vector<17x32xf32>
    %786 = arith.mulf %780, %785 : vector<17x32xf32>
    %787 = arith.truncf %786 : vector<17x32xf32> to vector<17x32xbf16>
    %cst_262 = arith.constant dense<0.000000e+00> : vector<17x17xf32>
    %788 = tpu.matmul %787, %782, %cst_262 {dimension_numbers = #tpu.dot_dimension_numbers<[1], [1], [0], [0], [0, 0, 1, 0], [], []>} : vector<17x32xbf16>, vector<17x32xbf16>, vector<17x17xf32> -> vector<17x17xf32>
    %cst_263 = arith.constant dense<0xFF800000> : vector<17xf32>
    %789 = vector.multi_reduction <maximumf>, %788, %cst_263 [1] : vector<17x17xf32> to vector<17xf32>
    %790 = vector.shape_cast %789 : vector<17xf32> to vector<17x1xf32>
    %791 = vector.broadcast %790 : vector<17x1xf32> to vector<17x17xf32>
    %792 = arith.subf %788, %791 : vector<17x17xf32>
    %793 = math.exp %792 : vector<17x17xf32>
    %cst_264 = arith.constant dense<0.000000e+00> : vector<17xf32>
    %794 = vector.multi_reduction <add>, %793, %cst_264 [1] : vector<17x17xf32> to vector<17xf32>
    %795 = vector.shape_cast %794 : vector<17xf32> to vector<17x1xf32>
    %796 = tpu.reciprocal %795 {approx = true} : vector<17x1xf32> -> vector<17x1xf32>
    %797 = vector.broadcast %796 : vector<17x1xf32> to vector<17x17xf32>
    %798 = arith.mulf %793, %797 : vector<17x17xf32>
    %799 = vector.broadcast %7 : vector<1x32xf32> to vector<17x32xf32>
    %800 = arith.mulf %783, %799 : vector<17x32xf32>
    %801 = arith.truncf %800 : vector<17x32xf32> to vector<17x32xbf16>
    %802 = arith.truncf %798 : vector<17x17xf32> to vector<17x17xbf16>
    %cst_265 = arith.constant dense<0.000000e+00> : vector<17x32xf32>
    %803 = tpu.matmul %802, %801, %cst_265 {dimension_numbers = #tpu.dot_dimension_numbers<[1], [0], [0], [1], [0, 0, 1, 1], [], []>} : vector<17x17xbf16>, vector<17x32xbf16>, vector<17x32xf32> -> vector<17x32xf32>
    %804 = arith.addf %784, %803 : vector<17x32xf32>
    %805 = vector.broadcast %14 : vector<1x32xf32> to vector<17x32xf32>
    %806 = arith.mulf %780, %805 : vector<17x32xf32>
    %807 = arith.truncf %806 : vector<17x32xf32> to vector<17x32xbf16>
    %cst_266 = arith.constant dense<0.000000e+00> : vector<17x17xf32>
    %808 = tpu.matmul %807, %782, %cst_266 {dimension_numbers = #tpu.dot_dimension_numbers<[1], [1], [0], [0], [0, 0, 1, 0], [], []>} : vector<17x32xbf16>, vector<17x32xbf16>, vector<17x17xf32> -> vector<17x17xf32>
    %cst_267 = arith.constant dense<0xFF800000> : vector<17xf32>
    %809 = vector.multi_reduction <maximumf>, %808, %cst_267 [1] : vector<17x17xf32> to vector<17xf32>
    %810 = vector.shape_cast %809 : vector<17xf32> to vector<17x1xf32>
    %811 = vector.broadcast %810 : vector<17x1xf32> to vector<17x17xf32>
    %812 = arith.subf %808, %811 : vector<17x17xf32>
    %813 = math.exp %812 : vector<17x17xf32>
    %cst_268 = arith.constant dense<0.000000e+00> : vector<17xf32>
    %814 = vector.multi_reduction <add>, %813, %cst_268 [1] : vector<17x17xf32> to vector<17xf32>
    %815 = vector.shape_cast %814 : vector<17xf32> to vector<17x1xf32>
    %816 = tpu.reciprocal %815 {approx = true} : vector<17x1xf32> -> vector<17x1xf32>
    %817 = vector.broadcast %816 : vector<17x1xf32> to vector<17x17xf32>
    %818 = arith.mulf %813, %817 : vector<17x17xf32>
    %819 = vector.broadcast %14 : vector<1x32xf32> to vector<17x32xf32>
    %820 = arith.mulf %783, %819 : vector<17x32xf32>
    %821 = arith.truncf %820 : vector<17x32xf32> to vector<17x32xbf16>
    %822 = arith.truncf %818 : vector<17x17xf32> to vector<17x17xbf16>
    %cst_269 = arith.constant dense<0.000000e+00> : vector<17x32xf32>
    %823 = tpu.matmul %822, %821, %cst_269 {dimension_numbers = #tpu.dot_dimension_numbers<[1], [0], [0], [1], [0, 0, 1, 1], [], []>} : vector<17x17xbf16>, vector<17x32xbf16>, vector<17x32xf32> -> vector<17x32xf32>
    %824 = arith.addf %804, %823 : vector<17x32xf32>
    %825 = vector.broadcast %21 : vector<1x32xf32> to vector<17x32xf32>
    %826 = arith.mulf %780, %825 : vector<17x32xf32>
    %827 = arith.truncf %826 : vector<17x32xf32> to vector<17x32xbf16>
    %cst_270 = arith.constant dense<0.000000e+00> : vector<17x17xf32>
    %828 = tpu.matmul %827, %782, %cst_270 {dimension_numbers = #tpu.dot_dimension_numbers<[1], [1], [0], [0], [0, 0, 1, 0], [], []>} : vector<17x32xbf16>, vector<17x32xbf16>, vector<17x17xf32> -> vector<17x17xf32>
    %cst_271 = arith.constant dense<0xFF800000> : vector<17xf32>
    %829 = vector.multi_reduction <maximumf>, %828, %cst_271 [1] : vector<17x17xf32> to vector<17xf32>
    %830 = vector.shape_cast %829 : vector<17xf32> to vector<17x1xf32>
    %831 = vector.broadcast %830 : vector<17x1xf32> to vector<17x17xf32>
    %832 = arith.subf %828, %831 : vector<17x17xf32>
    %833 = math.exp %832 : vector<17x17xf32>
    %cst_272 = arith.constant dense<0.000000e+00> : vector<17xf32>
    %834 = vector.multi_reduction <add>, %833, %cst_272 [1] : vector<17x17xf32> to vector<17xf32>
    %835 = vector.shape_cast %834 : vector<17xf32> to vector<17x1xf32>
    %836 = tpu.reciprocal %835 {approx = true} : vector<17x1xf32> -> vector<17x1xf32>
    %837 = vector.broadcast %836 : vector<17x1xf32> to vector<17x17xf32>
    %838 = arith.mulf %833, %837 : vector<17x17xf32>
    %839 = vector.broadcast %21 : vector<1x32xf32> to vector<17x32xf32>
    %840 = arith.mulf %783, %839 : vector<17x32xf32>
    %841 = arith.truncf %840 : vector<17x32xf32> to vector<17x32xbf16>
    %842 = arith.truncf %838 : vector<17x17xf32> to vector<17x17xbf16>
    %cst_273 = arith.constant dense<0.000000e+00> : vector<17x32xf32>
    %843 = tpu.matmul %842, %841, %cst_273 {dimension_numbers = #tpu.dot_dimension_numbers<[1], [0], [0], [1], [0, 0, 1, 1], [], []>} : vector<17x17xbf16>, vector<17x32xbf16>, vector<17x32xf32> -> vector<17x32xf32>
    %844 = arith.addf %824, %843 : vector<17x32xf32>
    %845 = vector.broadcast %28 : vector<1x32xf32> to vector<17x32xf32>
    %846 = arith.mulf %780, %845 : vector<17x32xf32>
    %847 = arith.truncf %846 : vector<17x32xf32> to vector<17x32xbf16>
    %cst_274 = arith.constant dense<0.000000e+00> : vector<17x17xf32>
    %848 = tpu.matmul %847, %782, %cst_274 {dimension_numbers = #tpu.dot_dimension_numbers<[1], [1], [0], [0], [0, 0, 1, 0], [], []>} : vector<17x32xbf16>, vector<17x32xbf16>, vector<17x17xf32> -> vector<17x17xf32>
    %cst_275 = arith.constant dense<0xFF800000> : vector<17xf32>
    %849 = vector.multi_reduction <maximumf>, %848, %cst_275 [1] : vector<17x17xf32> to vector<17xf32>
    %850 = vector.shape_cast %849 : vector<17xf32> to vector<17x1xf32>
    %851 = vector.broadcast %850 : vector<17x1xf32> to vector<17x17xf32>
    %852 = arith.subf %848, %851 : vector<17x17xf32>
    %853 = math.exp %852 : vector<17x17xf32>
    %cst_276 = arith.constant dense<0.000000e+00> : vector<17xf32>
    %854 = vector.multi_reduction <add>, %853, %cst_276 [1] : vector<17x17xf32> to vector<17xf32>
    %855 = vector.shape_cast %854 : vector<17xf32> to vector<17x1xf32>
    %856 = tpu.reciprocal %855 {approx = true} : vector<17x1xf32> -> vector<17x1xf32>
    %857 = vector.broadcast %856 : vector<17x1xf32> to vector<17x17xf32>
    %858 = arith.mulf %853, %857 : vector<17x17xf32>
    %859 = vector.broadcast %28 : vector<1x32xf32> to vector<17x32xf32>
    %860 = arith.mulf %783, %859 : vector<17x32xf32>
    %861 = arith.truncf %860 : vector<17x32xf32> to vector<17x32xbf16>
    %862 = arith.truncf %858 : vector<17x17xf32> to vector<17x17xbf16>
    %cst_277 = arith.constant dense<0.000000e+00> : vector<17x32xf32>
    %863 = tpu.matmul %862, %861, %cst_277 {dimension_numbers = #tpu.dot_dimension_numbers<[1], [0], [0], [1], [0, 0, 1, 1], [], []>} : vector<17x17xbf16>, vector<17x32xbf16>, vector<17x32xf32> -> vector<17x32xf32>
    %864 = arith.addf %844, %863 : vector<17x32xf32>
    %c1_278 = arith.constant 1 : index
    %c0_279 = arith.constant 0 : index
    %c0_280 = arith.constant 0 : index
    %865 = vector.load %arg5[%c1_278, %c0_279, %c0_280] : memref<4x32x32xbf16, #tpu.memory_space<vmem>>, vector<1x32x32xbf16>
    %866 = vector.shape_cast %865 : vector<1x32x32xbf16> to vector<32x32xbf16>
    %867 = arith.truncf %864 : vector<17x32xf32> to vector<17x32xbf16>
    %cst_281 = arith.constant dense<0.000000e+00> : vector<17x32xf32>
    %868 = tpu.matmul %867, %866, %cst_281 {dimension_numbers = #tpu.dot_dimension_numbers<[1], [0], [0], [1], [0, 0, 1, 1], [], []>} : vector<17x32xbf16>, vector<32x32xbf16>, vector<17x32xf32> -> vector<17x32xf32>
    %869 = arith.addf %746, %868 : vector<17x32xf32>
    %c50_282 = arith.constant 50 : index
    %c0_283 = arith.constant 0 : index
    %870 = vector.load %arg9[%c50_282, %c0_283] : memref<72x128xf32, #tpu.memory_space<vmem>>, vector<1x32xf32>
    %871 = vector.broadcast %870 : vector<1x32xf32> to vector<17x32xf32>
    %872 = arith.addf %869, %871 : vector<17x32xf32>
    %c51_284 = arith.constant 51 : index
    %c0_285 = arith.constant 0 : index
    %873 = vector.load %arg9[%c51_284, %c0_285] : memref<72x128xf32, #tpu.memory_space<vmem>>, vector<1x32xf32>
    %c52_286 = arith.constant 52 : index
    %c0_287 = arith.constant 0 : index
    %874 = vector.load %arg9[%c52_286, %c0_287] : memref<72x128xf32, #tpu.memory_space<vmem>>, vector<1x32xf32>
    %cst_288 = arith.constant dense<0.000000e+00> : vector<17xf32>
    %875 = vector.multi_reduction <add>, %872, %cst_288 [1] : vector<17x32xf32> to vector<17xf32>
    %876 = vector.shape_cast %875 : vector<17xf32> to vector<17x1xf32>
    %cst_289 = arith.constant 3.200000e+01 : f32
    %877 = vector.broadcast %cst_289 : f32 to vector<17x1xf32>
    %878 = arith.divf %876, %877 : vector<17x1xf32>
    %879 = arith.mulf %872, %872 : vector<17x32xf32>
    %cst_290 = arith.constant dense<0.000000e+00> : vector<17xf32>
    %880 = vector.multi_reduction <add>, %879, %cst_290 [1] : vector<17x32xf32> to vector<17xf32>
    %881 = vector.shape_cast %880 : vector<17xf32> to vector<17x1xf32>
    %cst_291 = arith.constant 3.200000e+01 : f32
    %882 = vector.broadcast %cst_291 : f32 to vector<17x1xf32>
    %883 = arith.divf %881, %882 : vector<17x1xf32>
    %884 = arith.mulf %878, %878 : vector<17x1xf32>
    %885 = arith.subf %883, %884 : vector<17x1xf32>
    %886 = vector.broadcast %878 : vector<17x1xf32> to vector<17x32xf32>
    %887 = arith.subf %872, %886 : vector<17x32xf32>
    %cst_292 = arith.constant 9.99999974E-6 : f32
    %888 = vector.broadcast %cst_292 : f32 to vector<17x1xf32>
    %889 = arith.addf %885, %888 : vector<17x1xf32>
    %890 = math.rsqrt %889 : vector<17x1xf32>
    %891 = vector.broadcast %890 : vector<17x1xf32> to vector<17x32xf32>
    %892 = arith.mulf %887, %891 : vector<17x32xf32>
    %893 = vector.broadcast %873 : vector<1x32xf32> to vector<17x32xf32>
    %894 = arith.mulf %892, %893 : vector<17x32xf32>
    %895 = vector.broadcast %874 : vector<1x32xf32> to vector<17x32xf32>
    %896 = arith.addf %894, %895 : vector<17x32xf32>
    %c1_293 = arith.constant 1 : index
    %c0_294 = arith.constant 0 : index
    %c0_295 = arith.constant 0 : index
    %897 = vector.load %arg6[%c1_293, %c0_294, %c0_295] : memref<2x32x64xbf16, #tpu.memory_space<vmem>>, vector<1x32x64xbf16>
    %898 = vector.shape_cast %897 : vector<1x32x64xbf16> to vector<32x64xbf16>
    %899 = arith.truncf %896 : vector<17x32xf32> to vector<17x32xbf16>
    %cst_296 = arith.constant dense<0.000000e+00> : vector<17x64xf32>
    %900 = tpu.matmul %899, %898, %cst_296 {dimension_numbers = #tpu.dot_dimension_numbers<[1], [0], [0], [1], [0, 0, 1, 1], [], []>} : vector<17x32xbf16>, vector<32x64xbf16>, vector<17x64xf32> -> vector<17x64xf32>
    %c55_297 = arith.constant 55 : index
    %c0_298 = arith.constant 0 : index
    %901 = vector.load %arg9[%c55_297, %c0_298] : memref<72x128xf32, #tpu.memory_space<vmem>>, vector<1x64xf32>
    %902 = vector.broadcast %901 : vector<1x64xf32> to vector<17x64xf32>
    %903 = arith.addf %900, %902 : vector<17x64xf32>
    %cst_299 = arith.constant 1.702000e+00 : f32
    %904 = vector.broadcast %cst_299 : f32 to vector<17x64xf32>
    %905 = arith.mulf %904, %903 : vector<17x64xf32>
    %906 = arith.negf %905 : vector<17x64xf32>
    %907 = math.exp %906 : vector<17x64xf32>
    %cst_300 = arith.constant 1.000000e+00 : f32
    %908 = vector.broadcast %cst_300 : f32 to vector<17x64xf32>
    %909 = arith.addf %908, %907 : vector<17x64xf32>
    %910 = arith.divf %908, %909 : vector<17x64xf32>
    %911 = arith.mulf %903, %910 : vector<17x64xf32>
    %c1_301 = arith.constant 1 : index
    %c0_302 = arith.constant 0 : index
    %c0_303 = arith.constant 0 : index
    %912 = vector.load %arg7[%c1_301, %c0_302, %c0_303] : memref<2x64x32xbf16, #tpu.memory_space<vmem>>, vector<1x64x32xbf16>
    %913 = vector.shape_cast %912 : vector<1x64x32xbf16> to vector<64x32xbf16>
    %914 = arith.truncf %911 : vector<17x64xf32> to vector<17x64xbf16>
    %cst_304 = arith.constant dense<0.000000e+00> : vector<17x32xf32>
    %915 = tpu.matmul %914, %913, %cst_304 {dimension_numbers = #tpu.dot_dimension_numbers<[1], [0], [0], [1], [0, 0, 1, 1], [], []>} : vector<17x64xbf16>, vector<64x32xbf16>, vector<17x32xf32> -> vector<17x32xf32>
    %916 = arith.addf %872, %915 : vector<17x32xf32>
    %c53_305 = arith.constant 53 : index
    %c0_306 = arith.constant 0 : index
    %917 = vector.load %arg9[%c53_305, %c0_306] : memref<72x128xf32, #tpu.memory_space<vmem>>, vector<1x32xf32>
    %918 = vector.broadcast %917 : vector<1x32xf32> to vector<17x32xf32>
    %919 = arith.addf %916, %918 : vector<17x32xf32>
    %cst_307 = arith.constant dense<0.000000e+00> : vector<17xf32>
    %920 = vector.multi_reduction <add>, %919, %cst_307 [1] : vector<17x32xf32> to vector<17xf32>
    %921 = vector.shape_cast %920 : vector<17xf32> to vector<17x1xf32>
    %cst_308 = arith.constant 3.200000e+01 : f32
    %922 = vector.broadcast %cst_308 : f32 to vector<17x1xf32>
    %923 = arith.divf %921, %922 : vector<17x1xf32>
    %924 = arith.mulf %919, %919 : vector<17x32xf32>
    %cst_309 = arith.constant dense<0.000000e+00> : vector<17xf32>
    %925 = vector.multi_reduction <add>, %924, %cst_309 [1] : vector<17x32xf32> to vector<17xf32>
    %926 = vector.shape_cast %925 : vector<17xf32> to vector<17x1xf32>
    %cst_310 = arith.constant 3.200000e+01 : f32
    %927 = vector.broadcast %cst_310 : f32 to vector<17x1xf32>
    %928 = arith.divf %926, %927 : vector<17x1xf32>
    %929 = arith.mulf %923, %923 : vector<17x1xf32>
    %930 = arith.subf %928, %929 : vector<17x1xf32>
    %931 = vector.broadcast %923 : vector<17x1xf32> to vector<17x32xf32>
    %932 = arith.subf %919, %931 : vector<17x32xf32>
    %cst_311 = arith.constant 9.99999974E-6 : f32
    %933 = vector.broadcast %cst_311 : f32 to vector<17x1xf32>
    %934 = arith.addf %930, %933 : vector<17x1xf32>
    %935 = math.rsqrt %934 : vector<17x1xf32>
    %936 = vector.broadcast %935 : vector<17x1xf32> to vector<17x32xf32>
    %937 = arith.mulf %932, %936 : vector<17x32xf32>
    %938 = vector.broadcast %32 : vector<1x32xf32> to vector<17x32xf32>
    %939 = arith.mulf %937, %938 : vector<17x32xf32>
    %940 = vector.broadcast %33 : vector<1x32xf32> to vector<17x32xf32>
    %941 = arith.addf %939, %940 : vector<17x32xf32>
    %942 = vector.extract_strided_slice %941 {offsets = [1, 0], sizes = [16, 32], strides = [1, 1]} : vector<17x32xf32> to vector<16x32xf32>
    %943 = vector.extract_strided_slice %941 {offsets = [0, 0], sizes = [1, 32], strides = [1, 1]} : vector<17x32xf32> to vector<1x32xf32>
    %944 = vector.broadcast %943 : vector<1x32xf32> to vector<16x32xf32>
    %945 = arith.mulf %942, %944 : vector<16x32xf32>
    %cst_312 = arith.constant dense<0.000000e+00> : vector<16xf32>
    %946 = vector.multi_reduction <add>, %945, %cst_312 [1] : vector<16x32xf32> to vector<16xf32>
    %947 = vector.shape_cast %946 : vector<16xf32> to vector<16x1xf32>
    %cst_313 = arith.constant 3.200000e+01 : f32
    %948 = vector.broadcast %cst_313 : f32 to vector<16x1xf32>
    %949 = arith.divf %947, %948 : vector<16x1xf32>
    %950 = arith.mulf %945, %945 : vector<16x32xf32>
    %cst_314 = arith.constant dense<0.000000e+00> : vector<16xf32>
    %951 = vector.multi_reduction <add>, %950, %cst_314 [1] : vector<16x32xf32> to vector<16xf32>
    %952 = vector.shape_cast %951 : vector<16xf32> to vector<16x1xf32>
    %cst_315 = arith.constant 3.200000e+01 : f32
    %953 = vector.broadcast %cst_315 : f32 to vector<16x1xf32>
    %954 = arith.divf %952, %953 : vector<16x1xf32>
    %955 = arith.mulf %949, %949 : vector<16x1xf32>
    %956 = arith.subf %954, %955 : vector<16x1xf32>
    %957 = vector.broadcast %949 : vector<16x1xf32> to vector<16x32xf32>
    %958 = arith.subf %945, %957 : vector<16x32xf32>
    %cst_316 = arith.constant 9.99999974E-6 : f32
    %959 = vector.broadcast %cst_316 : f32 to vector<16x1xf32>
    %960 = arith.addf %956, %959 : vector<16x1xf32>
    %961 = math.rsqrt %960 : vector<16x1xf32>
    %962 = vector.broadcast %961 : vector<16x1xf32> to vector<16x32xf32>
    %963 = arith.mulf %958, %962 : vector<16x32xf32>
    %964 = vector.broadcast %34 : vector<1x32xf32> to vector<16x32xf32>
    %965 = arith.mulf %963, %964 : vector<16x32xf32>
    %966 = vector.broadcast %35 : vector<1x32xf32> to vector<16x32xf32>
    %967 = arith.addf %965, %966 : vector<16x32xf32>
    %c0_317 = arith.constant 0 : index
    %c0_318 = arith.constant 0 : index
    %968 = vector.load %arg8[%c0_317, %c0_318] : memref<32x56xbf16, #tpu.memory_space<vmem>>, vector<32x56xbf16>
    %969 = arith.truncf %967 : vector<16x32xf32> to vector<16x32xbf16>
    %cst_319 = arith.constant dense<0.000000e+00> : vector<16x56xf32>
    %970 = tpu.matmul %969, %968, %cst_319 {dimension_numbers = #tpu.dot_dimension_numbers<[1], [0], [0], [1], [0, 0, 1, 1], [], []>} : vector<16x32xbf16>, vector<32x56xbf16>, vector<16x56xf32> -> vector<16x56xf32>
    %971 = vector.extract_strided_slice %970 {offsets = [0, 0], sizes = [16, 32], strides = [1, 1]} : vector<16x56xf32> to vector<16x32xf32>
    %972 = vector.broadcast %36 : vector<1x32xf32> to vector<16x32xf32>
    %973 = arith.addf %971, %972 : vector<16x32xf32>
    %974 = arith.mulf %973, %973 : vector<16x32xf32>
    %975 = arith.mulf %973, %974 : vector<16x32xf32>
    %cst_320 = arith.constant 4.471500e-02 : f32
    %976 = vector.broadcast %cst_320 : f32 to vector<16x32xf32>
    %977 = arith.mulf %976, %975 : vector<16x32xf32>
    %978 = arith.addf %973, %977 : vector<16x32xf32>
    %cst_321 = arith.constant 0.797884583 : f32
    %979 = vector.broadcast %cst_321 : f32 to vector<16x32xf32>
    %980 = arith.mulf %979, %978 : vector<16x32xf32>
    %981 = math.tanh %980 : vector<16x32xf32>
    %cst_322 = arith.constant 1.000000e+00 : f32
    %982 = vector.broadcast %cst_322 : f32 to vector<16x32xf32>
    %983 = arith.addf %982, %981 : vector<16x32xf32>
    %cst_323 = arith.constant 5.000000e-01 : f32
    %984 = vector.broadcast %cst_323 : f32 to vector<16x32xf32>
    %985 = arith.mulf %984, %983 : vector<16x32xf32>
    %986 = arith.mulf %973, %985 : vector<16x32xf32>
    %987 = vector.extract_strided_slice %970 {offsets = [0, 32], sizes = [16, 24], strides = [1, 1]} : vector<16x56xf32> to vector<16x24xf32>
    %988 = vector.broadcast %38 : vector<1x24xf32> to vector<16x24xf32>
    %989 = arith.addf %987, %988 : vector<16x24xf32>
    %c2_324 = arith.constant 2 : index
    %c0_325 = arith.constant 0 : index
    %c0_326 = arith.constant 0 : index
    %990 = vector.load %arg5[%c2_324, %c0_325, %c0_326] : memref<4x32x32xbf16, #tpu.memory_space<vmem>>, vector<1x32x32xbf16>
    %991 = vector.shape_cast %990 : vector<1x32x32xbf16> to vector<32x32xbf16>
    %992 = arith.truncf %986 : vector<16x32xf32> to vector<16x32xbf16>
    %cst_327 = arith.constant dense<0.000000e+00> : vector<16x32xf32>
    %993 = tpu.matmul %992, %991, %cst_327 {dimension_numbers = #tpu.dot_dimension_numbers<[1], [0], [0], [1], [0, 0, 1, 1], [], []>} : vector<16x32xbf16>, vector<32x32xbf16>, vector<16x32xf32> -> vector<16x32xf32>
    %994 = vector.broadcast %37 : vector<1x32xf32> to vector<16x32xf32>
    %995 = arith.addf %993, %994 : vector<16x32xf32>
    %996 = arith.mulf %995, %995 : vector<16x32xf32>
    %997 = arith.mulf %995, %996 : vector<16x32xf32>
    %cst_328 = arith.constant 4.471500e-02 : f32
    %998 = vector.broadcast %cst_328 : f32 to vector<16x32xf32>
    %999 = arith.mulf %998, %997 : vector<16x32xf32>
    %1000 = arith.addf %995, %999 : vector<16x32xf32>
    %cst_329 = arith.constant 0.797884583 : f32
    %1001 = vector.broadcast %cst_329 : f32 to vector<16x32xf32>
    %1002 = arith.mulf %1001, %1000 : vector<16x32xf32>
    %1003 = math.tanh %1002 : vector<16x32xf32>
    %cst_330 = arith.constant 1.000000e+00 : f32
    %1004 = vector.broadcast %cst_330 : f32 to vector<16x32xf32>
    %1005 = arith.addf %1004, %1003 : vector<16x32xf32>
    %cst_331 = arith.constant 5.000000e-01 : f32
    %1006 = vector.broadcast %cst_331 : f32 to vector<16x32xf32>
    %1007 = arith.mulf %1006, %1005 : vector<16x32xf32>
    %1008 = arith.mulf %995, %1007 : vector<16x32xf32>
    %c3_332 = arith.constant 3 : index
    %c0_333 = arith.constant 0 : index
    %c0_334 = arith.constant 0 : index
    %1009 = vector.load %arg5[%c3_332, %c0_333, %c0_334] : memref<4x32x32xbf16, #tpu.memory_space<vmem>>, vector<1x32x32xbf16>
    %1010 = vector.shape_cast %1009 : vector<1x32x32xbf16> to vector<32x32xbf16>
    %1011 = arith.truncf %1008 : vector<16x32xf32> to vector<16x32xbf16>
    %cst_335 = arith.constant dense<0.000000e+00> : vector<16x32xf32>
    %1012 = tpu.matmul %1011, %1010, %cst_335 {dimension_numbers = #tpu.dot_dimension_numbers<[1], [0], [0], [1], [0, 0, 1, 1], [], []>} : vector<16x32xbf16>, vector<32x32xbf16>, vector<16x32xf32> -> vector<16x32xf32>
    %1013 = vector.extract_strided_slice %1012 {offsets = [0, 0], sizes = [16, 4], strides = [1, 1]} : vector<16x32xf32> to vector<16x4xf32>
    %1014 = arith.addf %1013, %39 : vector<16x4xf32>
    %1015 = arith.negf %1014 : vector<16x4xf32>
    %1016 = math.exp %1015 : vector<16x4xf32>
    %cst_336 = arith.constant 1.000000e+00 : f32
    %1017 = vector.broadcast %cst_336 : f32 to vector<16x4xf32>
    %1018 = arith.addf %1017, %1016 : vector<16x4xf32>
    %1019 = arith.divf %1017, %1018 : vector<16x4xf32>
    %1020 = vector.extract_strided_slice %1019 {offsets = [0, 0], sizes = [16, 2], strides = [1, 1]} : vector<16x4xf32> to vector<16x2xf32>
    %1021 = vector.extract_strided_slice %1019 {offsets = [0, 2], sizes = [16, 2], strides = [1, 1]} : vector<16x4xf32> to vector<16x2xf32>
    %cst_337 = arith.constant 5.000000e-01 : f32
    %1022 = vector.broadcast %cst_337 : f32 to vector<16x2xf32>
    %1023 = arith.mulf %1022, %1021 : vector<16x2xf32>
    %1024 = arith.subf %1020, %1023 : vector<16x2xf32>
    %1025 = arith.addf %1020, %1023 : vector<16x2xf32>
    %1026 = tpu.concatenate %1024, %1025 in 1 : vector<16x2xf32>, vector<16x2xf32> -> vector<16x4xf32>
    %1027 = arith.mulf %989, %989 : vector<16x24xf32>
    %cst_338 = arith.constant dense<0.000000e+00> : vector<16xf32>
    %1028 = vector.multi_reduction <add>, %1027, %cst_338 [1] : vector<16x24xf32> to vector<16xf32>
    %1029 = vector.shape_cast %1028 : vector<16xf32> to vector<16x1xf32>
    %1030 = math.sqrt %1029 : vector<16x1xf32>
    %cst_339 = arith.constant 9.99999997E-7 : f32
    %1031 = vector.broadcast %cst_339 : f32 to vector<16x1xf32>
    %1032 = arith.addf %1030, %1031 : vector<16x1xf32>
    %1033 = tpu.reciprocal %1032 {approx = true} : vector<16x1xf32> -> vector<16x1xf32>
    %1034 = vector.broadcast %1033 : vector<16x1xf32> to vector<16x24xf32>
    %1035 = arith.mulf %989, %1034 : vector<16x24xf32>
    %c1_340 = arith.constant 1 : index
    %c0_341 = arith.constant 0 : index
    %c0_342 = arith.constant 0 : index
    %1036 = vector.load %arg2[%c1_340, %c0_341, %c0_342] : memref<2x5x24xf32, #tpu.memory_space<vmem>>, vector<1x5x24xf32>
    %1037 = vector.shape_cast %1036 : vector<1x5x24xf32> to vector<5x24xf32>
    %1038 = arith.mulf %1037, %1037 : vector<5x24xf32>
    %cst_343 = arith.constant dense<0.000000e+00> : vector<5xf32>
    %1039 = vector.multi_reduction <add>, %1038, %cst_343 [1] : vector<5x24xf32> to vector<5xf32>
    %1040 = vector.shape_cast %1039 : vector<5xf32> to vector<5x1xf32>
    %1041 = math.rsqrt %1040 : vector<5x1xf32>
    %1042 = vector.broadcast %1041 : vector<5x1xf32> to vector<5x24xf32>
    %1043 = arith.mulf %1037, %1042 : vector<5x24xf32>
    %cst_344 = arith.constant 9.99999997E-7 : f32
    %1044 = vector.broadcast %cst_344 : f32 to vector<5x24xf32>
    %1045 = arith.addf %1043, %1044 : vector<5x24xf32>
    %cst_345 = arith.constant dense<0.000000e+00> : vector<16x5xf32>
    %1046 = tpu.matmul %1035, %1045, %cst_345 {dimension_numbers = #tpu.dot_dimension_numbers<[1], [1], [0], [0], [0, 0, 1, 0], [], []>} : vector<16x24xf32>, vector<5x24xf32>, vector<16x5xf32> -> vector<16x5xf32>
    %cst_346 = arith.constant 0.000000e+00 : f32
    %1047 = vector.broadcast %cst_346 : f32 to vector<16x119xf32>
    %1048 = tpu.concatenate %1026, %1046, %1047 in 1 : vector<16x4xf32>, vector<16x5xf32>, vector<16x119xf32> -> vector<16x128xf32>
    %c1_347 = arith.constant 1 : index
    %c0_348 = arith.constant 0 : index
    %c0_349 = arith.constant 0 : index
    %1049 = vector.load %arg10[%c1_347, %c0_348, %c0_349] : memref<2x16x128xf32, #tpu.memory_space<vmem>>, vector<1x16x128xf32>
    %1050 = vector.shape_cast %1049 : vector<1x16x128xf32> to vector<16x128xf32>
    %1051 = vector.shape_cast %1048 : vector<16x128xf32> to vector<1x16x128xf32>
    tpu.vector_store %arg10[%c1_347, %c0_348, %c0_349], %1051 {strides = array<i32>} : memref<2x16x128xf32, #tpu.memory_space<vmem>>, vector<1x16x128xf32>,
    return
  }
  func.func @transform_0(%arg0: i32) -> (i32, i32, i32) {
    %c0_i32 = arith.constant 0 : i32
    %c0_i32_0 = arith.constant 0 : i32
    %c0_i32_1 = arith.constant 0 : i32
    return %arg0, %c0_i32, %c0_i32_0 : i32, i32, i32
  }
  func.func @transform_1(%arg0: i32) -> (i32, i32, i32) {
    %c0_i32 = arith.constant 0 : i32
    %c0_i32_0 = arith.constant 0 : i32
    %c0_i32_1 = arith.constant 0 : i32
    return %arg0, %c0_i32, %c0_i32_0 : i32, i32, i32
  }
  func.func @transform_2(%arg0: i32) -> (i32, i32) {
    %c0_i32 = arith.constant 0 : i32
    %c0_i32_0 = arith.constant 0 : i32
    %c0_i32_1 = arith.constant 0 : i32
    return %c0_i32, %c0_i32_0 : i32, i32
  }
  func.func @transform_3(%arg0: i32) -> (i32, i32, i32) {
    %c0_i32 = arith.constant 0 : i32
    %c0_i32_0 = arith.constant 0 : i32
    %c0_i32_1 = arith.constant 0 : i32
    %c0_i32_2 = arith.constant 0 : i32
    return %c0_i32, %c0_i32_0, %c0_i32_1 : i32, i32, i32
  }
  func.func @transform_4(%arg0: i32) -> (i32, i32, i32) {
    %c0_i32 = arith.constant 0 : i32
    %c0_i32_0 = arith.constant 0 : i32
    %c0_i32_1 = arith.constant 0 : i32
    %c0_i32_2 = arith.constant 0 : i32
    return %c0_i32, %c0_i32_0, %c0_i32_1 : i32, i32, i32
  }
  func.func @transform_5(%arg0: i32) -> (i32, i32, i32) {
    %c0_i32 = arith.constant 0 : i32
    %c0_i32_0 = arith.constant 0 : i32
    %c0_i32_1 = arith.constant 0 : i32
    %c0_i32_2 = arith.constant 0 : i32
    return %c0_i32, %c0_i32_0, %c0_i32_1 : i32, i32, i32
  }
  func.func @transform_6(%arg0: i32) -> (i32, i32, i32) {
    %c0_i32 = arith.constant 0 : i32
    %c0_i32_0 = arith.constant 0 : i32
    %c0_i32_1 = arith.constant 0 : i32
    %c0_i32_2 = arith.constant 0 : i32
    return %c0_i32, %c0_i32_0, %c0_i32_1 : i32, i32, i32
  }
  func.func @transform_7(%arg0: i32) -> (i32, i32) {
    %c0_i32 = arith.constant 0 : i32
    %c0_i32_0 = arith.constant 0 : i32
    %c0_i32_1 = arith.constant 0 : i32
    return %c0_i32, %c0_i32_0 : i32, i32
  }
  func.func @transform_8(%arg0: i32) -> (i32, i32) {
    %c0_i32 = arith.constant 0 : i32
    %c0_i32_0 = arith.constant 0 : i32
    %c0_i32_1 = arith.constant 0 : i32
    return %c0_i32, %c0_i32_0 : i32, i32
  }
  func.func @transform_9(%arg0: i32) -> (i32, i32, i32) {
    %c0_i32 = arith.constant 0 : i32
    %c0_i32_0 = arith.constant 0 : i32
    %c0_i32_1 = arith.constant 0 : i32
    return %arg0, %c0_i32, %c0_i32_0 : i32, i32, i32
  }
}

</mosaic_0001>

<bundles_post_ra>
// kernel: tpu_custom_call.1
= control target key start
LH: loop header
LB: loop body
LE: loop exit
PB: predicated region body
PF: predicated region fallthrough
CT: control target
= control target key end

     0   :  { %v7858_v1 = vmov 0   ;;  %vm176_vm0 = vcmask 523264   ;;  %s9679_s0 = inlined_call_operand.vmem [shape: f32[2,17,192], index: 0, kind: input, shape index: {}]   ;;  %s9680_s1 = inlined_call_operand.vmem [shape: f32[2,5,24], index: 1, kind: input, shape index: {}]   ;;  %s9681_s2 = inlined_call_operand.vmem [shape: bf16[192,32], index: 2, kind: input, shape index: {}]   ;;  %s9682_s3 = inlined_call_operand.vmem [shape: bf16[2,32,96], index: 3, kind: input, shape index: {}]   ;;  %s9683_s4 = inlined_call_operand.vmem [shape: bf16[4,32,32], index: 4, kind: input, shape index: {}]   ;;  %s9684_s5 = inlined_call_operand.vmem [shape: bf16[2,32,64], index: 5, kind: input, shape index: {}]   ;;  %s9685_s6 = inlined_call_operand.vmem [shape: bf16[2,64,32], index: 6, kind: input, shape index: {}]   ;;  %s9686_s7 = inlined_call_operand.vmem [shape: bf16[32,56], index: 7, kind: input, shape index: {}]   ;;  %s9687_s8 = inlined_call_operand.vmem [shape: f32[72,128], index: 8, kind: input, shape index: {}]   ;;  %s9688_s9 = inlined_call_operand.hbm [shape: f32[2,16,128], index: 9, kind: output, shape index: {}]  }
   0x1   :  { %v7371_v0 = vld [vmem:[%s9681_s2] sm:$0xff]   ;;  %183 = vmatprep.subr.bf16.mxu0 %v7858_v1  ;;  %v7372_v2 = vld [vmem:[%s9681_s2 + $0x8] sm:$0xff]   ;;  %v7373_v3 = vld [vmem:[%s9681_s2 + $0x10] sm:$0xff]  }
   0x2   :  { %184 = vmatpush1.bf16.msra.mxu0 %v7371_v0  ;;  %v7374_v4 = vld [vmem:[%s9681_s2 + $0x18] sm:$0xff]   ;;  %v71_v5 = vld [vmem:[%s9679_s0 + $0x8] sm:$0xff]  ;;  %v7375_v8 = vld [vmem:[%s9681_s2 + $0x20] sm:$0xff]  }
   0x3   :  { %185 = vmatprep.subr.bf16.mxu0 %v7858_v1  ;;  %v73_v6 = vld [vmem:[%s9679_s0 + $0x18] sm:$0xff]  ;;  %v7376_v9 = vld [vmem:[%s9681_s2 + $0x28] sm:$0xff]   ;;  %v7377_v10 = vld [vmem:[%s9681_s2 + $0x30] sm:$0xff]  }
   0x4   :  { %v101_v7 = vpack.c.bf16 %v73_v6, %v71_v5  ;;  %v7378_v11 = vld [vmem:[%s9681_s2 + $0x38] sm:$0xff]   ;;  %v7379_v12 = vld [vmem:[%s9681_s2 + $0x40] sm:$0xff]   ;;  %v7380_v13 = vld [vmem:[%s9681_s2 + $0x48] sm:$0xff]  }
   0x5   :  { %v7381_v14 = vld [vmem:[%s9681_s2 + $0x50] sm:$0xff]   ;;  %v7382_v15 = vld [vmem:[%s9681_s2 + $0x58] sm:$0xff]   ;;  %v70_v16 = vld [vmem:[%s9679_s0] sm:$0xff] }
   0x6   :  { %186 = vmatpush1.bf16.msra.mxu0 %v7372_v2  ;;  %6291 = vmatprep.mubr.msk.bf16.mxu0 %vm176_vm0, %v101_v7  ;;  %v72_v17 = vld [vmem:[%s9679_s0 + $0x10] sm:$0xff]  ;;  %v75_v18 = vld [vmem:[%s9679_s0 + $0x28] sm:$0x1]  ;;  %v74_v21 = vld [vmem:[%s9679_s0 + $0x20] sm:$0x1] }
   0x7   :  { %187 = vmatprep.subr.bf16.mxu0 %v7858_v1  ;;  %v100_v19 = vpack.c.bf16 %v72_v17, %v70_v16  ;;  %v103_v20 = vpack.c.bf16 %v75_v18, %v75_v18  ;;  %v102_v22 = vpack.c.bf16 %v74_v21, %v74_v21 }
   0xa   :  { %188 = vmatpush1.bf16.msra.mxu0 %v7373_v3 }
   0xb   :  { %189 = vmatprep.subr.bf16.mxu0 %v7858_v1 }
   0xe   :  { %190 = vmatpush1.bf16.msra.mxu0 %v7374_v4 }
   0xf   :  { %191 = vmatprep.subr.bf16.mxu0 %v7858_v1 }
  0x12   :  { %192 = vmatpush1.bf16.msra.mxu0 %v7375_v8 }
  0x13   :  { %193 = vmatprep.subr.bf16.mxu0 %v7858_v1 }
  0x16   :  { %194 = vmatpush1.bf16.msra.mxu0 %v7376_v9 }
  0x17   :  { %195 = vmatprep.subr.bf16.mxu0 %v7858_v1 }
  0x1a   :  { %196 = vmatpush1.bf16.msra.mxu0 %v7377_v10 }
  0x1b   :  { %197 = vmatprep.subr.bf16.mxu0 %v7858_v1 }
  0x1e   :  { %198 = vmatpush1.bf16.msra.mxu0 %v7378_v11 }
  0x1f   :  { %199 = vmatprep.subr.bf16.mxu0 %v7858_v1 }
  0x22   :  { %200 = vmatpush1.bf16.msra.mxu0 %v7379_v12 }
  0x23   :  { %201 = vmatprep.subr.bf16.mxu0 %v7858_v1 }
  0x26   :  { %202 = vmatpush1.bf16.msra.mxu0 %v7380_v13 }
  0x27   :  { %203 = vmatprep.subr.bf16.mxu0 %v7858_v1 }
  0x2a   :  { %204 = vmatpush1.bf16.msra.mxu0 %v7381_v14 }
  0x2b   :  { %205 = vmatprep.subr.bf16.mxu0 %v7858_v1 }
  0x2e   :  { %206 = vmatpush1.bf16.msra.mxu0 %v7382_v15 }
  0x31   :  { %216 = vmatmul.mubr.bf16.vlgmr.msra.gmra.mrb[0].mxu0 %v100_v19 }
  0x32   :  { %6292 = vmatprep.mubr.msk.bf16.mxu0 %vm176_vm0, %v103_v20 }
  0x39   :  { %224 = vmatmul.mubr.bf16.gmra.mrb[4].mxu0 %v102_v22 }
  0x3a   :  { %14 = vsyncpa [#allocation3], 0  ;;  %v56_v23 = vld [vmem:[%s9687_s8] sm:$0xff]  ;;  %v57_v25 = vld [vmem:[%s9687_s8 + $0x8] sm:$0xff]  ;;  %vm231_vm1 = vcmask 261120   ;;  %vm238_vm2 = vcmask 253952  }
  0x3b   :  { %v58_v34 = vld [vmem:[%s9687_s8 + $0x10] sm:$0x1]  ;;  %v6293_v6 = vld [vmem:[%s9687_s8 + $0x18] ss:$0 sm:$0xff]  ;;  %v6294_v8 = vld [vmem:[%s9687_s8 + $0x19] ss:$0 sm:$0xff] }
  0x3c   :  { %s7860_s23 = smov 96   ;;  %s7861_s24 = smov 64   ;;  %vm514_vm13 = vcmask 131072   ;;  %vm507_vm14 = vcmask 138240   ;;  %vm669_vm15 = vcmask 1040384  }
  0x3d   :  { %s7863_s19 = smov 32   ;;  %s7866_s11 = smov 4  }
  0x3e   :  { %s7867_s12 = smov [#allocation2]  }
 0x104   :  { %v217_v24 = vpop.f32.mrb[0].mxu0 }
 0x105   :  { %v218_v26 = vadd.f32 %v217_v24, %v56_v23  ;;  %v219_v27 = vpop.f32.mrb[1].mxu0 }
 0x106   :  { %v220_v28 = vpop.f32.mrb[2].mxu0 }
 0x107   :  { %v221_v29 = vadd.f32 %v220_v28, %v57_v25  ;;  %v222_v30 = vpop.f32.mrb[3].mxu0  ;;  %v232_v31 = vsel %vm231_vm1, %v218_v26, 0.0  ;;  %v246_v32 = vmul.f32 %v218_v26, %v218_v26 }
 0x108   :  { %233 = vadd.xlane.f32.xlu0 %v232_v31  ;;  %v7383_v30 = vld [vmem:[%s9682_s3] sm:$0xff]   ;;  %v7384_v31 = vld [vmem:[%s9682_s3 + $0x8] sm:$0xff]  }
 0x109   :  { %v249_v33 = vsel %vm231_vm1, %v246_v32, 0.0  ;;  %v235_v35 = vsel %vm231_vm1, %v221_v29, 0.0  ;;  %v247_v36 = vmul.f32 %v221_v29, %v221_v29  ;;  %6811 = vmatprep.subr.bf16.mxu1 %v7383_v30 }
 0x10a   :  { %250 = vadd.xlane.f32.xlu1 %v249_v33  ;;  %6812 = vmatpush3.bf16.msra.mxu1 %v7383_v30 }
 0x10b   :  { %v252_v43 = vsel %vm231_vm1, %v247_v36, 0.0  ;;  %6813 = vmatprep.subr.bf16.mxu1 %v7384_v31 }
 0x10c   :  { %v225_v37 = vpop.f32.mrb[4].mxu0  ;;  %236 = vadd.xlane.f32.xlu0 %v235_v35 }
 0x10d   :  { %v226_v38 = vadd.f32 %v225_v37, %v58_v34  ;;  %v227_v39 = vpop.f32.mrb[5].mxu0 }
 0x10e   :  { %v228_v40 = vpop.f32.mrb[6].mxu0  ;;  %6814 = vmatpush3.bf16.msra.mxu1 %v7384_v31 }
 0x10f   :  { %v229_v41 = vpop.f32.mrb[7].mxu0  ;;  %v239_v42 = vsel %vm238_vm2, %v226_v38, 0.0  ;;  %v248_v44 = vmul.f32 %v226_v38, %v226_v38 }
 0x110   :  { %240 = vadd.xlane.f32.xlu1 %v239_v42  ;;  %253 = vadd.xlane.f32.xlu0 %v252_v43 }
 0x111   :  { %v255_v45 = vsel %vm238_vm2, %v248_v44, 0.0 }
 0x114   :  { %256 = vadd.xlane.f32.xlu1 %v255_v45 }
 0x195   :  { %v234_v46 = vpop.xlane.xlu0 %233 }
 0x196   :  { %v243_v47 = vmul.f32 0.03125, %v234_v46 }
 0x197   :  { %v251_v48 = vpop.xlane.xlu1 %250 }
 0x198   :  { %v261_v49 = vmul.f32 %v243_v47, %v243_v47  ;;  %v258_v50 = vmul.f32 0.03125, %v251_v48  ;;  %v267_v4 = vsub.f32 %v218_v26, %v243_v47 }
 0x199   :  { %v237_v51 = vpop.xlane.xlu0 %236 }
 0x19a   :  { %v264_v52 = vsub.f32 %v258_v50, %v261_v49  ;;  %v244_v53 = vmul.f32 0.03125, %v237_v51 }
 0x19c   :  { %v270_v54 = vadd.f32 1e-05, %v264_v52  ;;  %v262_v57 = vmul.f32 %v244_v53, %v244_v53  ;;  %v268_v10 = vsub.f32 %v221_v29, %v244_v53 }
 0x19d   :  { %v241_v55 = vpop.xlane.xlu1 %240  ;;  %v254_v56 = vpop.xlane.xlu0 %253 }
 0x19e   :  { %7447 = vrsqrt.f32 %v270_v54  ;;  %v245_v58 = vmul.f32 0.03125, %v241_v55  ;;  %v259_v59 = vmul.f32 0.03125, %v254_v56 }
 0x1a0   :  { %v265_v60 = vsub.f32 %v259_v59, %v262_v57  ;;  %v263_v62 = vmul.f32 %v245_v58, %v245_v58  ;;  %v269_v15 = vsub.f32 %v226_v38, %v245_v58  ;;  %v6295_v57 = vld [vmem:[%s9687_s8 + $0x28] ss:$0 sm:$0xff] }
 0x1a1   :  { %v257_v61 = vpop.xlane.xlu1 %256 }
 0x1a2   :  { %v271_v63 = vadd.f32 1e-05, %v265_v60  ;;  %v260_v0 = vmul.f32 0.03125, %v257_v61 }
 0x1a4   :  { %7449 = vrsqrt.f32 %v271_v63  ;;  %v266_v2 = vsub.f32 %v260_v0, %v263_v62  ;;  %v6296_v0 = vld [vmem:[%s9687_s8 + $0x29] ss:$0 sm:$0xff] }
 0x1a6   :  { %v272_v3 = vadd.f32 1e-05, %v266_v2 }
 0x1a8   :  { %v7448_v5 = vpop.eup %7447  ;;  %7451 = vrsqrt.f32 %v272_v3 }
 0x1a9   :  { %v276_v7 = vmul.f32 %v7448_v5, %v267_v4 }
 0x1ab   :  { %v283_v9 = vmul.f32 %v6293_v6, %v276_v7 }
 0x1ad   :  { %v8009_v11 = vadd.f32 %v6294_v8, %v283_v9  ;;  %v34_v9 = vlaneseq }
 0x1ae   :  { %v7450_v12 = vpop.eup %7449 }
 0x1af   :  { %v295_v13 = vsel %vm231_vm1, %v8009_v11, 0.0  ;;  %v277_v14 = vmul.f32 %v7450_v12, %v268_v10  ;;  %v307_v22 = vmul.f32 %v8009_v11, %v8009_v11  ;;  %v35_v10 = vand.u32 127, %v34_v9  ;;  %v6297_v12 = vld [vmem:[%s9687_s8 + $0x2e] ss:$0 sm:$0xff] }
 0x1b0   :  { %296 = vadd.xlane.f32.xlu0 %v295_v13 }
 0x1b1   :  { %v284_v16 = vmul.f32 %v6293_v6, %v277_v14  ;;  %v310_v25 = vsel %vm231_vm1, %v307_v22, 0.0  ;;  %vm46_vm3 = vcmp.ge.s32.totalorder %v35_v10, 16  ;;  %vm47_vm4 = vcmp.lt.s32.totalorder %v35_v10, 24 }
 0x1b2   :  { %v7452_v17 = vpop.eup %7451  ;;  %vm51_vm5 = vcmp.ge.s32.totalorder %v35_v10, 24  ;;  %vm52_vm6 = vcmp.lt.s32.totalorder %v35_v10, 32  ;;  %vm41_vm7 = vcmp.ge.s32.totalorder %v35_v10, 8  ;;  %vm42_vm8 = vcmp.lt.s32.totalorder %v35_v10, 16  ;;  %vm48_vm9 = vmand %vm46_vm3, %vm47_vm4 }
 0x1b3   :  { %v8013_v18 = vadd.f32 %v6294_v8, %v284_v16  ;;  %v278_v19 = vmul.f32 %v7452_v17, %v269_v15  ;;  %vm53_vm10 = vmand %vm51_vm5, %vm52_vm6  ;;  %vm37_vm11 = vcmp.lt.s32.totalorder %v35_v10, 8  ;;  %vm2698_vm3 = vcmask 261121  }
 0x1b4   :  { %vm43_vm12 = vmand %vm41_vm7, %vm42_vm8  ;;  %vm7862_vm4 = vmmov 0   ;;  %vm2764_vm5 = vsmask.f32 7424  ;;  %vm3062_vm6 = vcmask 195584   ;;  %vm3091_vm7 = vcmask 192512  }
 0x1b5   :  { %v298_v20 = vsel %vm231_vm1, %v8013_v18, 0.0  ;;  %v285_v21 = vmul.f32 %v6293_v6, %v278_v19  ;;  %v308_v26 = vmul.f32 %v8013_v18, %v8013_v18 }
 0x1b6   :  { %299 = vadd.xlane.f32.xlu1 %v298_v20 }
 0x1b7   :  { %v8019_v23 = vadd.f32 %v6294_v8, %v285_v21  ;;  %v313_v28 = vsel %vm231_vm1, %v308_v26, 0.0  ;;  %v7859_v21 = vmov 0.0  }
 0x1b8   :  { %v8058_v22 = vsel %vm48_vm9, 1.0, %v7859_v21  ;;  %v8066_v26 = vsel %vm53_vm10, 1.0, %v7859_v21 }
 0x1b9   :  { %v301_v24 = vsel %vm238_vm2, %v8019_v23, 0.0  ;;  %v309_v27 = vmul.f32 %v8019_v23, %v8019_v23 }
 0x1ba   :  { %302 = vadd.xlane.f32.xlu0 %v301_v24  ;;  %311 = vadd.xlane.f32.xlu1 %v310_v25  ;;  %v8061_v24 = vsel %vm37_vm11, 1.0, %v7859_v21 }
 0x1bb   :  { %v316_v29 = vsel %vm238_vm2, %v309_v27, 0.0 }
 0x1be   :  { %314 = vadd.xlane.f32.xlu0 %v313_v28  ;;  %317 = vadd.xlane.f32.xlu1 %v316_v29  ;;  %v8070_v28 = vsel %vm43_vm12, 1.0, %v7859_v21  ;;  %v7366_v29 = vpack.i.bf16 %v8066_v26, %v8058_v22 }
 0x23d   :  { %v297_v32 = vpop.xlane.xlu0 %296 }
 0x23e   :  { %v304_v34 = vmul.f32 0.03125, %v297_v32  ;;  %v7361_v32 = vpack.i.bf16 %v8061_v24, %v8070_v28 }
 0x240   :  { %v322_v38 = vmul.f32 %v304_v34, %v304_v34  ;;  %v328_v54 = vsub.f32 %v8009_v11, %v304_v34 }
 0x243   :  { %v300_v33 = vpop.xlane.xlu1 %299 }
 0x244   :  { %v305_v35 = vmul.f32 0.03125, %v300_v33 }
 0x246   :  { %v323_v42 = vmul.f32 %v305_v35, %v305_v35  ;;  %v329_v59 = vsub.f32 %v8013_v18, %v305_v35 }
 0x247   :  { %v312_v36 = vpop.xlane.xlu1 %311  ;;  %v303_v37 = vpop.xlane.xlu0 %302 }
 0x248   :  { %v319_v39 = vmul.f32 0.03125, %v312_v36  ;;  %v306_v40 = vmul.f32 0.03125, %v303_v37 }
 0x24a   :  { %v325_v41 = vsub.f32 %v319_v39, %v322_v38  ;;  %v324_v46 = vmul.f32 %v306_v40, %v306_v40  ;;  %v330_v56 = vsub.f32 %v8019_v23, %v306_v40 }
 0x24b   :  { %v318_v43 = vpop.xlane.xlu1 %317  ;;  %v315_v44 = vpop.xlane.xlu0 %314 }
 0x24c   :  { %v331_v45 = vadd.f32 1e-05, %v325_v41  ;;  %v321_v47 = vmul.f32 0.03125, %v318_v43  ;;  %v320_v48 = vmul.f32 0.03125, %v315_v44 }
 0x24e   :  { %7453 = vrsqrt.f32 %v331_v45  ;;  %v327_v49 = vsub.f32 %v321_v47, %v324_v46  ;;  %v326_v50 = vsub.f32 %v320_v48, %v323_v42 }
 0x250   :  { %v333_v51 = vadd.f32 1e-05, %v327_v49  ;;  %v332_v52 = vadd.f32 1e-05, %v326_v50 }
 0x252   :  { %7455 = vrsqrt.f32 %v333_v51 }
 0x253   :  { %7457 = vrsqrt.f32 %v332_v52 }
 0x258   :  { %v7454_v53 = vpop.eup %7453 }
 0x259   :  { %v337_v55 = vmul.f32 %v7454_v53, %v328_v54 }
 0x25b   :  { %v344_v63 = vmul.f32 %v6295_v57, %v337_v55 }
 0x25c   :  { %v7456_v58 = vpop.eup %7455 }
 0x25d   :  { %v7458_v60 = vpop.eup %7457  ;;  %v339_v61 = vmul.f32 %v7456_v58, %v330_v56  ;;  %v351_v5 = vadd.f32 %v6296_v0, %v344_v63 }
 0x25e   :  { %v338_v62 = vmul.f32 %v7458_v60, %v329_v59 }
 0x25f   :  { %v346_v2 = vmul.f32 %v6295_v57, %v339_v61 }
 0x260   :  { %v345_v3 = vmul.f32 %v6295_v57, %v338_v62 }
 0x261   :  { %v353_v4 = vadd.f32 %v6296_v0, %v346_v2 }
 0x262   :  { %v352_v6 = vadd.f32 %v6296_v0, %v345_v3 }
 0x263   :  { %v359_v7 = vpack.c.bf16 %v353_v4, %v353_v4 }
 0x264   :  { %v358_v8 = vpack.c.bf16 %v352_v6, %v351_v5 }
 0x266   :  { %6815 = vmatprep.mubr.msk.bf16.mxu1 %vm231_vm1, %v358_v8 }
 0x267   :  { %6816 = vmatmul.mubr.msk.bf16.vlgmr.msra.gmra.mrb[0].mxu1 %vm231_vm1, %v359_v7 }
 0x33a   :  { %v6817_v13 = vpop.f32.mrb[0].mxu1 }
 0x33b   :  { %v8051_v14 = vadd.f32 %v6817_v13, %v6297_v12  ;;  %v417_v15 = vpop.f32.mrb[1].mxu1 }
 0x33c   :  { %v8053_v16 = vadd.f32 %v6297_v12, %v417_v15  ;;  %v6818_v17 = vpop.f32.mrb[2].mxu1 }
 0x33d   :  { %v420_v19 = vpop.f32.mrb[3].mxu1  ;;  %v435_v20 = vpack.c.bf16 %v8051_v14, %v8051_v14  ;;  %v433_v48 = vmul.f32 0.35355338, %v8051_v14 }
 0x33e   :  { %v8063_v25 = vadd.f32 %v6297_v12, %v420_v19  ;;  %v431_v27 = vmul.f32 0.35355338, %v8053_v16 }
 0x33f   :  { %445 = vrot.lane.b32.xlu1 %v435_v20, %s7860_s23  ;;  %v438_v50 = vmul.f32 %v8061_v24, %v433_v48  ;;  %v789_v51 = vmul.f32 %v8058_v22, %v433_v48  ;;  %v555_v54 = vmul.f32 %v8070_v28, %v433_v48  ;;  %v959_v55 = vmul.f32 %v8066_v26, %v433_v48 }
 0x340   :  { %v434_v30 = vpack.c.bf16 %v8063_v25, %v8053_v16  ;;  %v432_v31 = vmul.f32 0.35355338, %v8063_v25  ;;  %v787_v33 = vmul.f32 %v8058_v22, %v431_v27  ;;  %v436_v34 = vmul.f32 %v8061_v24, %v431_v27 }
 0x341   :  { %v553_v35 = vmul.f32 %v8070_v28, %v431_v27  ;;  %v957_v36 = vmul.f32 %v8066_v26, %v431_v27  ;;  %v440_v52 = vpack.c.bf16 %v438_v50, %v438_v50  ;;  %v791_v53 = vpack.c.bf16 %v789_v51, %v789_v51 }
 0x342   :  { %443 = vrot.lane.b32.xlu0 %v434_v30, %s7860_s23  ;;  %v788_v37 = vmul.f32 %v8058_v22, %v432_v31  ;;  %v437_v38 = vmul.f32 %v8061_v24, %v432_v31  ;;  %v554_v39 = vmul.f32 %v8070_v28, %v432_v31  ;;  %v958_v40 = vmul.f32 %v8066_v26, %v432_v31 }
 0x343   :  { %7367 = vrot.lane.b32.xlu1 %v7366_v29, %s7861_s24  ;;  %v557_v56 = vpack.c.bf16 %v555_v54, %v555_v54  ;;  %v961_v57 = vpack.c.bf16 %v959_v55, %v959_v55 }
 0x344   :  { %v790_v41 = vpack.c.bf16 %v788_v37, %v787_v33  ;;  %v439_v42 = vpack.c.bf16 %v437_v38, %v436_v34  ;;  %v556_v43 = vpack.c.bf16 %v554_v39, %v553_v35  ;;  %v960_v44 = vpack.c.bf16 %v958_v40, %v957_v36 }
 0x346   :  { %6855 = vmatprep.mubr.msk.bf16.mxu0 %vm231_vm1, %v790_v41  ;;  %7362 = vrot.lane.b32.xlu0 %v7361_v32, %s7861_s24 }
 0x347   :  { %6823 = vmatprep.mubr.msk.bf16.mxu1 %vm231_vm1, %v439_v42 }
 0x3b1   :  { %v446_v47 = vpop.permute.xlu1 %445 }
 0x3b2   :  { %v457_v49 = vsel %vm231_vm1, %v446_v47, 0 }
 0x3b4   :  { %v444_v45 = vpop.permute.xlu0 %443 }
 0x3b5   :  { %7317 = vmatprep.subr.msk.bf16.mxu1 %vm231_vm1, %v444_v45  ;;  %7321 = vmatprep.subr.msk.bf16.mxu0 %vm231_vm1, %v444_v45  ;;  %v454_v46 = vsel %vm231_vm1, %v444_v45, 0  ;;  %v8157_v42 = vpop.permute.xlu1 %7367 }
 0x3b6   :  { %6820 = vmatpush3.bf16.xpose.msra.mxu1 %v454_v46  ;;  %6852 = vmatpush3.bf16.xpose.msra.mxu0 %v454_v46 }
 0x3b7   :  { %7318 = vmatprep.subr.msk.bf16.mxu1 %vm231_vm1, %v446_v47  ;;  %7322 = vmatprep.subr.msk.bf16.mxu0 %vm231_vm1, %v446_v47 }
 0x3b8   :  { %v8142_v34 = vpop.permute.xlu0 %7362 }
 0x3b9   :  { %v8145_v35 = vunpack.i.l.bf16 %v8142_v34 }
 0x3bb   :  { %v651_v36 = vmul.f32 %v8145_v35, %v8051_v14  ;;  %v649_v37 = vmul.f32 %v8145_v35, %v8053_v16  ;;  %v650_v38 = vmul.f32 %v8145_v35, %v8063_v25 }
 0x3bd   :  { %v653_v39 = vpack.c.bf16 %v651_v36, %v651_v36  ;;  %v652_v40 = vpack.c.bf16 %v650_v38, %v649_v37 }
 0x3be   :  { %6822 = vmatpush3.bf16.xpose.msra.mxu1 %v457_v49  ;;  %6854 = vmatpush3.bf16.xpose.msra.mxu0 %v457_v49 }
 0x3bf   :  { %7319 = vmatprep.subr.msk.bf16.mxu1 %vm231_vm1, %v444_v45  ;;  %7323 = vmatprep.subr.msk.bf16.mxu0 %vm231_vm1, %v444_v45 }
 0x3c5   :  { %6824 = vmatmul.mubr.msk.bf16.vlgmr.msra.gmra.mrb[4].mxu1 %vm231_vm1, %v440_v52  ;;  %6856 = vmatmul.mubr.msk.bf16.vlgmr.msra.gmra.mrb[8].mxu0 %vm231_vm1, %v791_v53 }
 0x3c6   :  { %6828 = vmatpush3.bf16.xpose.msra.mxu1 %v454_v46  ;;  %6831 = vmatprep.mubr.msk.bf16.mxu1 %vm231_vm1, %v556_v43 }
 0x3c7   :  { %6868 = vmatpush3.bf16.xpose.msra.mxu0 %v454_v46  ;;  %6871 = vmatprep.mubr.msk.bf16.mxu0 %vm231_vm1, %v960_v44 }
 0x3c8   :  { %7320 = vmatprep.subr.msk.bf16.mxu1 %vm231_vm1, %v446_v47  ;;  %7324 = vmatprep.subr.msk.bf16.mxu0 %vm231_vm1, %v446_v47 }
 0x3ce   :  { %6830 = vmatpush3.bf16.xpose.msra.mxu1 %v457_v49 }
 0x3cf   :  { %6870 = vmatpush3.bf16.xpose.msra.mxu0 %v457_v49 }
 0x3d5   :  { %6832 = vmatmul.mubr.msk.bf16.vlgmr.msra.gmra.mrb[8].mxu1 %vm231_vm1, %v557_v56 }
 0x3d6   :  { %6872 = vmatmul.mubr.msk.bf16.vlgmr.msra.gmra.mrb[12].mxu0 %vm231_vm1, %v961_v57 }
 0x498   :  { %v6825_v58 = vpop.f32.mrb[4].mxu1  ;;  %v6857_v59 = vpop.f32.mrb[8].mxu0 }
 0x499   :  { %v493_v60 = vpop.f32.mrb[5].mxu1  ;;  %v832_v61 = vpop.f32.mrb[9].mxu0  ;;  %v852_v62 = vsel %vm514_vm13, %v6857_v59, -inf  ;;  %v515_v63 = vsel %vm514_vm13, %v6825_v58, -inf }
 0x49a   :  { %v6858_v0 = vpop.f32.mrb[10].mxu0  ;;  %853 = vmax.xlane.f32.xlu0 %v852_v62  ;;  %516 = vmax.xlane.f32.xlu1 %v515_v63  ;;  %v6826_v2 = vpop.f32.mrb[6].mxu1  ;;  %v846_v5 = vsel %vm507_vm14, %v832_v61, -inf  ;;  %v508_v6 = vsel %vm507_vm14, %v493_v60, -inf }
 0x49b   :  { %v496_v3 = vpop.f32.mrb[7].mxu1  ;;  %v835_v4 = vpop.f32.mrb[11].mxu0 }
 0x49c   :  { %v849_v7 = vsel %vm507_vm14, %v835_v4, -inf  ;;  %v511_v8 = vsel %vm507_vm14, %v496_v3, -inf }
 0x49e   :  { %847 = vmax.xlane.f32.xlu0 %v846_v5  ;;  %509 = vmax.xlane.f32.xlu1 %v508_v6 }
 0x4a2   :  { %850 = vmax.xlane.f32.xlu1 %v849_v7  ;;  %512 = vmax.xlane.f32.xlu0 %v511_v8 }
 0x4a8   :  { %v8120_v10 = vpop.f32.mrb[8].mxu1 }
 0x4a9   :  { %v8122_v12 = vpop.f32.mrb[12].mxu0  ;;  %v8124_v13 = vpop.f32.mrb[9].mxu1  ;;  %v618_v15 = vsel %vm514_vm13, %v8120_v10, -inf }
 0x4aa   :  { %v8128_v17 = vpop.f32.mrb[13].mxu0  ;;  %v1022_v19 = vsel %vm514_vm13, %v8122_v12, -inf  ;;  %v6834_v20 = vpop.f32.mrb[10].mxu1  ;;  %619 = vmax.xlane.f32.xlu0 %v618_v15  ;;  %v612_v32 = vsel %vm507_vm14, %v8124_v13, -inf }
 0x4ab   :  { %v6874_v27 = vpop.f32.mrb[14].mxu0  ;;  %1023 = vmax.xlane.f32.xlu1 %v1022_v19  ;;  %v8132_v29 = vpop.f32.mrb[11].mxu1  ;;  %v1016_v33 = vsel %vm507_vm14, %v8128_v17, -inf }
 0x4ac   :  { %v8134_v30 = vpop.f32.mrb[15].mxu0  ;;  %v615_v31 = vsel %vm507_vm14, %v8132_v29, -inf }
 0x4ad   :  { %v1019_v41 = vsel %vm507_vm14, %v8134_v30, -inf }
 0x4ae   :  { %616 = vmax.xlane.f32.xlu0 %v615_v31 }
 0x4af   :  { %613 = vmax.xlane.f32.xlu1 %v612_v32 }
 0x4b3   :  { %1017 = vmax.xlane.f32.xlu1 %v1016_v33 }
 0x4c4   :  { %660 = vrot.lane.b32.xlu1 %v653_v39, %s7861_s24  ;;  %658 = vrot.lane.b32.xlu0 %v652_v40, %s7861_s24 }
 0x4e3   :  { %1020 = vmax.xlane.f32.xlu0 %v1019_v41 }
 0x527   :  { %v854_v43 = vpop.xlane.xlu0 %853  ;;  %v517_v44 = vpop.xlane.xlu1 %516 }
 0x528   :  { %v857_v45 = vsub.f32 %v6857_v59, %v854_v43  ;;  %v520_v46 = vsub.f32 %v6825_v58, %v517_v44 }
 0x52a   :  { %v862_v47 = vmul.f32 1.442695, %v857_v45  ;;  %v525_v48 = vmul.f32 1.442695, %v520_v46 }
 0x52b   :  { %v848_v49 = vpop.xlane.xlu0 %847  ;;  %v510_v50 = vpop.xlane.xlu1 %509 }
 0x52c   :  { %7459 = vpow2.f32 %v862_v47  ;;  %v855_v51 = vsub.f32 %v832_v61, %v848_v49  ;;  %v518_v52 = vsub.f32 %v493_v60, %v510_v50  ;;  %v8203_v49 = vunpack.i.h.bf16 %v8142_v34 }
 0x52d   :  { %7461 = vpow2.f32 %v525_v48 }
 0x52e   :  { %v521_v53 = vmul.f32 1.442695, %v518_v52  ;;  %v858_v54 = vmul.f32 1.442695, %v855_v51  ;;  %v546_v50 = vmul.f32 %v8203_v49, %v8053_v16  ;;  %v547_v51 = vmul.f32 %v8203_v49, %v8063_v25 }
 0x52f   :  { %v851_v55 = vpop.xlane.xlu1 %850  ;;  %v513_v56 = vpop.xlane.xlu0 %512 }
 0x530   :  { %v856_v57 = vsub.f32 %v835_v4, %v851_v55  ;;  %v519_v62 = vsub.f32 %v496_v3, %v513_v56  ;;  %7463 = vpow2.f32 %v521_v53  ;;  %v549_v52 = vpack.c.bf16 %v547_v51, %v546_v50 }
 0x531   :  { %7465 = vpow2.f32 %v858_v54  ;;  %v548_v53 = vmul.f32 %v8203_v49, %v8051_v14 }
 0x532   :  { %v523_v63 = vmul.f32 1.442695, %v519_v62  ;;  %v860_v0 = vmul.f32 1.442695, %v856_v57 }
 0x533   :  { %v550_v54 = vpack.c.bf16 %v548_v53, %v548_v53 }
 0x534   :  { %7467 = vpow2.f32 %v523_v63 }
 0x535   :  { %7469 = vpow2.f32 %v860_v0 }
 0x536   :  { %v8159_v58 = vpop.eup %7459 }
 0x537   :  { %v8161_v59 = vpop.eup %7461  ;;  %v620_v2 = vpop.xlane.xlu0 %619  ;;  %v870_v60 = vsel %vm514_vm13, %v8159_v58, 0.0 }
 0x538   :  { %v1024_v61 = vpop.xlane.xlu1 %1023  ;;  %v623_v5 = vsub.f32 %v8120_v10, %v620_v2  ;;  %v533_v3 = vsel %vm514_vm13, %v8161_v59, 0.0  ;;  %871 = vadd.xlane.f32.xlu0 %v870_v60 }
 0x539   :  { %534 = vadd.xlane.f32.xlu1 %v533_v3  ;;  %v1027_v34 = vsub.f32 %v8122_v12, %v1024_v61  ;;  %v8229_v61 = vunpack.i.l.bf16 %v8157_v42  ;;  %v8232_v3 = vunpack.i.h.bf16 %v8157_v42 }
 0x53a   :  { %v628_v4 = vmul.f32 1.442695, %v623_v5  ;;  %v8168_v6 = vpop.eup %7463 }
 0x53b   :  { %v617_v7 = vpop.xlane.xlu0 %616  ;;  %v527_v19 = vsel %vm507_vm14, %v8168_v6, 0.0  ;;  %v8173_v20 = vpop.eup %7465  ;;  %v1032_v0 = vmul.f32 1.442695, %v1027_v34 }
 0x53c   :  { %7471 = vpow2.f32 %v628_v4  ;;  %v614_v8 = vpop.xlane.xlu1 %613  ;;  %v622_v15 = vsub.f32 %v8132_v29, %v617_v7  ;;  %v864_v37 = vsel %vm507_vm14, %v8173_v20, 0.0  ;;  %v885_v4 = vmul.f32 %v8229_v61, %v8051_v14 }
 0x53d   :  { %v621_v10 = vsub.f32 %v8124_v13, %v614_v8  ;;  %528 = vadd.xlane.f32.xlu1 %v527_v19  ;;  %v8185_v13 = vsel %vm669_vm15, 65535, %v7858_v1  ;;  %v883_v7 = vmul.f32 %v8229_v61, %v8053_v16  ;;  %v884_v8 = vmul.f32 %v8229_v61, %v8063_v25 }
 0x53e   :  { %v626_v27 = vmul.f32 1.442695, %v622_v15  ;;  %v8176_v31 = vpop.eup %7467  ;;  %v887_v15 = vpack.c.bf16 %v885_v4, %v885_v4  ;;  %v1053_v19 = vmul.f32 %v8232_v3, %v8053_v16  ;;  %vm3197_vm15 = vcmask 72704  }
 0x53f   :  { %v624_v32 = vmul.f32 1.442695, %v621_v10  ;;  %v659_v33 = vpop.permute.xlu0 %658  ;;  %v530_v29 = vsel %vm507_vm14, %v8176_v31, 0.0  ;;  %v8182_v38 = vpop.eup %7469  ;;  %v1054_v10 = vmul.f32 %v8232_v3, %v8063_v25 }
 0x540   :  { %7473 = vpow2.f32 %v626_v27  ;;  %v1018_v36 = vpop.xlane.xlu1 %1017  ;;  %6835 = vmatprep.subr.bf16.mxu1 %v659_v33  ;;  %531 = vadd.xlane.f32.xlu0 %v530_v29  ;;  %v867_v40 = vsel %vm507_vm14, %v8182_v38, 0.0  ;;  %v886_v27 = vpack.c.bf16 %v884_v8, %v883_v7 }
 0x541   :  { %7475 = vpow2.f32 %v624_v32  ;;  %865 = vadd.xlane.f32.xlu1 %v864_v37  ;;  %6836 = vmatpush3.bf16.msra.mxu1 %v659_v33  ;;  %v1025_v55 = vsub.f32 %v8128_v17, %v1018_v36  ;;  %v1056_v42 = vpack.c.bf16 %v1054_v10, %v1053_v19  ;;  %v1055_v32 = vmul.f32 %v8232_v3, %v8051_v14 }
 0x543   :  { %v1028_v56 = vmul.f32 1.442695, %v1025_v55  ;;  %v1057_v33 = vpack.c.bf16 %v1055_v32, %v1055_v32 }
 0x544   :  { %v661_v39 = vpop.permute.xlu1 %660  ;;  %868 = vadd.xlane.f32.xlu0 %v867_v40 }
 0x545   :  { %v673_v41 = vand.u32 %v8185_v13, %v661_v39  ;;  %7477 = vpow2.f32 %v1028_v56 }
 0x546   :  { %v8190_v43 = vpop.eup %7471 }
 0x547   :  { %6837 = vmatprep.subr.bf16.mxu1 %v673_v41  ;;  %v636_v44 = vsel %vm514_vm13, %v8190_v43, 0.0 }
 0x548   :  { %6838 = vmatpush3.bf16.msra.mxu1 %v673_v41  ;;  %637 = vadd.xlane.f32.xlu0 %v636_v44 }
 0x54a   :  { %v8194_v45 = vpop.eup %7473 }
 0x54b   :  { %v8196_v46 = vpop.eup %7475  ;;  %v633_v47 = vsel %vm507_vm14, %v8194_v45, 0.0 }
 0x54c   :  { %v630_v48 = vsel %vm507_vm14, %v8196_v46, 0.0  ;;  %634 = vadd.xlane.f32.xlu0 %v633_v47 }
 0x54d   :  { %631 = vadd.xlane.f32.xlu1 %v630_v48 }
 0x54f   :  { %v8216_v2 = vpop.eup %7477 }
 0x550   :  { %v1034_v17 = vsel %vm507_vm14, %v8216_v2, 0.0 }
 0x55e   :  { %725 = vrot.lane.b32.xlu1 %v549_v52, %s7861_s24 }
 0x562   :  { %727 = vrot.lane.b32.xlu0 %v550_v54, %s7861_s24 }
 0x570   :  { %v1021_v57 = vpop.xlane.xlu0 %1020 }
 0x571   :  { %v1026_v62 = vsub.f32 %v8134_v30, %v1021_v57 }
 0x573   :  { %v1030_v63 = vmul.f32 1.442695, %v1026_v62 }
 0x575   :  { %7479 = vpow2.f32 %v1030_v63 }
 0x576   :  { %7481 = vpow2.f32 %v1032_v0 }
 0x57f   :  { %v8218_v60 = vpop.eup %7479 }
 0x580   :  { %v1037_v5 = vsel %vm507_vm14, %v8218_v60, 0.0  ;;  %v8224_v12 = vpop.eup %7481 }
 0x581   :  { %1038 = vadd.xlane.f32.xlu0 %v1037_v5  ;;  %v1040_v30 = vsel %vm514_vm13, %v8224_v12, 0.0 }
 0x582   :  { %1035 = vadd.xlane.f32.xlu1 %v1034_v17 }
 0x586   :  { %1041 = vadd.xlane.f32.xlu1 %v1040_v30 }
 0x597   :  { %894 = vrot.lane.b32.xlu1 %v887_v15, %s7861_s24  ;;  %892 = vrot.lane.b32.xlu0 %v886_v27, %s7861_s24 }
 0x59b   :  { %1062 = vrot.lane.b32.xlu1 %v1056_v42, %s7861_s24 }
 0x59f   :  { %1064 = vrot.lane.b32.xlu1 %v1057_v33, %s7861_s24 }
 0x5c5   :  { %v872_v37 = vpop.xlane.xlu0 %871 }
 0x5c6   :  { %v535_v36 = vpop.xlane.xlu1 %534 }
 0x5ca   :  { %v529_v29 = vpop.xlane.xlu1 %528 }
 0x5cb   :  { %7483 = vrcp.f32 %v529_v29 }
 0x5cd   :  { %v532_v16 = vpop.xlane.xlu0 %531 }
 0x5ce   :  { %v866_v25 = vpop.xlane.xlu1 %865 }
 0x5d1   :  { %v869_v39 = vpop.xlane.xlu0 %868 }
 0x5d5   :  { %v638_v40 = vpop.xlane.xlu0 %637  ;;  %v7484_v47 = vpop.eup %7483 }
 0x5d6   :  { %7485 = vrcp.f32 %v638_v40  ;;  %v539_v62 = vmul.f32 %v7484_v47, %v8168_v6  ;;  %v7386_v40 = vld [vmem:[%s9683_s4 + $0x8] sm:$0xff]  }
 0x5d7   :  { %7487 = vrcp.f32 %v532_v16 }
 0x5d9   :  { %v635_v44 = vpop.xlane.xlu0 %634 }
 0x5da   :  { %v632_v41 = vpop.xlane.xlu1 %631 }
 0x5db   :  { %7489 = vrcp.f32 %v632_v41 }
 0x5dc   :  { %7491 = vrcp.f32 %v635_v44 }
 0x5dd   :  { %7493 = vrcp.f32 %v535_v36  ;;  %v728_v56 = vpop.permute.xlu0 %727 }
 0x5de   :  { %v726_v14 = vpop.permute.xlu1 %725  ;;  %7495 = vrcp.f32 %v869_v39  ;;  %v737_v5 = vand.u32 %v728_v56, %v8185_v13 }
 0x5df   :  { %6843 = vmatprep.subr.bf16.mxu1 %v726_v14  ;;  %7497 = vrcp.f32 %v866_v25 }
 0x5e0   :  { %v7486_v48 = vpop.eup %7485  ;;  %7499 = vrcp.f32 %v872_v37 }
 0x5e1   :  { %v7488_v50 = vpop.eup %7487  ;;  %v644_v54 = vmul.f32 %v7486_v48, %v8190_v43 }
 0x5e2   :  { %v540_v34 = vmul.f32 %v7488_v50, %v8176_v31 }
 0x5e3   :  { %v655_v63 = vpack.c.bf16 %v644_v54, %v644_v54 }
 0x5e4   :  { %v551_v0 = vpack.c.bf16 %v540_v34, %v539_v62 }
 0x5e5   :  { %v7490_v51 = vpop.eup %7489 }
 0x5e6   :  { %v7492_v52 = vpop.eup %7491  ;;  %v642_v53 = vmul.f32 %v7490_v51, %v8196_v46  ;;  %v6322_v51 = vld [vmem:[%s9687_s8 + $0x2a] ss:$0 sm:$0xff] }
 0x5e7   :  { %v643_v55 = vmul.f32 %v7492_v52, %v8194_v45  ;;  %v7494_v43 = vpop.eup %7493 }
 0x5e8   :  { %v7496_v45 = vpop.eup %7495  ;;  %v541_v46 = vmul.f32 %v7494_v43, %v8161_v59 }
 0x5e9   :  { %v654_v57 = vpack.c.bf16 %v643_v55, %v642_v53  ;;  %v7498_v31 = vpop.eup %7497  ;;  %v877_v6 = vmul.f32 %v7496_v45, %v8182_v38 }
 0x5ea   :  { %v876_v17 = vmul.f32 %v7498_v31, %v8173_v20  ;;  %v552_v30 = vpack.c.bf16 %v541_v46, %v541_v46  ;;  %v7500_v10 = vpop.eup %7499 }
 0x5eb   :  { %6839 = vmatprep.mubr.msk.bf16.mxu1 %vm507_vm14, %v654_v57  ;;  %v878_v38 = vmul.f32 %v7500_v10, %v8159_v58  ;;  %v7385_v58 = vld [vmem:[%s9683_s4] sm:$0xff]  }
 0x5ec   :  { %6840 = vmatmul.mubr.msk.bf16.vlgmr.msra.gmra.mrb[12].mxu1 %vm507_vm14, %v655_v63  ;;  %v888_v4 = vpack.c.bf16 %v877_v6, %v876_v17  ;;  %v7387_v6 = vld [vmem:[%s9684_s5] sm:$0xff]   ;;  %v7388_v17 = vld [vmem:[%s9684_s5 + $0x8] sm:$0xff]  }
 0x5ed   :  { %6844 = vmatpush3.bf16.msra.mxu1 %v726_v14  ;;  %6847 = vmatprep.mubr.msk.bf16.mxu1 %vm507_vm14, %v551_v0  ;;  %v889_v36 = vpack.c.bf16 %v878_v38, %v878_v38 }
 0x5ee   :  { %6845 = vmatprep.subr.bf16.mxu1 %v737_v5  ;;  %6891 = vmatprep.subr.bf16.mxu0 %v7387_v6 }
 0x5ef   :  { %6892 = vmatpush3.bf16.msra.mxu0 %v7387_v6 }
 0x5f0   :  { %6893 = vmatprep.subr.bf16.mxu0 %v7388_v17 }
 0x5f1   :  { %6846 = vmatpush3.bf16.msra.mxu1 %v737_v5 }
 0x5f3   :  { %6894 = vmatpush3.bf16.msra.mxu0 %v7388_v17 }
 0x5f8   :  { %6848 = vmatmul.mubr.msk.bf16.vlgmr.msra.gmra.mrb[12].mxu1 %vm507_vm14, %v552_v30 }
 0x5f9   :  { %6863 = vmatprep.mubr.msk.bf16.mxu1 %vm507_vm14, %v888_v4 }
 0x60e   :  { %v1039_v8 = vpop.xlane.xlu0 %1038 }
 0x60f   :  { %v1036_v7 = vpop.xlane.xlu1 %1035 }
 0x610   :  { %7501 = vrcp.f32 %v1036_v7 }
 0x611   :  { %7503 = vrcp.f32 %v1039_v8 }
 0x612   :  { %v893_v19 = vpop.permute.xlu0 %892 }
 0x613   :  { %v1042_v15 = vpop.xlane.xlu1 %1041  ;;  %6859 = vmatprep.subr.bf16.mxu1 %v893_v19 }
 0x614   :  { %6860 = vmatpush3.bf16.msra.mxu1 %v893_v19  ;;  %7505 = vrcp.f32 %v1042_v15 }
 0x617   :  { %v895_v59 = vpop.permute.xlu1 %894 }
 0x618   :  { %v904_v20 = vand.u32 %v895_v59, %v8185_v13 }
 0x61a   :  { %v7502_v27 = vpop.eup %7501  ;;  %6861 = vmatprep.subr.bf16.mxu1 %v904_v20 }
 0x61b   :  { %v7504_v42 = vpop.eup %7503  ;;  %v1063_v32 = vpop.permute.xlu1 %1062  ;;  %6862 = vmatpush3.bf16.msra.mxu1 %v904_v20  ;;  %v1046_v33 = vmul.f32 %v7502_v27, %v8216_v2 }
 0x61c   :  { %6875 = vmatprep.subr.bf16.mxu1 %v1063_v32  ;;  %v1047_v37 = vmul.f32 %v7504_v42, %v8218_v60 }
 0x61e   :  { %6864 = vmatmul.mubr.msk.bf16.vlgmr.msra.gmra.mrb[12].mxu1 %vm507_vm14, %v889_v36  ;;  %v1058_v16 = vpack.c.bf16 %v1047_v37, %v1046_v33  ;;  %v7506_v25 = vpop.eup %7505 }
 0x61f   :  { %v1065_v29 = vpop.permute.xlu1 %1064  ;;  %6876 = vmatpush3.bf16.msra.mxu1 %v1063_v32  ;;  %v1048_v2 = vmul.f32 %v7506_v25, %v8224_v12 }
 0x620   :  { %v1074_v39 = vand.u32 %v1065_v29, %v8185_v13  ;;  %6879 = vmatprep.mubr.msk.bf16.mxu1 %vm507_vm14, %v1058_v16 }
 0x621   :  { %v1059_v60 = vpack.c.bf16 %v1048_v2, %v1048_v2 }
 0x622   :  { %6877 = vmatprep.subr.bf16.mxu1 %v1074_v39 }
 0x623   :  { %6878 = vmatpush3.bf16.msra.mxu1 %v1074_v39 }
 0x624   :  { %6883 = vmatprep.subr.bf16.mxu1 %v7385_v58 }
 0x62a   :  { %6880 = vmatmul.mubr.msk.bf16.vlgmr.msra.gmra.mrb[12].mxu1 %vm507_vm14, %v1059_v60 }
 0x62b   :  { %6884 = vmatpush3.bf16.msra.mxu1 %v7385_v58 }
 0x62c   :  { %6885 = vmatprep.subr.bf16.mxu1 %v7386_v40 }
 0x62f   :  { %6886 = vmatpush3.bf16.msra.mxu1 %v7386_v40 }
 0x6fd   :  { %v6881_v41 = vpop.f32.mrb[12].mxu1 }
 0x6fe   :  { %v1110_v44 = vpop.f32.mrb[13].mxu1  ;;  %v1132_v50 = vpack.c.bf16 %v6881_v41, %v6881_v41 }
 0x6ff   :  { %v6882_v14 = vpop.f32.mrb[14].mxu1 }
 0x700   :  { %v1113_v47 = vpop.f32.mrb[15].mxu1  ;;  %v6323_v14 = vld [vmem:[%s9687_s8 + $0x2b] ss:$0 sm:$0xff] }
 0x701   :  { %v1131_v48 = vpack.c.bf16 %v1113_v47, %v1110_v44 }
 0x703   :  { %6887 = vmatprep.mubr.msk.bf16.mxu1 %vm231_vm1, %v1131_v48 }
 0x704   :  { %6888 = vmatmul.mubr.msk.bf16.vlgmr.msra.gmra.mrb[16].mxu1 %vm231_vm1, %v1132_v50 }
 0x7d7   :  { %v6889_v12 = vpop.f32.mrb[16].mxu1 }
 0x7d8   :  { %v1201_v52 = vadd.f32 %v6889_v12, %v8019_v23  ;;  %v1185_v53 = vpop.f32.mrb[17].mxu1 }
 0x7d9   :  { %v1199_v54 = vadd.f32 %v1185_v53, %v8009_v11  ;;  %v6890_v55 = vpop.f32.mrb[18].mxu1 }
 0x7da   :  { %v8286_v34 = vadd.f32 %v6322_v51, %v1201_v52  ;;  %v1188_v56 = vpop.f32.mrb[19].mxu1 }
 0x7db   :  { %v1200_v57 = vadd.f32 %v1188_v56, %v8013_v18  ;;  %v8289_v62 = vadd.f32 %v6322_v51, %v1199_v54 }
 0x7dc   :  { %v1218_v63 = vsel %vm238_vm2, %v8286_v34, 0.0  ;;  %v1226_v11 = vmul.f32 %v8286_v34, %v8286_v34 }
 0x7dd   :  { %v8293_v0 = vadd.f32 %v6322_v51, %v1200_v57  ;;  %1219 = vadd.xlane.f32.xlu0 %v1218_v63  ;;  %v1212_v5 = vsel %vm231_vm1, %v8289_v62, 0.0  ;;  %v1224_v18 = vmul.f32 %v8289_v62, %v8289_v62  ;;  %v6324_v51 = vld [vmem:[%s9687_s8 + $0x2c] ss:$0 sm:$0xff] }
 0x7de   :  { %v1233_v43 = vsel %vm238_vm2, %v1226_v11, 0.0  ;;  %v7389_v11 = vld [vmem:[%s9685_s6] sm:$0xff]  }
 0x7df   :  { %v1215_v23 = vsel %vm231_vm1, %v8293_v0, 0.0  ;;  %v1227_v45 = vsel %vm231_vm1, %v1224_v18, 0.0  ;;  %v1225_v31 = vmul.f32 %v8293_v0, %v8293_v0  ;;  %6899 = vmatprep.subr.bf16.mxu1 %v7389_v11  ;;  %v7391_v18 = vld [vmem:[%s9685_s6 + $0x10] sm:$0xff]  }
 0x7e0   :  { %1216 = vadd.xlane.f32.xlu1 %v1215_v23  ;;  %6900 = vmatpush3.bf16.msra.mxu1 %v7389_v11  ;;  %v7393_v11 = vld [vmem:[%s9682_s3 + $0x10] sm:$0xff]  }
 0x7e1   :  { %1213 = vadd.xlane.f32.xlu0 %v1212_v5  ;;  %v1230_v46 = vsel %vm231_vm1, %v1225_v31, 0.0  ;;  %v7390_v5 = vld [vmem:[%s9685_s6 + $0x8] sm:$0xff]   ;;  %6911 = vmatprep.subr.bf16.mxu0 %v7393_v11 }
 0x7e2   :  { %6901 = vmatprep.subr.bf16.mxu1 %v7390_v5 }
 0x7e4   :  { %1234 = vadd.xlane.f32.xlu1 %v1233_v43  ;;  %6902 = vmatpush3.bf16.msra.mxu1 %v7390_v5  ;;  %v7392_v43 = vld [vmem:[%s9685_s6 + $0x18] sm:$0xff]  }
 0x7e5   :  { %1228 = vadd.xlane.f32.xlu0 %v1227_v45  ;;  %6903 = vmatprep.subr.bf16.mxu1 %v7391_v18  ;;  %v6325_v45 = vld [vmem:[%s9687_s8 + $0x2f] ss:$0 sm:$0xff]  ;;  %v7394_v5 = vld [vmem:[%s9682_s3 + $0x18] sm:$0xff]  }
 0x7e8   :  { %6904 = vmatpush3.bf16.msra.mxu1 %v7391_v18 }
 0x7e9   :  { %1231 = vadd.xlane.f32.xlu0 %v1230_v46  ;;  %6905 = vmatprep.subr.bf16.mxu1 %v7392_v43 }
 0x7ec   :  { %6906 = vmatpush3.bf16.msra.mxu1 %v7392_v43 }
 0x86a   :  { %v1220_v30 = vpop.xlane.xlu0 %1219 }
 0x86b   :  { %v1223_v7 = vmul.f32 0.03125, %v1220_v30 }
 0x86d   :  { %v1217_v4 = vpop.xlane.xlu1 %1216  ;;  %v1241_v10 = vmul.f32 %v1223_v7, %v1223_v7  ;;  %v1247_v2 = vsub.f32 %v8286_v34, %v1223_v7 }
 0x86e   :  { %v1214_v8 = vpop.xlane.xlu0 %1213  ;;  %v1222_v38 = vmul.f32 0.03125, %v1217_v4 }
 0x86f   :  { %v1221_v15 = vmul.f32 0.03125, %v1214_v8 }
 0x870   :  { %v1240_v16 = vmul.f32 %v1222_v38, %v1222_v38  ;;  %v1246_v48 = vsub.f32 %v8293_v0, %v1222_v38 }
 0x871   :  { %v1235_v19 = vpop.xlane.xlu1 %1234  ;;  %v1239_v27 = vmul.f32 %v1221_v15, %v1221_v15  ;;  %v1245_v40 = vsub.f32 %v8289_v62, %v1221_v15 }
 0x872   :  { %v1238_v59 = vmul.f32 0.03125, %v1235_v19  ;;  %v1229_v20 = vpop.xlane.xlu0 %1228 }
 0x873   :  { %v1236_v42 = vmul.f32 0.03125, %v1229_v20 }
 0x874   :  { %v1244_v32 = vsub.f32 %v1238_v59, %v1241_v10 }
 0x875   :  { %v1242_v33 = vsub.f32 %v1236_v42, %v1239_v27 }
 0x876   :  { %v1250_v36 = vadd.f32 1e-05, %v1244_v32  ;;  %v1232_v37 = vpop.xlane.xlu0 %1231 }
 0x877   :  { %v1248_v29 = vadd.f32 1e-05, %v1242_v33  ;;  %v1237_v39 = vmul.f32 0.03125, %v1232_v37 }
 0x878   :  { %7507 = vrsqrt.f32 %v1250_v36 }
 0x879   :  { %7509 = vrsqrt.f32 %v1248_v29  ;;  %v1243_v58 = vsub.f32 %v1237_v39, %v1240_v16 }
 0x87b   :  { %v1249_v25 = vadd.f32 1e-05, %v1243_v58 }
 0x87d   :  { %7511 = vrsqrt.f32 %v1249_v25 }
 0x882   :  { %v7508_v60 = vpop.eup %7507 }
 0x883   :  { %v7510_v41 = vpop.eup %7509  ;;  %v1256_v44 = vmul.f32 %v7508_v60, %v1247_v2 }
 0x884   :  { %v1254_v47 = vmul.f32 %v7510_v41, %v1245_v40  ;;  %v6339_v41 = vld [vmem:[%s9687_s8 + $0x2d] ss:$0 sm:$0xff] }
 0x885   :  { %v1263_v12 = vmul.f32 %v6323_v14, %v1256_v44 }
 0x886   :  { %v1261_v53 = vmul.f32 %v6323_v14, %v1254_v47 }
 0x887   :  { %v7512_v50 = vpop.eup %7511  ;;  %v1270_v55 = vadd.f32 %v6324_v51, %v1263_v12 }
 0x888   :  { %v1255_v52 = vmul.f32 %v7512_v50, %v1246_v48  ;;  %v1268_v56 = vadd.f32 %v6324_v51, %v1261_v53 }
 0x889   :  { %v1276_v23 = vpack.c.bf16 %v1270_v55, %v1270_v55 }
 0x88a   :  { %v1262_v54 = vmul.f32 %v6323_v14, %v1255_v52 }
 0x88c   :  { %v1269_v57 = vadd.f32 %v6324_v51, %v1262_v54 }
 0x88e   :  { %v1275_v63 = vpack.c.bf16 %v1269_v57, %v1268_v56 }
 0x890   :  { %6895 = vmatprep.mubr.msk.bf16.mxu0 %vm231_vm1, %v1275_v63 }
 0x891   :  { %6896 = vmatmul.mubr.msk.bf16.vlgmr.msra.gmra.mrb[16].mxu0 %vm231_vm1, %v1276_v23 }
 0x892   :  { %6912 = vmatpush3.bf16.msra.mxu0 %v7393_v11 }
 0x893   :  { %6913 = vmatprep.subr.bf16.mxu0 %v7394_v5 }
 0x896   :  { %6914 = vmatpush3.bf16.msra.mxu0 %v7394_v5 }
 0x964   :  { %v6897_v31 = vpop.f32.mrb[16].mxu0 }
 0x965   :  { %v1343_v46 = vadd.f32 %v6897_v31, %v6325_v45  ;;  %v1334_v6 = vpop.f32.mrb[17].mxu0 }
 0x966   :  { %v1335_v17 = vadd.f32 %v6325_v45, %v1334_v6  ;;  %v6898_v30 = vpop.f32.mrb[18].mxu0 }
 0x967   :  { %v6332_v4 = vmul.f32 -1.702, %v1343_v46  ;;  %v1337_v7 = vpop.f32.mrb[19].mxu0 }
 0x968   :  { %v6330_v8 = vmul.f32 -1.702, %v1335_v17  ;;  %v1338_v15 = vadd.f32 %v6325_v45, %v1337_v7 }
 0x969   :  { %v1358_v19 = vmul.f32 1.442695, %v6332_v4 }
 0x96a   :  { %v1354_v10 = vmul.f32 1.442695, %v6330_v8  ;;  %v6331_v59 = vmul.f32 -1.702, %v1338_v15 }
 0x96b   :  { %7513 = vpow2.f32 %v1358_v19 }
 0x96c   :  { %7515 = vpow2.f32 %v1354_v10  ;;  %v1356_v20 = vmul.f32 1.442695, %v6331_v59 }
 0x96e   :  { %7517 = vpow2.f32 %v1356_v20 }
 0x975   :  { %v7514_v38 = vpop.eup %7513 }
 0x976   :  { %v7516_v27 = vpop.eup %7515  ;;  %v1362_v42 = vadd.f32 1.0, %v7514_v38 }
 0x977   :  { %v1360_v32 = vadd.f32 1.0, %v7516_v27 }
 0x978   :  { %v7518_v33 = vpop.eup %7517  ;;  %7519 = vrcp.f32 %v1362_v42 }
 0x979   :  { %7521 = vrcp.f32 %v1360_v32  ;;  %v1361_v36 = vadd.f32 1.0, %v7518_v33 }
 0x97b   :  { %7523 = vrcp.f32 %v1361_v36 }
 0x982   :  { %v7520_v37 = vpop.eup %7519 }
 0x983   :  { %v7522_v16 = vpop.eup %7521  ;;  %v1371_v39 = vmul.f32 %v7520_v37, %v1343_v46 }
 0x984   :  { %v1369_v58 = vmul.f32 %v7522_v16, %v1335_v17 }
 0x985   :  { %v7524_v29 = vpop.eup %7523  ;;  %v1381_v60 = vpack.c.bf16 %v1371_v39, %v1371_v39 }
 0x986   :  { %v1370_v25 = vmul.f32 %v7524_v29, %v1338_v15  ;;  %v6340_v29 = vld [vmem:[%s9687_s8 + $0x30] ss:$0 sm:$0xff] }
 0x988   :  { %v1380_v2 = vpack.c.bf16 %v1370_v25, %v1369_v58  ;;  %v6341_v25 = vld [vmem:[%s9687_s8 + $0x31] ss:$0 sm:$0xff] }
 0x98a   :  { %6907 = vmatprep.mubr.msk.bf16.mxu1 %vm176_vm0, %v1380_v2 }
 0x98b   :  { %6908 = vmatmul.mubr.msk.bf16.vlgmr.msra.gmra.mrb[20].mxu1 %vm176_vm0, %v1381_v60 }
 0xa5e   :  { %v6909_v40 = vpop.f32.mrb[20].mxu1 }
 0xa5f   :  { %v1462_v44 = vadd.f32 %v6909_v40, %v8286_v34  ;;  %v1446_v14 = vpop.f32.mrb[21].mxu1 }
 0xa60   :  { %v1460_v47 = vadd.f32 %v1446_v14, %v8289_v62  ;;  %v6910_v48 = vpop.f32.mrb[22].mxu1 }
 0xa61   :  { %v8347_v50 = vadd.f32 %v6339_v41, %v1462_v44  ;;  %v1449_v12 = vpop.f32.mrb[23].mxu1 }
 0xa62   :  { %v8349_v51 = vadd.f32 %v6339_v41, %v1460_v47  ;;  %v1461_v52 = vadd.f32 %v1449_v12, %v8293_v0 }
 0xa63   :  { %v1479_v53 = vsel %vm238_vm2, %v8347_v50, 0.0  ;;  %v1487_v57 = vmul.f32 %v8347_v50, %v8347_v50 }
 0xa64   :  { %v8354_v54 = vadd.f32 %v6339_v41, %v1461_v52  ;;  %1480 = vadd.xlane.f32.xlu0 %v1479_v53  ;;  %v1485_v62 = vmul.f32 %v8349_v51, %v8349_v51  ;;  %v1473_v55 = vsel %vm231_vm1, %v8349_v51, 0.0 }
 0xa65   :  { %v1494_v23 = vsel %vm238_vm2, %v1487_v57, 0.0 }
 0xa66   :  { %v1476_v34 = vsel %vm231_vm1, %v8354_v54, 0.0  ;;  %v1486_v56 = vmul.f32 %v8354_v54, %v8354_v54  ;;  %v1488_v0 = vsel %vm231_vm1, %v1485_v62, 0.0  ;;  %v6346_v62 = vld [vmem:[%s9687_s8 + $0x36] ss:$0 sm:$0xff] }
 0xa67   :  { %1477 = vadd.xlane.f32.xlu1 %v1476_v34 }
 0xa68   :  { %1474 = vadd.xlane.f32.xlu0 %v1473_v55  ;;  %v1491_v63 = vsel %vm231_vm1, %v1486_v56, 0.0 }
 0xa6b   :  { %1489 = vadd.xlane.f32.xlu1 %v1488_v0 }
 0xa6c   :  { %1492 = vadd.xlane.f32.xlu0 %v1491_v63 }
 0xa6f   :  { %1495 = vadd.xlane.f32.xlu1 %v1494_v23 }
 0xaf1   :  { %v1481_v18 = vpop.xlane.xlu0 %1480 }
 0xaf2   :  { %v1484_v30 = vmul.f32 0.03125, %v1481_v18 }
 0xaf4   :  { %v1478_v43 = vpop.xlane.xlu1 %1477  ;;  %v1502_v20 = vmul.f32 %v1484_v30, %v1484_v30  ;;  %v1508_v60 = vsub.f32 %v8347_v50, %v1484_v30 }
 0xaf5   :  { %v1475_v45 = vpop.xlane.xlu0 %1474  ;;  %v1483_v31 = vmul.f32 0.03125, %v1478_v43 }
 0xaf6   :  { %v1482_v46 = vmul.f32 0.03125, %v1475_v45 }
 0xaf7   :  { %v1501_v8 = vmul.f32 %v1483_v31, %v1483_v31  ;;  %v1507_v16 = vsub.f32 %v8354_v54, %v1483_v31 }
 0xaf8   :  { %v1500_v6 = vmul.f32 %v1482_v46, %v1482_v46  ;;  %v1490_v17 = vpop.xlane.xlu1 %1489  ;;  %v1506_v36 = vsub.f32 %v8349_v51, %v1482_v46 }
 0xaf9   :  { %v1497_v4 = vmul.f32 0.03125, %v1490_v17  ;;  %v1493_v7 = vpop.xlane.xlu0 %1492 }
 0xafa   :  { %v1498_v15 = vmul.f32 0.03125, %v1493_v7 }
 0xafb   :  { %v1503_v19 = vsub.f32 %v1497_v4, %v1500_v6 }
 0xafc   :  { %v1504_v10 = vsub.f32 %v1498_v15, %v1501_v8  ;;  %v1496_v59 = vpop.xlane.xlu1 %1495 }
 0xafd   :  { %v1509_v38 = vadd.f32 1e-05, %v1503_v19  ;;  %v1499_v27 = vmul.f32 0.03125, %v1496_v59 }
 0xafe   :  { %v1510_v42 = vadd.f32 1e-05, %v1504_v10 }
 0xaff   :  { %7525 = vrsqrt.f32 %v1509_v38  ;;  %v1505_v32 = vsub.f32 %v1499_v27, %v1502_v20 }
 0xb00   :  { %7527 = vrsqrt.f32 %v1510_v42 }
 0xb01   :  { %v1511_v33 = vadd.f32 1e-05, %v1505_v32 }
 0xb03   :  { %7529 = vrsqrt.f32 %v1511_v33 }
 0xb09   :  { %v7526_v37 = vpop.eup %7525 }
 0xb0a   :  { %v7528_v39 = vpop.eup %7527  ;;  %v1515_v58 = vmul.f32 %v7526_v37, %v1506_v36 }
 0xb0b   :  { %v1516_v2 = vmul.f32 %v7528_v39, %v1507_v16 }
 0xb0c   :  { %v1522_v40 = vmul.f32 %v6340_v29, %v1515_v58 }
 0xb0d   :  { %v7530_v41 = vpop.eup %7529  ;;  %v1523_v44 = vmul.f32 %v6340_v29, %v1516_v2 }
 0xb0e   :  { %v1517_v14 = vmul.f32 %v7530_v41, %v1508_v60  ;;  %v1529_v47 = vadd.f32 %v6341_v25, %v1522_v40 }
 0xb0f   :  { %v1530_v48 = vadd.f32 %v6341_v25, %v1523_v44 }
 0xb10   :  { %v1524_v12 = vmul.f32 %v6340_v29, %v1517_v14 }
 0xb11   :  { %v1537_v52 = vpack.c.bf16 %v1530_v48, %v1529_v47 }
 0xb12   :  { %v1531_v53 = vadd.f32 %v6341_v25, %v1524_v12 }
 0xb13   :  { %6915 = vmatprep.mubr.msk.bf16.mxu0 %vm231_vm1, %v1537_v52 }
 0xb14   :  { %v1538_v34 = vpack.c.bf16 %v1531_v53, %v1531_v53 }
 0xb16   :  { %6916 = vmatmul.mubr.msk.bf16.vlgmr.msra.gmra.mrb[20].mxu0 %vm231_vm1, %v1538_v34 }
 0xbe9   :  { %v6917_v55 = vpop.f32.mrb[20].mxu0 }
 0xbea   :  { %v8389_v56 = vadd.f32 %v6917_v55, %v6346_v62  ;;  %v1596_v0 = vpop.f32.mrb[21].mxu0 }
 0xbeb   :  { %v1597_v57 = vadd.f32 %v6346_v62, %v1596_v0  ;;  %v6918_v63 = vpop.f32.mrb[22].mxu0 }
 0xbec   :  { %v1599_v23 = vpop.f32.mrb[23].mxu0  ;;  %v1614_v11 = vpack.c.bf16 %v8389_v56, %v8389_v56  ;;  %v1612_v40 = vmul.f32 0.35355338, %v8389_v56 }
 0xbed   :  { %v1600_v5 = vadd.f32 %v6346_v62, %v1599_v23  ;;  %v1610_v18 = vmul.f32 0.35355338, %v1597_v57  ;;  %v8397_v6 = vmul.f32 %v8145_v35, %v1597_v57  ;;  %v8410_v10 = vmul.f32 %v8203_v49, %v1597_v57 }
 0xbee   :  { %1624 = vrot.lane.b32.xlu1 %v1614_v11, %s7860_s23  ;;  %v8422_v36 = vmul.f32 %v8232_v3, %v1597_v57  ;;  %v8428_v16 = vmul.f32 %v8229_v61, %v1597_v57  ;;  %v1617_v44 = vmul.f32 %v8061_v24, %v1612_v40  ;;  %v1728_v14 = vmul.f32 %v8070_v28, %v1612_v40 }
 0xbef   :  { %v1613_v43 = vpack.c.bf16 %v1600_v5, %v1597_v57  ;;  %v1611_v45 = vmul.f32 0.35355338, %v1600_v5  ;;  %v1615_v31 = vmul.f32 %v8061_v24, %v1610_v18  ;;  %v1726_v46 = vmul.f32 %v8070_v28, %v1610_v18 }
 0xbf0   :  { %v1953_v4 = vmul.f32 %v8058_v22, %v1610_v18  ;;  %v2119_v8 = vmul.f32 %v8066_v26, %v1610_v18  ;;  %v8407_v19 = vmul.f32 %v8145_v35, %v1600_v5  ;;  %v8413_v27 = vmul.f32 %v8203_v49, %v1600_v5 }
 0xbf1   :  { %1622 = vrot.lane.b32.xlu0 %v1613_v43, %s7860_s23  ;;  %v1616_v17 = vmul.f32 %v8061_v24, %v1611_v45  ;;  %v1727_v30 = vmul.f32 %v8070_v28, %v1611_v45  ;;  %v1954_v7 = vmul.f32 %v8058_v22, %v1611_v45  ;;  %v2120_v15 = vmul.f32 %v8066_v26, %v1611_v45 }
 0xbf2   :  { %v1821_v32 = vpack.c.bf16 %v8407_v19, %v8397_v6  ;;  %v1722_v33 = vpack.c.bf16 %v8413_v27, %v8410_v10  ;;  %v8425_v37 = vmul.f32 %v8232_v3, %v1600_v5  ;;  %v8431_v29 = vmul.f32 %v8229_v61, %v1600_v5 }
 0xbf3   :  { %v1618_v59 = vpack.c.bf16 %v1616_v17, %v1615_v31  ;;  %v1729_v20 = vpack.c.bf16 %v1727_v30, %v1726_v46  ;;  %v1956_v38 = vpack.c.bf16 %v1954_v7, %v1953_v4  ;;  %v2122_v42 = vpack.c.bf16 %v2120_v15, %v2119_v8 }
 0xbf4   :  { %v2214_v39 = vpack.c.bf16 %v8425_v37, %v8422_v36  ;;  %v2048_v58 = vpack.c.bf16 %v8431_v29, %v8428_v16  ;;  %v1619_v47 = vpack.c.bf16 %v1617_v44, %v1617_v44  ;;  %v1730_v48 = vpack.c.bf16 %v1728_v14, %v1728_v14 }
 0xbf5   :  { %6923 = vmatprep.mubr.msk.bf16.mxu0 %vm231_vm1, %v1618_v59  ;;  %6931 = vmatprep.mubr.msk.bf16.mxu1 %vm231_vm1, %v1729_v20  ;;  %v1955_v12 = vmul.f32 %v8058_v22, %v1612_v40  ;;  %v2121_v53 = vmul.f32 %v8066_v26, %v1612_v40  ;;  %v1820_v20 = vmul.f32 %v8145_v35, %v8389_v56 }
 0xbf6   :  { %v1721_v6 = vmul.f32 %v8203_v49, %v8389_v56 }
 0xbf7   :  { %v1957_v52 = vpack.c.bf16 %v1955_v12, %v1955_v12  ;;  %v2123_v34 = vpack.c.bf16 %v2121_v53, %v2121_v53 }
 0xbf8   :  { %v1723_v19 = vpack.c.bf16 %v1721_v6, %v1721_v6 }
 0xc60   :  { %v1625_v60 = vpop.permute.xlu1 %1624 }
 0xc61   :  { %v1636_v41 = vsel %vm231_vm1, %v1625_v60, 0 }
 0xc63   :  { %v1623_v25 = vpop.permute.xlu0 %1622 }
 0xc64   :  { %7325 = vmatprep.subr.msk.bf16.mxu0 %vm231_vm1, %v1623_v25  ;;  %7327 = vmatprep.subr.msk.bf16.mxu1 %vm231_vm1, %v1623_v25  ;;  %v1633_v2 = vsel %vm231_vm1, %v1623_v25, 0 }
 0xc65   :  { %6920 = vmatpush3.bf16.xpose.msra.mxu0 %v1633_v2  ;;  %6928 = vmatpush3.bf16.xpose.msra.mxu1 %v1633_v2 }
 0xc66   :  { %7326 = vmatprep.subr.msk.bf16.mxu0 %vm231_vm1, %v1625_v60  ;;  %7328 = vmatprep.subr.msk.bf16.mxu1 %vm231_vm1, %v1625_v60 }
 0xc6d   :  { %6922 = vmatpush3.bf16.xpose.msra.mxu0 %v1636_v41  ;;  %6930 = vmatpush3.bf16.xpose.msra.mxu1 %v1636_v41 }
 0xc6e   :  { %7329 = vmatprep.subr.msk.bf16.mxu1 %vm231_vm1, %v1623_v25 }
 0xc74   :  { %6924 = vmatmul.mubr.msk.bf16.vlgmr.msra.gmra.mrb[24].mxu0 %vm231_vm1, %v1619_v47  ;;  %6932 = vmatmul.mubr.msk.bf16.vlgmr.msra.gmra.mrb[24].mxu1 %vm231_vm1, %v1730_v48 }
 0xc75   :  { %6952 = vmatpush3.bf16.xpose.msra.mxu1 %v1633_v2  ;;  %6955 = vmatprep.mubr.msk.bf16.mxu1 %vm231_vm1, %v1956_v38  ;;  %v1822_v38 = vpack.c.bf16 %v1820_v20, %v1820_v20 }
 0xc76   :  { %7330 = vmatprep.subr.msk.bf16.mxu1 %vm231_vm1, %v1625_v60 }
 0xc7d   :  { %6954 = vmatpush3.bf16.xpose.msra.mxu1 %v1636_v41 }
 0xc7e   :  { %7331 = vmatprep.subr.msk.bf16.mxu1 %vm231_vm1, %v1623_v25 }
 0xc84   :  { %6956 = vmatmul.mubr.msk.bf16.vlgmr.msra.gmra.mrb[28].mxu1 %vm231_vm1, %v1957_v52 }
 0xc85   :  { %6968 = vmatpush3.bf16.xpose.msra.mxu1 %v1633_v2  ;;  %6971 = vmatprep.mubr.msk.bf16.mxu1 %vm231_vm1, %v2122_v42 }
 0xc86   :  { %7332 = vmatprep.subr.msk.bf16.mxu1 %vm231_vm1, %v1625_v60 }
 0xc8d   :  { %6970 = vmatpush3.bf16.xpose.msra.mxu1 %v1636_v41 }
 0xc94   :  { %6972 = vmatmul.mubr.msk.bf16.vlgmr.msra.gmra.mrb[32].mxu1 %vm231_vm1, %v2123_v34 }
 0xd47   :  { %v6925_v62 = vpop.f32.mrb[24].mxu0  ;;  %v6933_v55 = vpop.f32.mrb[24].mxu1 }
 0xd48   :  { %v8458_v0 = vpop.f32.mrb[25].mxu0  ;;  %v1771_v57 = vpop.f32.mrb[25].mxu1  ;;  %v1791_v63 = vsel %vm514_vm13, %v6933_v55, -inf  ;;  %v1692_v23 = vsel %vm514_vm13, %v6925_v62, -inf }
 0xd49   :  { %1792 = vmax.xlane.f32.xlu0 %v1791_v63  ;;  %v6934_v11 = vpop.f32.mrb[26].mxu1  ;;  %1693 = vmax.xlane.f32.xlu1 %v1692_v23  ;;  %v6926_v5 = vpop.f32.mrb[26].mxu0  ;;  %v1785_v31 = vsel %vm507_vm14, %v1771_v57, -inf  ;;  %v1686_v46 = vsel %vm507_vm14, %v8458_v0, -inf }
 0xd4a   :  { %v1675_v18 = vpop.f32.mrb[27].mxu0  ;;  %v1774_v43 = vpop.f32.mrb[27].mxu1 }
 0xd4b   :  { %v1788_v45 = vsel %vm507_vm14, %v1774_v43, -inf  ;;  %v1689_v17 = vsel %vm507_vm14, %v1675_v18, -inf }
 0xd4d   :  { %1789 = vmax.xlane.f32.xlu0 %v1788_v45  ;;  %1786 = vmax.xlane.f32.xlu1 %v1785_v31 }
 0xd51   :  { %1687 = vmax.xlane.f32.xlu1 %v1686_v46  ;;  %1690 = vmax.xlane.f32.xlu0 %v1689_v17 }
 0xd57   :  { %v6957_v30 = vpop.f32.mrb[28].mxu1 }
 0xd58   :  { %v8467_v4 = vpop.f32.mrb[29].mxu1  ;;  %v2018_v7 = vsel %vm514_vm13, %v6957_v30, -inf }
 0xd59   :  { %v6958_v8 = vpop.f32.mrb[30].mxu1  ;;  %2019 = vmax.xlane.f32.xlu0 %v2018_v7  ;;  %v2012_v59 = vsel %vm507_vm14, %v8467_v4, -inf }
 0xd5a   :  { %v8470_v15 = vpop.f32.mrb[31].mxu1 }
 0xd5b   :  { %v2015_v40 = vsel %vm507_vm14, %v8470_v15, -inf }
 0xd5d   :  { %2013 = vmax.xlane.f32.xlu0 %v2012_v59 }
 0xd62   :  { %1829 = vrot.lane.b32.xlu1 %v1822_v38, %s7861_s24 }
 0xd67   :  { %v8477_v42 = vpop.f32.mrb[32].mxu1 }
 0xd68   :  { %v8479_v25 = vpop.f32.mrb[33].mxu1  ;;  %v2184_v41 = vsel %vm514_vm13, %v8477_v42, -inf }
 0xd69   :  { %v6974_v2 = vpop.f32.mrb[34].mxu1  ;;  %v2178_v44 = vsel %vm507_vm14, %v8479_v25, -inf }
 0xd6a   :  { %v8481_v60 = vpop.f32.mrb[35].mxu1 }
 0xd6b   :  { %v2181_v14 = vsel %vm507_vm14, %v8481_v60, -inf }
 0xd73   :  { %1827 = vrot.lane.b32.xlu0 %v1821_v32, %s7861_s24 }
 0xd86   :  { %2016 = vmax.xlane.f32.xlu1 %v2015_v40 }
 0xd8a   :  { %2185 = vmax.xlane.f32.xlu1 %v2184_v41 }
 0xd8e   :  { %2179 = vmax.xlane.f32.xlu1 %v2178_v44 }
 0xd92   :  { %2182 = vmax.xlane.f32.xlu0 %v2181_v14 }
 0xd9f   :  { %1891 = vrot.lane.b32.xlu1 %v1722_v33, %s7861_s24 }
 0xda8   :  { %1893 = vrot.lane.b32.xlu0 %v1723_v19, %s7861_s24 }
 0xdd6   :  { %v1793_v32 = vpop.xlane.xlu0 %1792  ;;  %v1694_v47 = vpop.xlane.xlu1 %1693 }
 0xdd7   :  { %v1796_v48 = vsub.f32 %v6933_v55, %v1793_v32  ;;  %v1697_v12 = vsub.f32 %v6925_v62, %v1694_v47 }
 0xdd9   :  { %v1801_v52 = vmul.f32 1.442695, %v1796_v48  ;;  %v1702_v53 = vmul.f32 1.442695, %v1697_v12 }
 0xdda   :  { %v1790_v34 = vpop.xlane.xlu0 %1789  ;;  %v1787_v63 = vpop.xlane.xlu1 %1786 }
 0xddb   :  { %7531 = vpow2.f32 %v1801_v52  ;;  %v1794_v23 = vsub.f32 %v1771_v57, %v1787_v63  ;;  %v1795_v11 = vsub.f32 %v1774_v43, %v1790_v34 }
 0xddc   :  { %7533 = vpow2.f32 %v1702_v53 }
 0xddd   :  { %v1797_v10 = vmul.f32 1.442695, %v1794_v23  ;;  %v1799_v31 = vmul.f32 1.442695, %v1795_v11 }
 0xdde   :  { %v1688_v27 = vpop.xlane.xlu1 %1687  ;;  %v1691_v33 = vpop.xlane.xlu0 %1690 }
 0xddf   :  { %v1695_v5 = vsub.f32 %v8458_v0, %v1688_v27  ;;  %v1696_v45 = vsub.f32 %v1675_v18, %v1691_v33  ;;  %7535 = vpow2.f32 %v1797_v10 }
 0xde1   :  { %v1698_v46 = vmul.f32 1.442695, %v1695_v5  ;;  %v1700_v17 = vmul.f32 1.442695, %v1696_v45 }
 0xde2   :  { %v1830_v2 = vpop.permute.xlu1 %1829 }
 0xde3   :  { %7537 = vpow2.f32 %v1698_v46  ;;  %v1839_v19 = vand.u32 %v1830_v2, %v8185_v13 }
 0xde4   :  { %7539 = vpow2.f32 %v1700_v17 }
 0xde5   :  { %v8503_v62 = vpop.eup %7531  ;;  %7541 = vpow2.f32 %v1799_v31 }
 0xde6   :  { %v8505_v55 = vpop.eup %7533  ;;  %v2020_v57 = vpop.xlane.xlu0 %2019  ;;  %v1809_v43 = vsel %vm514_vm13, %v8503_v62, 0.0 }
 0xde7   :  { %v2023_v7 = vsub.f32 %v6957_v30, %v2020_v57  ;;  %v1710_v0 = vsel %vm514_vm13, %v8505_v55, 0.0  ;;  %1810 = vadd.xlane.f32.xlu0 %v1809_v43 }
 0xde8   :  { %1711 = vadd.xlane.f32.xlu1 %v1710_v0 }
 0xde9   :  { %v2028_v18 = vmul.f32 1.442695, %v2023_v7  ;;  %v8511_v8 = vpop.eup %7535 }
 0xdea   :  { %v2014_v59 = vpop.xlane.xlu0 %2013  ;;  %v1803_v38 = vsel %vm507_vm14, %v8511_v8, 0.0 }
 0xdeb   :  { %7543 = vpow2.f32 %v2028_v18  ;;  %v2021_v20 = vsub.f32 %v8467_v4, %v2014_v59  ;;  %1804 = vadd.xlane.f32.xlu0 %v1803_v38  ;;  %v2047_v18 = vmul.f32 %v8229_v61, %v8389_v56 }
 0xded   :  { %v8516_v40 = vpop.eup %7537  ;;  %v2024_v30 = vmul.f32 1.442695, %v2021_v20  ;;  %v2049_v59 = vpack.c.bf16 %v2047_v18, %v2047_v18  ;;  %v2213_v20 = vmul.f32 %v8232_v3, %v8389_v56 }
 0xdee   :  { %v8518_v41 = vpop.eup %7539  ;;  %v1828_v44 = vpop.permute.xlu0 %1827  ;;  %v1704_v14 = vsel %vm507_vm14, %v8516_v40, 0.0 }
 0xdef   :  { %v8522_v6 = vpop.eup %7541  ;;  %7545 = vpow2.f32 %v2024_v30  ;;  %1705 = vadd.xlane.f32.xlu1 %v1704_v14  ;;  %v1707_v4 = vsel %vm507_vm14, %v8518_v41, 0.0  ;;  %6935 = vmatprep.subr.bf16.mxu0 %v1828_v44  ;;  %v2215_v38 = vpack.c.bf16 %v2213_v20, %v2213_v20 }
 0xdf0   :  { %1708 = vadd.xlane.f32.xlu0 %v1707_v4  ;;  %6936 = vmatpush3.bf16.msra.mxu0 %v1828_v44  ;;  %v1806_v32 = vsel %vm507_vm14, %v8522_v6, 0.0 }
 0xdf1   :  { %6937 = vmatprep.subr.bf16.mxu0 %v1839_v19 }
 0xdf3   :  { %1807 = vadd.xlane.f32.xlu1 %v1806_v32 }
 0xdf4   :  { %6938 = vmatpush3.bf16.msra.mxu0 %v1839_v19 }
 0xdf5   :  { %v8529_v47 = vpop.eup %7543 }
 0xdf6   :  { %v2036_v48 = vsel %vm514_vm13, %v8529_v47, 0.0 }
 0xdf7   :  { %2037 = vadd.xlane.f32.xlu0 %v2036_v48 }
 0xdf9   :  { %v8533_v12 = vpop.eup %7545 }
 0xdfa   :  { %v2030_v52 = vsel %vm507_vm14, %v8533_v12, 0.0 }
 0xdfb   :  { %2031 = vadd.xlane.f32.xlu1 %v2030_v52 }
 0xe13   :  { %v2017_v53 = vpop.xlane.xlu1 %2016 }
 0xe14   :  { %v2022_v34 = vsub.f32 %v8470_v15, %v2017_v53 }
 0xe16   :  { %v2026_v63 = vmul.f32 1.442695, %v2022_v34 }
 0xe17   :  { %v2186_v23 = vpop.xlane.xlu1 %2185 }
 0xe18   :  { %7547 = vpow2.f32 %v2026_v63  ;;  %v2189_v11 = vsub.f32 %v8477_v42, %v2186_v23 }
 0xe1a   :  { %v2194_v10 = vmul.f32 1.442695, %v2189_v11 }
 0xe1b   :  { %v2180_v27 = vpop.xlane.xlu1 %2179 }
 0xe1c   :  { %7549 = vpow2.f32 %v2194_v10  ;;  %v2187_v33 = vsub.f32 %v8479_v25, %v2180_v27 }
 0xe1e   :  { %v2190_v5 = vmul.f32 1.442695, %v2187_v33 }
 0xe1f   :  { %v1892_v45 = vpop.permute.xlu1 %1891  ;;  %v2183_v31 = vpop.xlane.xlu0 %2182 }
 0xe20   :  { %7551 = vpow2.f32 %v2190_v5  ;;  %v2188_v46 = vsub.f32 %v8481_v60, %v2183_v31  ;;  %6943 = vmatprep.subr.bf16.mxu0 %v1892_v45 }
 0xe22   :  { %v8541_v17 = vpop.eup %7547  ;;  %v2192_v15 = vmul.f32 1.442695, %v2188_v46 }
 0xe23   :  { %v2033_v57 = vsel %vm507_vm14, %v8541_v17, 0.0  ;;  %v1894_v2 = vpop.permute.xlu0 %1893 }
 0xe24   :  { %7553 = vpow2.f32 %v2192_v15  ;;  %2034 = vadd.xlane.f32.xlu0 %v2033_v57  ;;  %v1903_v11 = vand.u32 %v1894_v2, %v8185_v13 }
 0xe26   :  { %v8545_v42 = vpop.eup %7549 }
 0xe27   :  { %v2202_v25 = vsel %vm514_vm13, %v8545_v42, 0.0 }
 0xe28   :  { %2203 = vadd.xlane.f32.xlu1 %v2202_v25 }
 0xe2a   :  { %v8549_v43 = vpop.eup %7551 }
 0xe2b   :  { %v2196_v60 = vsel %vm507_vm14, %v8549_v43, 0.0 }
 0xe2c   :  { %2197 = vadd.xlane.f32.xlu1 %v2196_v60 }
 0xe2e   :  { %v8553_v7 = vpop.eup %7553 }
 0xe2f   :  { %v2199_v0 = vsel %vm507_vm14, %v8553_v7, 0.0 }
 0xe30   :  { %2200 = vadd.xlane.f32.xlu0 %v2199_v0 }
 0xe3d   :  { %2056 = vrot.lane.b32.xlu1 %v2049_v59, %s7861_s24 }
 0xe41   :  { %2220 = vrot.lane.b32.xlu1 %v2214_v39, %s7861_s24 }
 0xe45   :  { %2222 = vrot.lane.b32.xlu1 %v2215_v38, %s7861_s24 }
 0xe46   :  { %2054 = vrot.lane.b32.xlu0 %v2048_v58, %s7861_s24 }
 0xe74   :  { %v1811_v30 = vpop.xlane.xlu0 %1810 }
 0xe75   :  { %v1712_v44 = vpop.xlane.xlu1 %1711  ;;  %7555 = vrcp.f32 %v1811_v30 }
 0xe78   :  { %v1805_v14 = vpop.xlane.xlu0 %1804 }
 0xe79   :  { %7557 = vrcp.f32 %v1805_v14 }
 0xe7c   :  { %v1706_v19 = vpop.xlane.xlu1 %1705 }
 0xe7d   :  { %v1709_v56 = vpop.xlane.xlu0 %1708  ;;  %7559 = vrcp.f32 %v1706_v19 }
 0xe7e   :  { %7561 = vrcp.f32 %v1709_v56 }
 0xe7f   :  { %v7556_v37 = vpop.eup %7555 }
 0xe80   :  { %v1808_v36 = vpop.xlane.xlu1 %1807  ;;  %v1817_v16 = vmul.f32 %v7556_v37, %v8503_v62 }
 0xe81   :  { %7563 = vrcp.f32 %v1808_v36 }
 0xe82   :  { %7565 = vrcp.f32 %v1712_v44  ;;  %v1824_v63 = vpack.c.bf16 %v1817_v16, %v1817_v16  ;;  %v6375_v16 = vld [vmem:[%s9687_s8 + $0x32] ss:$0 sm:$0xff] }
 0xe83   :  { %v7558_v39 = vpop.eup %7557 }
 0xe84   :  { %v1815_v29 = vmul.f32 %v7558_v39, %v8511_v8 }
 0xe87   :  { %v7560_v4 = vpop.eup %7559 }
 0xe88   :  { %v7562_v32 = vpop.eup %7561  ;;  %v1716_v52 = vmul.f32 %v7560_v4, %v8516_v40 }
 0xe89   :  { %v1717_v53 = vmul.f32 %v7562_v32, %v8518_v41  ;;  %v2038_v41 = vpop.xlane.xlu0 %2037 }
 0xe8b   :  { %v7564_v48 = vpop.eup %7563  ;;  %v1724_v23 = vpack.c.bf16 %v1717_v53, %v1716_v52 }
 0xe8c   :  { %v1816_v58 = vmul.f32 %v7564_v48, %v8522_v6  ;;  %v7566_v62 = vpop.eup %7565  ;;  %v2032_v6 = vpop.xlane.xlu1 %2031 }
 0xe8d   :  { %v1718_v8 = vmul.f32 %v7566_v62, %v8505_v55  ;;  %7567 = vrcp.f32 %v2032_v6 }
 0xe8e   :  { %v1823_v34 = vpack.c.bf16 %v1816_v58, %v1815_v29 }
 0xe8f   :  { %v1725_v40 = vpack.c.bf16 %v1718_v8, %v1718_v8 }
 0xe90   :  { %6939 = vmatprep.mubr.msk.bf16.mxu0 %vm507_vm14, %v1823_v34 }
 0xe91   :  { %6940 = vmatmul.mubr.msk.bf16.vlgmr.msra.gmra.mrb[28].mxu0 %vm507_vm14, %v1824_v63 }
 0xe92   :  { %6944 = vmatpush3.bf16.msra.mxu0 %v1892_v45  ;;  %6947 = vmatprep.mubr.msk.bf16.mxu0 %vm507_vm14, %v1724_v23 }
 0xe93   :  { %6945 = vmatprep.subr.bf16.mxu0 %v1903_v11 }
 0xe96   :  { %6946 = vmatpush3.bf16.msra.mxu0 %v1903_v11 }
 0xe97   :  { %v7568_v5 = vpop.eup %7567 }
 0xe98   :  { %v2042_v15 = vmul.f32 %v7568_v5, %v8533_v12  ;;  %v7398_v5 = vld [vmem:[%s9684_s5 + $0x18] sm:$0xff]  }
 0xe9d   :  { %6948 = vmatmul.mubr.msk.bf16.vlgmr.msra.gmra.mrb[28].mxu0 %vm507_vm14, %v1725_v40 }
 0xeb1   :  { %v2035_v10 = vpop.xlane.xlu0 %2034 }
 0xeb2   :  { %7569 = vrcp.f32 %v2035_v10 }
 0xeb3   :  { %7571 = vrcp.f32 %v2038_v41 }
 0xeb5   :  { %v2204_v27 = vpop.xlane.xlu1 %2203 }
 0xeb9   :  { %v2198_v33 = vpop.xlane.xlu1 %2197 }
 0xeba   :  { %7573 = vrcp.f32 %v2198_v33  ;;  %v7397_v33 = vld [vmem:[%s9684_s5 + $0x10] sm:$0xff]  }
 0xebb   :  { %6991 = vmatprep.subr.bf16.mxu1 %v7397_v33 }
 0xebc   :  { %v7570_v45 = vpop.eup %7569  ;;  %6992 = vmatpush3.bf16.msra.mxu1 %v7397_v33 }
 0xebd   :  { %v2057_v31 = vpop.permute.xlu1 %2056  ;;  %v2201_v46 = vpop.xlane.xlu0 %2200  ;;  %v2043_v55 = vmul.f32 %v7570_v45, %v8541_v17  ;;  %6993 = vmatprep.subr.bf16.mxu1 %v7398_v5 }
 0xebe   :  { %7575 = vrcp.f32 %v2201_v46  ;;  %v7572_v25 = vpop.eup %7571  ;;  %v2066_v18 = vand.u32 %v2057_v31, %v8185_v13 }
 0xebf   :  { %v2050_v57 = vpack.c.bf16 %v2043_v55, %v2042_v15  ;;  %7577 = vrcp.f32 %v2204_v27  ;;  %v2044_v59 = vmul.f32 %v7572_v25, %v8529_v47  ;;  %v7395_v47 = vld [vmem:[%s9683_s4 + $0x10] sm:$0xff]  }
 0xec0   :  { %6994 = vmatpush3.bf16.msra.mxu1 %v7398_v5 }
 0xec1   :  { %v2221_v60 = vpop.permute.xlu1 %2220  ;;  %6963 = vmatprep.mubr.msk.bf16.mxu0 %vm507_vm14, %v2050_v57  ;;  %v2055_v0 = vpop.permute.xlu0 %2054  ;;  %v2051_v17 = vpack.c.bf16 %v2044_v59, %v2044_v59  ;;  %7011 = vmatprep.subr.bf16.mxu1 %v7859_v21 }
 0xec2   :  { %6959 = vmatprep.subr.bf16.mxu0 %v2055_v0 }
 0xec3   :  { %6960 = vmatpush3.bf16.msra.mxu0 %v2055_v0 }
 0xec4   :  { %6961 = vmatprep.subr.bf16.mxu0 %v2066_v18  ;;  %v7574_v20 = vpop.eup %7573 }
 0xec5   :  { %v2223_v38 = vpop.permute.xlu1 %2222  ;;  %v2208_v2 = vmul.f32 %v7574_v20, %v8549_v43 }
 0xec6   :  { %v2232_v44 = vand.u32 %v2223_v38, %v8185_v13 }
 0xec7   :  { %6962 = vmatpush3.bf16.msra.mxu0 %v2066_v18 }
 0xec8   :  { %v7576_v12 = vpop.eup %7575  ;;  %6975 = vmatprep.subr.bf16.mxu0 %v2221_v60 }
 0xec9   :  { %v2209_v30 = vmul.f32 %v7576_v12, %v8553_v7  ;;  %v7578_v19 = vpop.eup %7577  ;;  %v7396_v7 = vld [vmem:[%s9683_s4 + $0x18] sm:$0xff]  }
 0xeca   :  { %6964 = vmatmul.mubr.msk.bf16.vlgmr.msra.gmra.mrb[28].mxu0 %vm507_vm14, %v2051_v17  ;;  %v2210_v56 = vmul.f32 %v7578_v19, %v8545_v42 }
 0xecb   :  { %6976 = vmatpush3.bf16.msra.mxu0 %v2221_v60  ;;  %v2216_v14 = vpack.c.bf16 %v2209_v30, %v2208_v2 }
 0xecc   :  { %6977 = vmatprep.subr.bf16.mxu0 %v2232_v44  ;;  %v2217_v43 = vpack.c.bf16 %v2210_v56, %v2210_v56 }
 0xecd   :  { %6979 = vmatprep.mubr.msk.bf16.mxu0 %vm507_vm14, %v2216_v14 }
 0xecf   :  { %6978 = vmatpush3.bf16.msra.mxu0 %v2232_v44 }
 0xed0   :  { %6983 = vmatprep.subr.bf16.mxu0 %v7395_v47 }
 0xed6   :  { %6980 = vmatmul.mubr.msk.bf16.vlgmr.msra.gmra.mrb[28].mxu0 %vm507_vm14, %v2217_v43 }
 0xed7   :  { %6984 = vmatpush3.bf16.msra.mxu0 %v7395_v47 }
 0xed8   :  { %6985 = vmatprep.subr.bf16.mxu0 %v7396_v7 }
 0xedb   :  { %6986 = vmatpush3.bf16.msra.mxu0 %v7396_v7 }
 0xfa9   :  { %v6981_v36 = vpop.f32.mrb[28].mxu0 }
 0xfaa   :  { %v2268_v37 = vpop.f32.mrb[29].mxu0  ;;  %v2291_v48 = vpack.c.bf16 %v6981_v36, %v6981_v36 }
 0xfab   :  { %v6982_v39 = vpop.f32.mrb[30].mxu0 }
 0xfac   :  { %v2271_v4 = vpop.f32.mrb[31].mxu0  ;;  %v6376_v39 = vld [vmem:[%s9687_s8 + $0x33] ss:$0 sm:$0xff] }
 0xfad   :  { %v2290_v32 = vpack.c.bf16 %v2271_v4, %v2268_v37 }
 0xfaf   :  { %6987 = vmatprep.mubr.msk.bf16.mxu0 %vm231_vm1, %v2290_v32 }
 0xfb0   :  { %6988 = vmatmul.mubr.msk.bf16.vlgmr.msra.gmra.mrb[32].mxu0 %vm231_vm1, %v2291_v48 }
0x1083   :  { %v6989_v42 = vpop.f32.mrb[32].mxu0 }
0x1084   :  { %v2360_v29 = vadd.f32 %v6989_v42, %v8347_v50  ;;  %v2344_v58 = vpop.f32.mrb[33].mxu0 }
0x1085   :  { %v2358_v52 = vadd.f32 %v2344_v58, %v8349_v51  ;;  %v6990_v53 = vpop.f32.mrb[34].mxu0 }
0x1086   :  { %v8607_v34 = vadd.f32 %v6375_v16, %v2360_v29  ;;  %v2347_v63 = vpop.f32.mrb[35].mxu0 }
0x1087   :  { %v2359_v23 = vadd.f32 %v2347_v63, %v8354_v54  ;;  %v8610_v11 = vadd.f32 %v6375_v16, %v2358_v52 }
0x1088   :  { %v2377_v62 = vsel %vm238_vm2, %v8607_v34, 0.0  ;;  %v2385_v51 = vmul.f32 %v8607_v34, %v8607_v34 }
0x1089   :  { %v8614_v8 = vadd.f32 %v6375_v16, %v2359_v23  ;;  %2378 = vadd.xlane.f32.xlu0 %v2377_v62  ;;  %v2371_v40 = vsel %vm231_vm1, %v8610_v11, 0.0  ;;  %v2383_v54 = vmul.f32 %v8610_v11, %v8610_v11  ;;  %v6377_v16 = vld [vmem:[%s9687_s8 + $0x34] ss:$0 sm:$0xff] }
0x108a   :  { %v2392_v41 = vsel %vm238_vm2, %v2385_v51, 0.0  ;;  %v7399_v51 = vld [vmem:[%s9685_s6 + $0x20] sm:$0xff]  }
0x108b   :  { %v2374_v50 = vsel %vm231_vm1, %v8614_v8, 0.0  ;;  %v2386_v6 = vsel %vm231_vm1, %v2383_v54, 0.0  ;;  %v2384_v10 = vmul.f32 %v8614_v8, %v8614_v8  ;;  %6999 = vmatprep.subr.bf16.mxu0 %v7399_v51  ;;  %v7401_v54 = vld [vmem:[%s9685_s6 + $0x30] sm:$0xff]  }
0x108c   :  { %2375 = vadd.xlane.f32.xlu1 %v2374_v50  ;;  %7000 = vmatpush3.bf16.msra.mxu0 %v7399_v51 }
0x108d   :  { %2372 = vadd.xlane.f32.xlu0 %v2371_v40  ;;  %v2389_v27 = vsel %vm231_vm1, %v2384_v10, 0.0  ;;  %v7400_v40 = vld [vmem:[%s9685_s6 + $0x28] sm:$0xff]  }
0x108e   :  { %7001 = vmatprep.subr.bf16.mxu0 %v7400_v40 }
0x1090   :  { %2393 = vadd.xlane.f32.xlu1 %v2392_v41  ;;  %7002 = vmatpush3.bf16.msra.mxu0 %v7400_v40  ;;  %v7402_v41 = vld [vmem:[%s9685_s6 + $0x38] sm:$0xff]  }
0x1091   :  { %2387 = vadd.xlane.f32.xlu0 %v2386_v6  ;;  %7003 = vmatprep.subr.bf16.mxu0 %v7401_v54  ;;  %v6382_v6 = vld [vmem:[%s9687_s8 + $0x37] ss:$0 sm:$0xff] }
0x1094   :  { %7004 = vmatpush3.bf16.msra.mxu0 %v7401_v54 }
0x1095   :  { %2390 = vadd.xlane.f32.xlu0 %v2389_v27  ;;  %7005 = vmatprep.subr.bf16.mxu0 %v7402_v41 }
0x1098   :  { %7006 = vmatpush3.bf16.msra.mxu0 %v7402_v41 }
0x1099   :  { %7027 = vmatprep.subr.bf16.mxu0 %v7859_v21 }
0x1116   :  { %v2379_v45 = vpop.xlane.xlu0 %2378 }
0x1117   :  { %v2382_v46 = vmul.f32 0.03125, %v2379_v45 }
0x1119   :  { %v2376_v31 = vpop.xlane.xlu1 %2375  ;;  %v2400_v25 = vmul.f32 %v2382_v46, %v2382_v46  ;;  %v2406_v56 = vsub.f32 %v8607_v34, %v2382_v46 }
0x111a   :  { %v2373_v15 = vpop.xlane.xlu0 %2372  ;;  %v2381_v18 = vmul.f32 0.03125, %v2376_v31 }
0x111b   :  { %v2380_v55 = vmul.f32 0.03125, %v2373_v15 }
0x111c   :  { %v2399_v30 = vmul.f32 %v2381_v18, %v2381_v18  ;;  %v2405_v32 = vsub.f32 %v8614_v8, %v2381_v18 }
0x111d   :  { %v2394_v57 = vpop.xlane.xlu1 %2393  ;;  %v2398_v59 = vmul.f32 %v2380_v55, %v2380_v55  ;;  %v2404_v7 = vsub.f32 %v8610_v11, %v2380_v55 }
0x111e   :  { %v2397_v60 = vmul.f32 0.03125, %v2394_v57  ;;  %v2388_v0 = vpop.xlane.xlu0 %2387 }
0x111f   :  { %v2395_v20 = vmul.f32 0.03125, %v2388_v0 }
0x1120   :  { %v2403_v38 = vsub.f32 %v2397_v60, %v2400_v25 }
0x1121   :  { %v2401_v12 = vsub.f32 %v2395_v20, %v2398_v59 }
0x1122   :  { %v2409_v17 = vadd.f32 1e-05, %v2403_v38  ;;  %v2391_v2 = vpop.xlane.xlu0 %2390 }
0x1123   :  { %v2407_v44 = vadd.f32 1e-05, %v2401_v12  ;;  %v2396_v14 = vmul.f32 0.03125, %v2391_v2 }
0x1124   :  { %7579 = vrsqrt.f32 %v2409_v17 }
0x1125   :  { %7581 = vrsqrt.f32 %v2407_v44  ;;  %v2402_v47 = vsub.f32 %v2396_v14, %v2399_v30 }
0x1127   :  { %v2408_v19 = vadd.f32 1e-05, %v2402_v47 }
0x1129   :  { %7583 = vrsqrt.f32 %v2408_v19 }
0x112e   :  { %v7580_v43 = vpop.eup %7579 }
0x112f   :  { %v7582_v36 = vpop.eup %7581  ;;  %v2415_v37 = vmul.f32 %v7580_v43, %v2406_v56 }
0x1130   :  { %v2413_v4 = vmul.f32 %v7582_v36, %v2404_v7  ;;  %v6404_v36 = vld [vmem:[%s9687_s8 + $0x35] ss:$0 sm:$0xff] }
0x1131   :  { %v2422_v42 = vmul.f32 %v6376_v39, %v2415_v37 }
0x1132   :  { %v2420_v58 = vmul.f32 %v6376_v39, %v2413_v4 }
0x1133   :  { %v7584_v48 = vpop.eup %7583  ;;  %v2429_v53 = vadd.f32 %v6377_v16, %v2422_v42 }
0x1134   :  { %v2414_v29 = vmul.f32 %v7584_v48, %v2405_v32  ;;  %v2427_v63 = vadd.f32 %v6377_v16, %v2420_v58 }
0x1135   :  { %v2436_v50 = vpack.c.bf16 %v2429_v53, %v2429_v53 }
0x1136   :  { %v2421_v52 = vmul.f32 %v6376_v39, %v2414_v29 }
0x1138   :  { %v2428_v23 = vadd.f32 %v6377_v16, %v2421_v52 }
0x113a   :  { %v2435_v62 = vpack.c.bf16 %v2428_v23, %v2427_v63 }
0x113c   :  { %6995 = vmatprep.mubr.msk.bf16.mxu1 %vm231_vm1, %v2435_v62 }
0x113d   :  { %6996 = vmatmul.mubr.msk.bf16.vlgmr.msra.gmra.mrb[36].mxu1 %vm231_vm1, %v2436_v50 }
0x113e   :  { %7015 = vmatprep.mubr.msk.bf16.mxu1 %vm7862_vm4, %v7859_v21 }
0x1210   :  { %v6997_v10 = vpop.f32.mrb[36].mxu1 }
0x1211   :  { %v2503_v27 = vadd.f32 %v6997_v10, %v6382_v6  ;;  %v2494_v33 = vpop.f32.mrb[37].mxu1 }
0x1212   :  { %v2495_v5 = vadd.f32 %v6382_v6, %v2494_v33  ;;  %v6998_v45 = vpop.f32.mrb[38].mxu1 }
0x1213   :  { %v6389_v31 = vmul.f32 -1.702, %v2503_v27  ;;  %v2497_v46 = vpop.f32.mrb[39].mxu1 }
0x1214   :  { %v6387_v15 = vmul.f32 -1.702, %v2495_v5  ;;  %v2498_v55 = vadd.f32 %v6382_v6, %v2497_v46 }
0x1215   :  { %v2518_v57 = vmul.f32 1.442695, %v6389_v31 }
0x1216   :  { %v2514_v25 = vmul.f32 1.442695, %v6387_v15  ;;  %v6388_v60 = vmul.f32 -1.702, %v2498_v55 }
0x1217   :  { %7585 = vpow2.f32 %v2518_v57 }
0x1218   :  { %7587 = vpow2.f32 %v2514_v25  ;;  %v2516_v0 = vmul.f32 1.442695, %v6388_v60 }
0x121a   :  { %7589 = vpow2.f32 %v2516_v0 }
0x1221   :  { %v7586_v18 = vpop.eup %7585 }
0x1222   :  { %v7588_v59 = vpop.eup %7587  ;;  %v2522_v20 = vadd.f32 1.0, %v7586_v18 }
0x1223   :  { %v2520_v38 = vadd.f32 1.0, %v7588_v59 }
0x1224   :  { %v7590_v12 = vpop.eup %7589  ;;  %7591 = vrcp.f32 %v2522_v20 }
0x1225   :  { %7593 = vrcp.f32 %v2520_v38  ;;  %v2521_v17 = vadd.f32 1.0, %v7590_v12  ;;  %v8678_v12 = vshrl.u32 %v34_v9, 7 }
0x1227   :  { %7595 = vrcp.f32 %v2521_v17 }
0x122e   :  { %v7592_v2 = vpop.eup %7591 }
0x122f   :  { %v7594_v30 = vpop.eup %7593  ;;  %v2531_v14 = vmul.f32 %v7592_v2, %v2503_v27  ;;  %v6405_v2 = vld [vmem:[%s9687_s8 + $0x1a] ss:$0 sm:$0xff] }
0x1230   :  { %v2529_v47 = vmul.f32 %v7594_v30, %v2495_v5 }
0x1231   :  { %v7596_v44 = vpop.eup %7595  ;;  %v2542_v43 = vpack.c.bf16 %v2531_v14, %v2531_v14  ;;  %v6406_v14 = vld [vmem:[%s9687_s8 + $0x1b] ss:$0 sm:$0xff] }
0x1232   :  { %v2530_v19 = vmul.f32 %v7596_v44, %v2498_v55 }
0x1234   :  { %v2541_v56 = vpack.c.bf16 %v2530_v19, %v2529_v47 }
0x1236   :  { %7007 = vmatprep.mubr.msk.bf16.mxu0 %vm176_vm0, %v2541_v56 }
0x1237   :  { %7008 = vmatmul.mubr.msk.bf16.vlgmr.msra.gmra.mrb[36].mxu0 %vm176_vm0, %v2542_v43  ;;  %v2693_v43 = vsub.s32 0, %v8678_v12 }
0x1238   :  { %7031 = vmatprep.mubr.msk.bf16.mxu0 %vm7862_vm4, %v7859_v21 }
0x130a   :  { %v7009_v7 = vpop.f32.mrb[36].mxu0 }
0x130b   :  { %v2623_v37 = vadd.f32 %v7009_v7, %v8607_v34  ;;  %v2607_v39 = vpop.f32.mrb[37].mxu0 }
0x130c   :  { %v2621_v4 = vadd.f32 %v2607_v39, %v8610_v11  ;;  %v7010_v32 = vpop.f32.mrb[38].mxu0 }
0x130d   :  { %v2631_v48 = vadd.f32 %v6404_v36, %v2623_v37  ;;  %v2610_v42 = vpop.f32.mrb[39].mxu0 }
0x130e   :  { %v2629_v16 = vadd.f32 %v6404_v36, %v2621_v4  ;;  %v2622_v29 = vadd.f32 %v2610_v42, %v8614_v8 }
0x130f   :  { %v2638_v58 = vsel %vm238_vm2, %v2631_v48, 0.0  ;;  %v2646_v34 = vmul.f32 %v2631_v48, %v2631_v48 }
0x1310   :  { %v2630_v52 = vadd.f32 %v6404_v36, %v2622_v29  ;;  %2639 = vadd.xlane.f32.xlu1 %v2638_v58  ;;  %v2632_v53 = vsel %vm231_vm1, %v2629_v16, 0.0  ;;  %v2644_v63 = vmul.f32 %v2629_v16, %v2629_v16 }
0x1311   :  { %2633 = vadd.xlane.f32.xlu0 %v2632_v53  ;;  %v2653_v50 = vsel %vm238_vm2, %v2646_v34, 0.0 }
0x1312   :  { %v2635_v23 = vsel %vm231_vm1, %v2630_v52, 0.0  ;;  %v2647_v11 = vsel %vm231_vm1, %v2644_v63, 0.0  ;;  %v2645_v62 = vmul.f32 %v2630_v52, %v2630_v52 }
0x1314   :  { %2636 = vadd.xlane.f32.xlu1 %v2635_v23  ;;  %v2650_v8 = vsel %vm231_vm1, %v2645_v62, 0.0 }
0x1315   :  { %2648 = vadd.xlane.f32.xlu0 %v2647_v11 }
0x1318   :  { %2654 = vadd.xlane.f32.xlu1 %v2653_v50 }
0x1319   :  { %2651 = vadd.xlane.f32.xlu0 %v2650_v8 }
0x139d   :  { %v2640_v51 = vpop.xlane.xlu1 %2639 }
0x139e   :  { %v2634_v40 = vpop.xlane.xlu0 %2633  ;;  %v2643_v6 = vmul.f32 0.03125, %v2640_v51  ;;  %v7403_v51 = vld [vmem:[%s9686_s7] sm:$0xff]  }
0x139f   :  { %v2641_v54 = vmul.f32 0.03125, %v2634_v40  ;;  %7012 = vmatpush3.bf16.msra.mxu1 %v7403_v51  ;;  %v7404_v40 = vld [vmem:[%s9686_s7 + $0x8] sm:$0xff]  }
0x13a0   :  { %v2661_v46 = vmul.f32 %v2643_v6, %v2643_v6  ;;  %v2667_v44 = vsub.f32 %v2631_v48, %v2643_v6  ;;  %7013 = vmatprep.subr.bf16.mxu1 %v7859_v21  ;;  %v7406_v51 = vld [vmem:[%s9683_s4 + $0x28] sm:$0xff]  }
0x13a1   :  { %v2637_v41 = vpop.xlane.xlu1 %2636  ;;  %v2659_v27 = vmul.f32 %v2641_v54, %v2641_v54  ;;  %v2665_v38 = vsub.f32 %v2629_v16, %v2641_v54  ;;  %v6413_v54 = vld [vmem:[%s9687_s8 + $0x20] ss:$0 sm:$0xff] }
0x13a2   :  { %v2649_v10 = vpop.xlane.xlu0 %2648  ;;  %v2642_v33 = vmul.f32 0.03125, %v2637_v41 }
0x13a3   :  { %v2656_v5 = vmul.f32 0.03125, %v2649_v10  ;;  %7014 = vmatpush3.bf16.msra.mxu1 %v7404_v40 }
0x13a4   :  { %v2660_v57 = vmul.f32 %v2642_v33, %v2642_v33  ;;  %v2666_v19 = vsub.f32 %v2630_v52, %v2642_v33  ;;  %7019 = vmatprep.subr.bf16.mxu1 %v7859_v21 }
0x13a5   :  { %v2662_v45 = vsub.f32 %v2656_v5, %v2659_v27  ;;  %v2655_v31 = vpop.xlane.xlu1 %2654 }
0x13a6   :  { %v2658_v15 = vmul.f32 0.03125, %v2655_v31  ;;  %v2652_v55 = vpop.xlane.xlu0 %2651 }
0x13a7   :  { %v2668_v25 = vadd.f32 1e-05, %v2662_v45  ;;  %v2657_v60 = vmul.f32 0.03125, %v2652_v55 }
0x13a8   :  { %v2664_v0 = vsub.f32 %v2658_v15, %v2661_v46 }
0x13a9   :  { %7597 = vrsqrt.f32 %v2668_v25  ;;  %v2663_v18 = vsub.f32 %v2657_v60, %v2660_v57 }
0x13aa   :  { %v2670_v59 = vadd.f32 1e-05, %v2664_v0 }
0x13ab   :  { %v2669_v20 = vadd.f32 1e-05, %v2663_v18 }
0x13ac   :  { %7599 = vrsqrt.f32 %v2670_v59 }
0x13ad   :  { %7601 = vrsqrt.f32 %v2669_v20 }
0x13b3   :  { %v7598_v17 = vpop.eup %7597 }
0x13b4   :  { %v2674_v30 = vmul.f32 %v7598_v17, %v2665_v38 }
0x13b6   :  { %v7600_v47 = vpop.eup %7599  ;;  %v2681_v56 = vmul.f32 %v6405_v2, %v2674_v30 }
0x13b7   :  { %v7602_v7 = vpop.eup %7601  ;;  %v2676_v36 = vmul.f32 %v7600_v47, %v2667_v44 }
0x13b8   :  { %v2688_v9 = vadd.f32 %v6406_v14, %v2681_v56  ;;  %v2675_v37 = vmul.f32 %v7602_v7, %v2666_v19 }
0x13b9   :  { %v2683_v39 = vmul.f32 %v6405_v2, %v2676_v36 }
0x13ba   :  { %v2694_v4 = vrot.slane %v2688_v9, %v2693_v43  ;;  %v2682_v32 = vmul.f32 %v6405_v2, %v2675_v37 }
0x13bb   :  { %v2690_v48 = vadd.f32 %v6406_v14, %v2683_v39  ;;  %v6408_v39 = vld [vmem:[%s9687_s8 + $0x1d] ss:$0 sm:$0xff] }
0x13bc   :  { %v2695_v42 = vmul.f32 %v2694_v4, %v2688_v9  ;;  %v2689_v16 = vadd.f32 %v6406_v14, %v2682_v32  ;;  %v6407_v14 = vld [vmem:[%s9687_s8 + $0x1c] ss:$0 sm:$0xff] }
0x13bd   :  { %v8690_v52 = vmul.f32 %v2694_v4, %v2690_v48 }
0x13be   :  { %v2699_v29 = vsel %vm2698_vm3, %v2695_v42, 0.0  ;;  %v2696_v58 = vmul.f32 %v2694_v4, %v2689_v16  ;;  %v2711_v63 = vmul.f32 %v2695_v42, %v2695_v42 }
0x13bf   :  { %2700 = vadd.xlane.f32.xlu0 %v2699_v29  ;;  %v2705_v23 = vsel %vm238_vm2, %v8690_v52, 0.0  ;;  %v2713_v62 = vmul.f32 %v8690_v52, %v8690_v52 }
0x13c0   :  { %v2702_v53 = vsel %vm231_vm1, %v2696_v58, 0.0  ;;  %v2712_v34 = vmul.f32 %v2696_v58, %v2696_v58  ;;  %v2714_v11 = vsel %vm2698_vm3, %v2711_v63, 0.0 }
0x13c1   :  { %2703 = vadd.xlane.f32.xlu1 %v2702_v53  ;;  %v2720_v8 = vsel %vm238_vm2, %v2713_v62, 0.0 }
0x13c2   :  { %v2717_v50 = vsel %vm231_vm1, %v2712_v34, 0.0 }
0x13c3   :  { %2706 = vadd.xlane.f32.xlu0 %v2705_v23 }
0x13c5   :  { %2715 = vadd.xlane.f32.xlu1 %v2714_v11 }
0x13c7   :  { %2718 = vadd.xlane.f32.xlu0 %v2717_v50 }
0x13c9   :  { %2721 = vadd.xlane.f32.xlu1 %v2720_v8  ;;  %v7405_v8 = vld [vmem:[%s9683_s4 + $0x20] sm:$0xff]  }
0x13dd   :  { %2862 = vrot.lane.b32.xlu0 %v6413_v54, %s7863_s19  ;;  %v6412_v54 = vld [vmem:[%s9687_s8 + $0x1e] ss:$0 sm:$0xff] }
0x144c   :  { %v2701_v41 = vpop.xlane.xlu0 %2700 }
0x144d   :  { %v2708_v10 = vmul.f32 0.03125, %v2701_v41 }
0x144e   :  { %v2704_v6 = vpop.xlane.xlu1 %2703 }
0x144f   :  { %v2709_v33 = vmul.f32 0.03125, %v2704_v6  ;;  %v2726_v45 = vmul.f32 %v2708_v10, %v2708_v10  ;;  %v2732_v30 = vsub.f32 %v2695_v42, %v2708_v10 }
0x1450   :  { %v2707_v27 = vpop.xlane.xlu0 %2706 }
0x1451   :  { %v2710_v31 = vmul.f32 0.03125, %v2707_v27  ;;  %v2727_v55 = vmul.f32 %v2709_v33, %v2709_v33  ;;  %v2733_v47 = vsub.f32 %v2696_v58, %v2709_v33 }
0x1452   :  { %v2716_v5 = vpop.xlane.xlu1 %2715 }
0x1453   :  { %v2723_v46 = vmul.f32 0.03125, %v2716_v5  ;;  %v2728_v0 = vmul.f32 %v2710_v31, %v2710_v31  ;;  %v2734_v7 = vsub.f32 %v8690_v52, %v2710_v31 }
0x1454   :  { %v2719_v15 = vpop.xlane.xlu0 %2718 }
0x1455   :  { %v2729_v57 = vsub.f32 %v2723_v46, %v2726_v45  ;;  %v2724_v25 = vmul.f32 0.03125, %v2719_v15 }
0x1456   :  { %v2722_v60 = vpop.xlane.xlu1 %2721 }
0x1457   :  { %v2735_v18 = vadd.f32 1e-05, %v2729_v57  ;;  %v2730_v59 = vsub.f32 %v2724_v25, %v2727_v55  ;;  %v2725_v20 = vmul.f32 0.03125, %v2722_v60 }
0x1458   :  { %v8733_v40 = vpop.permute.xlu0 %2862 }
0x1459   :  { %7603 = vrsqrt.f32 %v2735_v18  ;;  %v2736_v38 = vadd.f32 1e-05, %v2730_v59  ;;  %v2731_v17 = vsub.f32 %v2725_v20, %v2728_v0 }
0x145b   :  { %7605 = vrsqrt.f32 %v2736_v38  ;;  %v2737_v2 = vadd.f32 1e-05, %v2731_v17 }
0x145d   :  { %7607 = vrsqrt.f32 %v2737_v2 }
0x1463   :  { %v7604_v44 = vpop.eup %7603 }
0x1464   :  { %v2741_v19 = vmul.f32 %v7604_v44, %v2732_v30 }
0x1465   :  { %v7606_v56 = vpop.eup %7605 }
0x1466   :  { %v2748_v36 = vmul.f32 %v6407_v14, %v2741_v19  ;;  %v2742_v9 = vmul.f32 %v7606_v56, %v2733_v47 }
0x1467   :  { %v7608_v37 = vpop.eup %7607 }
0x1468   :  { %v2749_v4 = vmul.f32 %v6407_v14, %v2742_v9  ;;  %v2743_v32 = vmul.f32 %v7608_v37, %v2734_v7  ;;  %v2755_v42 = vadd.f32 %v6408_v39, %v2748_v36  ;;  %v7407_v9 = vld [vmem:[%s9683_s4 + $0x30] sm:$0xff]   ;;  %v7408_v37 = vld [vmem:[%s9683_s4 + $0x38] sm:$0xff]  }
0x1469   :  { %7028 = vmatpush3.bf16.msra.mxu0 %v7407_v9  ;;  %v6438_v9 = vld [vmem:[%s9679_s0 + $0x50] sm:$0x1] }
0x146a   :  { %v2750_v48 = vmul.f32 %v6407_v14, %v2743_v32  ;;  %v2756_v16 = vadd.f32 %v6408_v39, %v2749_v4  ;;  %7029 = vmatprep.subr.bf16.mxu0 %v7859_v21 }
0x146c   :  { %v2757_v29 = vadd.f32 %v6408_v39, %v2750_v48  ;;  %v2762_v53 = vpack.c.bf16 %v2756_v16, %v2755_v42  ;;  %v6418_v39 = vld [vmem:[%s9687_s8 + $0x1f] ss:$0 sm:$0xff] }
0x146d   :  { %7030 = vmatpush3.bf16.msra.mxu0 %v7408_v37  ;;  %v3235_v37 = vpack.c.bf16 %v6438_v9, %v6438_v9 }
0x146e   :  { %v2763_v63 = vpack.c.bf16 %v2757_v29, %v2757_v29  ;;  %v2768_v58 = vshll.u32 %v2762_v53, 16  ;;  %v2766_v23 = vshrl.u32 %v2762_v53, 16  ;;  %3315 = vmatprep.subr.bf16.mxu0 %v7858_v1 }
0x1470   :  { %v2770_v34 = vrot.slane %v2768_v58, 1  ;;  %v2773_v11 = vshll.u32 %v2763_v63, 16 }
0x1472   :  { %v2771_v52 = vor.u32 %v2770_v34, %v2766_v23  ;;  %v2775_v62 = vrot.slane %v2773_v11, 1 }
0x1474   :  { %v2776_v50 = vsel %vm2764_vm5, %v2771_v52, %v2775_v62 }
0x1475   :  { %7016 = vmatmul.mubr.msk.bf16.vlgmr.msra.gmra.mrb[40].mxu1 %vm231_vm1, %v2776_v50 }
0x1476   :  { %7023 = vmatprep.mubr.msk.bf16.mxu1 %vm7862_vm4, %v7859_v21  ;;  %7020 = vmatpush3.bf16.msra.mxu1 %v7405_v8 }
0x1477   :  { %7021 = vmatprep.subr.bf16.mxu1 %v7859_v21 }
0x147a   :  { %7022 = vmatpush3.bf16.msra.mxu1 %v7406_v51 }
0x1548   :  { %v2826_v41 = vpop.f32.mrb[40].mxu1 }
0x1549   :  { %v2837_v6 = vadd.f32 %v6412_v54, %v2826_v41  ;;  %v8739_v10 = vadd.f32 %v8733_v40, %v2826_v41  ;;  %v7017_v27 = vpop.f32.mrb[41].mxu1 }
0x154a   :  { %v2829_v33 = vpop.f32.mrb[42].mxu1 }
0x154b   :  { %v2839_v5 = vmul.f32 %v2837_v6, %v2837_v6  ;;  %v3052_v45 = vmul.f32 %v8739_v10, %v8739_v10  ;;  %v2838_v31 = vadd.f32 %v6412_v54, %v2829_v33  ;;  %v8744_v46 = vadd.f32 %v8733_v40, %v2829_v33  ;;  %v7018_v15 = vpop.f32.mrb[43].mxu1 }
0x154d   :  { %v2841_v55 = vmul.f32 %v2839_v5, %v2837_v6  ;;  %v2840_v57 = vmul.f32 %v2838_v31, %v2838_v31  ;;  %3056 = vrot.lane.b32.xlu1 %v3052_v45, %s7860_s23  ;;  %v3053_v0 = vmul.f32 %v8744_v46, %v8744_v46  ;;  %v6435_v5 = vld [vmem:[%s9679_s0 + $0x38] sm:$0xff]  ;;  %v6437_v45 = vld [vmem:[%s9679_s0 + $0x48] sm:$0xff] }
0x154f   :  { %v2843_v25 = vmul.f32 0.044715, %v2841_v55  ;;  %v2842_v60 = vmul.f32 %v2840_v57, %v2838_v31  ;;  %v7409_v55 = vld [vmem:[%s9681_s2] sm:$0xff]   ;;  %v3234_v57 = vpack.c.bf16 %v6437_v45, %v6435_v5 }
0x1551   :  { %v2845_v18 = vadd.f32 %v2843_v25, %v2837_v6  ;;  %v2844_v59 = vmul.f32 0.044715, %v2842_v60  ;;  %3058 = vrot.lane.b32.xlu1 %v3053_v0, %s7860_s23  ;;  %v7410_v60 = vld [vmem:[%s9681_s2 + $0x8] sm:$0xff]   ;;  %v7411_v0 = vld [vmem:[%s9681_s2 + $0x10] sm:$0xff]  }
0x1553   :  { %v2847_v20 = vmul.f32 0.7978846, %v2845_v18  ;;  %v2846_v38 = vadd.f32 %v2844_v59, %v2838_v31  ;;  %v7412_v18 = vld [vmem:[%s9681_s2 + $0x18] sm:$0xff]   ;;  %v7413_v59 = vld [vmem:[%s9681_s2 + $0x20] sm:$0xff]  }
0x1555   :  { %7609 = vtanh.f32 %v2847_v20  ;;  %v2848_v17 = vmul.f32 0.7978846, %v2846_v38  ;;  %v7414_v20 = vld [vmem:[%s9681_s2 + $0x28] sm:$0xff]   ;;  %v7415_v38 = vld [vmem:[%s9681_s2 + $0x30] sm:$0xff]  }
0x1557   :  { %7611 = vtanh.f32 %v2848_v17  ;;  %v7416_v17 = vld [vmem:[%s9681_s2 + $0x38] sm:$0xff]  }
0x155f   :  { %v7610_v2 = vpop.eup %7609 }
0x1560   :  { %v2851_v30 = vadd.f32 1.0, %v7610_v2  ;;  %v7417_v2 = vld [vmem:[%s9681_s2 + $0x40] sm:$0xff]  }
0x1561   :  { %v7612_v44 = vpop.eup %7611 }
0x1562   :  { %v2853_v14 = vmul.f32 0.5, %v2851_v30  ;;  %v2852_v47 = vadd.f32 1.0, %v7612_v44  ;;  %v7418_v30 = vld [vmem:[%s9681_s2 + $0x48] sm:$0xff]   ;;  %v7419_v44 = vld [vmem:[%s9681_s2 + $0x50] sm:$0xff]  }
0x1564   :  { %v2854_v19 = vmul.f32 0.5, %v2852_v47  ;;  %v2855_v56 = vmul.f32 %v2853_v14, %v2837_v6  ;;  %v7420_v14 = vld [vmem:[%s9681_s2 + $0x58] sm:$0xff]   ;;  %v6434_v47 = vld [vmem:[%s9679_s0 + $0x30] sm:$0xff]  ;;  %s6264_s2 = sshll.u32 %s7867_s12, 4  ;;  %s6265_s2 = int_to_ptr.vmem [resolvable:$true] %s6264_s2 }
0x1565   :  { %s7834_s13 = scalar_lea.vmem %s6265_s2, 512  ;;  %p7839_p1 = scmp.lt.s32.totalorder %s6265_s2, %s6265_s2 }
0x1566   :  { %v2856_v7 = vmul.f32 %v2854_v19, %v2838_v31  ;;  %v6436_v19 = vld [vmem:[%s9679_s0 + $0x40] sm:$0xff]  ;;  %p7835_p0 = scmp.ne.s32.totalorder %s6265_s2, %s7834_s13  ;;  %p7840_p2 = scmp.lt.s32.totalorder %s7834_s13, %s7834_s13 }
0x1568   :  { %v2872_v36 = vpack.c.bf16 %v2856_v7, %v2855_v56  ;;  %v6439_v56 = vld [vmem:[%s9679_s0 + $0x58] sm:$0x1]  ;;  %v3233_v7 = vpack.c.bf16 %v6436_v19, %v6434_v47  ;;  %p7841_p3 = por %p7840_p2, %p7839_p1 }
0x156a   :  { %7024 = vmatmul.mubr.msk.bf16.vlgmr.msra.gmra.mrb[44].mxu1 %vm231_vm1, %v2872_v36  ;;  %v3236_v36 = vpack.c.bf16 %v6439_v56, %v6439_v56  ;;  %p7842_p4 = pnand %p7841_p3, %p7835_p0 }
0x163d   :  { %v2926_v4 = vpop.f32.mrb[44].mxu1 }
0x163e   :  { %v2927_v32 = vadd.f32 %v6418_v39, %v2926_v4  ;;  %v7025_v48 = vpop.f32.mrb[45].mxu1 }
0x163f   :  { %v2929_v42 = vpop.f32.mrb[46].mxu1 }
0x1640   :  { %v2933_v16 = vmul.f32 %v2927_v32, %v2927_v32  ;;  %v2930_v29 = vadd.f32 %v6418_v39, %v2929_v42  ;;  %v7026_v53 = vpop.f32.mrb[47].mxu1  ;;  %v7823_v42 = vld [vmem:[%s9687_s8] sm:$0xff] }
0x1642   :  { %v2935_v63 = vmul.f32 %v2933_v16, %v2927_v32  ;;  %v2934_v58 = vmul.f32 %v2930_v29, %v2930_v29 }
0x1644   :  { %v2937_v23 = vmul.f32 0.044715, %v2935_v63  ;;  %v2936_v34 = vmul.f32 %v2934_v58, %v2930_v29  ;;  %v7824_v63 = vld [vmem:[%s9687_s8 + $0x8] sm:$0xff] }
0x1646   :  { %v2939_v11 = vadd.f32 %v2937_v23, %v2927_v32  ;;  %v2938_v52 = vmul.f32 0.044715, %v2936_v34 }
0x1648   :  { %v2941_v62 = vmul.f32 0.7978846, %v2939_v11  ;;  %v2940_v50 = vadd.f32 %v2938_v52, %v2930_v29 }
0x164a   :  { %7613 = vtanh.f32 %v2941_v62  ;;  %v2942_v8 = vmul.f32 0.7978846, %v2940_v50 }
0x164c   :  { %7615 = vtanh.f32 %v2942_v8  ;;  %v3057_v8 = vpop.permute.xlu1 %3056 }
0x164d   :  { %v3063_v45 = vsel %vm3062_vm6, %v3057_v8, 0.0  ;;  %v7826_v8 = vld [vmem:[%s9687_s8 + $0x18] ss:$0 sm:$0xff] }
0x1654   :  { %v7614_v51 = vpop.eup %7613 }
0x1655   :  { %v2945_v54 = vadd.f32 1.0, %v7614_v51 }
0x1656   :  { %v7616_v41 = vpop.eup %7615 }
0x1657   :  { %v2947_v6 = vmul.f32 0.5, %v2945_v54  ;;  %v2946_v27 = vadd.f32 1.0, %v7616_v41  ;;  %v7825_v54 = vld [vmem:[%s9687_s8 + $0x10] sm:$0x1] }
0x1659   :  { %v2948_v33 = vmul.f32 0.5, %v2946_v27  ;;  %v2949_v31 = vmul.f32 %v2947_v6, %v2927_v32 }
0x165b   :  { %v2950_v15 = vmul.f32 %v2948_v33, %v2930_v29 }
0x165d   :  { %v2956_v25 = vpack.c.bf16 %v2950_v15, %v2949_v31 }
0x165f   :  { %7032 = vmatmul.mubr.msk.bf16.vlgmr.msra.gmra.mrb[40].mxu0 %vm231_vm1, %v2956_v25 }
0x1660   :  { %3316 = vmatpush1.bf16.msra.mxu0 %v7409_v55  ;;  %6452 = vmatprep.mubr.msk.bf16.mxu0 %vm176_vm0, %v3234_v57  ;;  %v3059_v57 = vpop.permute.xlu1 %3058 }
0x1661   :  { %3317 = vmatprep.subr.bf16.mxu0 %v7858_v1  ;;  %v3066_v25 = vsel %vm3062_vm6, %v3059_v57, 0.0 }
0x1664   :  { %3318 = vmatpush1.bf16.msra.mxu0 %v7410_v60  ;;  %v8869_v60 = vld [vmem:[%s9680_s1] sm:$0x1f] }
0x1665   :  { %3319 = vmatprep.subr.bf16.mxu0 %v7858_v1 }
0x1668   :  { %3320 = vmatpush1.bf16.msra.mxu0 %v7411_v0  ;;  %v3090_v0 = vmul.f32 %v8869_v60, %v8869_v60 }
0x1669   :  { %3321 = vmatprep.subr.bf16.mxu0 %v7858_v1 }
0x166c   :  { %3322 = vmatpush1.bf16.msra.mxu0 %v7412_v18  ;;  %v3092_v18 = vsel %vm3091_vm7, %v3090_v0, 0.0 }
0x166d   :  { %3323 = vmatprep.subr.bf16.mxu0 %v7858_v1 }
0x1670   :  { %3324 = vmatpush1.bf16.msra.mxu0 %v7413_v59 }
0x1671   :  { %3325 = vmatprep.subr.bf16.mxu0 %v7858_v1 }
0x1674   :  { %3326 = vmatpush1.bf16.msra.mxu0 %v7414_v20 }
0x1675   :  { %3327 = vmatprep.subr.bf16.mxu0 %v7858_v1 }
0x1678   :  { %3328 = vmatpush1.bf16.msra.mxu0 %v7415_v38 }
0x1679   :  { %3329 = vmatprep.subr.bf16.mxu0 %v7858_v1 }
0x167c   :  { %3330 = vmatpush1.bf16.msra.mxu0 %v7416_v17 }
0x167d   :  { %3331 = vmatprep.subr.bf16.mxu0 %v7858_v1 }
0x1680   :  { %3332 = vmatpush1.bf16.msra.mxu0 %v7417_v2 }
0x1681   :  { %3333 = vmatprep.subr.bf16.mxu0 %v7858_v1 }
0x1684   :  { %3334 = vmatpush1.bf16.msra.mxu0 %v7418_v30 }
0x1685   :  { %3335 = vmatprep.subr.bf16.mxu0 %v7858_v1 }
0x1688   :  { %3336 = vmatpush1.bf16.msra.mxu0 %v7419_v44 }
0x1689   :  { %3337 = vmatprep.subr.bf16.mxu0 %v7858_v1 }
0x168c   :  { %3338 = vmatpush1.bf16.msra.mxu0 %v7420_v14 }
0x168f   :  { %3348 = vmatmul.mubr.bf16.vlgmr.msra.gmra.mrb[44].mxu0 %v3233_v7 }
0x1690   :  { %6453 = vmatprep.mubr.msk.bf16.mxu0 %vm176_vm0, %v3236_v36 }
0x1697   :  { %3356 = vmatmul.mubr.bf16.gmra.mrb[48].mxu0 %v3235_v37 }
0x1732   :  { %v8830_v39 = vpop.f32.mrb[40].mxu0 }
0x1733   :  { %v7033_v4 = vpop.f32.mrb[41].mxu0 }
0x1734   :  { %v8832_v1 = vpop.f32.mrb[42].mxu0 }
0x1735   :  { %v7034_v32 = vpop.f32.mrb[43].mxu0 }
0x1762   :  { %v3349_v48 = vpop.f32.mrb[44].mxu0 }
0x1763   :  { %v8837_v16 = vadd.f32 %v7823_v42, %v3349_v48  ;;  %v3351_v29 = vpop.f32.mrb[45].mxu0 }
0x1764   :  { %v3352_v53 = vpop.f32.mrb[46].mxu0 }
0x1765   :  { %v8842_v58 = vadd.f32 %v7824_v63, %v3352_v53  ;;  %v3354_v23 = vpop.f32.mrb[47].mxu0  ;;  %v3363_v34 = vsel %vm231_vm1, %v8837_v16, 0.0  ;;  %v3375_v62 = vmul.f32 %v8837_v16, %v8837_v16 }
0x1766   :  { %3364 = vadd.xlane.f32.xlu1 %v3363_v34 }
0x1767   :  { %v3366_v11 = vsel %vm231_vm1, %v8842_v58, 0.0  ;;  %v3376_v52 = vmul.f32 %v8842_v58, %v8842_v58  ;;  %v3378_v27 = vsel %vm231_vm1, %v3375_v62, 0.0 }
0x1768   :  { %3367 = vadd.xlane.f32.xlu0 %v3366_v11 }
0x1769   :  { %v3381_v50 = vsel %vm231_vm1, %v3376_v52, 0.0 }
0x176a   :  { %v3357_v51 = vpop.f32.mrb[48].mxu0  ;;  %3382 = vadd.xlane.f32.xlu1 %v3381_v50 }
0x176b   :  { %v8856_v41 = vadd.f32 %v7825_v54, %v3357_v51  ;;  %v3359_v6 = vpop.f32.mrb[49].mxu0 }
0x176c   :  { %v3360_v33 = vpop.f32.mrb[50].mxu0  ;;  %3379 = vadd.xlane.f32.xlu0 %v3378_v27  ;;  %v7827_v6 = vld [vmem:[%s9687_s8 + $0x19] ss:$0 sm:$0xff] }
0x176d   :  { %v3361_v5 = vpop.f32.mrb[51].mxu0  ;;  %v3369_v31 = vsel %vm238_vm2, %v8856_v41, 0.0  ;;  %v3377_v15 = vmul.f32 %v8856_v41, %v8856_v41 }
0x176e   :  { %3064 = vadd.xlane.f32.xlu1 %v3063_v45 }
0x176f   :  { %v3384_v55 = vsel %vm238_vm2, %v3377_v15, 0.0 }
0x1770   :  { %3370 = vadd.xlane.f32.xlu0 %v3369_v31 }
0x1772   :  { %3093 = vadd.xlane.f32.xlu1 %v3092_v18 }
0x1774   :  { %3385 = vadd.xlane.f32.xlu0 %v3384_v55 }
0x1778   :  { %3067 = vadd.xlane.f32.xlu0 %v3066_v25 }
0x17f3   :  { %v3365_v59 = vpop.xlane.xlu1 %3364 }
0x17f4   :  { %v3372_v38 = vmul.f32 0.03125, %v3365_v59 }
0x17f5   :  { %v3368_v20 = vpop.xlane.xlu0 %3367 }
0x17f6   :  { %v3373_v17 = vmul.f32 0.03125, %v3368_v20  ;;  %v3390_v47 = vmul.f32 %v3372_v38, %v3372_v38  ;;  %v3396_v52 = vsub.f32 %v8837_v16, %v3372_v38 }
0x17f7   :  { %v3383_v2 = vpop.xlane.xlu1 %3382 }
0x17f8   :  { %v3391_v30 = vmul.f32 %v3373_v17, %v3373_v17  ;;  %v3388_v44 = vmul.f32 0.03125, %v3383_v2  ;;  %v3397_v34 = vsub.f32 %v8842_v58, %v3373_v17 }
0x17f9   :  { %v3380_v14 = vpop.xlane.xlu0 %3379 }
0x17fa   :  { %v3394_v19 = vsub.f32 %v3388_v44, %v3391_v30  ;;  %v3387_v56 = vmul.f32 0.03125, %v3380_v14 }
0x17fb   :  { %v3065_v63 = vpop.xlane.xlu1 %3064 }
0x17fc   :  { %v3400_v7 = vadd.f32 1e-05, %v3394_v19  ;;  %v3393_v36 = vsub.f32 %v3387_v56, %v3390_v47  ;;  %vm3071_vm10 = vcmp.eq.f32.partialorder %v3065_v63, inf  ;;  %v3074_v56 = vand.u32 2147483648, %v3065_v63 }
0x17fd   :  { %v3371_v9 = vpop.xlane.xlu0 %3370  ;;  %vm3073_vm11 = vcmp.eq.f32.partialorder %v3065_v63, 0.0 }
0x17fe   :  { %7617 = vrsqrt.f32 %v3400_v7  ;;  %v3399_v37 = vadd.f32 1e-05, %v3393_v36  ;;  %v3374_v4 = vmul.f32 0.03125, %v3371_v9 }
0x1800   :  { %7619 = vrsqrt.f32 %v3399_v37  ;;  %v3392_v48 = vmul.f32 %v3374_v4, %v3374_v4  ;;  %v3398_v45 = vsub.f32 %v8856_v41, %v3374_v4  ;;  %v3094_v4 = vpop.xlane.xlu1 %3093 }
0x1801   :  { %v3386_v32 = vpop.xlane.xlu0 %3385 }
0x1802   :  { %v3389_v42 = vmul.f32 0.03125, %v3386_v32 }
0x1804   :  { %v3395_v29 = vsub.f32 %v3389_v42, %v3392_v48 }
0x1805   :  { %v3068_v53 = vpop.xlane.xlu0 %3067 }
0x1806   :  { %v3401_v23 = vadd.f32 1e-05, %v3395_v29  ;;  %7621 = vrsqrt.f32 %v3068_v53  ;;  %vm3078_vm8 = vcmp.eq.f32.partialorder %v3068_v53, inf  ;;  %v3081_v59 = vand.u32 2147483648, %v3068_v53 }
0x1807   :  { %vm3080_vm9 = vcmp.eq.f32.partialorder %v3068_v53, 0.0 }
0x1808   :  { %v7618_v11 = vpop.eup %7617  ;;  %7623 = vrsqrt.f32 %v3401_v23 }
0x1809   :  { %7625 = vrsqrt.f32 %v3065_v63  ;;  %v3406_v62 = vmul.f32 %v7618_v11, %v3397_v34  ;;  %v7421_v34 = vld [vmem:[%s9682_s3] sm:$0xff]  }
0x180a   :  { %v7620_v50 = vpop.eup %7619 }
0x180b   :  { %v3409_v51 = vmul.f32 %v7826_v8, %v3406_v62  ;;  %v3405_v54 = vmul.f32 %v7620_v50, %v3396_v52 }
0x180d   :  { %v8882_v27 = vadd.f32 %v7827_v6, %v3409_v51  ;;  %v3408_v58 = vmul.f32 %v7826_v8, %v3405_v54 }
0x180f   :  { %v3419_v33 = vsel %vm231_vm1, %v8882_v27, 0.0  ;;  %v8886_v16 = vadd.f32 %v7827_v6, %v3408_v58  ;;  %v3429_v14 = vmul.f32 %v8882_v27, %v8882_v27 }
0x1810   :  { %v7622_v5 = vpop.eup %7621  ;;  %3420 = vadd.xlane.f32.xlu0 %v3419_v33 }
0x1811   :  { %v3077_v31 = vmul.f32 %v7622_v5, %v3068_v53  ;;  %v3416_v15 = vsel %vm231_vm1, %v8886_v16, 0.0  ;;  %v3428_v55 = vmul.f32 %v8886_v16, %v8886_v16  ;;  %v3434_v9 = vsel %vm231_vm1, %v3429_v14, 0.0  ;;  %v6454_v14 = vld [vmem:[%s9687_s8 + $0x28] ss:$0 sm:$0xff] }
0x1812   :  { %v7624_v57 = vpop.eup %7623  ;;  %3417 = vadd.xlane.f32.xlu1 %v3416_v15 }
0x1813   :  { %v7626_v25 = vpop.eup %7625  ;;  %v3407_v0 = vmul.f32 %v7624_v57, %v3398_v45  ;;  %v3079_v18 = vsel %vm3078_vm8, %v3068_v53, %v3077_v31  ;;  %v3431_v20 = vsel %vm231_vm1, %v3428_v55, 0.0 }
0x1814   :  { %v3070_v17 = vmul.f32 %v7626_v25, %v3065_v63  ;;  %v3082_v41 = vsel %vm3080_vm9, %v3081_v59, %v3079_v18  ;;  %v7422_v18 = vld [vmem:[%s9682_s3 + $0x8] sm:$0xff]  }
0x1815   :  { %v3410_v38 = vmul.f32 %v7826_v8, %v3407_v0  ;;  %v3084_v19 = vadd.f32 1e-06, %v3082_v41 }
0x1816   :  { %3432 = vadd.xlane.f32.xlu1 %v3431_v20  ;;  %v3072_v47 = vsel %vm3071_vm10, %v3065_v63, %v3070_v17 }
0x1817   :  { %v8894_v2 = vadd.f32 %v7827_v6, %v3410_v38  ;;  %v3075_v36 = vsel %vm3073_vm11, %v3074_v56, %v3072_v47  ;;  %7627 = vrcp.f32 %v3084_v19 }
0x1818   :  { %v3083_v37 = vadd.f32 1e-06, %v3075_v36 }
0x1819   :  { %v3422_v30 = vsel %vm238_vm2, %v8894_v2, 0.0  ;;  %v3430_v44 = vmul.f32 %v8894_v2, %v8894_v2 }
0x181a   :  { %3423 = vadd.xlane.f32.xlu0 %v3422_v30  ;;  %7629 = vrcp.f32 %v3083_v37  ;;  %v6455_v37 = vld [vmem:[%s9687_s8 + $0x29] ss:$0 sm:$0xff] }
0x181b   :  { %v3437_v7 = vsel %vm238_vm2, %v3430_v44, 0.0  ;;  %7631 = vrsqrt.f32 %v3094_v4 }
0x181c   :  { %3438 = vadd.xlane.f32.xlu1 %v3437_v7 }
0x181e   :  { %3435 = vadd.xlane.f32.xlu0 %v3434_v9 }
0x1821   :  { %v7628_v32 = vpop.eup %7627 }
0x1822   :  { %v3088_v48 = vmul.f32 %v7628_v32, %v8744_v46 }
0x1824   :  { %v7630_v42 = vpop.eup %7629 }
0x1825   :  { %v7632_v29 = vpop.eup %7631  ;;  %v3087_v53 = vmul.f32 %v7630_v42, %v8739_v10 }
0x1826   :  { %v3096_v63 = vmul.f32 %v7632_v29, %v8869_v60 }
0x1828   :  { %v3097_v23 = vadd.f32 1e-06, %v3096_v63 }
0x182a   :  { %7035 = vmatprep.subr.msk.mxu1 %vm3062_vm6, %v3097_v23 }
0x182b   :  { %7036 = vmatpush3.xpose.msk.msra.mxu1 %vm3062_vm6, %v3097_v23 }
0x182c   :  { %7040 = vmatprep.subr.bf16.mxu1 %v7421_v34 }
0x182d   :  { %3102 = vrot.lane.b32.xlu1 %v3088_v48, %s7860_s23 }
0x1834   :  { %3100 = vrot.lane.b32.xlu0 %v3087_v53, %s7860_s23 }
0x189d   :  { %v3421_v52 = vpop.xlane.xlu0 %3420 }
0x189e   :  { %v3426_v51 = vmul.f32 0.03125, %v3421_v52 }
0x189f   :  { %v3418_v46 = vpop.xlane.xlu1 %3417 }
0x18a0   :  { %v3425_v11 = vmul.f32 0.03125, %v3418_v46  ;;  %v3444_v31 = vmul.f32 %v3426_v51, %v3426_v51  ;;  %v3450_v47 = vsub.f32 %v8882_v27, %v3426_v51 }
0x18a2   :  { %v3443_v50 = vmul.f32 %v3425_v11, %v3425_v11  ;;  %v3449_v17 = vsub.f32 %v8886_v16, %v3425_v11 }
0x18a3   :  { %v3433_v62 = vpop.xlane.xlu1 %3432 }
0x18a4   :  { %v3440_v10 = vmul.f32 0.03125, %v3433_v62 }
0x18a6   :  { %v3446_v8 = vsub.f32 %v3440_v10, %v3443_v50 }
0x18a7   :  { %v3424_v60 = vpop.xlane.xlu0 %3423 }
0x18a8   :  { %v3452_v54 = vadd.f32 1e-05, %v3446_v8  ;;  %v3427_v6 = vmul.f32 0.03125, %v3424_v60 }
0x18a9   :  { %v3439_v58 = vpop.xlane.xlu1 %3438 }
0x18aa   :  { %v3445_v33 = vmul.f32 %v3427_v6, %v3427_v6  ;;  %v3442_v5 = vmul.f32 0.03125, %v3439_v58  ;;  %7633 = vrsqrt.f32 %v3452_v54  ;;  %v3451_v41 = vsub.f32 %v8894_v2, %v3427_v6 }
0x18ab   :  { %v3436_v45 = vpop.xlane.xlu0 %3435 }
0x18ac   :  { %v3448_v15 = vsub.f32 %v3442_v5, %v3445_v33  ;;  %v3441_v55 = vmul.f32 0.03125, %v3436_v45 }
0x18ad   :  { %v3103_v20 = vpop.permute.xlu1 %3102 }
0x18ae   :  { %v3454_v57 = vadd.f32 1e-05, %v3448_v15  ;;  %v3447_v25 = vsub.f32 %v3441_v55, %v3444_v31 }
0x18af   :  { %v3101_v0 = vpop.permute.xlu0 %3100 }
0x18b0   :  { %7635 = vrsqrt.f32 %v3454_v57  ;;  %v3453_v59 = vadd.f32 1e-05, %v3447_v25  ;;  %7037 = vmatprep.mubr.msk.f32.mxu1 %vm3062_vm6, %v3101_v0 }
0x18b1   :  { %7038 = vmatmul.mubr.msk.f32.vlgmr.msra.gmra.mrb[48].mxu1 %vm3062_vm6, %v3103_v20 }
0x18b2   :  { %7637 = vrsqrt.f32 %v3453_v59  ;;  %7041 = vmatpush3.bf16.msra.mxu1 %v7421_v34  ;;  %v6456_v34 = vld [vmem:[%s9687_s8 + $0x2e] ss:$0 sm:$0xff] }
0x18b3   :  { %7042 = vmatprep.subr.bf16.mxu1 %v7422_v18 }
0x18b4   :  { %v7634_v38 = vpop.eup %7633 }
0x18b5   :  { %v3458_v30 = vmul.f32 %v7634_v38, %v3449_v17 }
0x18b6   :  { %7043 = vmatpush3.bf16.msra.mxu1 %v7422_v18 }
0x18b7   :  { %v3465_v36 = vmul.f32 %v6454_v14, %v3458_v30 }
0x18b9   :  { %v3472_v48 = vadd.f32 %v6455_v37, %v3465_v36 }
0x18ba   :  { %v7636_v44 = vpop.eup %7635 }
0x18bb   :  { %v3460_v19 = vmul.f32 %v7636_v44, %v3451_v41 }
0x18bc   :  { %v7638_v56 = vpop.eup %7637 }
0x18bd   :  { %v3459_v7 = vmul.f32 %v7638_v56, %v3450_v47  ;;  %v3467_v9 = vmul.f32 %v6454_v14, %v3460_v19 }
0x18bf   :  { %v3466_v4 = vmul.f32 %v6454_v14, %v3459_v7  ;;  %v3474_v32 = vadd.f32 %v6455_v37, %v3467_v9 }
0x18c1   :  { %v3473_v42 = vadd.f32 %v6455_v37, %v3466_v4  ;;  %v3480_v53 = vpack.c.bf16 %v3474_v32, %v3474_v32 }
0x18c3   :  { %v3479_v29 = vpack.c.bf16 %v3473_v42, %v3472_v48 }
0x18c5   :  { %7044 = vmatprep.mubr.msk.bf16.mxu1 %vm231_vm1, %v3479_v29 }
0x18c6   :  { %7045 = vmatmul.mubr.msk.bf16.vlgmr.msra.gmra.mrb[52].mxu1 %vm231_vm1, %v3480_v53 }
0x1984   :  { %v8930_v63 = vpop.f32.mrb[48].mxu1 }
0x1985   :  { %v8932_v23 = vpop.f32.mrb[49].mxu1 }
0x1999   :  { %v7046_v46 = vpop.f32.mrb[52].mxu1 }
0x199a   :  { %v3538_v11 = vpop.f32.mrb[53].mxu1  ;;  %v8937_v60 = vadd.f32 %v7046_v46, %v6456_v34 }
0x199b   :  { %v3539_v52 = vadd.f32 %v6456_v34, %v3538_v11  ;;  %v7047_v62 = vpop.f32.mrb[54].mxu1 }
0x199c   :  { %v3541_v50 = vpop.f32.mrb[55].mxu1  ;;  %v3556_v57 = vpack.c.bf16 %v8937_v60, %v8937_v60  ;;  %v3554_v32 = vmul.f32 0.35355338, %v8937_v60 }
0x199d   :  { %v3542_v10 = vadd.f32 %v6456_v34, %v3541_v50  ;;  %v3552_v8 = vmul.f32 0.35355338, %v3539_v52  ;;  %v8951_v25 = vmul.f32 %v8145_v35, %v3539_v52  ;;  %v8959_v41 = vmul.f32 %v8203_v49, %v3539_v52 }
0x199e   :  { %v8967_v44 = vmul.f32 %v8229_v61, %v3539_v52  ;;  %v8976_v19 = vmul.f32 %v8232_v3, %v3539_v52  ;;  %v3559_v42 = vmul.f32 %v8061_v24, %v3554_v32  ;;  %v3897_v29 = vmul.f32 %v8058_v22, %v3554_v32 }
0x199f   :  { %v3555_v51 = vpack.c.bf16 %v3542_v10, %v3539_v52  ;;  %v3553_v54 = vmul.f32 0.35355338, %v3542_v10  ;;  %v3557_v6 = vmul.f32 %v8061_v24, %v3552_v8  ;;  %v3895_v58 = vmul.f32 %v8058_v22, %v3552_v8 }
0x19a0   :  { %v3668_v33 = vmul.f32 %v8070_v28, %v3552_v8  ;;  %v4061_v5 = vmul.f32 %v8066_v26, %v3552_v8  ;;  %v8954_v0 = vmul.f32 %v8145_v35, %v3542_v10  ;;  %v8962_v30 = vmul.f32 %v8203_v49, %v3542_v10 }
0x19a1   :  { %3564 = vrot.lane.b32.xlu1 %v3555_v51, %s7860_s23  ;;  %v3558_v45 = vmul.f32 %v8061_v24, %v3553_v54  ;;  %v3896_v31 = vmul.f32 %v8058_v22, %v3553_v54  ;;  %v3669_v15 = vmul.f32 %v8070_v28, %v3553_v54  ;;  %v4062_v55 = vmul.f32 %v8066_v26, %v3553_v54 }
0x19a2   :  { %v3763_v17 = vpack.c.bf16 %v8954_v0, %v8951_v25  ;;  %v8970_v14 = vmul.f32 %v8229_v61, %v3542_v10  ;;  %v3664_v47 = vpack.c.bf16 %v8962_v30, %v8959_v41  ;;  %v8979_v56 = vmul.f32 %v8232_v3, %v3542_v10 }
0x19a3   :  { %v3560_v18 = vpack.c.bf16 %v3558_v45, %v3557_v6  ;;  %v3898_v59 = vpack.c.bf16 %v3896_v31, %v3895_v58  ;;  %v3671_v20 = vpack.c.bf16 %v3669_v15, %v3668_v33  ;;  %v4064_v38 = vpack.c.bf16 %v4062_v55, %v4061_v5 }
0x19a4   :  { %v3990_v7 = vpack.c.bf16 %v8970_v14, %v8967_v44  ;;  %v4156_v36 = vpack.c.bf16 %v8979_v56, %v8976_v19  ;;  %v3561_v53 = vpack.c.bf16 %v3559_v42, %v3559_v42  ;;  %v3899_v34 = vpack.c.bf16 %v3897_v29, %v3897_v29 }
0x19a5   :  { %3566 = vrot.lane.b32.xlu1 %v3556_v57, %s7860_s23  ;;  %7052 = vmatprep.mubr.msk.bf16.mxu1 %vm231_vm1, %v3560_v18  ;;  %v3670_v46 = vmul.f32 %v8070_v28, %v3554_v32  ;;  %v4063_v11 = vmul.f32 %v8066_v26, %v3554_v32 }
0x19a6   :  { %7084 = vmatprep.mubr.msk.bf16.mxu0 %vm231_vm1, %v3898_v59 }
0x19a7   :  { %v3672_v52 = vpack.c.bf16 %v3670_v46, %v3670_v46  ;;  %v4065_v62 = vpack.c.bf16 %v4063_v11, %v4063_v11  ;;  %v3762_v46 = vmul.f32 %v8145_v35, %v8937_v60 }
0x19a9   :  { %v3764_v11 = vpack.c.bf16 %v3762_v46, %v3762_v46 }
0x1a13   :  { %v3565_v9 = vpop.permute.xlu1 %3564 }
0x1a14   :  { %7333 = vmatprep.subr.msk.bf16.mxu1 %vm231_vm1, %v3565_v9  ;;  %7337 = vmatprep.subr.msk.bf16.mxu0 %vm231_vm1, %v3565_v9  ;;  %v3575_v37 = vsel %vm231_vm1, %v3565_v9, 0 }
0x1a15   :  { %7049 = vmatpush3.bf16.xpose.msra.mxu1 %v3575_v37  ;;  %7081 = vmatpush3.bf16.xpose.msra.mxu0 %v3575_v37 }
0x1a17   :  { %v3567_v4 = vpop.permute.xlu1 %3566 }
0x1a18   :  { %7334 = vmatprep.subr.msk.bf16.mxu1 %vm231_vm1, %v3567_v4  ;;  %7338 = vmatprep.subr.msk.bf16.mxu0 %vm231_vm1, %v3567_v4  ;;  %v3578_v48 = vsel %vm231_vm1, %v3567_v4, 0 }
0x1a1d   :  { %7051 = vmatpush3.bf16.xpose.msra.mxu1 %v3578_v48  ;;  %7083 = vmatpush3.bf16.xpose.msra.mxu0 %v3578_v48 }
0x1a1e   :  { %7335 = vmatprep.subr.msk.bf16.mxu1 %vm231_vm1, %v3565_v9  ;;  %7339 = vmatprep.subr.msk.bf16.mxu0 %vm231_vm1, %v3565_v9 }
0x1a24   :  { %7053 = vmatmul.mubr.msk.bf16.vlgmr.msra.gmra.mrb[56].mxu1 %vm231_vm1, %v3561_v53  ;;  %7085 = vmatmul.mubr.msk.bf16.vlgmr.msra.gmra.mrb[52].mxu0 %vm231_vm1, %v3899_v34 }
0x1a25   :  { %7057 = vmatpush3.bf16.xpose.msra.mxu1 %v3575_v37  ;;  %7060 = vmatprep.mubr.msk.bf16.mxu1 %vm231_vm1, %v3671_v20 }
0x1a26   :  { %7097 = vmatpush3.bf16.xpose.msra.mxu0 %v3575_v37  ;;  %7100 = vmatprep.mubr.msk.bf16.mxu0 %vm231_vm1, %v4064_v38 }
0x1a27   :  { %7336 = vmatprep.subr.msk.bf16.mxu1 %vm231_vm1, %v3567_v4  ;;  %7340 = vmatprep.subr.msk.bf16.mxu0 %vm231_vm1, %v3567_v4 }
0x1a2d   :  { %7059 = vmatpush3.bf16.xpose.msra.mxu1 %v3578_v48 }
0x1a2e   :  { %7099 = vmatpush3.bf16.xpose.msra.mxu0 %v3578_v48 }
0x1a34   :  { %7061 = vmatmul.mubr.msk.bf16.vlgmr.msra.gmra.mrb[60].mxu1 %vm231_vm1, %v3672_v52 }
0x1a35   :  { %7101 = vmatmul.mubr.msk.bf16.vlgmr.msra.gmra.mrb[56].mxu0 %vm231_vm1, %v4065_v62 }
0x1af7   :  { %v7054_v50 = vpop.f32.mrb[56].mxu1  ;;  %v7086_v10 = vpop.f32.mrb[52].mxu0 }
0x1af8   :  { %v3614_v8 = vpop.f32.mrb[57].mxu1  ;;  %v3940_v51 = vpop.f32.mrb[53].mxu0  ;;  %v3960_v54 = vsel %vm514_vm13, %v7086_v10, -inf  ;;  %v3634_v6 = vsel %vm514_vm13, %v7054_v50, -inf }
0x1af9   :  { %3961 = vmax.xlane.f32.xlu0 %v3960_v54  ;;  %v7087_v58 = vpop.f32.mrb[54].mxu0  ;;  %3635 = vmax.xlane.f32.xlu1 %v3634_v6  ;;  %v7055_v33 = vpop.f32.mrb[58].mxu1  ;;  %v3628_v15 = vsel %vm507_vm14, %v3614_v8, -inf  ;;  %v3954_v55 = vsel %vm507_vm14, %v3940_v51, -inf }
0x1afa   :  { %v3617_v5 = vpop.f32.mrb[59].mxu1  ;;  %v3943_v45 = vpop.f32.mrb[55].mxu0 }
0x1afb   :  { %v3957_v31 = vsel %vm507_vm14, %v3943_v45, -inf  ;;  %v3631_v57 = vsel %vm507_vm14, %v3617_v5, -inf }
0x1afd   :  { %3958 = vmax.xlane.f32.xlu1 %v3957_v31  ;;  %3629 = vmax.xlane.f32.xlu0 %v3628_v15 }
0x1b01   :  { %3955 = vmax.xlane.f32.xlu0 %v3954_v55 }
0x1b05   :  { %3632 = vmax.xlane.f32.xlu0 %v3631_v57 }
0x1b07   :  { %v7062_v18 = vpop.f32.mrb[60].mxu1 }
0x1b08   :  { %v9012_v59 = vpop.f32.mrb[56].mxu0  ;;  %v9014_v20 = vpop.f32.mrb[61].mxu1  ;;  %v3733_v38 = vsel %vm514_vm13, %v7062_v18, -inf }
0x1b09   :  { %v9017_v9 = vpop.f32.mrb[57].mxu0  ;;  %v4126_v37 = vsel %vm514_vm13, %v9012_v59, -inf  ;;  %v7063_v4 = vpop.f32.mrb[62].mxu1  ;;  %3734 = vmax.xlane.f32.xlu0 %v3733_v38  ;;  %v3727_v29 = vsel %vm507_vm14, %v9014_v20, -inf }
0x1b0a   :  { %v7103_v32 = vpop.f32.mrb[58].mxu0  ;;  %4127 = vmax.xlane.f32.xlu1 %v4126_v37  ;;  %v9021_v48 = vpop.f32.mrb[63].mxu1  ;;  %v4120_v53 = vsel %vm507_vm14, %v9017_v9, -inf }
0x1b0b   :  { %v9023_v42 = vpop.f32.mrb[59].mxu0  ;;  %v3730_v34 = vsel %vm507_vm14, %v9021_v48, -inf }
0x1b0c   :  { %v4123_v52 = vsel %vm507_vm14, %v9023_v42, -inf }
0x1b0d   :  { %3728 = vmax.xlane.f32.xlu0 %v3727_v29 }
0x1b0e   :  { %4121 = vmax.xlane.f32.xlu1 %v4120_v53 }
0x1b12   :  { %3731 = vmax.xlane.f32.xlu1 %v3730_v34 }
0x1b23   :  { %3771 = vrot.lane.b32.xlu1 %v3764_v11, %s7861_s24  ;;  %3769 = vrot.lane.b32.xlu0 %v3763_v17, %s7861_s24 }
0x1b42   :  { %4124 = vmax.xlane.f32.xlu0 %v4123_v52 }
0x1b86   :  { %v3962_v62 = vpop.xlane.xlu0 %3961  ;;  %v3636_v54 = vpop.xlane.xlu1 %3635 }
0x1b87   :  { %v3965_v6 = vsub.f32 %v7086_v10, %v3962_v62  ;;  %v3639_v58 = vsub.f32 %v7054_v50, %v3636_v54 }
0x1b89   :  { %v3970_v33 = vmul.f32 1.442695, %v3965_v6  ;;  %v3644_v31 = vmul.f32 1.442695, %v3639_v58 }
0x1b8a   :  { %v3630_v15 = vpop.xlane.xlu0 %3629  ;;  %v3959_v38 = vpop.xlane.xlu1 %3958 }
0x1b8b   :  { %7639 = vpow2.f32 %v3970_v33  ;;  %v3637_v55 = vsub.f32 %v3614_v8, %v3630_v15  ;;  %v3964_v25 = vsub.f32 %v3943_v45, %v3959_v38 }
0x1b8c   :  { %7641 = vpow2.f32 %v3644_v31 }
0x1b8d   :  { %v3640_v57 = vmul.f32 1.442695, %v3637_v55  ;;  %v3968_v10 = vmul.f32 1.442695, %v3964_v25 }
0x1b8e   :  { %v3956_v37 = vpop.xlane.xlu0 %3955 }
0x1b8f   :  { %v3963_v4 = vsub.f32 %v3940_v51, %v3956_v37  ;;  %7643 = vpow2.f32 %v3640_v57 }
0x1b91   :  { %v3966_v0 = vmul.f32 1.442695, %v3963_v4 }
0x1b92   :  { %v3633_v17 = vpop.xlane.xlu0 %3632 }
0x1b93   :  { %7645 = vpow2.f32 %v3966_v0  ;;  %v3638_v32 = vsub.f32 %v3617_v5, %v3633_v17 }
0x1b95   :  { %v9040_v29 = vpop.eup %7639  ;;  %v3642_v50 = vmul.f32 1.442695, %v3638_v32 }
0x1b96   :  { %v9042_v53 = vpop.eup %7641  ;;  %v3735_v34 = vpop.xlane.xlu0 %3734  ;;  %v3978_v8 = vsel %vm514_vm13, %v9040_v29, 0.0 }
0x1b97   :  { %7647 = vpow2.f32 %v3642_v50  ;;  %v4128_v46 = vpop.xlane.xlu1 %4127  ;;  %v3738_v11 = vsub.f32 %v7062_v18, %v3735_v34  ;;  %v3652_v51 = vsel %vm514_vm13, %v9042_v53, 0.0  ;;  %3979 = vadd.xlane.f32.xlu0 %v3978_v8  ;;  %v3663_v8 = vmul.f32 %v8203_v49, %v8937_v60 }
0x1b98   :  { %3653 = vadd.xlane.f32.xlu1 %v3652_v51  ;;  %7649 = vpow2.f32 %v3968_v10 }
0x1b99   :  { %v3743_v5 = vmul.f32 1.442695, %v3738_v11  ;;  %v9048_v45 = vpop.eup %7643  ;;  %v3665_v11 = vpack.c.bf16 %v3663_v8, %v3663_v8 }
0x1b9a   :  { %v3729_v52 = vpop.xlane.xlu0 %3728  ;;  %v3646_v6 = vsel %vm507_vm14, %v9048_v45, 0.0 }
0x1b9b   :  { %v4122_v62 = vpop.xlane.xlu1 %4121  ;;  %v3736_v54 = vsub.f32 %v9014_v20, %v3729_v52  ;;  %7651 = vpow2.f32 %v3743_v5 }
0x1b9c   :  { %3647 = vadd.xlane.f32.xlu1 %v3646_v6  ;;  %v4129_v51 = vsub.f32 %v9017_v9, %v4122_v62  ;;  %v4131_v6 = vsub.f32 %v9012_v59, %v4128_v46  ;;  %v4155_v62 = vmul.f32 %v8232_v3, %v8937_v60 }
0x1b9d   :  { %v9053_v58 = vpop.eup %7645  ;;  %v3739_v18 = vmul.f32 1.442695, %v3736_v54 }
0x1b9e   :  { %v3770_v33 = vpop.permute.xlu0 %3769  ;;  %v3972_v31 = vsel %vm507_vm14, %v9053_v58, 0.0 }
0x1b9f   :  { %v3732_v15 = vpop.xlane.xlu1 %3731  ;;  %7064 = vmatprep.subr.bf16.mxu1 %v3770_v33  ;;  %7653 = vpow2.f32 %v3739_v18  ;;  %v4132_v18 = vmul.f32 1.442695, %v4129_v51 }
0x1ba0   :  { %v3737_v55 = vsub.f32 %v9021_v48, %v3732_v15  ;;  %3973 = vadd.xlane.f32.xlu1 %v3972_v31  ;;  %7065 = vmatpush3.bf16.msra.mxu1 %v3770_v33  ;;  %v4136_v33 = vmul.f32 1.442695, %v4131_v6  ;;  %v4157_v15 = vpack.c.bf16 %v4155_v62, %v4155_v62 }
0x1ba1   :  { %v9058_v57 = vpop.eup %7647 }
0x1ba2   :  { %v3741_v20 = vmul.f32 1.442695, %v3737_v55  ;;  %v3649_v38 = vsel %vm507_vm14, %v9058_v57, 0.0  ;;  %v9062_v37 = vpop.eup %7649 }
0x1ba3   :  { %v3772_v4 = vpop.permute.xlu1 %3771  ;;  %3650 = vadd.xlane.f32.xlu0 %v3649_v38  ;;  %v3975_v48 = vsel %vm507_vm14, %v9062_v37, 0.0 }
0x1ba4   :  { %7655 = vpow2.f32 %v3741_v20  ;;  %v3781_v25 = vand.u32 %v3772_v4, %v8185_v13 }
0x1ba5   :  { %v9067_v0 = vpop.eup %7651 }
0x1ba6   :  { %7066 = vmatprep.subr.bf16.mxu1 %v3781_v25  ;;  %v3751_v17 = vsel %vm514_vm13, %v9067_v0, 0.0 }
0x1ba7   :  { %7067 = vmatpush3.bf16.msra.mxu1 %v3781_v25  ;;  %3976 = vadd.xlane.f32.xlu0 %v3975_v48 }
0x1ba9   :  { %v7654_v32 = vpop.eup %7653 }
0x1baa   :  { %v3745_v50 = vsel %vm507_vm14, %v7654_v32, 0.0 }
0x1bab   :  { %3752 = vadd.xlane.f32.xlu0 %v3751_v17 }
0x1bae   :  { %v7656_v10 = vpop.eup %7655 }
0x1baf   :  { %v3748_v34 = vsel %vm507_vm14, %v7656_v10, 0.0  ;;  %3746 = vadd.xlane.f32.xlu0 %v3745_v50 }
0x1bb0   :  { %3749 = vadd.xlane.f32.xlu1 %v3748_v34 }
0x1bc1   :  { %3833 = vrot.lane.b32.xlu1 %v3664_v47, %s7861_s24 }
0x1bc5   :  { %3835 = vrot.lane.b32.xlu0 %v3665_v11, %s7861_s24 }
0x1bcf   :  { %v4125_v5 = vpop.xlane.xlu0 %4124 }
0x1bd0   :  { %v4130_v52 = vsub.f32 %v9023_v42, %v4125_v5  ;;  %v3989_v42 = vmul.f32 %v8229_v61, %v8937_v60 }
0x1bd2   :  { %v4134_v54 = vmul.f32 1.442695, %v4130_v52  ;;  %v3991_v46 = vpack.c.bf16 %v3989_v42, %v3989_v42 }
0x1bd4   :  { %7657 = vpow2.f32 %v4134_v54 }
0x1bd5   :  { %7659 = vpow2.f32 %v4132_v18 }
0x1bd6   :  { %7661 = vpow2.f32 %v4136_v33 }
0x1bde   :  { %v9083_v31 = vpop.eup %7657 }
0x1bdf   :  { %v9085_v41 = vpop.eup %7659  ;;  %v4141_v30 = vsel %vm507_vm14, %v9083_v31, 0.0 }
0x1be0   :  { %v4138_v47 = vsel %vm507_vm14, %v9085_v41, 0.0  ;;  %v9091_v9 = vpop.eup %7661 }
0x1be1   :  { %v4144_v59 = vsel %vm514_vm13, %v9091_v9, 0.0 }
0x1be4   :  { %4142 = vadd.xlane.f32.xlu0 %v4141_v30 }
0x1be5   :  { %4139 = vadd.xlane.f32.xlu1 %v4138_v47 }
0x1be9   :  { %4145 = vadd.xlane.f32.xlu1 %v4144_v59 }
0x1bfa   :  { %3998 = vrot.lane.b32.xlu1 %v3991_v46, %s7861_s24  ;;  %3996 = vrot.lane.b32.xlu0 %v3990_v7, %s7861_s24 }
0x1bfe   :  { %4162 = vrot.lane.b32.xlu1 %v4156_v36, %s7861_s24 }
0x1c02   :  { %4164 = vrot.lane.b32.xlu1 %v4157_v15, %s7861_s24 }
0x1c24   :  { %v3980_v55 = vpop.xlane.xlu0 %3979 }
0x1c25   :  { %v3654_v20 = vpop.xlane.xlu1 %3653 }
0x1c29   :  { %v3648_v4 = vpop.xlane.xlu1 %3647 }
0x1c2a   :  { %7663 = vrcp.f32 %v3648_v4 }
0x1c2d   :  { %v3974_v17 = vpop.xlane.xlu1 %3973 }
0x1c30   :  { %v3651_v38 = vpop.xlane.xlu0 %3650 }
0x1c34   :  { %v3977_v25 = vpop.xlane.xlu0 %3976  ;;  %v7664_v19 = vpop.eup %7663 }
0x1c35   :  { %v3658_v54 = vmul.f32 %v7664_v19, %v9048_v45 }
0x1c38   :  { %v3753_v48 = vpop.xlane.xlu0 %3752 }
0x1c39   :  { %7665 = vrcp.f32 %v3753_v48 }
0x1c3a   :  { %7667 = vrcp.f32 %v3651_v38 }
0x1c3c   :  { %v3747_v44 = vpop.xlane.xlu0 %3746 }
0x1c3d   :  { %v3750_v60 = vpop.xlane.xlu1 %3749  ;;  %7669 = vrcp.f32 %v3747_v44 }
0x1c3e   :  { %7671 = vrcp.f32 %v3750_v60 }
0x1c3f   :  { %7673 = vrcp.f32 %v3654_v20 }
0x1c40   :  { %7675 = vrcp.f32 %v3977_v25  ;;  %v3836_v5 = vpop.permute.xlu0 %3835 }
0x1c41   :  { %v3834_v14 = vpop.permute.xlu1 %3833  ;;  %7677 = vrcp.f32 %v3974_v17  ;;  %v3845_v33 = vand.u32 %v3836_v5, %v8185_v13 }
0x1c42   :  { %7072 = vmatprep.subr.bf16.mxu1 %v3834_v14  ;;  %7679 = vrcp.f32 %v3980_v55 }
0x1c43   :  { %v7666_v56 = vpop.eup %7665 }
0x1c44   :  { %v7668_v7 = vpop.eup %7667  ;;  %v3759_v34 = vmul.f32 %v7666_v56, %v9067_v0  ;;  %v7424_v56 = vld [vmem:[%s9683_s4 + $0x8] sm:$0xff]  }
0x1c45   :  { %v3659_v51 = vmul.f32 %v7668_v7, %v9058_v57 }
0x1c46   :  { %v3766_v6 = vpack.c.bf16 %v3759_v34, %v3759_v34 }
0x1c47   :  { %v7670_v36 = vpop.eup %7669  ;;  %v3666_v18 = vpack.c.bf16 %v3659_v51, %v3658_v54  ;;  %v6481_v51 = vld [vmem:[%s9687_s8 + $0x2a] ss:$0 sm:$0xff] }
0x1c48   :  { %v7672_v50 = vpop.eup %7671  ;;  %v3757_v8 = vmul.f32 %v7670_v36, %v7654_v32 }
0x1c49   :  { %v3758_v11 = vmul.f32 %v7672_v50, %v7656_v10  ;;  %v7674_v0 = vpop.eup %7673 }
0x1c4a   :  { %v7676_v32 = vpop.eup %7675  ;;  %v3660_v10 = vmul.f32 %v7674_v0, %v9042_v53 }
0x1c4b   :  { %v3765_v52 = vpack.c.bf16 %v3758_v11, %v3757_v8  ;;  %v7678_v57 = vpop.eup %7677  ;;  %v3985_v45 = vmul.f32 %v7676_v32, %v9062_v37 }
0x1c4c   :  { %v3984_v30 = vmul.f32 %v7678_v57, %v9053_v58  ;;  %v3667_v47 = vpack.c.bf16 %v3660_v10, %v3660_v10  ;;  %v7680_v53 = vpop.eup %7679 }
0x1c4d   :  { %7068 = vmatprep.mubr.msk.bf16.mxu1 %vm507_vm14, %v3765_v52  ;;  %v3986_v20 = vmul.f32 %v7680_v53, %v9040_v29 }
0x1c4e   :  { %7069 = vmatmul.mubr.msk.bf16.vlgmr.msra.gmra.mrb[64].mxu1 %vm507_vm14, %v3766_v6  ;;  %v3992_v59 = vpack.c.bf16 %v3985_v45, %v3984_v30 }
0x1c4f   :  { %7073 = vmatpush3.bf16.msra.mxu1 %v3834_v14  ;;  %7076 = vmatprep.mubr.msk.bf16.mxu1 %vm507_vm14, %v3666_v18  ;;  %v3993_v17 = vpack.c.bf16 %v3986_v20, %v3986_v20  ;;  %v7423_v14 = vld [vmem:[%s9683_s4] sm:$0xff]  }
0x1c50   :  { %7074 = vmatprep.subr.bf16.mxu1 %v3845_v33 }
0x1c53   :  { %7075 = vmatpush3.bf16.msra.mxu1 %v3845_v33 }
0x1c5a   :  { %7077 = vmatmul.mubr.msk.bf16.vlgmr.msra.gmra.mrb[64].mxu1 %vm507_vm14, %v3667_v47 }
0x1c5b   :  { %7092 = vmatprep.mubr.msk.bf16.mxu1 %vm507_vm14, %v3992_v59 }
0x1c71   :  { %v4143_v42 = vpop.xlane.xlu0 %4142 }
0x1c72   :  { %v4140_v46 = vpop.xlane.xlu1 %4139  ;;  %7681 = vrcp.f32 %v4143_v42 }
0x1c73   :  { %7683 = vrcp.f32 %v4140_v46  ;;  %v7425_v46 = vld [vmem:[%s9684_s5] sm:$0xff]  }
0x1c74   :  { %7120 = vmatprep.subr.bf16.mxu0 %v7425_v46 }
0x1c75   :  { %v3997_v62 = vpop.permute.xlu0 %3996  ;;  %7121 = vmatpush3.bf16.msra.mxu0 %v7425_v46  ;;  %v7429_v46 = vld [vmem:[%s9685_s6 + $0x10] sm:$0xff]  }
0x1c76   :  { %v4146_v15 = vpop.xlane.xlu1 %4145  ;;  %7088 = vmatprep.subr.bf16.mxu1 %v3997_v62 }
0x1c77   :  { %7089 = vmatpush3.bf16.msra.mxu1 %v3997_v62  ;;  %7685 = vrcp.f32 %v4146_v15  ;;  %v7426_v62 = vld [vmem:[%s9684_s5 + $0x8] sm:$0xff]  }
0x1c78   :  { %7122 = vmatprep.subr.bf16.mxu0 %v7426_v62 }
0x1c79   :  { %7123 = vmatpush3.bf16.msra.mxu0 %v7426_v62  ;;  %v7430_v62 = vld [vmem:[%s9685_s6 + $0x18] sm:$0xff]  }
0x1c7a   :  { %v3999_v37 = vpop.permute.xlu1 %3998 }
0x1c7b   :  { %v4008_v58 = vand.u32 %v3999_v37, %v8185_v13 }
0x1c7c   :  { %v7682_v38 = vpop.eup %7681 }
0x1c7d   :  { %v7684_v4 = vpop.eup %7683  ;;  %7090 = vmatprep.subr.bf16.mxu1 %v4008_v58  ;;  %v4151_v55 = vmul.f32 %v7682_v38, %v9083_v31 }
0x1c7e   :  { %v4163_v25 = vpop.permute.xlu1 %4162  ;;  %7091 = vmatpush3.bf16.msra.mxu1 %v4008_v58  ;;  %v4150_v48 = vmul.f32 %v7684_v4, %v9085_v41 }
0x1c7f   :  { %7104 = vmatprep.subr.bf16.mxu1 %v4163_v25 }
0x1c80   :  { %v4158_v44 = vpack.c.bf16 %v4151_v55, %v4150_v48 }
0x1c81   :  { %7093 = vmatmul.mubr.msk.bf16.vlgmr.msra.gmra.mrb[64].mxu1 %vm507_vm14, %v3993_v17  ;;  %v7686_v31 = vpop.eup %7685 }
0x1c82   :  { %v4165_v60 = vpop.permute.xlu1 %4164  ;;  %7105 = vmatpush3.bf16.msra.mxu1 %v4163_v25  ;;  %7108 = vmatprep.mubr.msk.bf16.mxu1 %vm507_vm14, %v4158_v44  ;;  %v4152_v41 = vmul.f32 %v7686_v31, %v9091_v9 }
0x1c83   :  { %v4174_v29 = vand.u32 %v4165_v60, %v8185_v13 }
0x1c84   :  { %v4159_v19 = vpack.c.bf16 %v4152_v41, %v4152_v41 }
0x1c85   :  { %7106 = vmatprep.subr.bf16.mxu1 %v4174_v29 }
0x1c86   :  { %7107 = vmatpush3.bf16.msra.mxu1 %v4174_v29 }
0x1c87   :  { %7112 = vmatprep.subr.bf16.mxu1 %v7423_v14 }
0x1c8d   :  { %7109 = vmatmul.mubr.msk.bf16.vlgmr.msra.gmra.mrb[64].mxu1 %vm507_vm14, %v4159_v19 }
0x1c8e   :  { %7113 = vmatpush3.bf16.msra.mxu1 %v7423_v14 }
0x1c8f   :  { %7114 = vmatprep.subr.bf16.mxu1 %v7424_v56 }
0x1c92   :  { %7115 = vmatpush3.bf16.msra.mxu1 %v7424_v56 }
0x1d60   :  { %v7110_v7 = vpop.f32.mrb[64].mxu1 }
0x1d61   :  { %v4210_v36 = vpop.f32.mrb[65].mxu1  ;;  %v4232_v11 = vpack.c.bf16 %v7110_v7, %v7110_v7 }
0x1d62   :  { %v7111_v50 = vpop.f32.mrb[66].mxu1 }
0x1d63   :  { %v4213_v34 = vpop.f32.mrb[67].mxu1 }
0x1d64   :  { %v4231_v8 = vpack.c.bf16 %v4213_v34, %v4210_v36 }
0x1d66   :  { %7116 = vmatprep.mubr.msk.bf16.mxu1 %vm231_vm1, %v4231_v8 }
0x1d67   :  { %7117 = vmatmul.mubr.msk.bf16.vlgmr.msra.gmra.mrb[68].mxu1 %vm231_vm1, %v4232_v11 }
0x1e3a   :  { %v7118_v9 = vpop.f32.mrb[68].mxu1 }
0x1e3b   :  { %v4301_v5 = vadd.f32 %v7118_v9, %v8894_v2  ;;  %v4285_v52 = vpop.f32.mrb[69].mxu1 }
0x1e3c   :  { %v4299_v54 = vadd.f32 %v4285_v52, %v8886_v16  ;;  %v7119_v6 = vpop.f32.mrb[70].mxu1 }
0x1e3d   :  { %v9143_v18 = vadd.f32 %v6481_v51, %v4301_v5  ;;  %v4288_v33 = vpop.f32.mrb[71].mxu1 }
0x1e3e   :  { %v4300_v0 = vadd.f32 %v4288_v33, %v8882_v27  ;;  %v9146_v32 = vadd.f32 %v6481_v51, %v4299_v54  ;;  %v6483_v33 = vld [vmem:[%s9687_s8 + $0x2c] ss:$0 sm:$0xff] }
0x1e3f   :  { %v4318_v57 = vsel %vm238_vm2, %v9143_v18, 0.0  ;;  %v4326_v16 = vmul.f32 %v9143_v18, %v9143_v18 }
0x1e40   :  { %v9150_v10 = vadd.f32 %v6481_v51, %v4300_v0  ;;  %4319 = vadd.xlane.f32.xlu0 %v4318_v57  ;;  %v4312_v45 = vsel %vm231_vm1, %v9146_v32, 0.0  ;;  %v4324_v27 = vmul.f32 %v9146_v32, %v9146_v32  ;;  %v6482_v51 = vld [vmem:[%s9687_s8 + $0x2b] ss:$0 sm:$0xff] }
0x1e41   :  { %v4333_v30 = vsel %vm238_vm2, %v4326_v16, 0.0 }
0x1e42   :  { %v4315_v2 = vsel %vm231_vm1, %v9150_v10, 0.0  ;;  %v4327_v47 = vsel %vm231_vm1, %v4324_v27, 0.0  ;;  %v4325_v59 = vmul.f32 %v9150_v10, %v9150_v10 }
0x1e43   :  { %4316 = vadd.xlane.f32.xlu1 %v4315_v2 }
0x1e44   :  { %4313 = vadd.xlane.f32.xlu0 %v4312_v45  ;;  %v4330_v42 = vsel %vm231_vm1, %v4325_v59, 0.0  ;;  %v7427_v59 = vld [vmem:[%s9685_s6] sm:$0xff]  }
0x1e45   :  { %7128 = vmatprep.subr.bf16.mxu1 %v7427_v59 }
0x1e46   :  { %7129 = vmatpush3.bf16.msra.mxu1 %v7427_v59 }
0x1e47   :  { %4334 = vadd.xlane.f32.xlu1 %v4333_v30 }
0x1e48   :  { %4328 = vadd.xlane.f32.xlu0 %v4327_v47 }
0x1e4c   :  { %4331 = vadd.xlane.f32.xlu0 %v4330_v42  ;;  %v7428_v42 = vld [vmem:[%s9685_s6 + $0x8] sm:$0xff]  }
0x1e4d   :  { %7130 = vmatprep.subr.bf16.mxu1 %v7428_v42 }
0x1e4e   :  { %7131 = vmatpush3.bf16.msra.mxu1 %v7428_v42 }
0x1e4f   :  { %7132 = vmatprep.subr.bf16.mxu1 %v7429_v46 }
0x1e52   :  { %7133 = vmatpush3.bf16.msra.mxu1 %v7429_v46 }
0x1e53   :  { %7134 = vmatprep.subr.bf16.mxu1 %v7430_v62 }
0x1e56   :  { %7135 = vmatpush3.bf16.msra.mxu1 %v7430_v62 }
0x1ecd   :  { %v4320_v15 = vpop.xlane.xlu0 %4319 }
0x1ece   :  { %v4323_v37 = vmul.f32 0.03125, %v4320_v15  ;;  %v6484_v15 = vld [vmem:[%s9687_s8 + $0x2f] ss:$0 sm:$0xff] }
0x1ed0   :  { %v4317_v53 = vpop.xlane.xlu1 %4316  ;;  %v4341_v4 = vmul.f32 %v4323_v37, %v4323_v37  ;;  %v4347_v50 = vsub.f32 %v9143_v18, %v4323_v37 }
0x1ed1   :  { %v4314_v58 = vpop.xlane.xlu0 %4313  ;;  %v4322_v48 = vmul.f32 0.03125, %v4317_v53 }
0x1ed2   :  { %v4321_v20 = vmul.f32 0.03125, %v4314_v58 }
0x1ed3   :  { %v4340_v41 = vmul.f32 %v4322_v48, %v4322_v48  ;;  %v4346_v52 = vsub.f32 %v9150_v10, %v4322_v48 }
0x1ed4   :  { %v4335_v38 = vpop.xlane.xlu1 %4334  ;;  %v4339_v17 = vmul.f32 %v4321_v20, %v4321_v20  ;;  %v4345_v8 = vsub.f32 %v9146_v32, %v4321_v20 }
0x1ed5   :  { %v4338_v55 = vmul.f32 0.03125, %v4335_v38  ;;  %v4329_v25 = vpop.xlane.xlu0 %4328 }
0x1ed6   :  { %v4336_v44 = vmul.f32 0.03125, %v4329_v25 }
0x1ed7   :  { %v4344_v60 = vsub.f32 %v4338_v55, %v4341_v4 }
0x1ed8   :  { %v4342_v29 = vsub.f32 %v4336_v44, %v4339_v17 }
0x1ed9   :  { %v4350_v14 = vadd.f32 1e-05, %v4344_v60  ;;  %v4332_v31 = vpop.xlane.xlu0 %4331 }
0x1eda   :  { %v4348_v19 = vadd.f32 1e-05, %v4342_v29  ;;  %v4337_v56 = vmul.f32 0.03125, %v4332_v31 }
0x1edb   :  { %7687 = vrsqrt.f32 %v4350_v14 }
0x1edc   :  { %7689 = vrsqrt.f32 %v4348_v19  ;;  %v4343_v7 = vsub.f32 %v4337_v56, %v4340_v41 }
0x1ede   :  { %v4349_v36 = vadd.f32 1e-05, %v4343_v7 }
0x1ee0   :  { %7691 = vrsqrt.f32 %v4349_v36 }
0x1ee5   :  { %v7688_v34 = vpop.eup %7687 }
0x1ee6   :  { %v7690_v11 = vpop.eup %7689  ;;  %v4356_v9 = vmul.f32 %v7688_v34, %v4347_v50 }
0x1ee7   :  { %v4354_v5 = vmul.f32 %v7690_v11, %v4345_v8 }
0x1ee8   :  { %v4363_v6 = vmul.f32 %v6482_v51, %v4356_v9 }
0x1ee9   :  { %v4361_v57 = vmul.f32 %v6482_v51, %v4354_v5 }
0x1eea   :  { %v7692_v54 = vpop.eup %7691  ;;  %v4370_v16 = vadd.f32 %v6483_v33, %v4363_v6 }
0x1eeb   :  { %v4355_v0 = vmul.f32 %v7692_v54, %v4346_v52  ;;  %v4368_v45 = vadd.f32 %v6483_v33, %v4361_v57  ;;  %v6498_v54 = vld [vmem:[%s9687_s8 + $0x2d] ss:$0 sm:$0xff] }
0x1eec   :  { %v4376_v47 = vpack.c.bf16 %v4370_v16, %v4370_v16 }
0x1eed   :  { %v4362_v2 = vmul.f32 %v6482_v51, %v4355_v0 }
0x1eef   :  { %v4369_v27 = vadd.f32 %v6483_v33, %v4362_v2 }
0x1ef1   :  { %v4375_v30 = vpack.c.bf16 %v4369_v27, %v4368_v45 }
0x1ef3   :  { %7124 = vmatprep.mubr.msk.bf16.mxu0 %vm231_vm1, %v4375_v30 }
0x1ef4   :  { %7125 = vmatmul.mubr.msk.bf16.vlgmr.msra.gmra.mrb[60].mxu0 %vm231_vm1, %v4376_v47 }
0x1fc7   :  { %v7126_v53 = vpop.f32.mrb[60].mxu0 }
0x1fc8   :  { %v4443_v37 = vadd.f32 %v7126_v53, %v6484_v15  ;;  %v4434_v58 = vpop.f32.mrb[61].mxu0  ;;  %v7431_v53 = vld [vmem:[%s9682_s3 + $0x10] sm:$0xff]  }
0x1fc9   :  { %v4435_v20 = vadd.f32 %v6484_v15, %v4434_v58  ;;  %v7127_v38 = vpop.f32.mrb[62].mxu0  ;;  %7140 = vmatprep.subr.bf16.mxu0 %v7431_v53 }
0x1fca   :  { %v6491_v4 = vmul.f32 -1.702, %v4443_v37  ;;  %v4437_v55 = vpop.f32.mrb[63].mxu0  ;;  %7141 = vmatpush3.bf16.msra.mxu0 %v7431_v53 }
0x1fcb   :  { %v6489_v25 = vmul.f32 -1.702, %v4435_v20  ;;  %v4438_v48 = vadd.f32 %v6484_v15, %v4437_v55 }
0x1fcc   :  { %v4458_v17 = vmul.f32 1.442695, %v6491_v4 }
0x1fcd   :  { %v4454_v44 = vmul.f32 1.442695, %v6489_v25  ;;  %v6490_v60 = vmul.f32 -1.702, %v4438_v48 }
0x1fce   :  { %7693 = vpow2.f32 %v4458_v17 }
0x1fcf   :  { %7695 = vpow2.f32 %v4454_v44  ;;  %v4456_v29 = vmul.f32 1.442695, %v6490_v60 }
0x1fd1   :  { %7697 = vpow2.f32 %v4456_v29 }
0x1fd8   :  { %v7694_v14 = vpop.eup %7693 }
0x1fd9   :  { %v7696_v31 = vpop.eup %7695  ;;  %v4462_v41 = vadd.f32 1.0, %v7694_v14 }
0x1fda   :  { %v4460_v19 = vadd.f32 1.0, %v7696_v31 }
0x1fdb   :  { %v7698_v56 = vpop.eup %7697  ;;  %7699 = vrcp.f32 %v4462_v41 }
0x1fdc   :  { %7701 = vrcp.f32 %v4460_v19  ;;  %v4461_v7 = vadd.f32 1.0, %v7698_v56 }
0x1fde   :  { %7703 = vrcp.f32 %v4461_v7 }
0x1fe5   :  { %v7700_v36 = vpop.eup %7699 }
0x1fe6   :  { %v7702_v50 = vpop.eup %7701  ;;  %v4471_v8 = vmul.f32 %v7700_v36, %v4443_v37  ;;  %v7432_v37 = vld [vmem:[%s9682_s3 + $0x18] sm:$0xff]  }
0x1fe7   :  { %v4469_v11 = vmul.f32 %v7702_v50, %v4435_v20  ;;  %7142 = vmatprep.subr.bf16.mxu0 %v7432_v37 }
0x1fe8   :  { %v7704_v34 = vpop.eup %7703  ;;  %v4481_v5 = vpack.c.bf16 %v4471_v8, %v4471_v8  ;;  %7143 = vmatpush3.bf16.msra.mxu0 %v7432_v37 }
0x1fe9   :  { %v4470_v9 = vmul.f32 %v7704_v34, %v4438_v48 }
0x1feb   :  { %v4480_v51 = vpack.c.bf16 %v4470_v9, %v4469_v11 }
0x1fed   :  { %7136 = vmatprep.mubr.msk.bf16.mxu1 %vm176_vm0, %v4480_v51 }
0x1fee   :  { %7137 = vmatmul.mubr.msk.bf16.vlgmr.msra.gmra.mrb[72].mxu1 %vm176_vm0, %v4481_v5  ;;  %v6499_v5 = vld [vmem:[%s9687_s8 + $0x30] ss:$0 sm:$0xff] }
0x20c1   :  { %v7138_v52 = vpop.f32.mrb[72].mxu1 }
0x20c2   :  { %v4562_v6 = vadd.f32 %v7138_v52, %v9143_v18  ;;  %v4546_v33 = vpop.f32.mrb[73].mxu1 }
0x20c3   :  { %v4560_v0 = vadd.f32 %v4546_v33, %v9146_v32  ;;  %v7139_v57 = vpop.f32.mrb[74].mxu1 }
0x20c4   :  { %v9204_v2 = vadd.f32 %v6498_v54, %v4562_v6  ;;  %v4549_v16 = vpop.f32.mrb[75].mxu1  ;;  %v6500_v6 = vld [vmem:[%s9687_s8 + $0x31] ss:$0 sm:$0xff] }
0x20c5   :  { %v9206_v45 = vadd.f32 %v6498_v54, %v4560_v0  ;;  %v4561_v27 = vadd.f32 %v4549_v16, %v9150_v10 }
0x20c6   :  { %v4579_v30 = vsel %vm238_vm2, %v9204_v2, 0.0  ;;  %v4587_v46 = vmul.f32 %v9204_v2, %v9204_v2 }
0x20c7   :  { %v9211_v47 = vadd.f32 %v6498_v54, %v4561_v27  ;;  %4580 = vadd.xlane.f32.xlu0 %v4579_v30  ;;  %v4585_v32 = vmul.f32 %v9206_v45, %v9206_v45  ;;  %v4573_v59 = vsel %vm231_vm1, %v9206_v45, 0.0 }
0x20c8   :  { %v4594_v15 = vsel %vm238_vm2, %v4587_v46, 0.0 }
0x20c9   :  { %v4576_v18 = vsel %vm231_vm1, %v9211_v47, 0.0  ;;  %v4586_v42 = vmul.f32 %v9211_v47, %v9211_v47  ;;  %v4588_v10 = vsel %vm231_vm1, %v4585_v32, 0.0 }
0x20ca   :  { %4577 = vadd.xlane.f32.xlu1 %v4576_v18 }
0x20cb   :  { %4574 = vadd.xlane.f32.xlu0 %v4573_v59  ;;  %v4591_v62 = vsel %vm231_vm1, %v4586_v42, 0.0 }
0x20ce   :  { %4589 = vadd.xlane.f32.xlu1 %v4588_v10 }
0x20cf   :  { %4592 = vadd.xlane.f32.xlu0 %v4591_v62  ;;  %v6505_v62 = vld [vmem:[%s9687_s8 + $0x36] ss:$0 sm:$0xff] }
0x20d2   :  { %4595 = vadd.xlane.f32.xlu1 %v4594_v15 }
0x2154   :  { %v4581_v58 = vpop.xlane.xlu0 %4580 }
0x2155   :  { %v4584_v17 = vmul.f32 0.03125, %v4581_v58 }
0x2157   :  { %v4578_v20 = vpop.xlane.xlu1 %4577  ;;  %v4602_v56 = vmul.f32 %v4584_v17, %v4584_v17  ;;  %v4608_v0 = vsub.f32 %v9204_v2, %v4584_v17 }
0x2158   :  { %v4575_v38 = vpop.xlane.xlu0 %4574  ;;  %v4583_v4 = vmul.f32 0.03125, %v4578_v20 }
0x2159   :  { %v4582_v55 = vmul.f32 0.03125, %v4575_v38 }
0x215a   :  { %v4601_v29 = vmul.f32 %v4583_v4, %v4583_v4  ;;  %v4607_v51 = vsub.f32 %v9211_v47, %v4583_v4 }
0x215b   :  { %v4600_v25 = vmul.f32 %v4582_v55, %v4582_v55  ;;  %v4590_v48 = vpop.xlane.xlu1 %4589  ;;  %v4606_v11 = vsub.f32 %v9206_v45, %v4582_v55 }
0x215c   :  { %v4597_v44 = vmul.f32 0.03125, %v4590_v48  ;;  %v4593_v60 = vpop.xlane.xlu0 %4592 }
0x215d   :  { %v4598_v14 = vmul.f32 0.03125, %v4593_v60 }
0x215e   :  { %v4603_v31 = vsub.f32 %v4597_v44, %v4600_v25 }
0x215f   :  { %v4604_v41 = vsub.f32 %v4598_v14, %v4601_v29  ;;  %v4596_v19 = vpop.xlane.xlu1 %4595 }
0x2160   :  { %v4609_v7 = vadd.f32 1e-05, %v4603_v31  ;;  %v4599_v36 = vmul.f32 0.03125, %v4596_v19 }
0x2161   :  { %v4610_v50 = vadd.f32 1e-05, %v4604_v41 }
0x2162   :  { %7705 = vrsqrt.f32 %v4609_v7  ;;  %v4605_v34 = vsub.f32 %v4599_v36, %v4602_v56 }
0x2163   :  { %7707 = vrsqrt.f32 %v4610_v50 }
0x2164   :  { %v4611_v8 = vadd.f32 1e-05, %v4605_v34 }
0x2166   :  { %7709 = vrsqrt.f32 %v4611_v8 }
0x216c   :  { %v7706_v9 = vpop.eup %7705 }
0x216d   :  { %v7708_v52 = vpop.eup %7707  ;;  %v4615_v54 = vmul.f32 %v7706_v9, %v4606_v11 }
0x216e   :  { %v4616_v33 = vmul.f32 %v7708_v52, %v4607_v51 }
0x216f   :  { %v4622_v57 = vmul.f32 %v6499_v5, %v4615_v54 }
0x2170   :  { %v7710_v16 = vpop.eup %7709  ;;  %v4623_v27 = vmul.f32 %v6499_v5, %v4616_v33 }
0x2171   :  { %v4617_v30 = vmul.f32 %v7710_v16, %v4608_v0  ;;  %v4629_v18 = vadd.f32 %v6500_v6, %v4622_v57 }
0x2172   :  { %v4630_v32 = vadd.f32 %v6500_v6, %v4623_v27 }
0x2173   :  { %v4624_v59 = vmul.f32 %v6499_v5, %v4617_v30 }
0x2174   :  { %v4636_v42 = vpack.c.bf16 %v4630_v32, %v4629_v18 }
0x2175   :  { %v4631_v10 = vadd.f32 %v6500_v6, %v4624_v59 }
0x2176   :  { %7144 = vmatprep.mubr.msk.bf16.mxu0 %vm231_vm1, %v4636_v42 }
0x2177   :  { %v4637_v46 = vpack.c.bf16 %v4631_v10, %v4631_v10 }
0x2179   :  { %7145 = vmatmul.mubr.msk.bf16.vlgmr.msra.gmra.mrb[64].mxu0 %vm231_vm1, %v4637_v46 }
0x224c   :  { %v7146_v15 = vpop.f32.mrb[64].mxu0 }
0x224d   :  { %v9246_v53 = vadd.f32 %v7146_v15, %v6505_v62  ;;  %v4695_v37 = vpop.f32.mrb[65].mxu0 }
0x224e   :  { %v4696_v58 = vadd.f32 %v6505_v62, %v4695_v37  ;;  %v7147_v20 = vpop.f32.mrb[66].mxu0 }
0x224f   :  { %v4698_v38 = vpop.f32.mrb[67].mxu0  ;;  %v4713_v4 = vpack.c.bf16 %v9246_v53, %v9246_v53  ;;  %v4711_v32 = vmul.f32 0.35355338, %v9246_v53 }
0x2250   :  { %v4699_v55 = vadd.f32 %v6505_v62, %v4698_v38  ;;  %v4709_v25 = vmul.f32 0.35355338, %v4696_v58  ;;  %v9254_v29 = vmul.f32 %v8145_v35, %v4696_v58  ;;  %v9267_v50 = vmul.f32 %v8203_v49, %v4696_v58 }
0x2251   :  { %4723 = vrot.lane.b32.xlu1 %v4713_v4, %s7860_s23  ;;  %v9279_v54 = vmul.f32 %v8232_v3, %v4696_v58  ;;  %v9285_v33 = vmul.f32 %v8229_v61, %v4696_v58  ;;  %v4716_v42 = vmul.f32 %v8061_v24, %v4711_v32  ;;  %v4827_v10 = vmul.f32 %v8070_v28, %v4711_v32 }
0x2252   :  { %v4712_v48 = vpack.c.bf16 %v4699_v55, %v4696_v58  ;;  %v4710_v17 = vmul.f32 0.35355338, %v4699_v55  ;;  %v4714_v44 = vmul.f32 %v8061_v24, %v4709_v25  ;;  %v4825_v60 = vmul.f32 %v8070_v28, %v4709_v25 }
0x2253   :  { %v5052_v41 = vmul.f32 %v8058_v22, %v4709_v25  ;;  %v5218_v56 = vmul.f32 %v8066_v26, %v4709_v25  ;;  %v9264_v36 = vmul.f32 %v8145_v35, %v4699_v55  ;;  %v9270_v9 = vmul.f32 %v8203_v49, %v4699_v55 }
0x2254   :  { %4721 = vrot.lane.b32.xlu0 %v4712_v48, %s7860_s23  ;;  %v4715_v14 = vmul.f32 %v8061_v24, %v4710_v17  ;;  %v4826_v31 = vmul.f32 %v8070_v28, %v4710_v17  ;;  %v5053_v19 = vmul.f32 %v8058_v22, %v4710_v17  ;;  %v5219_v7 = vmul.f32 %v8066_v26, %v4710_v17 }
0x2255   :  { %v4920_v5 = vpack.c.bf16 %v9264_v36, %v9254_v29  ;;  %v4821_v52 = vpack.c.bf16 %v9270_v9, %v9267_v50  ;;  %v9282_v6 = vmul.f32 %v8232_v3, %v4699_v55  ;;  %v9288_v0 = vmul.f32 %v8229_v61, %v4699_v55 }
0x2256   :  { %v4717_v34 = vpack.c.bf16 %v4715_v14, %v4714_v44  ;;  %v4828_v8 = vpack.c.bf16 %v4826_v31, %v4825_v60  ;;  %v5055_v11 = vpack.c.bf16 %v5053_v19, %v5052_v41  ;;  %v5221_v51 = vpack.c.bf16 %v5219_v7, %v5218_v56 }
0x2257   :  { %v5313_v57 = vpack.c.bf16 %v9282_v6, %v9279_v54  ;;  %v5147_v16 = vpack.c.bf16 %v9288_v0, %v9285_v33  ;;  %v4718_v46 = vpack.c.bf16 %v4716_v42, %v4716_v42  ;;  %v4829_v62 = vpack.c.bf16 %v4827_v10, %v4827_v10 }
0x2258   :  { %7152 = vmatprep.mubr.msk.bf16.mxu0 %vm231_vm1, %v4717_v34  ;;  %7160 = vmatprep.mubr.msk.bf16.mxu1 %vm231_vm1, %v4828_v8  ;;  %v5054_v15 = vmul.f32 %v8058_v22, %v4711_v32  ;;  %v5220_v24 = vmul.f32 %v8066_v26, %v4711_v32  ;;  %v4820_v29 = vmul.f32 %v8203_v49, %v9246_v53 }
0x225a   :  { %v5056_v37 = vpack.c.bf16 %v5054_v15, %v5054_v15  ;;  %v5222_v28 = vpack.c.bf16 %v5220_v24, %v5220_v24  ;;  %v4822_v36 = vpack.c.bf16 %v4820_v29, %v4820_v29 }
0x22c3   :  { %v4724_v18 = vpop.permute.xlu1 %4723 }
0x22c4   :  { %v4735_v59 = vsel %vm231_vm1, %v4724_v18, 0 }
0x22c6   :  { %v4722_v27 = vpop.permute.xlu0 %4721 }
0x22c7   :  { %7341 = vmatprep.subr.msk.bf16.mxu0 %vm231_vm1, %v4722_v27  ;;  %7343 = vmatprep.subr.msk.bf16.mxu1 %vm231_vm1, %v4722_v27  ;;  %v4732_v30 = vsel %vm231_vm1, %v4722_v27, 0 }
0x22c8   :  { %7149 = vmatpush3.bf16.xpose.msra.mxu0 %v4732_v30  ;;  %7157 = vmatpush3.bf16.xpose.msra.mxu1 %v4732_v30 }
0x22c9   :  { %7342 = vmatprep.subr.msk.bf16.mxu0 %vm231_vm1, %v4724_v18  ;;  %7344 = vmatprep.subr.msk.bf16.mxu1 %vm231_vm1, %v4724_v18 }
0x22d0   :  { %7151 = vmatpush3.bf16.xpose.msra.mxu0 %v4735_v59  ;;  %7159 = vmatpush3.bf16.xpose.msra.mxu1 %v4735_v59 }
0x22d1   :  { %7345 = vmatprep.subr.msk.bf16.mxu1 %vm231_vm1, %v4722_v27 }
0x22d7   :  { %7153 = vmatmul.mubr.msk.bf16.vlgmr.msra.gmra.mrb[68].mxu0 %vm231_vm1, %v4718_v46  ;;  %7161 = vmatmul.mubr.msk.bf16.vlgmr.msra.gmra.mrb[76].mxu1 %vm231_vm1, %v4829_v62 }
0x22d8   :  { %7181 = vmatpush3.bf16.xpose.msra.mxu1 %v4732_v30  ;;  %7184 = vmatprep.mubr.msk.bf16.mxu1 %vm231_vm1, %v5055_v11  ;;  %v4919_v11 = vmul.f32 %v8145_v35, %v9246_v53 }
0x22d9   :  { %7346 = vmatprep.subr.msk.bf16.mxu1 %vm231_vm1, %v4724_v18 }
0x22e0   :  { %7183 = vmatpush3.bf16.xpose.msra.mxu1 %v4735_v59 }
0x22e1   :  { %7347 = vmatprep.subr.msk.bf16.mxu1 %vm231_vm1, %v4722_v27 }
0x22e7   :  { %7185 = vmatmul.mubr.msk.bf16.vlgmr.msra.gmra.mrb[80].mxu1 %vm231_vm1, %v5056_v37 }
0x22e8   :  { %7197 = vmatpush3.bf16.xpose.msra.mxu1 %v4732_v30  ;;  %7200 = vmatprep.mubr.msk.bf16.mxu1 %vm231_vm1, %v5221_v51  ;;  %v4921_v51 = vpack.c.bf16 %v4919_v11, %v4919_v11 }
0x22e9   :  { %7348 = vmatprep.subr.msk.bf16.mxu1 %vm231_vm1, %v4724_v18 }
0x22f0   :  { %7199 = vmatpush3.bf16.xpose.msra.mxu1 %v4735_v59 }
0x22f7   :  { %7201 = vmatmul.mubr.msk.bf16.vlgmr.msra.gmra.mrb[84].mxu1 %vm231_vm1, %v5222_v28 }
0x23aa   :  { %v7154_v58 = vpop.f32.mrb[68].mxu0  ;;  %v7162_v20 = vpop.f32.mrb[76].mxu1 }
0x23ab   :  { %v9315_v38 = vpop.f32.mrb[69].mxu0  ;;  %v4870_v4 = vpop.f32.mrb[77].mxu1  ;;  %v4890_v22 = vsel %vm514_vm13, %v7162_v20, -inf  ;;  %v4791_v55 = vsel %vm514_vm13, %v7154_v58, -inf }
0x23ac   :  { %4891 = vmax.xlane.f32.xlu0 %v4890_v22  ;;  %v7163_v25 = vpop.f32.mrb[78].mxu1  ;;  %4792 = vmax.xlane.f32.xlu1 %v4791_v55  ;;  %v7155_v48 = vpop.f32.mrb[70].mxu0  ;;  %v4884_v60 = vsel %vm507_vm14, %v4870_v4, -inf  ;;  %v4785_v14 = vsel %vm507_vm14, %v9315_v38, -inf }
0x23ad   :  { %v4774_v17 = vpop.f32.mrb[71].mxu0  ;;  %v4873_v44 = vpop.f32.mrb[79].mxu1 }
0x23ae   :  { %v4887_v26 = vsel %vm507_vm14, %v4873_v44, -inf  ;;  %v4788_v31 = vsel %vm507_vm14, %v4774_v17, -inf }
0x23b0   :  { %4888 = vmax.xlane.f32.xlu0 %v4887_v26  ;;  %4885 = vmax.xlane.f32.xlu1 %v4884_v60 }
0x23b4   :  { %4786 = vmax.xlane.f32.xlu1 %v4785_v14  ;;  %4789 = vmax.xlane.f32.xlu0 %v4788_v31 }
0x23ba   :  { %v7186_v41 = vpop.f32.mrb[80].mxu1 }
0x23bb   :  { %v9324_v19 = vpop.f32.mrb[81].mxu1  ;;  %v5117_v56 = vsel %vm514_vm13, %v7186_v41, -inf }
0x23bc   :  { %v7187_v7 = vpop.f32.mrb[82].mxu1  ;;  %5118 = vmax.xlane.f32.xlu0 %v5117_v56  ;;  %v5111_v8 = vsel %vm507_vm14, %v9324_v19, -inf }
0x23bd   :  { %v9327_v34 = vpop.f32.mrb[83].mxu1 }
0x23be   :  { %v5114_v59 = vsel %vm507_vm14, %v9327_v34, -inf }
0x23c0   :  { %5112 = vmax.xlane.f32.xlu0 %v5111_v8 }
0x23c5   :  { %4928 = vrot.lane.b32.xlu1 %v4921_v51, %s7861_s24 }
0x23ca   :  { %v9334_v27 = vpop.f32.mrb[84].mxu1 }
0x23cb   :  { %v9336_v30 = vpop.f32.mrb[85].mxu1  ;;  %v5283_v35 = vsel %vm514_vm13, %v9334_v27, -inf }
0x23cc   :  { %v7203_v18 = vpop.f32.mrb[86].mxu1  ;;  %v5277_v42 = vsel %vm507_vm14, %v9336_v30, -inf }
0x23cd   :  { %v9338_v32 = vpop.f32.mrb[87].mxu1 }
0x23ce   :  { %v5280_v10 = vsel %vm507_vm14, %v9338_v32, -inf }
0x23d6   :  { %4926 = vrot.lane.b32.xlu0 %v4920_v5, %s7861_s24 }
0x23e9   :  { %5115 = vmax.xlane.f32.xlu1 %v5114_v59 }
0x23ed   :  { %5284 = vmax.xlane.f32.xlu1 %v5283_v35 }
0x23f1   :  { %5278 = vmax.xlane.f32.xlu1 %v5277_v42 }
0x23f5   :  { %5281 = vmax.xlane.f32.xlu0 %v5280_v10 }
0x2402   :  { %4990 = vrot.lane.b32.xlu1 %v4821_v52, %s7861_s24 }
0x240b   :  { %4992 = vrot.lane.b32.xlu0 %v4822_v36, %s7861_s24 }
0x2439   :  { %v4892_v5 = vpop.xlane.xlu0 %4891  ;;  %v4793_v46 = vpop.xlane.xlu1 %4792 }
0x243a   :  { %v4895_v62 = vsub.f32 %v7162_v20, %v4892_v5  ;;  %v4796_v15 = vsub.f32 %v7154_v58, %v4793_v46 }
0x243c   :  { %v4900_v37 = vmul.f32 1.442695, %v4895_v62  ;;  %v4801_v24 = vmul.f32 1.442695, %v4796_v15 }
0x243d   :  { %v4889_v28 = vpop.xlane.xlu0 %4888  ;;  %v4886_v22 = vpop.xlane.xlu1 %4885 }
0x243e   :  { %7711 = vpow2.f32 %v4900_v37  ;;  %v4893_v55 = vsub.f32 %v4870_v4, %v4886_v22  ;;  %v4894_v25 = vsub.f32 %v4873_v44, %v4889_v28 }
0x243f   :  { %7713 = vpow2.f32 %v4801_v24 }
0x2440   :  { %v4896_v50 = vmul.f32 1.442695, %v4893_v55  ;;  %v4898_v26 = vmul.f32 1.442695, %v4894_v25 }
0x2441   :  { %v4787_v9 = vpop.xlane.xlu1 %4786  ;;  %v4790_v52 = vpop.xlane.xlu0 %4789 }
0x2442   :  { %v4794_v49 = vsub.f32 %v9315_v38, %v4787_v9  ;;  %v4795_v48 = vsub.f32 %v4774_v17, %v4790_v52  ;;  %7715 = vpow2.f32 %v4896_v50 }
0x2444   :  { %v4797_v60 = vmul.f32 1.442695, %v4794_v49  ;;  %v4799_v14 = vmul.f32 1.442695, %v4795_v48 }
0x2445   :  { %v4929_v51 = vpop.permute.xlu1 %4928 }
0x2446   :  { %7717 = vpow2.f32 %v4797_v60  ;;  %v4938_v29 = vand.u32 %v4929_v51, %v8185_v13 }
0x2447   :  { %7719 = vpow2.f32 %v4799_v14 }
0x2448   :  { %v9360_v58 = vpop.eup %7711  ;;  %7721 = vpow2.f32 %v4898_v26 }
0x2449   :  { %v9362_v20 = vpop.eup %7713  ;;  %v5119_v4 = vpop.xlane.xlu0 %5118  ;;  %v4908_v44 = vsel %vm514_vm13, %v9360_v58, 0.0 }
0x244a   :  { %v5122_v31 = vsub.f32 %v7186_v41, %v5119_v4  ;;  %v4809_v38 = vsel %vm514_vm13, %v9362_v20, 0.0  ;;  %4909 = vadd.xlane.f32.xlu0 %v4908_v44 }
0x244b   :  { %4810 = vadd.xlane.f32.xlu1 %v4809_v38  ;;  %v5146_v38 = vmul.f32 %v8229_v61, %v9246_v53 }
0x244c   :  { %v5127_v17 = vmul.f32 1.442695, %v5122_v31  ;;  %v9368_v56 = vpop.eup %7715 }
0x244d   :  { %v5113_v7 = vpop.xlane.xlu0 %5112  ;;  %v4902_v11 = vsel %vm507_vm14, %v9368_v56, 0.0 }
0x244e   :  { %7723 = vpow2.f32 %v5127_v17  ;;  %v5120_v8 = vsub.f32 %v9324_v19, %v5113_v7  ;;  %4903 = vadd.xlane.f32.xlu0 %v4902_v11  ;;  %v5148_v17 = vpack.c.bf16 %v5146_v38, %v5146_v38  ;;  %v5312_v7 = vmul.f32 %v8232_v3, %v9246_v53 }
0x2450   :  { %v9373_v18 = vpop.eup %7717  ;;  %v5123_v41 = vmul.f32 1.442695, %v5120_v8  ;;  %v5314_v8 = vpack.c.bf16 %v5312_v7, %v5312_v7 }
0x2451   :  { %v9375_v59 = vpop.eup %7719  ;;  %v4927_v35 = vpop.permute.xlu0 %4926  ;;  %v4803_v42 = vsel %vm507_vm14, %v9373_v18, 0.0 }
0x2452   :  { %v9379_v10 = vpop.eup %7721  ;;  %7725 = vpow2.f32 %v5123_v41  ;;  %4804 = vadd.xlane.f32.xlu1 %v4803_v42  ;;  %v4806_v19 = vsel %vm507_vm14, %v9375_v59, 0.0  ;;  %7164 = vmatprep.subr.bf16.mxu0 %v4927_v35 }
0x2453   :  { %4807 = vadd.xlane.f32.xlu0 %v4806_v19  ;;  %7165 = vmatpush3.bf16.msra.mxu0 %v4927_v35  ;;  %v4905_v36 = vsel %vm507_vm14, %v9379_v10, 0.0 }
0x2454   :  { %7166 = vmatprep.subr.bf16.mxu0 %v4938_v29 }
0x2456   :  { %4906 = vadd.xlane.f32.xlu1 %v4905_v36 }
0x2457   :  { %7167 = vmatpush3.bf16.msra.mxu0 %v4938_v29 }
0x2458   :  { %v9386_v5 = vpop.eup %7723 }
0x2459   :  { %v5135_v46 = vsel %vm514_vm13, %v9386_v5, 0.0 }
0x245a   :  { %5136 = vadd.xlane.f32.xlu0 %v5135_v46 }
0x245c   :  { %v9390_v62 = vpop.eup %7725 }
0x245d   :  { %v5129_v15 = vsel %vm507_vm14, %v9390_v62, 0.0 }
0x245e   :  { %5130 = vadd.xlane.f32.xlu1 %v5129_v15 }
0x2476   :  { %v5116_v37 = vpop.xlane.xlu1 %5115 }
0x2477   :  { %v5121_v24 = vsub.f32 %v9327_v34, %v5116_v37 }
0x2479   :  { %v5125_v28 = vmul.f32 1.442695, %v5121_v24 }
0x247a   :  { %v5285_v22 = vpop.xlane.xlu1 %5284 }
0x247b   :  { %7727 = vpow2.f32 %v5125_v28  ;;  %v5288_v55 = vsub.f32 %v9334_v27, %v5285_v22 }
0x247d   :  { %v5293_v25 = vmul.f32 1.442695, %v5288_v55 }
0x247e   :  { %v5279_v50 = vpop.xlane.xlu1 %5278 }
0x247f   :  { %7729 = vpow2.f32 %v5293_v25  ;;  %v5286_v9 = vsub.f32 %v9336_v30, %v5279_v50 }
0x2481   :  { %v5289_v52 = vmul.f32 1.442695, %v5286_v9 }
0x2482   :  { %v4991_v49 = vpop.permute.xlu1 %4990  ;;  %v5282_v48 = vpop.xlane.xlu0 %5281 }
0x2483   :  { %7731 = vpow2.f32 %v5289_v52  ;;  %v5287_v26 = vsub.f32 %v9338_v32, %v5282_v48  ;;  %7172 = vmatprep.subr.bf16.mxu0 %v4991_v49 }
0x2485   :  { %v9398_v60 = vpop.eup %7727  ;;  %v5291_v34 = vmul.f32 1.442695, %v5287_v26 }
0x2486   :  { %v5132_v14 = vsel %vm507_vm14, %v9398_v60, 0.0  ;;  %v4993_v61 = vpop.permute.xlu0 %4992 }
0x2487   :  { %7733 = vpow2.f32 %v5291_v34  ;;  %5133 = vadd.xlane.f32.xlu0 %v5132_v14  ;;  %v5002_v24 = vand.u32 %v4993_v61, %v8185_v13 }
0x2489   :  { %v9402_v27 = vpop.eup %7729 }
0x248a   :  { %v5301_v30 = vsel %vm514_vm13, %v9402_v27, 0.0 }
0x248b   :  { %5302 = vadd.xlane.f32.xlu1 %v5301_v30 }
0x248d   :  { %v9406_v4 = vpop.eup %7731 }
0x248e   :  { %v5295_v32 = vsel %vm507_vm14, %v9406_v4, 0.0 }
0x248f   :  { %5296 = vadd.xlane.f32.xlu1 %v5295_v32 }
0x2491   :  { %v9410_v44 = vpop.eup %7733 }
0x2492   :  { %v5298_v31 = vsel %vm507_vm14, %v9410_v44, 0.0 }
0x2493   :  { %5299 = vadd.xlane.f32.xlu0 %v5298_v31 }
0x24a0   :  { %5155 = vrot.lane.b32.xlu1 %v5148_v17, %s7861_s24 }
0x24a4   :  { %5319 = vrot.lane.b32.xlu1 %v5313_v57, %s7861_s24 }
0x24a8   :  { %5321 = vrot.lane.b32.xlu1 %v5314_v8, %s7861_s24 }
0x24a9   :  { %5153 = vrot.lane.b32.xlu0 %v5147_v16, %s7861_s24 }
0x24d7   :  { %v4910_v11 = vpop.xlane.xlu0 %4909 }
0x24d8   :  { %v4811_v51 = vpop.xlane.xlu1 %4810  ;;  %7735 = vrcp.f32 %v4910_v11 }
0x24db   :  { %v4904_v41 = vpop.xlane.xlu0 %4903 }
0x24dc   :  { %7737 = vrcp.f32 %v4904_v41 }
0x24df   :  { %v4805_v35 = vpop.xlane.xlu1 %4804 }
0x24e0   :  { %v4808_v3 = vpop.xlane.xlu0 %4807  ;;  %7739 = vrcp.f32 %v4805_v35 }
0x24e1   :  { %7741 = vrcp.f32 %v4808_v3 }
0x24e2   :  { %v7736_v54 = vpop.eup %7735 }
0x24e3   :  { %v4907_v53 = vpop.xlane.xlu1 %4906  ;;  %v4916_v33 = vmul.f32 %v7736_v54, %v9360_v58 }
0x24e4   :  { %7743 = vrcp.f32 %v4907_v53 }
0x24e5   :  { %7745 = vrcp.f32 %v4811_v51  ;;  %v4923_v15 = vpack.c.bf16 %v4916_v33, %v4916_v33 }
0x24e6   :  { %v7738_v6 = vpop.eup %7737 }
0x24e7   :  { %v4914_v0 = vmul.f32 %v7738_v6, %v9368_v56  ;;  %v6534_v6 = vld [vmem:[%s9687_s8 + $0x32] ss:$0 sm:$0xff] }
0x24ea   :  { %v7740_v57 = vpop.eup %7739 }
0x24eb   :  { %v7742_v42 = vpop.eup %7741  ;;  %v4815_v19 = vmul.f32 %v7740_v57, %v9373_v18 }
0x24ec   :  { %v4816_v36 = vmul.f32 %v7742_v42, %v9375_v59  ;;  %v5137_v59 = vpop.xlane.xlu0 %5136 }
0x24ee   :  { %v7744_v29 = vpop.eup %7743  ;;  %v4823_v37 = vpack.c.bf16 %v4816_v36, %v4815_v19 }
0x24ef   :  { %v4915_v16 = vmul.f32 %v7744_v29, %v9379_v10  ;;  %v7746_v58 = vpop.eup %7745  ;;  %v5131_v10 = vpop.xlane.xlu1 %5130 }
0x24f0   :  { %v4817_v56 = vmul.f32 %v7746_v58, %v9362_v20  ;;  %7747 = vrcp.f32 %v5131_v10  ;;  %v7436_v10 = vld [vmem:[%s9684_s5 + $0x18] sm:$0xff]  }
0x24f1   :  { %v4922_v46 = vpack.c.bf16 %v4915_v16, %v4914_v0 }
0x24f2   :  { %v4824_v18 = vpack.c.bf16 %v4817_v56, %v4817_v56 }
0x24f3   :  { %7168 = vmatprep.mubr.msk.bf16.mxu0 %vm507_vm14, %v4922_v46 }
0x24f4   :  { %7169 = vmatmul.mubr.msk.bf16.vlgmr.msra.gmra.mrb[72].mxu0 %vm507_vm14, %v4923_v15 }
0x24f5   :  { %7173 = vmatpush3.bf16.msra.mxu0 %v4991_v49  ;;  %7176 = vmatprep.mubr.msk.bf16.mxu0 %vm507_vm14, %v4823_v37 }
0x24f6   :  { %7174 = vmatprep.subr.bf16.mxu0 %v5002_v24 }
0x24f9   :  { %7175 = vmatpush3.bf16.msra.mxu0 %v5002_v24 }
0x24fa   :  { %v7748_v25 = vpop.eup %7747 }
0x24fb   :  { %v5141_v49 = vmul.f32 %v7748_v25, %v9390_v62 }
0x2500   :  { %7177 = vmatmul.mubr.msk.bf16.vlgmr.msra.gmra.mrb[72].mxu0 %vm507_vm14, %v4824_v18 }
0x2514   :  { %v5134_v28 = vpop.xlane.xlu0 %5133 }
0x2515   :  { %7749 = vrcp.f32 %v5134_v28 }
0x2516   :  { %7751 = vrcp.f32 %v5137_v59  ;;  %v7435_v59 = vld [vmem:[%s9684_s5 + $0x10] sm:$0xff]  }
0x2517   :  { %7220 = vmatprep.subr.bf16.mxu1 %v7435_v59 }
0x2518   :  { %v5303_v22 = vpop.xlane.xlu1 %5302  ;;  %7221 = vmatpush3.bf16.msra.mxu1 %v7435_v59 }
0x2519   :  { %7222 = vmatprep.subr.bf16.mxu1 %v7436_v10 }
0x251c   :  { %v5297_v55 = vpop.xlane.xlu1 %5296  ;;  %7223 = vmatpush3.bf16.msra.mxu1 %v7436_v10 }
0x251d   :  { %7753 = vrcp.f32 %v5297_v55  ;;  %7240 = vmatprep.subr.bf16.mxu1 %v7859_v21 }
0x251f   :  { %v7750_v50 = vpop.eup %7749 }
0x2520   :  { %v5156_v9 = vpop.permute.xlu1 %5155  ;;  %v5300_v52 = vpop.xlane.xlu0 %5299  ;;  %v5142_v20 = vmul.f32 %v7750_v50, %v9398_v60 }
0x2521   :  { %7755 = vrcp.f32 %v5300_v52  ;;  %v7752_v26 = vpop.eup %7751  ;;  %v5165_v30 = vand.u32 %v5156_v9, %v8185_v13 }
0x2522   :  { %v5149_v48 = vpack.c.bf16 %v5142_v20, %v5141_v49  ;;  %7757 = vrcp.f32 %v5303_v22  ;;  %v5143_v32 = vmul.f32 %v7752_v26, %v9386_v5  ;;  %v7433_v5 = vld [vmem:[%s9683_s4 + $0x10] sm:$0xff]  }
0x2524   :  { %v5320_v34 = vpop.permute.xlu1 %5319  ;;  %7192 = vmatprep.mubr.msk.bf16.mxu0 %vm507_vm14, %v5149_v48  ;;  %v5154_v14 = vpop.permute.xlu0 %5153  ;;  %v5150_v60 = vpack.c.bf16 %v5143_v32, %v5143_v32 }
0x2525   :  { %7188 = vmatprep.subr.bf16.mxu0 %v5154_v14 }
0x2526   :  { %7189 = vmatpush3.bf16.msra.mxu0 %v5154_v14 }
0x2527   :  { %7190 = vmatprep.subr.bf16.mxu0 %v5165_v30  ;;  %v7754_v31 = vpop.eup %7753 }
0x2528   :  { %v5322_v38 = vpop.permute.xlu1 %5321  ;;  %v5307_v17 = vmul.f32 %v7754_v31, %v9406_v4 }
0x2529   :  { %v5331_v8 = vand.u32 %v5322_v38, %v8185_v13  ;;  %v7434_v13 = vld [vmem:[%s9683_s4 + $0x18] sm:$0xff]  }
0x252a   :  { %7191 = vmatpush3.bf16.msra.mxu0 %v5165_v30 }
0x252b   :  { %v7756_v62 = vpop.eup %7755  ;;  %7204 = vmatprep.subr.bf16.mxu0 %v5320_v34 }
0x252c   :  { %v5308_v7 = vmul.f32 %v7756_v62, %v9410_v44  ;;  %v7758_v11 = vpop.eup %7757 }
0x252d   :  { %7193 = vmatmul.mubr.msk.bf16.vlgmr.msra.gmra.mrb[72].mxu0 %vm507_vm14, %v5150_v60  ;;  %v5309_v51 = vmul.f32 %v7758_v11, %v9402_v27 }
0x252e   :  { %7205 = vmatpush3.bf16.msra.mxu0 %v5320_v34  ;;  %v5315_v61 = vpack.c.bf16 %v5308_v7, %v5307_v17 }
0x252f   :  { %7206 = vmatprep.subr.bf16.mxu0 %v5331_v8  ;;  %v5316_v4 = vpack.c.bf16 %v5309_v51, %v5309_v51 }
0x2530   :  { %7208 = vmatprep.mubr.msk.bf16.mxu0 %vm507_vm14, %v5315_v61 }
0x2532   :  { %7207 = vmatpush3.bf16.msra.mxu0 %v5331_v8 }
0x2533   :  { %7212 = vmatprep.subr.bf16.mxu0 %v7433_v5 }
0x2539   :  { %7209 = vmatmul.mubr.msk.bf16.vlgmr.msra.gmra.mrb[72].mxu0 %vm507_vm14, %v5316_v4  ;;  %v6535_v4 = vld [vmem:[%s9687_s8 + $0x33] ss:$0 sm:$0xff]  ;;  %vm3194_vm14 = vcmask 31744  }
0x253a   :  { %7213 = vmatpush3.bf16.msra.mxu0 %v7433_v5 }
0x253b   :  { %7214 = vmatprep.subr.bf16.mxu0 %v7434_v13 }
0x253e   :  { %7215 = vmatpush3.bf16.msra.mxu0 %v7434_v13 }
0x260c   :  { %v7210_v44 = vpop.f32.mrb[72].mxu0 }
0x260d   :  { %v5367_v41 = vpop.f32.mrb[73].mxu0  ;;  %v5389_v54 = vpack.c.bf16 %v7210_v44, %v7210_v44 }
0x260e   :  { %v7211_v35 = vpop.f32.mrb[74].mxu0 }
0x260f   :  { %v5370_v3 = vpop.f32.mrb[75].mxu0 }
0x2610   :  { %v5388_v53 = vpack.c.bf16 %v5370_v3, %v5367_v41  ;;  %v6536_v3 = vld [vmem:[%s9687_s8 + $0x34] ss:$0 sm:$0xff] }
0x2612   :  { %7216 = vmatprep.mubr.msk.bf16.mxu0 %vm231_vm1, %v5388_v53 }
0x2613   :  { %7217 = vmatmul.mubr.msk.bf16.vlgmr.msra.gmra.mrb[76].mxu0 %vm231_vm1, %v5389_v54 }
0x26e6   :  { %v7218_v27 = vpop.f32.mrb[76].mxu0 }
0x26e7   :  { %v5458_v57 = vadd.f32 %v7218_v27, %v9204_v2  ;;  %v5442_v42 = vpop.f32.mrb[77].mxu0 }
0x26e8   :  { %v5456_v29 = vadd.f32 %v5442_v42, %v9206_v45  ;;  %v7219_v33 = vpop.f32.mrb[78].mxu0 }
0x26e9   :  { %v9464_v0 = vadd.f32 %v6534_v6, %v5458_v57  ;;  %v5445_v16 = vpop.f32.mrb[79].mxu0 }
0x26ea   :  { %v5457_v19 = vadd.f32 %v5445_v16, %v9211_v47  ;;  %v9467_v36 = vadd.f32 %v6534_v6, %v5456_v29  ;;  %v7437_v16 = vld [vmem:[%s9685_s6 + $0x20] sm:$0xff]  }
0x26eb   :  { %v5475_v46 = vsel %vm238_vm2, %v9464_v0, 0.0  ;;  %v5483_v45 = vmul.f32 %v9464_v0, %v9464_v0  ;;  %7228 = vmatprep.subr.bf16.mxu0 %v7437_v16 }
0x26ec   :  { %v9471_v15 = vadd.f32 %v6534_v6, %v5457_v19  ;;  %5476 = vadd.xlane.f32.xlu0 %v5475_v46  ;;  %v5469_v37 = vsel %vm231_vm1, %v9467_v36, 0.0  ;;  %v5481_v47 = vmul.f32 %v9467_v36, %v9467_v36  ;;  %7229 = vmatpush3.bf16.msra.mxu0 %v7437_v16  ;;  %v7438_v19 = vld [vmem:[%s9685_s6 + $0x28] sm:$0xff]   ;;  %v7439_v46 = vld [vmem:[%s9685_s6 + $0x30] sm:$0xff]  }
0x26ed   :  { %v5490_v24 = vsel %vm238_vm2, %v5483_v45, 0.0  ;;  %7230 = vmatprep.subr.bf16.mxu0 %v7438_v19  ;;  %v6541_v45 = vld [vmem:[%s9687_s8 + $0x37] ss:$0 sm:$0xff] }
0x26ee   :  { %v5472_v2 = vsel %vm231_vm1, %v9471_v15, 0.0  ;;  %v5484_v58 = vsel %vm231_vm1, %v5481_v47, 0.0  ;;  %v5482_v56 = vmul.f32 %v9471_v15, %v9471_v15 }
0x26ef   :  { %5473 = vadd.xlane.f32.xlu1 %v5472_v2  ;;  %v7440_v2 = vld [vmem:[%s9685_s6 + $0x38] sm:$0xff]  }
0x26f0   :  { %5470 = vadd.xlane.f32.xlu0 %v5469_v37  ;;  %v5487_v18 = vsel %vm231_vm1, %v5482_v56, 0.0  ;;  %7231 = vmatpush3.bf16.msra.mxu0 %v7438_v19 }
0x26f1   :  { %7232 = vmatprep.subr.bf16.mxu0 %v7439_v46 }
0x26f3   :  { %5491 = vadd.xlane.f32.xlu1 %v5490_v24 }
0x26f4   :  { %5485 = vadd.xlane.f32.xlu0 %v5484_v58  ;;  %7233 = vmatpush3.bf16.msra.mxu0 %v7439_v46 }
0x26f5   :  { %7234 = vmatprep.subr.bf16.mxu0 %v7440_v2 }
0x26f8   :  { %5488 = vadd.xlane.f32.xlu0 %v5487_v18  ;;  %7235 = vmatpush3.bf16.msra.mxu0 %v7440_v2 }
0x26f9   :  { %7256 = vmatprep.subr.bf16.mxu0 %v7859_v21 }
0x2779   :  { %v5477_v28 = vpop.xlane.xlu0 %5476 }
0x277a   :  { %v5480_v55 = vmul.f32 0.03125, %v5477_v28 }
0x277c   :  { %v5474_v22 = vpop.xlane.xlu1 %5473  ;;  %v5498_v52 = vmul.f32 %v5480_v55, %v5480_v55  ;;  %v5504_v8 = vsub.f32 %v9464_v0, %v5480_v55 }
0x277d   :  { %v5471_v25 = vpop.xlane.xlu0 %5470  ;;  %v5479_v48 = vmul.f32 0.03125, %v5474_v22 }
0x277e   :  { %v5478_v50 = vmul.f32 0.03125, %v5471_v25 }
0x277f   :  { %v5497_v38 = vmul.f32 %v5479_v48, %v5479_v48  ;;  %v5503_v44 = vsub.f32 %v9471_v15, %v5479_v48 }
0x2780   :  { %v5492_v9 = vpop.xlane.xlu1 %5491  ;;  %v5496_v26 = vmul.f32 %v5478_v50, %v5478_v50  ;;  %v5502_v5 = vsub.f32 %v9467_v36, %v5478_v50 }
0x2781   :  { %v5495_v49 = vmul.f32 0.03125, %v5492_v9  ;;  %v5486_v20 = vpop.xlane.xlu0 %5485 }
0x2782   :  { %v5493_v34 = vmul.f32 0.03125, %v5486_v20 }
0x2783   :  { %v5501_v14 = vsub.f32 %v5495_v49, %v5498_v52 }
0x2784   :  { %v5499_v30 = vsub.f32 %v5493_v34, %v5496_v26 }
0x2785   :  { %v5507_v32 = vadd.f32 1e-05, %v5501_v14  ;;  %v5489_v31 = vpop.xlane.xlu0 %5488 }
0x2786   :  { %v5505_v62 = vadd.f32 1e-05, %v5499_v30  ;;  %v5494_v60 = vmul.f32 0.03125, %v5489_v31 }
0x2787   :  { %7759 = vrsqrt.f32 %v5507_v32 }
0x2788   :  { %7761 = vrsqrt.f32 %v5505_v62  ;;  %v5500_v17 = vsub.f32 %v5494_v60, %v5497_v38 }
0x278a   :  { %v5506_v7 = vadd.f32 1e-05, %v5500_v17 }
0x278c   :  { %7763 = vrsqrt.f32 %v5506_v7  ;;  %v6563_v7 = vld [vmem:[%s9687_s8 + $0x35] ss:$0 sm:$0xff] }
0x2791   :  { %v7760_v61 = vpop.eup %7759 }
0x2792   :  { %v7762_v11 = vpop.eup %7761  ;;  %v5513_v51 = vmul.f32 %v7760_v61, %v5504_v8 }
0x2793   :  { %v5511_v13 = vmul.f32 %v7762_v11, %v5502_v5 }
0x2794   :  { %v5520_v35 = vmul.f32 %v6535_v4, %v5513_v51 }
0x2795   :  { %v5518_v54 = vmul.f32 %v6535_v4, %v5511_v13 }
0x2796   :  { %v7764_v41 = vpop.eup %7763  ;;  %v5527_v6 = vadd.f32 %v6536_v3, %v5520_v35 }
0x2797   :  { %v5512_v53 = vmul.f32 %v7764_v41, %v5503_v44  ;;  %v5525_v57 = vadd.f32 %v6536_v3, %v5518_v54 }
0x2798   :  { %v5533_v33 = vpack.c.bf16 %v5527_v6, %v5527_v6 }
0x2799   :  { %v5519_v27 = vmul.f32 %v6535_v4, %v5512_v53 }
0x279b   :  { %v5526_v42 = vadd.f32 %v6536_v3, %v5519_v27 }
0x279d   :  { %v5532_v29 = vpack.c.bf16 %v5526_v42, %v5525_v57 }
0x279f   :  { %7224 = vmatprep.mubr.msk.bf16.mxu1 %vm231_vm1, %v5532_v29 }
0x27a0   :  { %7225 = vmatmul.mubr.msk.bf16.vlgmr.msra.gmra.mrb[88].mxu1 %vm231_vm1, %v5533_v33 }
0x27a1   :  { %7244 = vmatprep.mubr.msk.bf16.mxu1 %vm7862_vm4, %v7859_v21 }
0x2873   :  { %v7226_v37 = vpop.f32.mrb[88].mxu1 }
0x2874   :  { %v5600_v47 = vadd.f32 %v7226_v37, %v6541_v45  ;;  %v5591_v24 = vpop.f32.mrb[89].mxu1 }
0x2875   :  { %v5592_v58 = vadd.f32 %v6541_v45, %v5591_v24  ;;  %v7227_v56 = vpop.f32.mrb[90].mxu1 }
0x2876   :  { %v6548_v18 = vmul.f32 -1.702, %v5600_v47  ;;  %v5594_v59 = vpop.f32.mrb[91].mxu1 }
0x2877   :  { %v6546_v10 = vmul.f32 -1.702, %v5592_v58  ;;  %v5595_v28 = vadd.f32 %v6541_v45, %v5594_v59 }
0x2878   :  { %v5615_v22 = vmul.f32 1.442695, %v6548_v18 }
0x2879   :  { %v5611_v55 = vmul.f32 1.442695, %v6546_v10  ;;  %v6547_v25 = vmul.f32 -1.702, %v5595_v28 }
0x287a   :  { %7765 = vpow2.f32 %v5615_v22 }
0x287b   :  { %7767 = vpow2.f32 %v5611_v55  ;;  %v5613_v50 = vmul.f32 1.442695, %v6547_v25 }
0x287d   :  { %7769 = vpow2.f32 %v5613_v50 }
0x2884   :  { %v7766_v9 = vpop.eup %7765 }
0x2885   :  { %v7768_v52 = vpop.eup %7767  ;;  %v5619_v49 = vadd.f32 1.0, %v7766_v9 }
0x2886   :  { %v5617_v20 = vadd.f32 1.0, %v7768_v52 }
0x2887   :  { %v7770_v48 = vpop.eup %7769  ;;  %7771 = vrcp.f32 %v5619_v49 }
0x2888   :  { %7773 = vrcp.f32 %v5617_v20  ;;  %v5618_v26 = vadd.f32 1.0, %v7770_v48 }
0x288a   :  { %7775 = vrcp.f32 %v5618_v26  ;;  %v7828_v26 = vld [vmem:[%s9687_s8 + $0x1a] ss:$0 sm:$0xff] }
0x2891   :  { %v7772_v34 = vpop.eup %7771 }
0x2892   :  { %v7774_v14 = vpop.eup %7773  ;;  %v5628_v32 = vmul.f32 %v7772_v34, %v5600_v47 }
0x2893   :  { %v5626_v31 = vmul.f32 %v7774_v14, %v5592_v58 }
0x2894   :  { %v7776_v30 = vpop.eup %7775  ;;  %v5638_v60 = vpack.c.bf16 %v5628_v32, %v5628_v32  ;;  %v7829_v32 = vld [vmem:[%s9687_s8 + $0x1b] ss:$0 sm:$0xff] }
0x2895   :  { %v5627_v38 = vmul.f32 %v7776_v30, %v5595_v28 }
0x2897   :  { %v5637_v62 = vpack.c.bf16 %v5627_v38, %v5626_v31 }
0x2899   :  { %7236 = vmatprep.mubr.msk.bf16.mxu0 %vm176_vm0, %v5637_v62 }
0x289a   :  { %7237 = vmatmul.mubr.msk.bf16.vlgmr.msra.gmra.mrb[80].mxu0 %vm176_vm0, %v5638_v60 }
0x289b   :  { %7260 = vmatprep.mubr.msk.bf16.mxu0 %vm7862_vm4, %v7859_v21 }
0x296d   :  { %v7238_v17 = vpop.f32.mrb[80].mxu0 }
0x296e   :  { %v5719_v8 = vadd.f32 %v7238_v17, %v9464_v0  ;;  %v5703_v61 = vpop.f32.mrb[81].mxu0 }
0x296f   :  { %v5717_v5 = vadd.f32 %v5703_v61, %v9467_v36  ;;  %v7239_v11 = vpop.f32.mrb[82].mxu0 }
0x2970   :  { %v5727_v51 = vadd.f32 %v6563_v7, %v5719_v8  ;;  %v5706_v4 = vpop.f32.mrb[83].mxu0 }
0x2971   :  { %v5725_v13 = vadd.f32 %v6563_v7, %v5717_v5  ;;  %v5718_v44 = vadd.f32 %v5706_v4, %v9471_v15 }
0x2972   :  { %v5734_v41 = vsel %vm238_vm2, %v5727_v51, 0.0  ;;  %v5742_v0 = vmul.f32 %v5727_v51, %v5727_v51 }
0x2973   :  { %v5726_v35 = vadd.f32 %v6563_v7, %v5718_v44  ;;  %5735 = vadd.xlane.f32.xlu1 %v5734_v41  ;;  %v5728_v3 = vsel %vm231_vm1, %v5725_v13, 0.0  ;;  %v5740_v53 = vmul.f32 %v5725_v13, %v5725_v13 }
0x2974   :  { %5729 = vadd.xlane.f32.xlu0 %v5728_v3  ;;  %v5749_v6 = vsel %vm238_vm2, %v5742_v0, 0.0 }
0x2975   :  { %v5731_v54 = vsel %vm231_vm1, %v5726_v35, 0.0  ;;  %v5743_v36 = vsel %vm231_vm1, %v5740_v53, 0.0  ;;  %v5741_v27 = vmul.f32 %v5726_v35, %v5726_v35  ;;  %v7441_v53 = vld [vmem:[%s9686_s7] sm:$0xff]  }
0x2976   :  { %7241 = vmatpush3.bf16.msra.mxu1 %v7441_v53 }
0x2977   :  { %5732 = vadd.xlane.f32.xlu1 %v5731_v54  ;;  %v5746_v15 = vsel %vm231_vm1, %v5741_v27, 0.0  ;;  %v7442_v54 = vld [vmem:[%s9686_s7 + $0x8] sm:$0xff]   ;;  %7242 = vmatprep.subr.bf16.mxu1 %v7859_v21 }
0x2978   :  { %5744 = vadd.xlane.f32.xlu0 %v5743_v36 }
0x297a   :  { %7243 = vmatpush3.bf16.msra.mxu1 %v7442_v54 }
0x297b   :  { %5750 = vadd.xlane.f32.xlu1 %v5749_v6  ;;  %7248 = vmatprep.subr.bf16.mxu1 %v7859_v21 }
0x297c   :  { %5747 = vadd.xlane.f32.xlu0 %v5746_v15 }
0x2a00   :  { %v5736_v57 = vpop.xlane.xlu1 %5735 }
0x2a01   :  { %v5730_v42 = vpop.xlane.xlu0 %5729  ;;  %v5739_v16 = vmul.f32 0.03125, %v5736_v57 }
0x2a02   :  { %v5737_v29 = vmul.f32 0.03125, %v5730_v42 }
0x2a03   :  { %v5757_v24 = vmul.f32 %v5739_v16, %v5739_v16  ;;  %v5763_v49 = vsub.f32 %v5727_v51, %v5739_v16 }
0x2a04   :  { %v5733_v33 = vpop.xlane.xlu1 %5732  ;;  %v5755_v46 = vmul.f32 %v5737_v29, %v5737_v29  ;;  %v5761_v50 = vsub.f32 %v5725_v13, %v5737_v29 }
0x2a05   :  { %v5745_v19 = vpop.xlane.xlu0 %5744  ;;  %v5738_v2 = vmul.f32 0.03125, %v5733_v33 }
0x2a06   :  { %v5752_v45 = vmul.f32 0.03125, %v5745_v19 }
0x2a07   :  { %v5756_v18 = vmul.f32 %v5738_v2, %v5738_v2  ;;  %v5762_v48 = vsub.f32 %v5726_v35, %v5738_v2 }
0x2a08   :  { %v5758_v37 = vsub.f32 %v5752_v45, %v5755_v46  ;;  %v5751_v47 = vpop.xlane.xlu1 %5750 }
0x2a09   :  { %v5754_v58 = vmul.f32 0.03125, %v5751_v47  ;;  %v5748_v56 = vpop.xlane.xlu0 %5747 }
0x2a0a   :  { %v5764_v59 = vadd.f32 1e-05, %v5758_v37  ;;  %v5753_v10 = vmul.f32 0.03125, %v5748_v56 }
0x2a0b   :  { %v5760_v28 = vsub.f32 %v5754_v58, %v5757_v24 }
0x2a0c   :  { %7777 = vrsqrt.f32 %v5764_v59  ;;  %v5759_v22 = vsub.f32 %v5753_v10, %v5756_v18 }
0x2a0d   :  { %v5766_v55 = vadd.f32 1e-05, %v5760_v28 }
0x2a0e   :  { %v5765_v25 = vadd.f32 1e-05, %v5759_v22 }
0x2a0f   :  { %7779 = vrsqrt.f32 %v5766_v55 }
0x2a10   :  { %7781 = vrsqrt.f32 %v5765_v25 }
0x2a16   :  { %v7778_v9 = vpop.eup %7777 }
0x2a17   :  { %v5770_v52 = vmul.f32 %v7778_v9, %v5761_v50  ;;  %v7830_v9 = vld [vmem:[%s9687_s8 + $0x1c] ss:$0 sm:$0xff] }
0x2a19   :  { %v7780_v20 = vpop.eup %7779  ;;  %v5773_v34 = vmul.f32 %v7828_v26, %v5770_v52 }
0x2a1a   :  { %v7782_v14 = vpop.eup %7781  ;;  %v5772_v30 = vmul.f32 %v7780_v20, %v5763_v49 }
0x2a1b   :  { %v5776_v31 = vadd.f32 %v7829_v32, %v5773_v34  ;;  %v5771_v38 = vmul.f32 %v7782_v14, %v5762_v48  ;;  %v7831_v14 = vld [vmem:[%s9687_s8 + $0x1d] ss:$0 sm:$0xff] }
0x2a1c   :  { %v5775_v62 = vmul.f32 %v7828_v26, %v5772_v30 }
0x2a1d   :  { %v5782_v60 = vrot.slane %v5776_v31, %v2693_v43  ;;  %v5774_v17 = vmul.f32 %v7828_v26, %v5771_v38 }
0x2a1e   :  { %v5778_v7 = vadd.f32 %v7829_v32, %v5775_v62 }
0x2a1f   :  { %v5783_v8 = vmul.f32 %v5782_v60, %v5776_v31  ;;  %v5777_v61 = vadd.f32 %v7829_v32, %v5774_v17 }
0x2a20   :  { %v5785_v51 = vmul.f32 %v5782_v60, %v5778_v7 }
0x2a21   :  { %v5786_v5 = vsel %vm2698_vm3, %v5783_v8, 0.0  ;;  %v5784_v11 = vmul.f32 %v5782_v60, %v5777_v61  ;;  %v5798_v13 = vmul.f32 %v5783_v8, %v5783_v8 }
0x2a22   :  { %5787 = vadd.xlane.f32.xlu0 %v5786_v5  ;;  %v5792_v44 = vsel %vm238_vm2, %v5785_v51, 0.0  ;;  %v5800_v43 = vmul.f32 %v5785_v51, %v5785_v51 }
0x2a23   :  { %v5789_v4 = vsel %vm231_vm1, %v5784_v11, 0.0  ;;  %v5799_v41 = vmul.f32 %v5784_v11, %v5784_v11  ;;  %v5801_v12 = vsel %vm2698_vm3, %v5798_v13, 0.0 }
0x2a24   :  { %5790 = vadd.xlane.f32.xlu1 %v5789_v4  ;;  %v5807_v3 = vsel %vm238_vm2, %v5800_v43, 0.0  ;;  %v7444_v4 = vld [vmem:[%s9683_s4 + $0x28] sm:$0xff]  }
0x2a25   :  { %v5804_v35 = vsel %vm231_vm1, %v5799_v41, 0.0 }
0x2a26   :  { %5793 = vadd.xlane.f32.xlu0 %v5792_v44  ;;  %v7832_v44 = vld [vmem:[%s9687_s8 + $0x1e] ss:$0 sm:$0xff] }
0x2a28   :  { %5802 = vadd.xlane.f32.xlu1 %v5801_v12 }
0x2a2a   :  { %5805 = vadd.xlane.f32.xlu0 %v5804_v35 }
0x2a2c   :  { %5808 = vadd.xlane.f32.xlu1 %v5807_v3 }
0x2aaf   :  { %v5788_v0 = vpop.xlane.xlu0 %5787 }
0x2ab0   :  { %v5795_v27 = vmul.f32 0.03125, %v5788_v0 }
0x2ab1   :  { %v5791_v36 = vpop.xlane.xlu1 %5790 }
0x2ab2   :  { %v5796_v15 = vmul.f32 0.03125, %v5791_v36  ;;  %v5813_v42 = vmul.f32 %v5795_v27, %v5795_v27  ;;  %v5819_v10 = vsub.f32 %v5783_v8, %v5795_v27 }
0x2ab3   :  { %v5794_v6 = vpop.xlane.xlu0 %5793 }
0x2ab4   :  { %v5797_v29 = vmul.f32 0.03125, %v5794_v6  ;;  %v5814_v19 = vmul.f32 %v5796_v15, %v5796_v15  ;;  %v5820_v22 = vsub.f32 %v5784_v11, %v5796_v15 }
0x2ab5   :  { %v5803_v57 = vpop.xlane.xlu1 %5802 }
0x2ab6   :  { %v5810_v33 = vmul.f32 0.03125, %v5803_v57  ;;  %v5815_v37 = vmul.f32 %v5797_v29, %v5797_v29  ;;  %v5821_v50 = vsub.f32 %v5785_v51, %v5797_v29  ;;  %v7443_v51 = vld [vmem:[%s9683_s4 + $0x20] sm:$0xff]  }
0x2ab7   :  { %v5806_v16 = vpop.xlane.xlu0 %5805 }
0x2ab8   :  { %v5816_v46 = vsub.f32 %v5810_v33, %v5813_v42  ;;  %v5811_v2 = vmul.f32 0.03125, %v5806_v16 }
0x2ab9   :  { %v5809_v45 = vpop.xlane.xlu1 %5808 }
0x2aba   :  { %v5822_v47 = vadd.f32 1e-05, %v5816_v46  ;;  %v5817_v24 = vsub.f32 %v5811_v2, %v5814_v19  ;;  %v5812_v58 = vmul.f32 0.03125, %v5809_v45 }
0x2abc   :  { %7783 = vrsqrt.f32 %v5822_v47  ;;  %v5823_v56 = vadd.f32 1e-05, %v5817_v24  ;;  %v5818_v18 = vsub.f32 %v5812_v58, %v5815_v37 }
0x2abe   :  { %7785 = vrsqrt.f32 %v5823_v56  ;;  %v5824_v59 = vadd.f32 1e-05, %v5818_v18 }
0x2ac0   :  { %7787 = vrsqrt.f32 %v5824_v59 }
0x2ac6   :  { %v7784_v28 = vpop.eup %7783 }
0x2ac7   :  { %v5828_v55 = vmul.f32 %v7784_v28, %v5819_v10 }
0x2ac8   :  { %v7786_v25 = vpop.eup %7785 }
0x2ac9   :  { %v5831_v52 = vmul.f32 %v7830_v9, %v5828_v55  ;;  %v5829_v49 = vmul.f32 %v7786_v25, %v5820_v22  ;;  %v9598_v55 = vld [vmem:[%s9680_s1 + $0x8] sm:$0x1f] }
0x2aca   :  { %v7788_v20 = vpop.eup %7787  ;;  %v6149_v25 = vmul.f32 %v9598_v55, %v9598_v55 }
0x2acb   :  { %v5832_v48 = vmul.f32 %v7830_v9, %v5829_v49  ;;  %v5830_v26 = vmul.f32 %v7788_v20, %v5821_v50  ;;  %v5834_v30 = vadd.f32 %v7831_v14, %v5831_v52  ;;  %v7446_v52 = vld [vmem:[%s9683_s4 + $0x38] sm:$0xff]  }
0x2acc   :  { %v6150_v50 = vsel %vm3091_vm7, %v6149_v25, 0.0  ;;  %v7833_v20 = vld [vmem:[%s9687_s8 + $0x1f] ss:$0 sm:$0xff] }
0x2acd   :  { %v5833_v34 = vmul.f32 %v7830_v9, %v5830_v26  ;;  %v5835_v32 = vadd.f32 %v7831_v14, %v5832_v48  ;;  %v7445_v9 = vld [vmem:[%s9683_s4 + $0x30] sm:$0xff]  }
0x2ace   :  { %7257 = vmatpush3.bf16.msra.mxu0 %v7445_v9 }
0x2acf   :  { %v5836_v31 = vadd.f32 %v7831_v14, %v5833_v34  ;;  %v5841_v38 = vpack.c.bf16 %v5835_v32, %v5834_v30  ;;  %7258 = vmatprep.subr.bf16.mxu0 %v7859_v21 }
0x2ad1   :  { %v5842_v62 = vpack.c.bf16 %v5836_v31, %v5836_v31  ;;  %v5846_v60 = vshll.u32 %v5841_v38, 16  ;;  %v5844_v17 = vshrl.u32 %v5841_v38, 16 }
0x2ad2   :  { %7259 = vmatpush3.bf16.msra.mxu0 %v7446_v52 }
0x2ad3   :  { %v5848_v7 = vrot.slane %v5846_v60, 1  ;;  %v5851_v8 = vshll.u32 %v5842_v62, 16  ;;  %v9616_v62 = vld [vmem:[%s9687_s8 + $0x38] sm:$0xff] }
0x2ad5   :  { %v5849_v61 = vor.u32 %v5848_v7, %v5844_v17  ;;  %v5853_v5 = vrot.slane %v5851_v8, 1  ;;  %v3013_v17 = vadd.f32 %v8830_v39, %v9616_v62 }
0x2ad7   :  { %v5854_v11 = vsel %vm2764_vm5, %v5849_v61, %v5853_v5 }
0x2ad8   :  { %7245 = vmatmul.mubr.msk.bf16.vlgmr.msra.gmra.mrb[92].mxu1 %vm231_vm1, %v5854_v11  ;;  %v6429_v11 = vmul.f32 -1.442695, %v3013_v17 }
0x2ad9   :  { %7252 = vmatprep.mubr.msk.bf16.mxu1 %vm7862_vm4, %v7859_v21  ;;  %7249 = vmatpush3.bf16.msra.mxu1 %v7443_v51  ;;  %v9623_v51 = vld [vmem:[%s9687_s8 + $0x40] sm:$0xff]  ;;  %s7864_s8 = smov 126  }
0x2ada   :  { %7250 = vmatprep.subr.bf16.mxu1 %v7859_v21 }
0x2add   :  { %7251 = vmatpush3.bf16.msra.mxu1 %v7444_v4 }
0x2bab   :  { %v5904_v13 = vpop.f32.mrb[92].mxu1 }
0x2bac   :  { %v5911_v41 = vadd.f32 %v7832_v44, %v5904_v13  ;;  %v9581_v12 = vadd.f32 %v5904_v13, %v8733_v40  ;;  %v7246_v43 = vpop.f32.mrb[93].mxu1  ;;  %v3014_v13 = vadd.f32 %v8832_v1, %v9623_v51 }
0x2bad   :  { %v5907_v35 = vpop.f32.mrb[94].mxu1 }
0x2bae   :  { %v5913_v3 = vmul.f32 %v5911_v41, %v5911_v41  ;;  %v6111_v53 = vmul.f32 %v9581_v12, %v9581_v12  ;;  %v5912_v54 = vadd.f32 %v7832_v44, %v5907_v35  ;;  %v9586_v0 = vadd.f32 %v5907_v35, %v8733_v40  ;;  %v7247_v36 = vpop.f32.mrb[95].mxu1 }
0x2bb0   :  { %v5915_v27 = vmul.f32 %v5913_v3, %v5911_v41  ;;  %v5914_v6 = vmul.f32 %v5912_v54, %v5912_v54  ;;  %v6112_v15 = vmul.f32 %v9586_v0, %v9586_v0  ;;  %6115 = vrot.lane.b32.xlu0 %v6111_v53, %s7860_s23 }
0x2bb2   :  { %v5917_v57 = vmul.f32 0.044715, %v5915_v27  ;;  %v5916_v42 = vmul.f32 %v5914_v6, %v5912_v54  ;;  %6117 = vrot.lane.b32.xlu1 %v6112_v15, %s7860_s23 }
0x2bb4   :  { %v5919_v29 = vadd.f32 %v5917_v57, %v5911_v41  ;;  %v5918_v33 = vmul.f32 0.044715, %v5916_v42 }
0x2bb6   :  { %v5921_v16 = vmul.f32 0.7978846, %v5919_v29  ;;  %v5920_v19 = vadd.f32 %v5918_v33, %v5912_v54 }
0x2bb8   :  { %7789 = vtanh.f32 %v5921_v16  ;;  %v5922_v46 = vmul.f32 0.7978846, %v5920_v19 }
0x2bba   :  { %7791 = vtanh.f32 %v5922_v46 }
0x2bc2   :  { %v7790_v40 = vpop.eup %7789 }
0x2bc3   :  { %v5925_v2 = vadd.f32 1.0, %v7790_v40 }
0x2bc4   :  { %v7792_v45 = vpop.eup %7791 }
0x2bc5   :  { %v5927_v37 = vmul.f32 0.5, %v5925_v2  ;;  %v5926_v47 = vadd.f32 1.0, %v7792_v45 }
0x2bc7   :  { %v5928_v24 = vmul.f32 0.5, %v5926_v47  ;;  %v5929_v58 = vmul.f32 %v5927_v37, %v5911_v41  ;;  %v6430_v41 = vmul.f32 -1.442695, %v3014_v13 }
0x2bc9   :  { %v5930_v56 = vmul.f32 %v5928_v24, %v5912_v54 }
0x2bcb   :  { %v5937_v18 = vpack.c.bf16 %v5930_v56, %v5929_v58 }
0x2bcd   :  { %7253 = vmatmul.mubr.msk.bf16.vlgmr.msra.gmra.mrb[96].mxu1 %vm231_vm1, %v5937_v18 }
0x2c22   :  { %v6116_v59 = vpop.permute.xlu0 %6115 }
0x2c23   :  { %v6121_v10 = vsel %vm3062_vm6, %v6116_v59, 0.0 }
0x2c24   :  { %6122 = vadd.xlane.f32.xlu1 %v6121_v10  ;;  %v6118_v28 = vpop.permute.xlu1 %6117 }
0x2c25   :  { %v6124_v22 = vsel %vm3062_vm6, %v6118_v28, 0.0 }
0x2c26   :  { %6125 = vadd.xlane.f32.xlu0 %v6124_v22 }
0x2c2a   :  { %6151 = vadd.xlane.f32.xlu0 %v6150_v50 }
0x2ca0   :  { %v5987_v49 = vpop.f32.mrb[96].mxu1 }
0x2ca1   :  { %v5988_v48 = vadd.f32 %v7833_v20, %v5987_v49  ;;  %v7254_v26 = vpop.f32.mrb[97].mxu1 }
0x2ca2   :  { %v5990_v34 = vpop.f32.mrb[98].mxu1 }
0x2ca3   :  { %v5994_v14 = vmul.f32 %v5988_v48, %v5988_v48  ;;  %v5991_v30 = vadd.f32 %v7833_v20, %v5990_v34  ;;  %v7255_v32 = vpop.f32.mrb[99].mxu1 }
0x2ca5   :  { %v5996_v31 = vmul.f32 %v5994_v14, %v5988_v48  ;;  %v5995_v38 = vmul.f32 %v5991_v30, %v5991_v30 }
0x2ca7   :  { %v5998_v21 = vmul.f32 0.044715, %v5996_v31  ;;  %v5997_v60 = vmul.f32 %v5995_v38, %v5991_v30 }
0x2ca9   :  { %v6000_v7 = vadd.f32 %v5998_v21, %v5988_v48  ;;  %v5999_v8 = vmul.f32 0.044715, %v5997_v60 }
0x2cab   :  { %v6002_v61 = vmul.f32 0.7978846, %v6000_v7  ;;  %v6001_v5 = vadd.f32 %v5999_v8, %v5991_v30 }
0x2cad   :  { %7793 = vtanh.f32 %v6002_v61  ;;  %v6003_v4 = vmul.f32 0.7978846, %v6001_v5 }
0x2caf   :  { %7795 = vtanh.f32 %v6003_v4 }
0x2cb0   :  { %7797 = vpow2.f32 %v6429_v11 }
0x2cb1   :  { %v6123_v44 = vpop.xlane.xlu1 %6122 }
0x2cb2   :  { %7799 = vrsqrt.f32 %v6123_v44  ;;  %vm6129_vm0 = vcmp.eq.f32.partialorder %v6123_v44, inf  ;;  %v6132_v33 = vand.u32 2147483648, %v6123_v44  ;;  %vm6131_vm2 = vcmp.eq.f32.partialorder %v6123_v44, 0.0 }
0x2cb3   :  { %v6126_v39 = vpop.xlane.xlu0 %6125 }
0x2cb4   :  { %7801 = vrsqrt.f32 %v6126_v39  ;;  %vm6136_vm12 = vcmp.eq.f32.partialorder %v6126_v39, inf  ;;  %v6139_v45 = vand.u32 2147483648, %v6126_v39  ;;  %vm6138_vm13 = vcmp.eq.f32.partialorder %v6126_v39, 0.0 }
0x2cb5   :  { %7803 = vpow2.f32 %v6430_v41 }
0x2cb7   :  { %v7794_v43 = vpop.eup %7793  ;;  %v6152_v27 = vpop.xlane.xlu0 %6151 }
0x2cb8   :  { %v6006_v35 = vadd.f32 1.0, %v7794_v43  ;;  %7805 = vrsqrt.f32 %v6152_v27 }
0x2cb9   :  { %v7796_v3 = vpop.eup %7795 }
0x2cba   :  { %v6008_v53 = vmul.f32 0.5, %v6006_v35  ;;  %v6007_v54 = vadd.f32 1.0, %v7796_v3  ;;  %v7798_v36 = vpop.eup %7797 }
0x2cbb   :  { %v3021_v16 = vadd.f32 1.0, %v7798_v36 }
0x2cbc   :  { %v7800_v6 = vpop.eup %7799  ;;  %v6009_v15 = vmul.f32 0.5, %v6007_v54  ;;  %v6010_v1 = vmul.f32 %v6008_v53, %v5988_v48 }
0x2cbd   :  { %v6128_v57 = vmul.f32 %v7800_v6, %v6123_v44 }
0x2cbe   :  { %v7802_v42 = vpop.eup %7801  ;;  %v6011_v29 = vmul.f32 %v6009_v15, %v5991_v30 }
0x2cbf   :  { %v6130_v19 = vsel %vm6129_vm0, %v6123_v44, %v6128_v57  ;;  %v6135_v46 = vmul.f32 %v7802_v42, %v6126_v39  ;;  %v7804_v24 = vpop.eup %7803 }
0x2cc0   :  { %v6016_v40 = vpack.c.bf16 %v6011_v29, %v6010_v1  ;;  %v6133_v2 = vsel %vm6131_vm2, %v6132_v33, %v6130_v19  ;;  %v3022_v18 = vadd.f32 1.0, %v7804_v24 }
0x2cc1   :  { %v6141_v37 = vadd.f32 1e-06, %v6133_v2  ;;  %v6137_v47 = vsel %vm6136_vm12, %v6126_v39, %v6135_v46 }
0x2cc2   :  { %v6140_v58 = vsel %vm6138_vm13, %v6139_v45, %v6137_v47  ;;  %7261 = vmatmul.mubr.msk.bf16.vlgmr.msra.gmra.mrb[84].mxu0 %vm231_vm1, %v6016_v40  ;;  %v7806_v59 = vpop.eup %7805  ;;  %vm3049_vm1 = vcmask 15360  }
0x2cc3   :  { %7807 = vrcp.f32 %v6141_v37  ;;  %v6142_v56 = vadd.f32 1e-06, %v6140_v58  ;;  %v6154_v10 = vmul.f32 %v7806_v59, %v9598_v55 }
0x2cc4   :  { %7809 = vrcp.f32 %v3021_v16 }
0x2cc5   :  { %7811 = vrcp.f32 %v6142_v56  ;;  %v6155_v28 = vadd.f32 1e-06, %v6154_v10 }
0x2cc6   :  { %7813 = vrcp.f32 %v3022_v18 }
0x2cc7   :  { %7264 = vmatprep.subr.msk.mxu1 %vm3062_vm6, %v6155_v28 }
0x2cc8   :  { %7265 = vmatpush3.xpose.msk.msra.mxu1 %vm3062_vm6, %v6155_v28 }
0x2ccd   :  { %v7808_v22 = vpop.eup %7807 }
0x2cce   :  { %v9631_v25 = vpop.eup %7809  ;;  %v6145_v50 = vmul.f32 %v7808_v22, %v9581_v12 }
0x2ccf   :  { %v7812_v9 = vpop.eup %7811  ;;  %v3027_v55 = vmul.f32 0.5, %v9631_v25 }
0x2cd0   :  { %6158 = vrot.lane.b32.xlu1 %v6145_v50, %s7860_s23  ;;  %v6146_v52 = vmul.f32 %v7812_v9, %v9586_v0  ;;  %v9638_v49 = vpop.eup %7813 }
0x2cd1   :  { %v3028_v20 = vmul.f32 0.5, %v9638_v49 }
0x2cd2   :  { %6160 = vrot.lane.b32.xlu0 %v6146_v52, %s7860_s23  ;;  %s7865_s23 = smov 2  }
0x2cd4   :  { %3031 = vrot.lane.b32.xlu1 %v3027_v55, %s7864_s8 }
0x2cd8   :  { %3033 = vrot.lane.b32.xlu1 %v3028_v20, %s7864_s8 }
0x2d42   :  { %v6159_v48 = vpop.permute.xlu1 %6158 }
0x2d43   :  { %7266 = vmatprep.mubr.msk.f32.mxu1 %vm3062_vm6, %v6159_v48 }
0x2d44   :  { %v6161_v12 = vpop.permute.xlu0 %6160 }
0x2d45   :  { %7267 = vmatmul.mubr.msk.f32.vlgmr.msra.gmra.mrb[50].mxu1 %vm3062_vm6, %v6161_v12 }
0x2d46   :  { %v3032_v8 = vpop.permute.xlu1 %3031 }
0x2d47   :  { %v3037_v54 = vsub.f32 %v9631_v25, %v3032_v8 }
0x2d4a   :  { %v3034_v4 = vpop.permute.xlu1 %3033 }
0x2d4b   :  { %v3040_v13 = vadd.f32 %v9638_v49, %v3034_v4 }
0x2d95   :  { %v6066_v0 = vpop.f32.mrb[84].mxu0 }
0x2d96   :  { %v6073_v26 = vadd.f32 %v6066_v0, %v9616_v62  ;;  %v7262_v34 = vpop.f32.mrb[85].mxu0 }
0x2d97   :  { %v6069_v14 = vpop.f32.mrb[86].mxu0 }
0x2d98   :  { %v6581_v30 = vmul.f32 -1.442695, %v6073_v26  ;;  %v6074_v32 = vadd.f32 %v6069_v14, %v9623_v51  ;;  %v7263_v31 = vpop.f32.mrb[87].mxu0  ;;  %v3039_v51 = vadd.f32 %v9631_v25, %v3032_v8 }
0x2d9a   :  { %7815 = vpow2.f32 %v6581_v30  ;;  %v6582_v38 = vmul.f32 -1.442695, %v6074_v32 }
0x2d9c   :  { %7817 = vpow2.f32 %v6582_v38 }
0x2da4   :  { %v7816_v21 = vpop.eup %7815 }
0x2da5   :  { %v6081_v60 = vadd.f32 1.0, %v7816_v21 }
0x2da6   :  { %v7818_v17 = vpop.eup %7817 }
0x2da7   :  { %7819 = vrcp.f32 %v6081_v60  ;;  %v6082_v7 = vadd.f32 1.0, %v7818_v17 }
0x2da9   :  { %7821 = vrcp.f32 %v6082_v7 }
0x2db1   :  { %v7820_v61 = vpop.eup %7819 }
0x2db2   :  { %v6087_v5 = vmul.f32 0.5, %v7820_v61 }
0x2db3   :  { %v7822_v11 = vpop.eup %7821 }
0x2db4   :  { %6091 = vrot.lane.b32.xlu1 %v6087_v5, %s7864_s8  ;;  %v6088_v62 = vmul.f32 0.5, %v7822_v11 }
0x2db6   :  { %6093 = vrot.lane.b32.xlu0 %v6088_v62, %s7864_s8 }
0x2db8   :  { %3043 = vrot.lane.b32.xlu1 %v3039_v51, %s7865_s23 }
0x2dba   :  { %3045 = vrot.lane.b32.xlu0 %v3040_v13, %s7865_s23 }
0x2dbc   :  { %3188 = vrot.lane.b32.xlu1 %v8932_v23, %s7866_s11  ;;  %v3038_v23 = vsub.f32 %v9638_v49, %v3034_v4 }
0x2dbe   :  { %3190 = vrot.lane.b32.xlu0 %v8930_v63, %s7866_s11 }
0x2e18   :  { %v7268_v44 = vpop.f32.mrb[50].mxu1 }
0x2e19   :  { %v6235_v39 = vpop.f32.mrb[51].mxu1 }
0x2e26   :  { %v6092_v41 = vpop.permute.xlu1 %6091 }
0x2e27   :  { %v6099_v43 = vadd.f32 %v7820_v61, %v6092_v41  ;;  %v6097_v16 = vsub.f32 %v7820_v61, %v6092_v41 }
0x2e28   :  { %v6094_v35 = vpop.permute.xlu0 %6093 }
0x2e29   :  { %v6100_v3 = vadd.f32 %v7822_v11, %v6094_v35  ;;  %6103 = vrot.lane.b32.xlu1 %v6099_v43, %s7865_s23  ;;  %v6098_v46 = vsub.f32 %v7822_v11, %v6094_v35 }
0x2e2a   :  { %v3044_v53 = vpop.permute.xlu1 %3043 }
0x2e2b   :  { %6105 = vrot.lane.b32.xlu0 %v6100_v3, %s7865_s23  ;;  %v3050_v63 = vsel %vm3049_vm1, %v3037_v54, %v3044_v53 }
0x2e2c   :  { %v3046_v36 = vpop.permute.xlu0 %3045 }
0x2e2d   :  { %6246 = vrot.lane.b32.xlu1 %v6235_v39, %s7866_s11  ;;  %v3051_v15 = vsel %vm3049_vm1, %v3038_v23, %v3046_v36 }
0x2e2e   :  { %v3189_v27 = vpop.permute.xlu1 %3188 }
0x2e2f   :  { %v3195_v6 = vsel %vm3194_vm14, %v3050_v63, %v3189_v27  ;;  %6248 = vrot.lane.b32.xlu0 %v7268_v44, %s7866_s11 }
0x2e30   :  { %v3198_v57 = vsel %vm3197_vm15, %v3195_v6, 0.0  ;;  %v3191_v42 = vpop.permute.xlu0 %3190 }
0x2e31   :  { %3200 = vst [vmem:[#allocation2] sm:$0xff] %v3198_v57  ;;  %v3196_v1 = vsel %vm3194_vm14, %v3051_v15, %v3191_v42 }
0x2e32   :  { %v3199_v29 = vsel %vm3197_vm15, %v3196_v1, 0.0 }
0x2e33   :  { %3201 = vst [vmem:[#allocation2 + $0x8] sm:$0xff] %v3199_v29 }
0x2e9b   :  { %v6104_v33 = vpop.permute.xlu1 %6103 }
0x2e9c   :  { %v6109_v40 = vsel %vm3049_vm1, %v6097_v16, %v6104_v33 }
0x2e9d   :  { %v6106_v19 = vpop.permute.xlu0 %6105 }
0x2e9e   :  { %v6110_v37 = vsel %vm3049_vm1, %v6098_v46, %v6106_v19 }
0x2e9f   :  { %v6247_v2 = vpop.permute.xlu1 %6246 }
0x2ea0   :  { %v6252_v45 = vsel %vm3194_vm14, %v6109_v40, %v6247_v2 }
0x2ea1   :  { %v6254_v47 = vsel %vm3197_vm15, %v6252_v45, 0.0  ;;  %v6249_v24 = vpop.permute.xlu0 %6248 }
0x2ea2   :  { %6257 = vst [vmem:[#allocation2 + $0x10] sm:$0xff] %v6254_v47  ;;  %v6253_v58 = vsel %vm3194_vm14, %v6110_v37, %v6249_v24 }
0x2ea3   :  { %v6255_v56 = vsel %vm3197_vm15, %v6253_v58, 0.0 }
0x2ea4   :  { %6258 = vst [vmem:[#allocation2 + $0x18] sm:$0xff] %v6255_v56 }
0x2ea5   :  { %7845 = shalt.err (!%p7842_p4)
}
0x2ea6   :  { %s7846_s7 = scalar_lea.hbm %s9688_s9, 512 }
0x2ea7   :  { %p7847_p5 = scmp.ne.s32.totalorder %s9688_s9, %s7846_s7  ;;  %p7850_p6 = scmp.lt.u32.totalorder %s7846_s7, %s9688_s9 }
0x2ea9   :  { %p7852_p7 = pnand %p7850_p6, %p7847_p5 }
0x2eab   :  { %7855 = shalt.err (!%p7852_p7)
}
0x2eac   :  { %s7868_s18 = smov 128   ;;  %s7869_s19 = smov 8  }
0x2ead   :  { %6270 = dma.vmem_to_hbm [thread:$0]  %s6265_s2, 512, %s9688_s9, [#allocation3], %s7868_s18, %s7868_s18, %s7869_s19  }
0x2eae   :  { %7856 = dma.done.wait [#allocation3], 512  }
0x2eaf   :  { %7857 = vsyncadd [#allocation3], 4294966784 }
0x2eb0   :  { %6274 = vsyncpa [#allocation3], 1 }

</bundles_post_ra>
